<compile_context>
chip_gen: v6e
topology: v6e:2x2x1
jax: 0.10.0
libtpu: 0.0.40
codegen_flags: <defaults>
</compile_context>

<pallas_src>
import functools
import numpy as np
import jax
import jax.numpy as jnp
from jax import lax
from jax.experimental import pallas as pl
from jax.experimental.pallas import tpu as pltpu

SQRT_HALF = 0.7071067811865476
BN_EPS = 1e-5
NEG_BIG = -1e30

CFG = dict(
    batch=2, c_in=4, seq_len=16,
    patch_len=4, stride=4, padding_patch="end",
    head_type="flatten",
    n_layers=2, d_model=32, n_heads=4, d_ff=64,
    norm="BatchNorm", res_attention=True, pre_norm=False,
    dropout=0.0, attn_dropout=0.0,
)


# ----------------------------- in-kernel math helpers ------------------------------

def _erf(x):
    # Abramowitz & Stegun 7.1.26 polynomial erf (max abs err ~1.5e-7), so the
    # erf-form GELU (torch.nn.GELU default) lowers cleanly on Mosaic.
    a1, a2, a3, a4, a5 = (0.254829592, -0.284496736, 1.421413741,
                          -1.453152027, 1.061405429)
    p = 0.3275911
    s = jnp.where(x >= 0.0, 1.0, -1.0)
    ax = jnp.abs(x)
    t = 1.0 / (1.0 + p * ax)          # kept exact to preserve GELU accuracy
    poly = ((((a5 * t + a4) * t + a3) * t + a2) * t + a1) * t
    return s * (1.0 - poly * jnp.exp(-ax * ax))


def _gelu(x):
    return 0.5 * x * (1.0 + _erf(x * SQRT_HALF))


def _batchnorm(x, gamma, beta, eps):
    # BatchNorm1d(d_model) on [N, d_model, L] == per-column norm of (N*L, d_model)
    mean = jnp.mean(x, axis=0, keepdims=True)
    xc = x - mean
    var = jnp.mean(xc * xc, axis=0, keepdims=True)   # biased var (training mode)
    return xc * lax.rsqrt(var + eps) * gamma + beta


# ----------------------------- fused backbone kernel ------------------------------

def _backbone_kernel(x_ref, emb_ref, attnw_ref, bqkv_ref, ffw_ref, misc_ref,
                     out_ref, attn_ref, s_scr,
                     *, n_layers, n_heads, dk, bs_n, pn, patch_len, d_ff,
                     scale, bn_eps):
    R = x_ref.shape[0]                       # flat token rows = batch*channels*patches
    dm = emb_ref.shape[1]
    fan = patch_len + pn + bs_n              # [patch values | pos one-hot | series one-hot]

    x_all = x_ref[...]                       # (R, fan)
    emb = emb_ref[...]                       # (fan+1, dm): [W_P ; W_pos ; zeros ; b_P]

    # Patch embedding + positional encoding in ONE matmul: the one-hot patch-position
    # columns of x_all select the matching W_pos row; the series one-hot columns hit
    # zero weight rows (they exist only to build the mask below).
    src = (jnp.dot(x_all, emb[0:fan, :], preferred_element_type=jnp.float32)
           + emb[fan:fan + 1, :])            # (R, dm)

    # Block-diagonal "own series" mask generated in-kernel (no (R,R) HBM mask input):
    # S @ S^T is exactly 1.0 where the row and column belong to the same series.
    S = x_all[:, patch_len + pn:fan]         # (R, bs_n) one-hot series id
    own_mask = lax.dot_general(S, S, (((1,), (1,)), ((), ())),
                               preferred_element_type=jnp.float32) > 0.5   # (R, R)

    prev = [None] * n_heads                  # Realformer residual scores (VMEM values only)

    for l in range(n_layers):
        # Per-head weights arrive as leading-dim blocks; head slices below are
        # sublane-aligned row slices (dk=8), never sub-vreg lane surgery.
        wq_all = attnw_ref[l, 0]             # (h*dk, dm) == Wq^T, head-major rows
        wk_all = attnw_ref[l, 1]
        wv_all = attnw_ref[l, 2]
        wo_all = attnw_ref[l, 3]             # (h*dk, dm) == Wo, head-major rows

        v_list = []
        for hh in range(n_heads):
            r0, r1 = hh * dk, (hh + 1) * dk
            q = lax.dot_general(src, wq_all[r0:r1, :], (((1,), (1,)), ((), ())),
                                preferred_element_type=jnp.float32) + bqkv_ref[l, hh]
            k = lax.dot_general(src, wk_all[r0:r1, :], (((1,), (1,)), ((), ())),
                                preferred_element_type=jnp.float32) + bqkv_ref[l, n_heads + hh]
            v = lax.dot_general(src, wv_all[r0:r1, :], (((1,), (1,)), ((), ())),
                                preferred_element_type=jnp.float32) + bqkv_ref[l, 2 * n_heads + hh]
            s = lax.dot_general(q, k, (((1,), (1,)), ((), ())),
                                preferred_element_type=jnp.float32) * scale
            if prev[hh] is not None:
                s = s + prev[hh]             # residual attention from previous layer
            prev[hh] = s                     # threaded to next layer, never hits HBM
            v_list.append(v)
            # Stack masked scores of every head along the sublane axis of one VMEM tile.
            s_scr[hh * R:(hh + 1) * R, :] = jnp.where(own_mask, s, NEG_BIG)

        # ONE fused masked softmax across all heads; divide goes to the EUP reciprocal.
        sm = s_scr[...]                                      # (h*R, R)
        mx = jnp.max(sm, axis=-1, keepdims=True)
        e = jnp.exp(sm - mx)                                 # off-block entries underflow to 0
        a_stack = e * pl.reciprocal(jnp.sum(e, axis=-1, keepdims=True), approx=True)

        # Output projection accumulated per head: sum_h (A_h @ V_h) @ Wo_h
        attn_out = None
        for hh in range(n_heads):
            a_h = a_stack[hh * R:(hh + 1) * R, :]            # sublane-aligned slice
            o_h = jnp.dot(a_h, v_list[hh], preferred_element_type=jnp.float32)   # (R, dk)
            c = jnp.dot(o_h, wo_all[hh * dk:(hh + 1) * dk, :],
                        preferred_element_type=jnp.float32)                       # (R, dm)
            attn_out = c if attn_out is None else attn_out + c
            # Emit only the per-series diagonal attention blocks: O(bs_n*pn^2) HBM
            # writes instead of O(R^2); the wrapper gather is gone.
            for si in range(bs_n):
                attn_ref[l, si * n_heads + hh] = a_h[si * pn:(si + 1) * pn,
                                                     si * pn:(si + 1) * pn]

        misc = misc_ref[l]                                   # (8, max(d_ff, dm)) bias/affine rows
        bo = misc[0:1, 0:dm]
        b1 = misc[1:2, 0:d_ff]
        b2 = misc[2:3, 0:dm]
        g1, be1 = misc[3:4, 0:dm], misc[4:5, 0:dm]
        g2, be2 = misc[5:6, 0:dm], misc[6:7, 0:dm]

        src = src + attn_out + bo                            # residual (dropout p=0)
        src = _batchnorm(src, g1, be1, bn_eps)

        # ---- position-wise feed-forward (GELU); W2 is stored transposed ----
        h1 = _gelu(jnp.dot(src, ffw_ref[l, 0], preferred_element_type=jnp.float32) + b1)
        ff = lax.dot_general(h1, ffw_ref[l, 1], (((1,), (1,)), ((), ())),
                             preferred_element_type=jnp.float32) + b2
        src = src + ff
        src = _batchnorm(src, g2, be2, bn_eps)
        out_ref[l] = src


def _fullspec(shape):
    n = len(shape)
    return pl.BlockSpec(tuple(shape), lambda i, _n=n: (0,) * _n)


# ----------------------------- params & forward (glue + kernel) -------------------

def init_params(key, cfg):
    pl_len, stride, seq_len = cfg["patch_len"], cfg["stride"], cfg["seq_len"]
    dm, h, dff, c_in = cfg["d_model"], cfg["n_heads"], cfg["d_ff"], cfg["c_in"]
    dk = dv = dm // h
    patch_num = (seq_len - pl_len) // stride + 1
    if cfg["padding_patch"] == "end":
        patch_num += 1
    if cfg["head_type"] == "cls":
        patch_num += 1
    keys = iter(jax.random.split(key, 64))

    def linear(fan_in, fan_out):
        bound = 1.0 / np.sqrt(fan_in)
        w = jax.random.uniform(next(keys), (fan_in, fan_out), jnp.float32, -bound, bound)
        b = jax.random.uniform(next(keys), (1, fan_out), jnp.float32, -bound, bound)
        return w, b

    params = {}
    params["W_P"], params["b_P"] = linear(pl_len, dm)                  # nn.Linear(patch_len, d_model)
    params["W_pos"] = jax.random.uniform(next(keys), (patch_num, dm),  # positional_encoding('zeros')
                                         jnp.float32, -0.02, 0.02)
    if cfg["head_type"] == "cls":
        params["cls_token"] = jax.random.normal(next(keys), (1, c_in, pl_len), jnp.float32)

    layers = []
    for _ in range(cfg["n_layers"]):
        lp = {}
        lp["Wq"], lp["bq"] = linear(dm, h * dk)
        lp["Wk"], lp["bk"] = linear(dm, h * dk)
        lp["Wv"], lp["bv"] = linear(dm, h * dv)
        lp["Wo"], lp["bo"] = linear(h * dv, dm)
        lp["bn1_g"] = jnp.ones((1, dm), jnp.float32)
        lp["bn1_b"] = jnp.zeros((1, dm), jnp.float32)
        lp["W1"], lp["b1"] = linear(dm, dff)
        lp["W2"], lp["b2"] = linear(dff, dm)
        lp["bn2_g"] = jnp.ones((1, dm), jnp.float32)
        lp["bn2_b"] = jnp.zeros((1, dm), jnp.float32)
        layers.append(lp)
    params["layers"] = layers
    params["patch_num"] = patch_num
    return params


def patchtst_backbone_forward(z, params, cfg):
    # z: (B, c_in, seq_len)
    B, C, Lseq = z.shape
    pl_len, stride = cfg["patch_len"], cfg["stride"]

    # ReplicationPad1d((0, pad_num)) + unfold -- pure data movement, JAX glue.
    if cfg["padding_patch"] == "end":
        pad_num = pl_len - Lseq % pl_len          # matches the reference module
        z = jnp.concatenate([z, jnp.repeat(z[..., -1:], pad_num, axis=-1)], axis=-1)
    Lp = z.shape[-1]
    pn = (Lp - pl_len) // stride + 1
    idx = np.arange(pn)[:, None] * stride + np.arange(pl_len)[None, :]
    zp = z[..., idx]                              # (B, C, pn, pl)  == unfold
    # ('b c pn pl -> b c pl pn' followed by 'b n l p -> b n p l' cancel exactly.)
    if cfg["head_type"] == "cls":
        cls = jnp.broadcast_to(params["cls_token"][:, :, None, :], (B, C, 1, pl_len))
        zp = jnp.concatenate([cls, zp], axis=2)
        pn += 1

    dm, h, nl, dff = cfg["d_model"], cfg["n_heads"], cfg["n_layers"], cfg["d_ff"]
    dk = dm // h
    bs_n = B * C
    R = bs_n * pn                                 # flat token rows, (b n) p order
    f32 = jnp.float32
    assert params["W_pos"].shape[0] == pn

    # ---- pack everything into a handful of slabs: 6 input DMAs instead of 17 ----
    rows = np.arange(R)
    pos_oh = (rows[:, None] % pn == np.arange(pn)[None, :]).astype(np.float32)     # pos one-hot
    ser_oh = (rows[:, None] // pn == np.arange(bs_n)[None, :]).astype(np.float32)  # series one-hot
    x_aug = jnp.concatenate([zp.reshape(R, pl_len).astype(f32),
                             jnp.asarray(pos_oh), jnp.asarray(ser_oh)], axis=1)    # (R, pl+pn+bs_n)

    emb = jnp.concatenate([params["W_P"], params["W_pos"],
                           jnp.zeros((bs_n, dm), f32), params["b_P"]], axis=0)     # (pl+pn+bs_n+1, dm)

    lys = params["layers"]
    # Per-head Q/K/V weights stored transposed (head-major rows); Wo already (h*dk, dm).
    attnw = jnp.stack([jnp.stack([lp["Wq"].T, lp["Wk"].T, lp["Wv"].T, lp["Wo"]], axis=0)
                       for lp in lys])                                             # (nl, 4, h*dk, dm)
    bqkv = jnp.stack([jnp.concatenate([lp["bq"].reshape(h, 1, dk),
                                       lp["bk"].reshape(h, 1, dk),
                                       lp["bv"].reshape(h, 1, dk)], axis=0)
                      for lp in lys])                                              # (nl, 3h, 1, dk)
    ffw = jnp.stack([jnp.stack([lp["W1"], lp["W2"].T], axis=0) for lp in lys])     # (nl, 2, dm, dff)

    bw = max(dff, dm)

    def _row(v):
        return jnp.pad(v, ((0, 0), (0, bw - v.shape[1])))

    misc = jnp.stack([jnp.concatenate([_row(lp["bo"]), _row(lp["b1"]), _row(lp["b2"]),
                                       _row(lp["bn1_g"]), _row(lp["bn1_b"]),
                                       _row(lp["bn2_g"]), _row(lp["bn2_b"]),
                                       jnp.zeros((1, bw), f32)], axis=0)
                      for lp in lys])                                              # (nl, 8, bw)

    ins = (x_aug, emb, attnw, bqkv, ffw, misc)

    out_layers, attn_blocks = pl.pallas_call(
        functools.partial(_backbone_kernel, n_layers=nl, n_heads=h, dk=dk,
                          bs_n=bs_n, pn=pn, patch_len=pl_len, d_ff=dff,
                          scale=float(dk ** -0.5), bn_eps=BN_EPS),
        out_shape=(jax.ShapeDtypeStruct((nl, R, dm), f32),
                   jax.ShapeDtypeStruct((nl, bs_n * h, pn, pn), f32)),
        grid=(1,),
        in_specs=[_fullspec(a.shape) for a in ins],
        out_specs=(_fullspec((nl, R, dm)), _fullspec((nl, bs_n * h, pn, pn))),
        scratch_shapes=[pltpu.VMEM((h * R, R), f32)],      # sublane-stacked head scores
        compiler_params=pltpu.CompilerParams(dimension_semantics=("arbitrary",)),
    )(*ins)

    # ---- glue: map back to the module's output layouts ----
    zz = out_layers[nl - 1].reshape(B, C, pn, dm).transpose(0, 1, 3, 2)   # (B,C,dm,pn)
    output_list = [out_layers[l].reshape(B, C, pn, dm).transpose(0, 1, 3, 2)
                   for l in range(nl)]                                    # '(b n) p d -> b n d p'
    attn5 = attn_blocks.reshape(nl, bs_n, h, pn, pn)
    attention_list = [attn5[l] for l in range(nl)]                        # (bs_n, h, pn, pn)
    return zz, output_list, attention_list


if __name__ == "__main__":
    key = jax.random.PRNGKey(0)
    kp, kx = jax.random.split(key)
    params = init_params(kp, CFG)
    z = jax.random.normal(kx, (CFG["batch"], CFG["c_in"], CFG["seq_len"]), jnp.float32)

    out, output_list, attention_list = patchtst_backbone_forward(z, params, CFG)
    out = jax.block_until_ready(out)
    for o in output_list:
        jax.block_until_ready(o)
    for a in attention_list:
        jax.block_until_ready(a)

    pn = params["patch_num"]
    assert out.shape == (CFG["batch"], CFG["c_in"], CFG["d_model"], pn)
    assert len(output_list) == CFG["n_layers"]
    assert output_list[0].shape == (CFG["batch"], CFG["c_in"], CFG["d_model"], pn)
    assert attention_list[0].shape == (CFG["batch"] * CFG["c_in"], CFG["n_heads"], pn, pn)
    assert bool(jnp.all(jnp.isfinite(out)))
    for a in attention_list:
        assert bool(jnp.all(jnp.isfinite(a)))
    print("KERNEL_OK")
</pallas_src>

<mosaic_0001>
module attributes {stable_mosaic.version = 11 : i64} {
  func.func @_backbone_kernel(%arg0: i32, %arg1: memref<40x17xf32, #tpu.memory_space<vmem>>, %arg2: memref<18x32xf32, #tpu.memory_space<vmem>>, %arg3: memref<2x4x32x32xf32, #tpu.memory_space<vmem>>, %arg4: memref<2x12x1x8xf32, #tpu.memory_space<vmem>>, %arg5: memref<2x2x32x64xf32, #tpu.memory_space<vmem>>, %arg6: memref<2x8x64xf32, #tpu.memory_space<vmem>>, %arg7: memref<2x40x32xf32, #tpu.memory_space<vmem>>, %arg8: memref<2x32x5x5xf32, #tpu.memory_space<vmem>>, %arg9: memref<160x40xf32, #tpu.memory_space<vmem>>) attributes {dimension_semantics = [#tpu.dimension_semantics<arbitrary>], iteration_bounds = array<i64: 1>, scalar_prefetch = 0 : i64, scratch_operands = 1 : i64, tpu.core_type = #tpu.core_type<tc>, window_params = [{pipeline_mode = #tpu.pipeline_mode<synchronous>, transform_indices = @transform_0, window_bounds = array<i64: 40, 17>}, {pipeline_mode = #tpu.pipeline_mode<synchronous>, transform_indices = @transform_1, window_bounds = array<i64: 18, 32>}, {pipeline_mode = #tpu.pipeline_mode<synchronous>, transform_indices = @transform_2, window_bounds = array<i64: 2, 4, 32, 32>}, {pipeline_mode = #tpu.pipeline_mode<synchronous>, transform_indices = @transform_3, window_bounds = array<i64: 2, 12, 1, 8>}, {pipeline_mode = #tpu.pipeline_mode<synchronous>, transform_indices = @transform_4, window_bounds = array<i64: 2, 2, 32, 64>}, {pipeline_mode = #tpu.pipeline_mode<synchronous>, transform_indices = @transform_5, window_bounds = array<i64: 2, 8, 64>}, {pipeline_mode = #tpu.pipeline_mode<synchronous>, transform_indices = @transform_6, window_bounds = array<i64: 2, 40, 32>}, {pipeline_mode = #tpu.pipeline_mode<synchronous>, transform_indices = @transform_7, window_bounds = array<i64: 2, 32, 5, 5>}]} {
    %c0 = arith.constant 0 : index
    %c0_0 = arith.constant 0 : index
    %0 = vector.load %arg1[%c0, %c0_0] : memref<40x17xf32, #tpu.memory_space<vmem>>, vector<40x17xf32>
    %c0_1 = arith.constant 0 : index
    %c0_2 = arith.constant 0 : index
    %1 = vector.load %arg2[%c0_1, %c0_2] : memref<18x32xf32, #tpu.memory_space<vmem>>, vector<18x32xf32>
    %2 = vector.extract_strided_slice %1 {offsets = [0, 0], sizes = [17, 32], strides = [1, 1]} : vector<18x32xf32> to vector<17x32xf32>
    %cst = arith.constant dense<0.000000e+00> : vector<40x32xf32>
    %3 = tpu.matmul %0, %2, %cst {dimension_numbers = #tpu.dot_dimension_numbers<[1], [0], [0], [1], [0, 0, 1, 1], [], []>} : vector<40x17xf32>, vector<17x32xf32>, vector<40x32xf32> -> vector<40x32xf32>
    %4 = vector.extract_strided_slice %1 {offsets = [17, 0], sizes = [1, 32], strides = [1, 1]} : vector<18x32xf32> to vector<1x32xf32>
    %5 = vector.broadcast %4 : vector<1x32xf32> to vector<40x32xf32>
    %6 = arith.addf %3, %5 : vector<40x32xf32>
    %7 = vector.extract_strided_slice %0 {offsets = [0, 9], sizes = [40, 8], strides = [1, 1]} : vector<40x17xf32> to vector<40x8xf32>
    %cst_3 = arith.constant dense<0.000000e+00> : vector<40x40xf32>
    %8 = tpu.matmul %7, %7, %cst_3 {dimension_numbers = #tpu.dot_dimension_numbers<[1], [1], [0], [0], [0, 0, 1, 0], [], []>} : vector<40x8xf32>, vector<40x8xf32>, vector<40x40xf32> -> vector<40x40xf32>
    %cst_4 = arith.constant 5.000000e-01 : f32
    %9 = vector.broadcast %cst_4 : f32 to vector<40x40xf32>
    %10 = arith.cmpf ogt, %8, %9 : vector<40x40xf32>
    %c0_5 = arith.constant 0 : index
    %c0_6 = arith.constant 0 : index
    %c0_7 = arith.constant 0 : index
    %c0_8 = arith.constant 0 : index
    %11 = vector.load %arg3[%c0_5, %c0_6, %c0_7, %c0_8] : memref<2x4x32x32xf32, #tpu.memory_space<vmem>>, vector<1x1x32x32xf32>
    %12 = vector.shape_cast %11 : vector<1x1x32x32xf32> to vector<32x32xf32>
    %c0_9 = arith.constant 0 : index
    %c1 = arith.constant 1 : index
    %c0_10 = arith.constant 0 : index
    %c0_11 = arith.constant 0 : index
    %13 = vector.load %arg3[%c0_9, %c1, %c0_10, %c0_11] : memref<2x4x32x32xf32, #tpu.memory_space<vmem>>, vector<1x1x32x32xf32>
    %14 = vector.shape_cast %13 : vector<1x1x32x32xf32> to vector<32x32xf32>
    %c0_12 = arith.constant 0 : index
    %c2 = arith.constant 2 : index
    %c0_13 = arith.constant 0 : index
    %c0_14 = arith.constant 0 : index
    %15 = vector.load %arg3[%c0_12, %c2, %c0_13, %c0_14] : memref<2x4x32x32xf32, #tpu.memory_space<vmem>>, vector<1x1x32x32xf32>
    %16 = vector.shape_cast %15 : vector<1x1x32x32xf32> to vector<32x32xf32>
    %c0_15 = arith.constant 0 : index
    %c3 = arith.constant 3 : index
    %c0_16 = arith.constant 0 : index
    %c0_17 = arith.constant 0 : index
    %17 = vector.load %arg3[%c0_15, %c3, %c0_16, %c0_17] : memref<2x4x32x32xf32, #tpu.memory_space<vmem>>, vector<1x1x32x32xf32>
    %18 = vector.shape_cast %17 : vector<1x1x32x32xf32> to vector<32x32xf32>
    %19 = vector.extract_strided_slice %12 {offsets = [0, 0], sizes = [8, 32], strides = [1, 1]} : vector<32x32xf32> to vector<8x32xf32>
    %cst_18 = arith.constant dense<0.000000e+00> : vector<40x8xf32>
    %20 = tpu.matmul %6, %19, %cst_18 {dimension_numbers = #tpu.dot_dimension_numbers<[1], [1], [0], [0], [0, 0, 1, 0], [], []>} : vector<40x32xf32>, vector<8x32xf32>, vector<40x8xf32> -> vector<40x8xf32>
    %c0_19 = arith.constant 0 : index
    %c0_20 = arith.constant 0 : index
    %c0_21 = arith.constant 0 : index
    %c0_22 = arith.constant 0 : index
    %21 = vector.load %arg4[%c0_19, %c0_20, %c0_21, %c0_22] : memref<2x12x1x8xf32, #tpu.memory_space<vmem>>, vector<1x1x1x8xf32>
    %22 = vector.shape_cast %21 : vector<1x1x1x8xf32> to vector<1x8xf32>
    %23 = vector.broadcast %22 : vector<1x8xf32> to vector<40x8xf32>
    %24 = arith.addf %20, %23 : vector<40x8xf32>
    %25 = vector.extract_strided_slice %14 {offsets = [0, 0], sizes = [8, 32], strides = [1, 1]} : vector<32x32xf32> to vector<8x32xf32>
    %cst_23 = arith.constant dense<0.000000e+00> : vector<40x8xf32>
    %26 = tpu.matmul %6, %25, %cst_23 {dimension_numbers = #tpu.dot_dimension_numbers<[1], [1], [0], [0], [0, 0, 1, 0], [], []>} : vector<40x32xf32>, vector<8x32xf32>, vector<40x8xf32> -> vector<40x8xf32>
    %c0_24 = arith.constant 0 : index
    %c4 = arith.constant 4 : index
    %c0_25 = arith.constant 0 : index
    %c0_26 = arith.constant 0 : index
    %27 = vector.load %arg4[%c0_24, %c4, %c0_25, %c0_26] : memref<2x12x1x8xf32, #tpu.memory_space<vmem>>, vector<1x1x1x8xf32>
    %28 = vector.shape_cast %27 : vector<1x1x1x8xf32> to vector<1x8xf32>
    %29 = vector.broadcast %28 : vector<1x8xf32> to vector<40x8xf32>
    %30 = arith.addf %26, %29 : vector<40x8xf32>
    %31 = vector.extract_strided_slice %16 {offsets = [0, 0], sizes = [8, 32], strides = [1, 1]} : vector<32x32xf32> to vector<8x32xf32>
    %cst_27 = arith.constant dense<0.000000e+00> : vector<40x8xf32>
    %32 = tpu.matmul %6, %31, %cst_27 {dimension_numbers = #tpu.dot_dimension_numbers<[1], [1], [0], [0], [0, 0, 1, 0], [], []>} : vector<40x32xf32>, vector<8x32xf32>, vector<40x8xf32> -> vector<40x8xf32>
    %c0_28 = arith.constant 0 : index
    %c8 = arith.constant 8 : index
    %c0_29 = arith.constant 0 : index
    %c0_30 = arith.constant 0 : index
    %33 = vector.load %arg4[%c0_28, %c8, %c0_29, %c0_30] : memref<2x12x1x8xf32, #tpu.memory_space<vmem>>, vector<1x1x1x8xf32>
    %34 = vector.shape_cast %33 : vector<1x1x1x8xf32> to vector<1x8xf32>
    %35 = vector.broadcast %34 : vector<1x8xf32> to vector<40x8xf32>
    %36 = arith.addf %32, %35 : vector<40x8xf32>
    %cst_31 = arith.constant dense<0.000000e+00> : vector<40x40xf32>
    %37 = tpu.matmul %24, %30, %cst_31 {dimension_numbers = #tpu.dot_dimension_numbers<[1], [1], [0], [0], [0, 0, 1, 0], [], []>} : vector<40x8xf32>, vector<40x8xf32>, vector<40x40xf32> -> vector<40x40xf32>
    %cst_32 = arith.constant 0.353553385 : f32
    %38 = vector.broadcast %cst_32 : f32 to vector<40x40xf32>
    %39 = arith.mulf %37, %38 : vector<40x40xf32>
    %cst_33 = arith.constant -1.000000e+30 : f32
    %40 = vector.broadcast %cst_33 : f32 to vector<40x40xf32>
    %41 = arith.select %10, %39, %40 : vector<40x40xi1>, vector<40x40xf32>
    %c0_34 = arith.constant 0 : index
    %c0_35 = arith.constant 0 : index
    %42 = vector.load %arg9[%c0_34, %c0_35] : memref<160x40xf32, #tpu.memory_space<vmem>>, vector<40x40xf32>
    tpu.vector_store %arg9[%c0_34, %c0_35], %41 {strides = array<i32>} : memref<160x40xf32, #tpu.memory_space<vmem>>, vector<40x40xf32>,
    %43 = vector.extract_strided_slice %12 {offsets = [8, 0], sizes = [8, 32], strides = [1, 1]} : vector<32x32xf32> to vector<8x32xf32>
    %cst_36 = arith.constant dense<0.000000e+00> : vector<40x8xf32>
    %44 = tpu.matmul %6, %43, %cst_36 {dimension_numbers = #tpu.dot_dimension_numbers<[1], [1], [0], [0], [0, 0, 1, 0], [], []>} : vector<40x32xf32>, vector<8x32xf32>, vector<40x8xf32> -> vector<40x8xf32>
    %c0_37 = arith.constant 0 : index
    %c1_38 = arith.constant 1 : index
    %c0_39 = arith.constant 0 : index
    %c0_40 = arith.constant 0 : index
    %45 = vector.load %arg4[%c0_37, %c1_38, %c0_39, %c0_40] : memref<2x12x1x8xf32, #tpu.memory_space<vmem>>, vector<1x1x1x8xf32>
    %46 = vector.shape_cast %45 : vector<1x1x1x8xf32> to vector<1x8xf32>
    %47 = vector.broadcast %46 : vector<1x8xf32> to vector<40x8xf32>
    %48 = arith.addf %44, %47 : vector<40x8xf32>
    %49 = vector.extract_strided_slice %14 {offsets = [8, 0], sizes = [8, 32], strides = [1, 1]} : vector<32x32xf32> to vector<8x32xf32>
    %cst_41 = arith.constant dense<0.000000e+00> : vector<40x8xf32>
    %50 = tpu.matmul %6, %49, %cst_41 {dimension_numbers = #tpu.dot_dimension_numbers<[1], [1], [0], [0], [0, 0, 1, 0], [], []>} : vector<40x32xf32>, vector<8x32xf32>, vector<40x8xf32> -> vector<40x8xf32>
    %c0_42 = arith.constant 0 : index
    %c5 = arith.constant 5 : index
    %c0_43 = arith.constant 0 : index
    %c0_44 = arith.constant 0 : index
    %51 = vector.load %arg4[%c0_42, %c5, %c0_43, %c0_44] : memref<2x12x1x8xf32, #tpu.memory_space<vmem>>, vector<1x1x1x8xf32>
    %52 = vector.shape_cast %51 : vector<1x1x1x8xf32> to vector<1x8xf32>
    %53 = vector.broadcast %52 : vector<1x8xf32> to vector<40x8xf32>
    %54 = arith.addf %50, %53 : vector<40x8xf32>
    %55 = vector.extract_strided_slice %16 {offsets = [8, 0], sizes = [8, 32], strides = [1, 1]} : vector<32x32xf32> to vector<8x32xf32>
    %cst_45 = arith.constant dense<0.000000e+00> : vector<40x8xf32>
    %56 = tpu.matmul %6, %55, %cst_45 {dimension_numbers = #tpu.dot_dimension_numbers<[1], [1], [0], [0], [0, 0, 1, 0], [], []>} : vector<40x32xf32>, vector<8x32xf32>, vector<40x8xf32> -> vector<40x8xf32>
    %c0_46 = arith.constant 0 : index
    %c9 = arith.constant 9 : index
    %c0_47 = arith.constant 0 : index
    %c0_48 = arith.constant 0 : index
    %57 = vector.load %arg4[%c0_46, %c9, %c0_47, %c0_48] : memref<2x12x1x8xf32, #tpu.memory_space<vmem>>, vector<1x1x1x8xf32>
    %58 = vector.shape_cast %57 : vector<1x1x1x8xf32> to vector<1x8xf32>
    %59 = vector.broadcast %58 : vector<1x8xf32> to vector<40x8xf32>
    %60 = arith.addf %56, %59 : vector<40x8xf32>
    %cst_49 = arith.constant dense<0.000000e+00> : vector<40x40xf32>
    %61 = tpu.matmul %48, %54, %cst_49 {dimension_numbers = #tpu.dot_dimension_numbers<[1], [1], [0], [0], [0, 0, 1, 0], [], []>} : vector<40x8xf32>, vector<40x8xf32>, vector<40x40xf32> -> vector<40x40xf32>
    %cst_50 = arith.constant 0.353553385 : f32
    %62 = vector.broadcast %cst_50 : f32 to vector<40x40xf32>
    %63 = arith.mulf %61, %62 : vector<40x40xf32>
    %cst_51 = arith.constant -1.000000e+30 : f32
    %64 = vector.broadcast %cst_51 : f32 to vector<40x40xf32>
    %65 = arith.select %10, %63, %64 : vector<40x40xi1>, vector<40x40xf32>
    %c40 = arith.constant 40 : index
    %c0_52 = arith.constant 0 : index
    %66 = vector.load %arg9[%c40, %c0_52] : memref<160x40xf32, #tpu.memory_space<vmem>>, vector<40x40xf32>
    tpu.vector_store %arg9[%c40, %c0_52], %65 {strides = array<i32>} : memref<160x40xf32, #tpu.memory_space<vmem>>, vector<40x40xf32>,
    %67 = vector.extract_strided_slice %12 {offsets = [16, 0], sizes = [8, 32], strides = [1, 1]} : vector<32x32xf32> to vector<8x32xf32>
    %cst_53 = arith.constant dense<0.000000e+00> : vector<40x8xf32>
    %68 = tpu.matmul %6, %67, %cst_53 {dimension_numbers = #tpu.dot_dimension_numbers<[1], [1], [0], [0], [0, 0, 1, 0], [], []>} : vector<40x32xf32>, vector<8x32xf32>, vector<40x8xf32> -> vector<40x8xf32>
    %c0_54 = arith.constant 0 : index
    %c2_55 = arith.constant 2 : index
    %c0_56 = arith.constant 0 : index
    %c0_57 = arith.constant 0 : index
    %69 = vector.load %arg4[%c0_54, %c2_55, %c0_56, %c0_57] : memref<2x12x1x8xf32, #tpu.memory_space<vmem>>, vector<1x1x1x8xf32>
    %70 = vector.shape_cast %69 : vector<1x1x1x8xf32> to vector<1x8xf32>
    %71 = vector.broadcast %70 : vector<1x8xf32> to vector<40x8xf32>
    %72 = arith.addf %68, %71 : vector<40x8xf32>
    %73 = vector.extract_strided_slice %14 {offsets = [16, 0], sizes = [8, 32], strides = [1, 1]} : vector<32x32xf32> to vector<8x32xf32>
    %cst_58 = arith.constant dense<0.000000e+00> : vector<40x8xf32>
    %74 = tpu.matmul %6, %73, %cst_58 {dimension_numbers = #tpu.dot_dimension_numbers<[1], [1], [0], [0], [0, 0, 1, 0], [], []>} : vector<40x32xf32>, vector<8x32xf32>, vector<40x8xf32> -> vector<40x8xf32>
    %c0_59 = arith.constant 0 : index
    %c6 = arith.constant 6 : index
    %c0_60 = arith.constant 0 : index
    %c0_61 = arith.constant 0 : index
    %75 = vector.load %arg4[%c0_59, %c6, %c0_60, %c0_61] : memref<2x12x1x8xf32, #tpu.memory_space<vmem>>, vector<1x1x1x8xf32>
    %76 = vector.shape_cast %75 : vector<1x1x1x8xf32> to vector<1x8xf32>
    %77 = vector.broadcast %76 : vector<1x8xf32> to vector<40x8xf32>
    %78 = arith.addf %74, %77 : vector<40x8xf32>
    %79 = vector.extract_strided_slice %16 {offsets = [16, 0], sizes = [8, 32], strides = [1, 1]} : vector<32x32xf32> to vector<8x32xf32>
    %cst_62 = arith.constant dense<0.000000e+00> : vector<40x8xf32>
    %80 = tpu.matmul %6, %79, %cst_62 {dimension_numbers = #tpu.dot_dimension_numbers<[1], [1], [0], [0], [0, 0, 1, 0], [], []>} : vector<40x32xf32>, vector<8x32xf32>, vector<40x8xf32> -> vector<40x8xf32>
    %c0_63 = arith.constant 0 : index
    %c10 = arith.constant 10 : index
    %c0_64 = arith.constant 0 : index
    %c0_65 = arith.constant 0 : index
    %81 = vector.load %arg4[%c0_63, %c10, %c0_64, %c0_65] : memref<2x12x1x8xf32, #tpu.memory_space<vmem>>, vector<1x1x1x8xf32>
    %82 = vector.shape_cast %81 : vector<1x1x1x8xf32> to vector<1x8xf32>
    %83 = vector.broadcast %82 : vector<1x8xf32> to vector<40x8xf32>
    %84 = arith.addf %80, %83 : vector<40x8xf32>
    %cst_66 = arith.constant dense<0.000000e+00> : vector<40x40xf32>
    %85 = tpu.matmul %72, %78, %cst_66 {dimension_numbers = #tpu.dot_dimension_numbers<[1], [1], [0], [0], [0, 0, 1, 0], [], []>} : vector<40x8xf32>, vector<40x8xf32>, vector<40x40xf32> -> vector<40x40xf32>
    %cst_67 = arith.constant 0.353553385 : f32
    %86 = vector.broadcast %cst_67 : f32 to vector<40x40xf32>
    %87 = arith.mulf %85, %86 : vector<40x40xf32>
    %cst_68 = arith.constant -1.000000e+30 : f32
    %88 = vector.broadcast %cst_68 : f32 to vector<40x40xf32>
    %89 = arith.select %10, %87, %88 : vector<40x40xi1>, vector<40x40xf32>
    %c80 = arith.constant 80 : index
    %c0_69 = arith.constant 0 : index
    %90 = vector.load %arg9[%c80, %c0_69] : memref<160x40xf32, #tpu.memory_space<vmem>>, vector<40x40xf32>
    tpu.vector_store %arg9[%c80, %c0_69], %89 {strides = array<i32>} : memref<160x40xf32, #tpu.memory_space<vmem>>, vector<40x40xf32>,
    %91 = vector.extract_strided_slice %12 {offsets = [24, 0], sizes = [8, 32], strides = [1, 1]} : vector<32x32xf32> to vector<8x32xf32>
    %cst_70 = arith.constant dense<0.000000e+00> : vector<40x8xf32>
    %92 = tpu.matmul %6, %91, %cst_70 {dimension_numbers = #tpu.dot_dimension_numbers<[1], [1], [0], [0], [0, 0, 1, 0], [], []>} : vector<40x32xf32>, vector<8x32xf32>, vector<40x8xf32> -> vector<40x8xf32>
    %c0_71 = arith.constant 0 : index
    %c3_72 = arith.constant 3 : index
    %c0_73 = arith.constant 0 : index
    %c0_74 = arith.constant 0 : index
    %93 = vector.load %arg4[%c0_71, %c3_72, %c0_73, %c0_74] : memref<2x12x1x8xf32, #tpu.memory_space<vmem>>, vector<1x1x1x8xf32>
    %94 = vector.shape_cast %93 : vector<1x1x1x8xf32> to vector<1x8xf32>
    %95 = vector.broadcast %94 : vector<1x8xf32> to vector<40x8xf32>
    %96 = arith.addf %92, %95 : vector<40x8xf32>
    %97 = vector.extract_strided_slice %14 {offsets = [24, 0], sizes = [8, 32], strides = [1, 1]} : vector<32x32xf32> to vector<8x32xf32>
    %cst_75 = arith.constant dense<0.000000e+00> : vector<40x8xf32>
    %98 = tpu.matmul %6, %97, %cst_75 {dimension_numbers = #tpu.dot_dimension_numbers<[1], [1], [0], [0], [0, 0, 1, 0], [], []>} : vector<40x32xf32>, vector<8x32xf32>, vector<40x8xf32> -> vector<40x8xf32>
    %c0_76 = arith.constant 0 : index
    %c7 = arith.constant 7 : index
    %c0_77 = arith.constant 0 : index
    %c0_78 = arith.constant 0 : index
    %99 = vector.load %arg4[%c0_76, %c7, %c0_77, %c0_78] : memref<2x12x1x8xf32, #tpu.memory_space<vmem>>, vector<1x1x1x8xf32>
    %100 = vector.shape_cast %99 : vector<1x1x1x8xf32> to vector<1x8xf32>
    %101 = vector.broadcast %100 : vector<1x8xf32> to vector<40x8xf32>
    %102 = arith.addf %98, %101 : vector<40x8xf32>
    %103 = vector.extract_strided_slice %16 {offsets = [24, 0], sizes = [8, 32], strides = [1, 1]} : vector<32x32xf32> to vector<8x32xf32>
    %cst_79 = arith.constant dense<0.000000e+00> : vector<40x8xf32>
    %104 = tpu.matmul %6, %103, %cst_79 {dimension_numbers = #tpu.dot_dimension_numbers<[1], [1], [0], [0], [0, 0, 1, 0], [], []>} : vector<40x32xf32>, vector<8x32xf32>, vector<40x8xf32> -> vector<40x8xf32>
    %c0_80 = arith.constant 0 : index
    %c11 = arith.constant 11 : index
    %c0_81 = arith.constant 0 : index
    %c0_82 = arith.constant 0 : index
    %105 = vector.load %arg4[%c0_80, %c11, %c0_81, %c0_82] : memref<2x12x1x8xf32, #tpu.memory_space<vmem>>, vector<1x1x1x8xf32>
    %106 = vector.shape_cast %105 : vector<1x1x1x8xf32> to vector<1x8xf32>
    %107 = vector.broadcast %106 : vector<1x8xf32> to vector<40x8xf32>
    %108 = arith.addf %104, %107 : vector<40x8xf32>
    %cst_83 = arith.constant dense<0.000000e+00> : vector<40x40xf32>
    %109 = tpu.matmul %96, %102, %cst_83 {dimension_numbers = #tpu.dot_dimension_numbers<[1], [1], [0], [0], [0, 0, 1, 0], [], []>} : vector<40x8xf32>, vector<40x8xf32>, vector<40x40xf32> -> vector<40x40xf32>
    %cst_84 = arith.constant 0.353553385 : f32
    %110 = vector.broadcast %cst_84 : f32 to vector<40x40xf32>
    %111 = arith.mulf %109, %110 : vector<40x40xf32>
    %cst_85 = arith.constant -1.000000e+30 : f32
    %112 = vector.broadcast %cst_85 : f32 to vector<40x40xf32>
    %113 = arith.select %10, %111, %112 : vector<40x40xi1>, vector<40x40xf32>
    %c120 = arith.constant 120 : index
    %c0_86 = arith.constant 0 : index
    %114 = vector.load %arg9[%c120, %c0_86] : memref<160x40xf32, #tpu.memory_space<vmem>>, vector<40x40xf32>
    tpu.vector_store %arg9[%c120, %c0_86], %113 {strides = array<i32>} : memref<160x40xf32, #tpu.memory_space<vmem>>, vector<40x40xf32>,
    %c0_87 = arith.constant 0 : index
    %c0_88 = arith.constant 0 : index
    %115 = vector.load %arg9[%c0_87, %c0_88] : memref<160x40xf32, #tpu.memory_space<vmem>>, vector<160x40xf32>
    %cst_89 = arith.constant dense<0xFF800000> : vector<160xf32>
    %116 = vector.multi_reduction <maximumf>, %115, %cst_89 [1] : vector<160x40xf32> to vector<160xf32>
    %117 = vector.shape_cast %116 : vector<160xf32> to vector<160x1xf32>
    %118 = vector.broadcast %117 : vector<160x1xf32> to vector<160x40xf32>
    %119 = arith.subf %115, %118 : vector<160x40xf32>
    %120 = math.exp %119 : vector<160x40xf32>
    %cst_90 = arith.constant dense<0.000000e+00> : vector<160xf32>
    %121 = vector.multi_reduction <add>, %120, %cst_90 [1] : vector<160x40xf32> to vector<160xf32>
    %122 = vector.shape_cast %121 : vector<160xf32> to vector<160x1xf32>
    %123 = tpu.reciprocal %122 {approx = true} : vector<160x1xf32> -> vector<160x1xf32>
    %124 = vector.broadcast %123 : vector<160x1xf32> to vector<160x40xf32>
    %125 = arith.mulf %120, %124 : vector<160x40xf32>
    %126 = vector.extract_strided_slice %125 {offsets = [0, 0], sizes = [40, 40], strides = [1, 1]} : vector<160x40xf32> to vector<40x40xf32>
    %cst_91 = arith.constant dense<0.000000e+00> : vector<40x8xf32>
    %127 = tpu.matmul %126, %36, %cst_91 {dimension_numbers = #tpu.dot_dimension_numbers<[1], [0], [0], [1], [0, 0, 1, 1], [], []>} : vector<40x40xf32>, vector<40x8xf32>, vector<40x8xf32> -> vector<40x8xf32>
    %128 = vector.extract_strided_slice %18 {offsets = [0, 0], sizes = [8, 32], strides = [1, 1]} : vector<32x32xf32> to vector<8x32xf32>
    %cst_92 = arith.constant dense<0.000000e+00> : vector<40x32xf32>
    %129 = tpu.matmul %127, %128, %cst_92 {dimension_numbers = #tpu.dot_dimension_numbers<[1], [0], [0], [1], [0, 0, 1, 1], [], []>} : vector<40x8xf32>, vector<8x32xf32>, vector<40x32xf32> -> vector<40x32xf32>
    %130 = vector.extract_strided_slice %126 {offsets = [0, 0], sizes = [5, 5], strides = [1, 1]} : vector<40x40xf32> to vector<5x5xf32>
    %c0_93 = arith.constant 0 : index
    %c0_94 = arith.constant 0 : index
    %c0_95 = arith.constant 0 : index
    %c0_96 = arith.constant 0 : index
    %131 = vector.load %arg8[%c0_93, %c0_94, %c0_95, %c0_96] : memref<2x32x5x5xf32, #tpu.memory_space<vmem>>, vector<1x1x5x5xf32>
    %132 = vector.shape_cast %131 : vector<1x1x5x5xf32> to vector<5x5xf32>
    %133 = vector.shape_cast %130 : vector<5x5xf32> to vector<1x1x5x5xf32>
    tpu.vector_store %arg8[%c0_93, %c0_94, %c0_95, %c0_96], %133 {strides = array<i32>} : memref<2x32x5x5xf32, #tpu.memory_space<vmem>>, vector<1x1x5x5xf32>,
    %134 = vector.extract_strided_slice %126 {offsets = [5, 5], sizes = [5, 5], strides = [1, 1]} : vector<40x40xf32> to vector<5x5xf32>
    %c0_97 = arith.constant 0 : index
    %c4_98 = arith.constant 4 : index
    %c0_99 = arith.constant 0 : index
    %c0_100 = arith.constant 0 : index
    %135 = vector.load %arg8[%c0_97, %c4_98, %c0_99, %c0_100] : memref<2x32x5x5xf32, #tpu.memory_space<vmem>>, vector<1x1x5x5xf32>
    %136 = vector.shape_cast %135 : vector<1x1x5x5xf32> to vector<5x5xf32>
    %137 = vector.shape_cast %134 : vector<5x5xf32> to vector<1x1x5x5xf32>
    tpu.vector_store %arg8[%c0_97, %c4_98, %c0_99, %c0_100], %137 {strides = array<i32>} : memref<2x32x5x5xf32, #tpu.memory_space<vmem>>, vector<1x1x5x5xf32>,
    %138 = vector.extract_strided_slice %126 {offsets = [10, 10], sizes = [5, 5], strides = [1, 1]} : vector<40x40xf32> to vector<5x5xf32>
    %c0_101 = arith.constant 0 : index
    %c8_102 = arith.constant 8 : index
    %c0_103 = arith.constant 0 : index
    %c0_104 = arith.constant 0 : index
    %139 = vector.load %arg8[%c0_101, %c8_102, %c0_103, %c0_104] : memref<2x32x5x5xf32, #tpu.memory_space<vmem>>, vector<1x1x5x5xf32>
    %140 = vector.shape_cast %139 : vector<1x1x5x5xf32> to vector<5x5xf32>
    %141 = vector.shape_cast %138 : vector<5x5xf32> to vector<1x1x5x5xf32>
    tpu.vector_store %arg8[%c0_101, %c8_102, %c0_103, %c0_104], %141 {strides = array<i32>} : memref<2x32x5x5xf32, #tpu.memory_space<vmem>>, vector<1x1x5x5xf32>,
    %142 = vector.extract_strided_slice %126 {offsets = [15, 15], sizes = [5, 5], strides = [1, 1]} : vector<40x40xf32> to vector<5x5xf32>
    %c0_105 = arith.constant 0 : index
    %c12 = arith.constant 12 : index
    %c0_106 = arith.constant 0 : index
    %c0_107 = arith.constant 0 : index
    %143 = vector.load %arg8[%c0_105, %c12, %c0_106, %c0_107] : memref<2x32x5x5xf32, #tpu.memory_space<vmem>>, vector<1x1x5x5xf32>
    %144 = vector.shape_cast %143 : vector<1x1x5x5xf32> to vector<5x5xf32>
    %145 = vector.shape_cast %142 : vector<5x5xf32> to vector<1x1x5x5xf32>
    tpu.vector_store %arg8[%c0_105, %c12, %c0_106, %c0_107], %145 {strides = array<i32>} : memref<2x32x5x5xf32, #tpu.memory_space<vmem>>, vector<1x1x5x5xf32>,
    %146 = vector.extract_strided_slice %126 {offsets = [20, 20], sizes = [5, 5], strides = [1, 1]} : vector<40x40xf32> to vector<5x5xf32>
    %c0_108 = arith.constant 0 : index
    %c16 = arith.constant 16 : index
    %c0_109 = arith.constant 0 : index
    %c0_110 = arith.constant 0 : index
    %147 = vector.load %arg8[%c0_108, %c16, %c0_109, %c0_110] : memref<2x32x5x5xf32, #tpu.memory_space<vmem>>, vector<1x1x5x5xf32>
    %148 = vector.shape_cast %147 : vector<1x1x5x5xf32> to vector<5x5xf32>
    %149 = vector.shape_cast %146 : vector<5x5xf32> to vector<1x1x5x5xf32>
    tpu.vector_store %arg8[%c0_108, %c16, %c0_109, %c0_110], %149 {strides = array<i32>} : memref<2x32x5x5xf32, #tpu.memory_space<vmem>>, vector<1x1x5x5xf32>,
    %150 = vector.extract_strided_slice %126 {offsets = [25, 25], sizes = [5, 5], strides = [1, 1]} : vector<40x40xf32> to vector<5x5xf32>
    %c0_111 = arith.constant 0 : index
    %c20 = arith.constant 20 : index
    %c0_112 = arith.constant 0 : index
    %c0_113 = arith.constant 0 : index
    %151 = vector.load %arg8[%c0_111, %c20, %c0_112, %c0_113] : memref<2x32x5x5xf32, #tpu.memory_space<vmem>>, vector<1x1x5x5xf32>
    %152 = vector.shape_cast %151 : vector<1x1x5x5xf32> to vector<5x5xf32>
    %153 = vector.shape_cast %150 : vector<5x5xf32> to vector<1x1x5x5xf32>
    tpu.vector_store %arg8[%c0_111, %c20, %c0_112, %c0_113], %153 {strides = array<i32>} : memref<2x32x5x5xf32, #tpu.memory_space<vmem>>, vector<1x1x5x5xf32>,
    %154 = vector.extract_strided_slice %126 {offsets = [30, 30], sizes = [5, 5], strides = [1, 1]} : vector<40x40xf32> to vector<5x5xf32>
    %c0_114 = arith.constant 0 : index
    %c24 = arith.constant 24 : index
    %c0_115 = arith.constant 0 : index
    %c0_116 = arith.constant 0 : index
    %155 = vector.load %arg8[%c0_114, %c24, %c0_115, %c0_116] : memref<2x32x5x5xf32, #tpu.memory_space<vmem>>, vector<1x1x5x5xf32>
    %156 = vector.shape_cast %155 : vector<1x1x5x5xf32> to vector<5x5xf32>
    %157 = vector.shape_cast %154 : vector<5x5xf32> to vector<1x1x5x5xf32>
    tpu.vector_store %arg8[%c0_114, %c24, %c0_115, %c0_116], %157 {strides = array<i32>} : memref<2x32x5x5xf32, #tpu.memory_space<vmem>>, vector<1x1x5x5xf32>,
    %158 = vector.extract_strided_slice %126 {offsets = [35, 35], sizes = [5, 5], strides = [1, 1]} : vector<40x40xf32> to vector<5x5xf32>
    %c0_117 = arith.constant 0 : index
    %c28 = arith.constant 28 : index
    %c0_118 = arith.constant 0 : index
    %c0_119 = arith.constant 0 : index
    %159 = vector.load %arg8[%c0_117, %c28, %c0_118, %c0_119] : memref<2x32x5x5xf32, #tpu.memory_space<vmem>>, vector<1x1x5x5xf32>
    %160 = vector.shape_cast %159 : vector<1x1x5x5xf32> to vector<5x5xf32>
    %161 = vector.shape_cast %158 : vector<5x5xf32> to vector<1x1x5x5xf32>
    tpu.vector_store %arg8[%c0_117, %c28, %c0_118, %c0_119], %161 {strides = array<i32>} : memref<2x32x5x5xf32, #tpu.memory_space<vmem>>, vector<1x1x5x5xf32>,
    %162 = vector.extract_strided_slice %125 {offsets = [40, 0], sizes = [40, 40], strides = [1, 1]} : vector<160x40xf32> to vector<40x40xf32>
    %cst_120 = arith.constant dense<0.000000e+00> : vector<40x8xf32>
    %163 = tpu.matmul %162, %60, %cst_120 {dimension_numbers = #tpu.dot_dimension_numbers<[1], [0], [0], [1], [0, 0, 1, 1], [], []>} : vector<40x40xf32>, vector<40x8xf32>, vector<40x8xf32> -> vector<40x8xf32>
    %164 = vector.extract_strided_slice %18 {offsets = [8, 0], sizes = [8, 32], strides = [1, 1]} : vector<32x32xf32> to vector<8x32xf32>
    %cst_121 = arith.constant dense<0.000000e+00> : vector<40x32xf32>
    %165 = tpu.matmul %163, %164, %cst_121 {dimension_numbers = #tpu.dot_dimension_numbers<[1], [0], [0], [1], [0, 0, 1, 1], [], []>} : vector<40x8xf32>, vector<8x32xf32>, vector<40x32xf32> -> vector<40x32xf32>
    %166 = arith.addf %129, %165 : vector<40x32xf32>
    %167 = vector.extract_strided_slice %162 {offsets = [0, 0], sizes = [5, 5], strides = [1, 1]} : vector<40x40xf32> to vector<5x5xf32>
    %c0_122 = arith.constant 0 : index
    %c1_123 = arith.constant 1 : index
    %c0_124 = arith.constant 0 : index
    %c0_125 = arith.constant 0 : index
    %168 = vector.load %arg8[%c0_122, %c1_123, %c0_124, %c0_125] : memref<2x32x5x5xf32, #tpu.memory_space<vmem>>, vector<1x1x5x5xf32>
    %169 = vector.shape_cast %168 : vector<1x1x5x5xf32> to vector<5x5xf32>
    %170 = vector.shape_cast %167 : vector<5x5xf32> to vector<1x1x5x5xf32>
    tpu.vector_store %arg8[%c0_122, %c1_123, %c0_124, %c0_125], %170 {strides = array<i32>} : memref<2x32x5x5xf32, #tpu.memory_space<vmem>>, vector<1x1x5x5xf32>,
    %171 = vector.extract_strided_slice %162 {offsets = [5, 5], sizes = [5, 5], strides = [1, 1]} : vector<40x40xf32> to vector<5x5xf32>
    %c0_126 = arith.constant 0 : index
    %c5_127 = arith.constant 5 : index
    %c0_128 = arith.constant 0 : index
    %c0_129 = arith.constant 0 : index
    %172 = vector.load %arg8[%c0_126, %c5_127, %c0_128, %c0_129] : memref<2x32x5x5xf32, #tpu.memory_space<vmem>>, vector<1x1x5x5xf32>
    %173 = vector.shape_cast %172 : vector<1x1x5x5xf32> to vector<5x5xf32>
    %174 = vector.shape_cast %171 : vector<5x5xf32> to vector<1x1x5x5xf32>
    tpu.vector_store %arg8[%c0_126, %c5_127, %c0_128, %c0_129], %174 {strides = array<i32>} : memref<2x32x5x5xf32, #tpu.memory_space<vmem>>, vector<1x1x5x5xf32>,
    %175 = vector.extract_strided_slice %162 {offsets = [10, 10], sizes = [5, 5], strides = [1, 1]} : vector<40x40xf32> to vector<5x5xf32>
    %c0_130 = arith.constant 0 : index
    %c9_131 = arith.constant 9 : index
    %c0_132 = arith.constant 0 : index
    %c0_133 = arith.constant 0 : index
    %176 = vector.load %arg8[%c0_130, %c9_131, %c0_132, %c0_133] : memref<2x32x5x5xf32, #tpu.memory_space<vmem>>, vector<1x1x5x5xf32>
    %177 = vector.shape_cast %176 : vector<1x1x5x5xf32> to vector<5x5xf32>
    %178 = vector.shape_cast %175 : vector<5x5xf32> to vector<1x1x5x5xf32>
    tpu.vector_store %arg8[%c0_130, %c9_131, %c0_132, %c0_133], %178 {strides = array<i32>} : memref<2x32x5x5xf32, #tpu.memory_space<vmem>>, vector<1x1x5x5xf32>,
    %179 = vector.extract_strided_slice %162 {offsets = [15, 15], sizes = [5, 5], strides = [1, 1]} : vector<40x40xf32> to vector<5x5xf32>
    %c0_134 = arith.constant 0 : index
    %c13 = arith.constant 13 : index
    %c0_135 = arith.constant 0 : index
    %c0_136 = arith.constant 0 : index
    %180 = vector.load %arg8[%c0_134, %c13, %c0_135, %c0_136] : memref<2x32x5x5xf32, #tpu.memory_space<vmem>>, vector<1x1x5x5xf32>
    %181 = vector.shape_cast %180 : vector<1x1x5x5xf32> to vector<5x5xf32>
    %182 = vector.shape_cast %179 : vector<5x5xf32> to vector<1x1x5x5xf32>
    tpu.vector_store %arg8[%c0_134, %c13, %c0_135, %c0_136], %182 {strides = array<i32>} : memref<2x32x5x5xf32, #tpu.memory_space<vmem>>, vector<1x1x5x5xf32>,
    %183 = vector.extract_strided_slice %162 {offsets = [20, 20], sizes = [5, 5], strides = [1, 1]} : vector<40x40xf32> to vector<5x5xf32>
    %c0_137 = arith.constant 0 : index
    %c17 = arith.constant 17 : index
    %c0_138 = arith.constant 0 : index
    %c0_139 = arith.constant 0 : index
    %184 = vector.load %arg8[%c0_137, %c17, %c0_138, %c0_139] : memref<2x32x5x5xf32, #tpu.memory_space<vmem>>, vector<1x1x5x5xf32>
    %185 = vector.shape_cast %184 : vector<1x1x5x5xf32> to vector<5x5xf32>
    %186 = vector.shape_cast %183 : vector<5x5xf32> to vector<1x1x5x5xf32>
    tpu.vector_store %arg8[%c0_137, %c17, %c0_138, %c0_139], %186 {strides = array<i32>} : memref<2x32x5x5xf32, #tpu.memory_space<vmem>>, vector<1x1x5x5xf32>,
    %187 = vector.extract_strided_slice %162 {offsets = [25, 25], sizes = [5, 5], strides = [1, 1]} : vector<40x40xf32> to vector<5x5xf32>
    %c0_140 = arith.constant 0 : index
    %c21 = arith.constant 21 : index
    %c0_141 = arith.constant 0 : index
    %c0_142 = arith.constant 0 : index
    %188 = vector.load %arg8[%c0_140, %c21, %c0_141, %c0_142] : memref<2x32x5x5xf32, #tpu.memory_space<vmem>>, vector<1x1x5x5xf32>
    %189 = vector.shape_cast %188 : vector<1x1x5x5xf32> to vector<5x5xf32>
    %190 = vector.shape_cast %187 : vector<5x5xf32> to vector<1x1x5x5xf32>
    tpu.vector_store %arg8[%c0_140, %c21, %c0_141, %c0_142], %190 {strides = array<i32>} : memref<2x32x5x5xf32, #tpu.memory_space<vmem>>, vector<1x1x5x5xf32>,
    %191 = vector.extract_strided_slice %162 {offsets = [30, 30], sizes = [5, 5], strides = [1, 1]} : vector<40x40xf32> to vector<5x5xf32>
    %c0_143 = arith.constant 0 : index
    %c25 = arith.constant 25 : index
    %c0_144 = arith.constant 0 : index
    %c0_145 = arith.constant 0 : index
    %192 = vector.load %arg8[%c0_143, %c25, %c0_144, %c0_145] : memref<2x32x5x5xf32, #tpu.memory_space<vmem>>, vector<1x1x5x5xf32>
    %193 = vector.shape_cast %192 : vector<1x1x5x5xf32> to vector<5x5xf32>
    %194 = vector.shape_cast %191 : vector<5x5xf32> to vector<1x1x5x5xf32>
    tpu.vector_store %arg8[%c0_143, %c25, %c0_144, %c0_145], %194 {strides = array<i32>} : memref<2x32x5x5xf32, #tpu.memory_space<vmem>>, vector<1x1x5x5xf32>,
    %195 = vector.extract_strided_slice %162 {offsets = [35, 35], sizes = [5, 5], strides = [1, 1]} : vector<40x40xf32> to vector<5x5xf32>
    %c0_146 = arith.constant 0 : index
    %c29 = arith.constant 29 : index
    %c0_147 = arith.constant 0 : index
    %c0_148 = arith.constant 0 : index
    %196 = vector.load %arg8[%c0_146, %c29, %c0_147, %c0_148] : memref<2x32x5x5xf32, #tpu.memory_space<vmem>>, vector<1x1x5x5xf32>
    %197 = vector.shape_cast %196 : vector<1x1x5x5xf32> to vector<5x5xf32>
    %198 = vector.shape_cast %195 : vector<5x5xf32> to vector<1x1x5x5xf32>
    tpu.vector_store %arg8[%c0_146, %c29, %c0_147, %c0_148], %198 {strides = array<i32>} : memref<2x32x5x5xf32, #tpu.memory_space<vmem>>, vector<1x1x5x5xf32>,
    %199 = vector.extract_strided_slice %125 {offsets = [80, 0], sizes = [40, 40], strides = [1, 1]} : vector<160x40xf32> to vector<40x40xf32>
    %cst_149 = arith.constant dense<0.000000e+00> : vector<40x8xf32>
    %200 = tpu.matmul %199, %84, %cst_149 {dimension_numbers = #tpu.dot_dimension_numbers<[1], [0], [0], [1], [0, 0, 1, 1], [], []>} : vector<40x40xf32>, vector<40x8xf32>, vector<40x8xf32> -> vector<40x8xf32>
    %201 = vector.extract_strided_slice %18 {offsets = [16, 0], sizes = [8, 32], strides = [1, 1]} : vector<32x32xf32> to vector<8x32xf32>
    %cst_150 = arith.constant dense<0.000000e+00> : vector<40x32xf32>
    %202 = tpu.matmul %200, %201, %cst_150 {dimension_numbers = #tpu.dot_dimension_numbers<[1], [0], [0], [1], [0, 0, 1, 1], [], []>} : vector<40x8xf32>, vector<8x32xf32>, vector<40x32xf32> -> vector<40x32xf32>
    %203 = arith.addf %166, %202 : vector<40x32xf32>
    %204 = vector.extract_strided_slice %199 {offsets = [0, 0], sizes = [5, 5], strides = [1, 1]} : vector<40x40xf32> to vector<5x5xf32>
    %c0_151 = arith.constant 0 : index
    %c2_152 = arith.constant 2 : index
    %c0_153 = arith.constant 0 : index
    %c0_154 = arith.constant 0 : index
    %205 = vector.load %arg8[%c0_151, %c2_152, %c0_153, %c0_154] : memref<2x32x5x5xf32, #tpu.memory_space<vmem>>, vector<1x1x5x5xf32>
    %206 = vector.shape_cast %205 : vector<1x1x5x5xf32> to vector<5x5xf32>
    %207 = vector.shape_cast %204 : vector<5x5xf32> to vector<1x1x5x5xf32>
    tpu.vector_store %arg8[%c0_151, %c2_152, %c0_153, %c0_154], %207 {strides = array<i32>} : memref<2x32x5x5xf32, #tpu.memory_space<vmem>>, vector<1x1x5x5xf32>,
    %208 = vector.extract_strided_slice %199 {offsets = [5, 5], sizes = [5, 5], strides = [1, 1]} : vector<40x40xf32> to vector<5x5xf32>
    %c0_155 = arith.constant 0 : index
    %c6_156 = arith.constant 6 : index
    %c0_157 = arith.constant 0 : index
    %c0_158 = arith.constant 0 : index
    %209 = vector.load %arg8[%c0_155, %c6_156, %c0_157, %c0_158] : memref<2x32x5x5xf32, #tpu.memory_space<vmem>>, vector<1x1x5x5xf32>
    %210 = vector.shape_cast %209 : vector<1x1x5x5xf32> to vector<5x5xf32>
    %211 = vector.shape_cast %208 : vector<5x5xf32> to vector<1x1x5x5xf32>
    tpu.vector_store %arg8[%c0_155, %c6_156, %c0_157, %c0_158], %211 {strides = array<i32>} : memref<2x32x5x5xf32, #tpu.memory_space<vmem>>, vector<1x1x5x5xf32>,
    %212 = vector.extract_strided_slice %199 {offsets = [10, 10], sizes = [5, 5], strides = [1, 1]} : vector<40x40xf32> to vector<5x5xf32>
    %c0_159 = arith.constant 0 : index
    %c10_160 = arith.constant 10 : index
    %c0_161 = arith.constant 0 : index
    %c0_162 = arith.constant 0 : index
    %213 = vector.load %arg8[%c0_159, %c10_160, %c0_161, %c0_162] : memref<2x32x5x5xf32, #tpu.memory_space<vmem>>, vector<1x1x5x5xf32>
    %214 = vector.shape_cast %213 : vector<1x1x5x5xf32> to vector<5x5xf32>
    %215 = vector.shape_cast %212 : vector<5x5xf32> to vector<1x1x5x5xf32>
    tpu.vector_store %arg8[%c0_159, %c10_160, %c0_161, %c0_162], %215 {strides = array<i32>} : memref<2x32x5x5xf32, #tpu.memory_space<vmem>>, vector<1x1x5x5xf32>,
    %216 = vector.extract_strided_slice %199 {offsets = [15, 15], sizes = [5, 5], strides = [1, 1]} : vector<40x40xf32> to vector<5x5xf32>
    %c0_163 = arith.constant 0 : index
    %c14 = arith.constant 14 : index
    %c0_164 = arith.constant 0 : index
    %c0_165 = arith.constant 0 : index
    %217 = vector.load %arg8[%c0_163, %c14, %c0_164, %c0_165] : memref<2x32x5x5xf32, #tpu.memory_space<vmem>>, vector<1x1x5x5xf32>
    %218 = vector.shape_cast %217 : vector<1x1x5x5xf32> to vector<5x5xf32>
    %219 = vector.shape_cast %216 : vector<5x5xf32> to vector<1x1x5x5xf32>
    tpu.vector_store %arg8[%c0_163, %c14, %c0_164, %c0_165], %219 {strides = array<i32>} : memref<2x32x5x5xf32, #tpu.memory_space<vmem>>, vector<1x1x5x5xf32>,
    %220 = vector.extract_strided_slice %199 {offsets = [20, 20], sizes = [5, 5], strides = [1, 1]} : vector<40x40xf32> to vector<5x5xf32>
    %c0_166 = arith.constant 0 : index
    %c18 = arith.constant 18 : index
    %c0_167 = arith.constant 0 : index
    %c0_168 = arith.constant 0 : index
    %221 = vector.load %arg8[%c0_166, %c18, %c0_167, %c0_168] : memref<2x32x5x5xf32, #tpu.memory_space<vmem>>, vector<1x1x5x5xf32>
    %222 = vector.shape_cast %221 : vector<1x1x5x5xf32> to vector<5x5xf32>
    %223 = vector.shape_cast %220 : vector<5x5xf32> to vector<1x1x5x5xf32>
    tpu.vector_store %arg8[%c0_166, %c18, %c0_167, %c0_168], %223 {strides = array<i32>} : memref<2x32x5x5xf32, #tpu.memory_space<vmem>>, vector<1x1x5x5xf32>,
    %224 = vector.extract_strided_slice %199 {offsets = [25, 25], sizes = [5, 5], strides = [1, 1]} : vector<40x40xf32> to vector<5x5xf32>
    %c0_169 = arith.constant 0 : index
    %c22 = arith.constant 22 : index
    %c0_170 = arith.constant 0 : index
    %c0_171 = arith.constant 0 : index
    %225 = vector.load %arg8[%c0_169, %c22, %c0_170, %c0_171] : memref<2x32x5x5xf32, #tpu.memory_space<vmem>>, vector<1x1x5x5xf32>
    %226 = vector.shape_cast %225 : vector<1x1x5x5xf32> to vector<5x5xf32>
    %227 = vector.shape_cast %224 : vector<5x5xf32> to vector<1x1x5x5xf32>
    tpu.vector_store %arg8[%c0_169, %c22, %c0_170, %c0_171], %227 {strides = array<i32>} : memref<2x32x5x5xf32, #tpu.memory_space<vmem>>, vector<1x1x5x5xf32>,
    %228 = vector.extract_strided_slice %199 {offsets = [30, 30], sizes = [5, 5], strides = [1, 1]} : vector<40x40xf32> to vector<5x5xf32>
    %c0_172 = arith.constant 0 : index
    %c26 = arith.constant 26 : index
    %c0_173 = arith.constant 0 : index
    %c0_174 = arith.constant 0 : index
    %229 = vector.load %arg8[%c0_172, %c26, %c0_173, %c0_174] : memref<2x32x5x5xf32, #tpu.memory_space<vmem>>, vector<1x1x5x5xf32>
    %230 = vector.shape_cast %229 : vector<1x1x5x5xf32> to vector<5x5xf32>
    %231 = vector.shape_cast %228 : vector<5x5xf32> to vector<1x1x5x5xf32>
    tpu.vector_store %arg8[%c0_172, %c26, %c0_173, %c0_174], %231 {strides = array<i32>} : memref<2x32x5x5xf32, #tpu.memory_space<vmem>>, vector<1x1x5x5xf32>,
    %232 = vector.extract_strided_slice %199 {offsets = [35, 35], sizes = [5, 5], strides = [1, 1]} : vector<40x40xf32> to vector<5x5xf32>
    %c0_175 = arith.constant 0 : index
    %c30 = arith.constant 30 : index
    %c0_176 = arith.constant 0 : index
    %c0_177 = arith.constant 0 : index
    %233 = vector.load %arg8[%c0_175, %c30, %c0_176, %c0_177] : memref<2x32x5x5xf32, #tpu.memory_space<vmem>>, vector<1x1x5x5xf32>
    %234 = vector.shape_cast %233 : vector<1x1x5x5xf32> to vector<5x5xf32>
    %235 = vector.shape_cast %232 : vector<5x5xf32> to vector<1x1x5x5xf32>
    tpu.vector_store %arg8[%c0_175, %c30, %c0_176, %c0_177], %235 {strides = array<i32>} : memref<2x32x5x5xf32, #tpu.memory_space<vmem>>, vector<1x1x5x5xf32>,
    %236 = vector.extract_strided_slice %125 {offsets = [120, 0], sizes = [40, 40], strides = [1, 1]} : vector<160x40xf32> to vector<40x40xf32>
    %cst_178 = arith.constant dense<0.000000e+00> : vector<40x8xf32>
    %237 = tpu.matmul %236, %108, %cst_178 {dimension_numbers = #tpu.dot_dimension_numbers<[1], [0], [0], [1], [0, 0, 1, 1], [], []>} : vector<40x40xf32>, vector<40x8xf32>, vector<40x8xf32> -> vector<40x8xf32>
    %238 = vector.extract_strided_slice %18 {offsets = [24, 0], sizes = [8, 32], strides = [1, 1]} : vector<32x32xf32> to vector<8x32xf32>
    %cst_179 = arith.constant dense<0.000000e+00> : vector<40x32xf32>
    %239 = tpu.matmul %237, %238, %cst_179 {dimension_numbers = #tpu.dot_dimension_numbers<[1], [0], [0], [1], [0, 0, 1, 1], [], []>} : vector<40x8xf32>, vector<8x32xf32>, vector<40x32xf32> -> vector<40x32xf32>
    %240 = arith.addf %203, %239 : vector<40x32xf32>
    %241 = vector.extract_strided_slice %236 {offsets = [0, 0], sizes = [5, 5], strides = [1, 1]} : vector<40x40xf32> to vector<5x5xf32>
    %c0_180 = arith.constant 0 : index
    %c3_181 = arith.constant 3 : index
    %c0_182 = arith.constant 0 : index
    %c0_183 = arith.constant 0 : index
    %242 = vector.load %arg8[%c0_180, %c3_181, %c0_182, %c0_183] : memref<2x32x5x5xf32, #tpu.memory_space<vmem>>, vector<1x1x5x5xf32>
    %243 = vector.shape_cast %242 : vector<1x1x5x5xf32> to vector<5x5xf32>
    %244 = vector.shape_cast %241 : vector<5x5xf32> to vector<1x1x5x5xf32>
    tpu.vector_store %arg8[%c0_180, %c3_181, %c0_182, %c0_183], %244 {strides = array<i32>} : memref<2x32x5x5xf32, #tpu.memory_space<vmem>>, vector<1x1x5x5xf32>,
    %245 = vector.extract_strided_slice %236 {offsets = [5, 5], sizes = [5, 5], strides = [1, 1]} : vector<40x40xf32> to vector<5x5xf32>
    %c0_184 = arith.constant 0 : index
    %c7_185 = arith.constant 7 : index
    %c0_186 = arith.constant 0 : index
    %c0_187 = arith.constant 0 : index
    %246 = vector.load %arg8[%c0_184, %c7_185, %c0_186, %c0_187] : memref<2x32x5x5xf32, #tpu.memory_space<vmem>>, vector<1x1x5x5xf32>
    %247 = vector.shape_cast %246 : vector<1x1x5x5xf32> to vector<5x5xf32>
    %248 = vector.shape_cast %245 : vector<5x5xf32> to vector<1x1x5x5xf32>
    tpu.vector_store %arg8[%c0_184, %c7_185, %c0_186, %c0_187], %248 {strides = array<i32>} : memref<2x32x5x5xf32, #tpu.memory_space<vmem>>, vector<1x1x5x5xf32>,
    %249 = vector.extract_strided_slice %236 {offsets = [10, 10], sizes = [5, 5], strides = [1, 1]} : vector<40x40xf32> to vector<5x5xf32>
    %c0_188 = arith.constant 0 : index
    %c11_189 = arith.constant 11 : index
    %c0_190 = arith.constant 0 : index
    %c0_191 = arith.constant 0 : index
    %250 = vector.load %arg8[%c0_188, %c11_189, %c0_190, %c0_191] : memref<2x32x5x5xf32, #tpu.memory_space<vmem>>, vector<1x1x5x5xf32>
    %251 = vector.shape_cast %250 : vector<1x1x5x5xf32> to vector<5x5xf32>
    %252 = vector.shape_cast %249 : vector<5x5xf32> to vector<1x1x5x5xf32>
    tpu.vector_store %arg8[%c0_188, %c11_189, %c0_190, %c0_191], %252 {strides = array<i32>} : memref<2x32x5x5xf32, #tpu.memory_space<vmem>>, vector<1x1x5x5xf32>,
    %253 = vector.extract_strided_slice %236 {offsets = [15, 15], sizes = [5, 5], strides = [1, 1]} : vector<40x40xf32> to vector<5x5xf32>
    %c0_192 = arith.constant 0 : index
    %c15 = arith.constant 15 : index
    %c0_193 = arith.constant 0 : index
    %c0_194 = arith.constant 0 : index
    %254 = vector.load %arg8[%c0_192, %c15, %c0_193, %c0_194] : memref<2x32x5x5xf32, #tpu.memory_space<vmem>>, vector<1x1x5x5xf32>
    %255 = vector.shape_cast %254 : vector<1x1x5x5xf32> to vector<5x5xf32>
    %256 = vector.shape_cast %253 : vector<5x5xf32> to vector<1x1x5x5xf32>
    tpu.vector_store %arg8[%c0_192, %c15, %c0_193, %c0_194], %256 {strides = array<i32>} : memref<2x32x5x5xf32, #tpu.memory_space<vmem>>, vector<1x1x5x5xf32>,
    %257 = vector.extract_strided_slice %236 {offsets = [20, 20], sizes = [5, 5], strides = [1, 1]} : vector<40x40xf32> to vector<5x5xf32>
    %c0_195 = arith.constant 0 : index
    %c19 = arith.constant 19 : index
    %c0_196 = arith.constant 0 : index
    %c0_197 = arith.constant 0 : index
    %258 = vector.load %arg8[%c0_195, %c19, %c0_196, %c0_197] : memref<2x32x5x5xf32, #tpu.memory_space<vmem>>, vector<1x1x5x5xf32>
    %259 = vector.shape_cast %258 : vector<1x1x5x5xf32> to vector<5x5xf32>
    %260 = vector.shape_cast %257 : vector<5x5xf32> to vector<1x1x5x5xf32>
    tpu.vector_store %arg8[%c0_195, %c19, %c0_196, %c0_197], %260 {strides = array<i32>} : memref<2x32x5x5xf32, #tpu.memory_space<vmem>>, vector<1x1x5x5xf32>,
    %261 = vector.extract_strided_slice %236 {offsets = [25, 25], sizes = [5, 5], strides = [1, 1]} : vector<40x40xf32> to vector<5x5xf32>
    %c0_198 = arith.constant 0 : index
    %c23 = arith.constant 23 : index
    %c0_199 = arith.constant 0 : index
    %c0_200 = arith.constant 0 : index
    %262 = vector.load %arg8[%c0_198, %c23, %c0_199, %c0_200] : memref<2x32x5x5xf32, #tpu.memory_space<vmem>>, vector<1x1x5x5xf32>
    %263 = vector.shape_cast %262 : vector<1x1x5x5xf32> to vector<5x5xf32>
    %264 = vector.shape_cast %261 : vector<5x5xf32> to vector<1x1x5x5xf32>
    tpu.vector_store %arg8[%c0_198, %c23, %c0_199, %c0_200], %264 {strides = array<i32>} : memref<2x32x5x5xf32, #tpu.memory_space<vmem>>, vector<1x1x5x5xf32>,
    %265 = vector.extract_strided_slice %236 {offsets = [30, 30], sizes = [5, 5], strides = [1, 1]} : vector<40x40xf32> to vector<5x5xf32>
    %c0_201 = arith.constant 0 : index
    %c27 = arith.constant 27 : index
    %c0_202 = arith.constant 0 : index
    %c0_203 = arith.constant 0 : index
    %266 = vector.load %arg8[%c0_201, %c27, %c0_202, %c0_203] : memref<2x32x5x5xf32, #tpu.memory_space<vmem>>, vector<1x1x5x5xf32>
    %267 = vector.shape_cast %266 : vector<1x1x5x5xf32> to vector<5x5xf32>
    %268 = vector.shape_cast %265 : vector<5x5xf32> to vector<1x1x5x5xf32>
    tpu.vector_store %arg8[%c0_201, %c27, %c0_202, %c0_203], %268 {strides = array<i32>} : memref<2x32x5x5xf32, #tpu.memory_space<vmem>>, vector<1x1x5x5xf32>,
    %269 = vector.extract_strided_slice %236 {offsets = [35, 35], sizes = [5, 5], strides = [1, 1]} : vector<40x40xf32> to vector<5x5xf32>
    %c0_204 = arith.constant 0 : index
    %c31 = arith.constant 31 : index
    %c0_205 = arith.constant 0 : index
    %c0_206 = arith.constant 0 : index
    %270 = vector.load %arg8[%c0_204, %c31, %c0_205, %c0_206] : memref<2x32x5x5xf32, #tpu.memory_space<vmem>>, vector<1x1x5x5xf32>
    %271 = vector.shape_cast %270 : vector<1x1x5x5xf32> to vector<5x5xf32>
    %272 = vector.shape_cast %269 : vector<5x5xf32> to vector<1x1x5x5xf32>
    tpu.vector_store %arg8[%c0_204, %c31, %c0_205, %c0_206], %272 {strides = array<i32>} : memref<2x32x5x5xf32, #tpu.memory_space<vmem>>, vector<1x1x5x5xf32>,
    %c0_207 = arith.constant 0 : index
    %c0_208 = arith.constant 0 : index
    %c0_209 = arith.constant 0 : index
    %273 = vector.load %arg6[%c0_207, %c0_208, %c0_209] : memref<2x8x64xf32, #tpu.memory_space<vmem>>, vector<1x8x64xf32>
    %274 = vector.shape_cast %273 : vector<1x8x64xf32> to vector<8x64xf32>
    %275 = vector.extract_strided_slice %274 {offsets = [0, 0], sizes = [1, 32], strides = [1, 1]} : vector<8x64xf32> to vector<1x32xf32>
    %276 = vector.extract_strided_slice %274 {offsets = [1, 0], sizes = [1, 64], strides = [1, 1]} : vector<8x64xf32> to vector<1x64xf32>
    %277 = vector.extract_strided_slice %274 {offsets = [2, 0], sizes = [1, 32], strides = [1, 1]} : vector<8x64xf32> to vector<1x32xf32>
    %278 = vector.extract_strided_slice %274 {offsets = [3, 0], sizes = [1, 32], strides = [1, 1]} : vector<8x64xf32> to vector<1x32xf32>
    %279 = vector.extract_strided_slice %274 {offsets = [4, 0], sizes = [1, 32], strides = [1, 1]} : vector<8x64xf32> to vector<1x32xf32>
    %280 = vector.extract_strided_slice %274 {offsets = [5, 0], sizes = [1, 32], strides = [1, 1]} : vector<8x64xf32> to vector<1x32xf32>
    %281 = vector.extract_strided_slice %274 {offsets = [6, 0], sizes = [1, 32], strides = [1, 1]} : vector<8x64xf32> to vector<1x32xf32>
    %282 = arith.addf %6, %240 : vector<40x32xf32>
    %283 = vector.broadcast %275 : vector<1x32xf32> to vector<40x32xf32>
    %284 = arith.addf %282, %283 : vector<40x32xf32>
    %cst_210 = arith.constant dense<0.000000e+00> : vector<32xf32>
    %285 = vector.multi_reduction <add>, %284, %cst_210 [0] : vector<40x32xf32> to vector<32xf32>
    %286 = vector.shape_cast %285 : vector<32xf32> to vector<1x32xf32>
    %cst_211 = arith.constant 4.000000e+01 : f32
    %287 = vector.broadcast %cst_211 : f32 to vector<1x32xf32>
    %288 = arith.divf %286, %287 : vector<1x32xf32>
    %289 = vector.broadcast %288 : vector<1x32xf32> to vector<40x32xf32>
    %290 = arith.subf %284, %289 : vector<40x32xf32>
    %291 = arith.mulf %290, %290 : vector<40x32xf32>
    %cst_212 = arith.constant dense<0.000000e+00> : vector<32xf32>
    %292 = vector.multi_reduction <add>, %291, %cst_212 [0] : vector<40x32xf32> to vector<32xf32>
    %293 = vector.shape_cast %292 : vector<32xf32> to vector<1x32xf32>
    %cst_213 = arith.constant 4.000000e+01 : f32
    %294 = vector.broadcast %cst_213 : f32 to vector<1x32xf32>
    %295 = arith.divf %293, %294 : vector<1x32xf32>
    %cst_214 = arith.constant 9.99999974E-6 : f32
    %296 = vector.broadcast %cst_214 : f32 to vector<1x32xf32>
    %297 = arith.addf %295, %296 : vector<1x32xf32>
    %298 = math.rsqrt %297 : vector<1x32xf32>
    %299 = vector.broadcast %298 : vector<1x32xf32> to vector<40x32xf32>
    %300 = arith.mulf %290, %299 : vector<40x32xf32>
    %301 = vector.broadcast %278 : vector<1x32xf32> to vector<40x32xf32>
    %302 = arith.mulf %300, %301 : vector<40x32xf32>
    %303 = vector.broadcast %279 : vector<1x32xf32> to vector<40x32xf32>
    %304 = arith.addf %302, %303 : vector<40x32xf32>
    %c0_215 = arith.constant 0 : index
    %c0_216 = arith.constant 0 : index
    %c0_217 = arith.constant 0 : index
    %c0_218 = arith.constant 0 : index
    %305 = vector.load %arg5[%c0_215, %c0_216, %c0_217, %c0_218] : memref<2x2x32x64xf32, #tpu.memory_space<vmem>>, vector<1x1x32x64xf32>
    %306 = vector.shape_cast %305 : vector<1x1x32x64xf32> to vector<32x64xf32>
    %cst_219 = arith.constant dense<0.000000e+00> : vector<40x64xf32>
    %307 = tpu.matmul %304, %306, %cst_219 {dimension_numbers = #tpu.dot_dimension_numbers<[1], [0], [0], [1], [0, 0, 1, 1], [], []>} : vector<40x32xf32>, vector<32x64xf32>, vector<40x64xf32> -> vector<40x64xf32>
    %308 = vector.broadcast %276 : vector<1x64xf32> to vector<40x64xf32>
    %309 = arith.addf %307, %308 : vector<40x64xf32>
    %cst_220 = arith.constant 5.000000e-01 : f32
    %310 = vector.broadcast %cst_220 : f32 to vector<40x64xf32>
    %311 = arith.mulf %310, %309 : vector<40x64xf32>
    %cst_221 = arith.constant 0.707106769 : f32
    %312 = vector.broadcast %cst_221 : f32 to vector<40x64xf32>
    %313 = arith.mulf %309, %312 : vector<40x64xf32>
    %cst_222 = arith.constant 0.000000e+00 : f32
    %314 = vector.broadcast %cst_222 : f32 to vector<40x64xf32>
    %315 = arith.cmpf oge, %313, %314 : vector<40x64xf32>
    %cst_223 = arith.constant 1.000000e+00 : f32
    %cst_224 = arith.constant -1.000000e+00 : f32
    %316 = vector.broadcast %cst_223 : f32 to vector<40x64xf32>
    %317 = vector.broadcast %cst_224 : f32 to vector<40x64xf32>
    %318 = arith.select %315, %316, %317 : vector<40x64xi1>, vector<40x64xf32>
    %319 = math.absf %313 : vector<40x64xf32>
    %cst_225 = arith.constant 0.327591091 : f32
    %320 = vector.broadcast %cst_225 : f32 to vector<40x64xf32>
    %321 = arith.mulf %320, %319 : vector<40x64xf32>
    %cst_226 = arith.constant 1.000000e+00 : f32
    %322 = vector.broadcast %cst_226 : f32 to vector<40x64xf32>
    %323 = arith.addf %322, %321 : vector<40x64xf32>
    %cst_227 = arith.constant 1.000000e+00 : f32
    %324 = vector.broadcast %cst_227 : f32 to vector<40x64xf32>
    %325 = arith.divf %324, %323 : vector<40x64xf32>
    %cst_228 = arith.constant 1.06140542 : f32
    %326 = vector.broadcast %cst_228 : f32 to vector<40x64xf32>
    %327 = arith.mulf %326, %325 : vector<40x64xf32>
    %cst_229 = arith.constant -1.45315206 : f32
    %328 = vector.broadcast %cst_229 : f32 to vector<40x64xf32>
    %329 = arith.addf %327, %328 : vector<40x64xf32>
    %330 = arith.mulf %329, %325 : vector<40x64xf32>
    %cst_230 = arith.constant 1.42141378 : f32
    %331 = vector.broadcast %cst_230 : f32 to vector<40x64xf32>
    %332 = arith.addf %330, %331 : vector<40x64xf32>
    %333 = arith.mulf %332, %325 : vector<40x64xf32>
    %cst_231 = arith.constant -0.284496725 : f32
    %334 = vector.broadcast %cst_231 : f32 to vector<40x64xf32>
    %335 = arith.addf %333, %334 : vector<40x64xf32>
    %336 = arith.mulf %335, %325 : vector<40x64xf32>
    %cst_232 = arith.constant 0.254829586 : f32
    %337 = vector.broadcast %cst_232 : f32 to vector<40x64xf32>
    %338 = arith.addf %336, %337 : vector<40x64xf32>
    %339 = arith.mulf %338, %325 : vector<40x64xf32>
    %cst_233 = arith.constant 0.000000e+00 : f32
    %340 = vector.broadcast %cst_233 : f32 to vector<40x64xf32>
    %341 = arith.subf %340, %319 : vector<40x64xf32>
    %342 = arith.mulf %341, %319 : vector<40x64xf32>
    %343 = math.exp %342 : vector<40x64xf32>
    %344 = arith.mulf %339, %343 : vector<40x64xf32>
    %cst_234 = arith.constant 1.000000e+00 : f32
    %345 = vector.broadcast %cst_234 : f32 to vector<40x64xf32>
    %346 = arith.subf %345, %344 : vector<40x64xf32>
    %347 = arith.mulf %318, %346 : vector<40x64xf32>
    %cst_235 = arith.constant 1.000000e+00 : f32
    %348 = vector.broadcast %cst_235 : f32 to vector<40x64xf32>
    %349 = arith.addf %348, %347 : vector<40x64xf32>
    %350 = arith.mulf %311, %349 : vector<40x64xf32>
    %c0_236 = arith.constant 0 : index
    %c1_237 = arith.constant 1 : index
    %c0_238 = arith.constant 0 : index
    %c0_239 = arith.constant 0 : index
    %351 = vector.load %arg5[%c0_236, %c1_237, %c0_238, %c0_239] : memref<2x2x32x64xf32, #tpu.memory_space<vmem>>, vector<1x1x32x64xf32>
    %352 = vector.shape_cast %351 : vector<1x1x32x64xf32> to vector<32x64xf32>
    %cst_240 = arith.constant dense<0.000000e+00> : vector<40x32xf32>
    %353 = tpu.matmul %350, %352, %cst_240 {dimension_numbers = #tpu.dot_dimension_numbers<[1], [1], [0], [0], [0, 0, 1, 0], [], []>} : vector<40x64xf32>, vector<32x64xf32>, vector<40x32xf32> -> vector<40x32xf32>
    %354 = vector.broadcast %277 : vector<1x32xf32> to vector<40x32xf32>
    %355 = arith.addf %353, %354 : vector<40x32xf32>
    %356 = arith.addf %304, %355 : vector<40x32xf32>
    %cst_241 = arith.constant dense<0.000000e+00> : vector<32xf32>
    %357 = vector.multi_reduction <add>, %356, %cst_241 [0] : vector<40x32xf32> to vector<32xf32>
    %358 = vector.shape_cast %357 : vector<32xf32> to vector<1x32xf32>
    %cst_242 = arith.constant 4.000000e+01 : f32
    %359 = vector.broadcast %cst_242 : f32 to vector<1x32xf32>
    %360 = arith.divf %358, %359 : vector<1x32xf32>
    %361 = vector.broadcast %360 : vector<1x32xf32> to vector<40x32xf32>
    %362 = arith.subf %356, %361 : vector<40x32xf32>
    %363 = arith.mulf %362, %362 : vector<40x32xf32>
    %cst_243 = arith.constant dense<0.000000e+00> : vector<32xf32>
    %364 = vector.multi_reduction <add>, %363, %cst_243 [0] : vector<40x32xf32> to vector<32xf32>
    %365 = vector.shape_cast %364 : vector<32xf32> to vector<1x32xf32>
    %cst_244 = arith.constant 4.000000e+01 : f32
    %366 = vector.broadcast %cst_244 : f32 to vector<1x32xf32>
    %367 = arith.divf %365, %366 : vector<1x32xf32>
    %cst_245 = arith.constant 9.99999974E-6 : f32
    %368 = vector.broadcast %cst_245 : f32 to vector<1x32xf32>
    %369 = arith.addf %367, %368 : vector<1x32xf32>
    %370 = math.rsqrt %369 : vector<1x32xf32>
    %371 = vector.broadcast %370 : vector<1x32xf32> to vector<40x32xf32>
    %372 = arith.mulf %362, %371 : vector<40x32xf32>
    %373 = vector.broadcast %280 : vector<1x32xf32> to vector<40x32xf32>
    %374 = arith.mulf %372, %373 : vector<40x32xf32>
    %375 = vector.broadcast %281 : vector<1x32xf32> to vector<40x32xf32>
    %376 = arith.addf %374, %375 : vector<40x32xf32>
    %c0_246 = arith.constant 0 : index
    %c0_247 = arith.constant 0 : index
    %c0_248 = arith.constant 0 : index
    %377 = vector.load %arg7[%c0_246, %c0_247, %c0_248] : memref<2x40x32xf32, #tpu.memory_space<vmem>>, vector<1x40x32xf32>
    %378 = vector.shape_cast %377 : vector<1x40x32xf32> to vector<40x32xf32>
    %379 = vector.shape_cast %376 : vector<40x32xf32> to vector<1x40x32xf32>
    tpu.vector_store %arg7[%c0_246, %c0_247, %c0_248], %379 {strides = array<i32>} : memref<2x40x32xf32, #tpu.memory_space<vmem>>, vector<1x40x32xf32>,
    %c1_249 = arith.constant 1 : index
    %c0_250 = arith.constant 0 : index
    %c0_251 = arith.constant 0 : index
    %c0_252 = arith.constant 0 : index
    %380 = vector.load %arg3[%c1_249, %c0_250, %c0_251, %c0_252] : memref<2x4x32x32xf32, #tpu.memory_space<vmem>>, vector<1x1x32x32xf32>
    %381 = vector.shape_cast %380 : vector<1x1x32x32xf32> to vector<32x32xf32>
    %c1_253 = arith.constant 1 : index
    %c1_254 = arith.constant 1 : index
    %c0_255 = arith.constant 0 : index
    %c0_256 = arith.constant 0 : index
    %382 = vector.load %arg3[%c1_253, %c1_254, %c0_255, %c0_256] : memref<2x4x32x32xf32, #tpu.memory_space<vmem>>, vector<1x1x32x32xf32>
    %383 = vector.shape_cast %382 : vector<1x1x32x32xf32> to vector<32x32xf32>
    %c1_257 = arith.constant 1 : index
    %c2_258 = arith.constant 2 : index
    %c0_259 = arith.constant 0 : index
    %c0_260 = arith.constant 0 : index
    %384 = vector.load %arg3[%c1_257, %c2_258, %c0_259, %c0_260] : memref<2x4x32x32xf32, #tpu.memory_space<vmem>>, vector<1x1x32x32xf32>
    %385 = vector.shape_cast %384 : vector<1x1x32x32xf32> to vector<32x32xf32>
    %c1_261 = arith.constant 1 : index
    %c3_262 = arith.constant 3 : index
    %c0_263 = arith.constant 0 : index
    %c0_264 = arith.constant 0 : index
    %386 = vector.load %arg3[%c1_261, %c3_262, %c0_263, %c0_264] : memref<2x4x32x32xf32, #tpu.memory_space<vmem>>, vector<1x1x32x32xf32>
    %387 = vector.shape_cast %386 : vector<1x1x32x32xf32> to vector<32x32xf32>
    %388 = vector.extract_strided_slice %381 {offsets = [0, 0], sizes = [8, 32], strides = [1, 1]} : vector<32x32xf32> to vector<8x32xf32>
    %cst_265 = arith.constant dense<0.000000e+00> : vector<40x8xf32>
    %389 = tpu.matmul %376, %388, %cst_265 {dimension_numbers = #tpu.dot_dimension_numbers<[1], [1], [0], [0], [0, 0, 1, 0], [], []>} : vector<40x32xf32>, vector<8x32xf32>, vector<40x8xf32> -> vector<40x8xf32>
    %c1_266 = arith.constant 1 : index
    %c0_267 = arith.constant 0 : index
    %c0_268 = arith.constant 0 : index
    %c0_269 = arith.constant 0 : index
    %390 = vector.load %arg4[%c1_266, %c0_267, %c0_268, %c0_269] : memref<2x12x1x8xf32, #tpu.memory_space<vmem>>, vector<1x1x1x8xf32>
    %391 = vector.shape_cast %390 : vector<1x1x1x8xf32> to vector<1x8xf32>
    %392 = vector.broadcast %391 : vector<1x8xf32> to vector<40x8xf32>
    %393 = arith.addf %389, %392 : vector<40x8xf32>
    %394 = vector.extract_strided_slice %383 {offsets = [0, 0], sizes = [8, 32], strides = [1, 1]} : vector<32x32xf32> to vector<8x32xf32>
    %cst_270 = arith.constant dense<0.000000e+00> : vector<40x8xf32>
    %395 = tpu.matmul %376, %394, %cst_270 {dimension_numbers = #tpu.dot_dimension_numbers<[1], [1], [0], [0], [0, 0, 1, 0], [], []>} : vector<40x32xf32>, vector<8x32xf32>, vector<40x8xf32> -> vector<40x8xf32>
    %c1_271 = arith.constant 1 : index
    %c4_272 = arith.constant 4 : index
    %c0_273 = arith.constant 0 : index
    %c0_274 = arith.constant 0 : index
    %396 = vector.load %arg4[%c1_271, %c4_272, %c0_273, %c0_274] : memref<2x12x1x8xf32, #tpu.memory_space<vmem>>, vector<1x1x1x8xf32>
    %397 = vector.shape_cast %396 : vector<1x1x1x8xf32> to vector<1x8xf32>
    %398 = vector.broadcast %397 : vector<1x8xf32> to vector<40x8xf32>
    %399 = arith.addf %395, %398 : vector<40x8xf32>
    %400 = vector.extract_strided_slice %385 {offsets = [0, 0], sizes = [8, 32], strides = [1, 1]} : vector<32x32xf32> to vector<8x32xf32>
    %cst_275 = arith.constant dense<0.000000e+00> : vector<40x8xf32>
    %401 = tpu.matmul %376, %400, %cst_275 {dimension_numbers = #tpu.dot_dimension_numbers<[1], [1], [0], [0], [0, 0, 1, 0], [], []>} : vector<40x32xf32>, vector<8x32xf32>, vector<40x8xf32> -> vector<40x8xf32>
    %c1_276 = arith.constant 1 : index
    %c8_277 = arith.constant 8 : index
    %c0_278 = arith.constant 0 : index
    %c0_279 = arith.constant 0 : index
    %402 = vector.load %arg4[%c1_276, %c8_277, %c0_278, %c0_279] : memref<2x12x1x8xf32, #tpu.memory_space<vmem>>, vector<1x1x1x8xf32>
    %403 = vector.shape_cast %402 : vector<1x1x1x8xf32> to vector<1x8xf32>
    %404 = vector.broadcast %403 : vector<1x8xf32> to vector<40x8xf32>
    %405 = arith.addf %401, %404 : vector<40x8xf32>
    %cst_280 = arith.constant dense<0.000000e+00> : vector<40x40xf32>
    %406 = tpu.matmul %393, %399, %cst_280 {dimension_numbers = #tpu.dot_dimension_numbers<[1], [1], [0], [0], [0, 0, 1, 0], [], []>} : vector<40x8xf32>, vector<40x8xf32>, vector<40x40xf32> -> vector<40x40xf32>
    %cst_281 = arith.constant 0.353553385 : f32
    %407 = vector.broadcast %cst_281 : f32 to vector<40x40xf32>
    %408 = arith.mulf %406, %407 : vector<40x40xf32>
    %409 = arith.addf %408, %39 : vector<40x40xf32>
    %cst_282 = arith.constant -1.000000e+30 : f32
    %410 = vector.broadcast %cst_282 : f32 to vector<40x40xf32>
    %411 = arith.select %10, %409, %410 : vector<40x40xi1>, vector<40x40xf32>
    %c0_283 = arith.constant 0 : index
    %c0_284 = arith.constant 0 : index
    %412 = vector.load %arg9[%c0_283, %c0_284] : memref<160x40xf32, #tpu.memory_space<vmem>>, vector<40x40xf32>
    tpu.vector_store %arg9[%c0_283, %c0_284], %411 {strides = array<i32>} : memref<160x40xf32, #tpu.memory_space<vmem>>, vector<40x40xf32>,
    %413 = vector.extract_strided_slice %381 {offsets = [8, 0], sizes = [8, 32], strides = [1, 1]} : vector<32x32xf32> to vector<8x32xf32>
    %cst_285 = arith.constant dense<0.000000e+00> : vector<40x8xf32>
    %414 = tpu.matmul %376, %413, %cst_285 {dimension_numbers = #tpu.dot_dimension_numbers<[1], [1], [0], [0], [0, 0, 1, 0], [], []>} : vector<40x32xf32>, vector<8x32xf32>, vector<40x8xf32> -> vector<40x8xf32>
    %c1_286 = arith.constant 1 : index
    %c1_287 = arith.constant 1 : index
    %c0_288 = arith.constant 0 : index
    %c0_289 = arith.constant 0 : index
    %415 = vector.load %arg4[%c1_286, %c1_287, %c0_288, %c0_289] : memref<2x12x1x8xf32, #tpu.memory_space<vmem>>, vector<1x1x1x8xf32>
    %416 = vector.shape_cast %415 : vector<1x1x1x8xf32> to vector<1x8xf32>
    %417 = vector.broadcast %416 : vector<1x8xf32> to vector<40x8xf32>
    %418 = arith.addf %414, %417 : vector<40x8xf32>
    %419 = vector.extract_strided_slice %383 {offsets = [8, 0], sizes = [8, 32], strides = [1, 1]} : vector<32x32xf32> to vector<8x32xf32>
    %cst_290 = arith.constant dense<0.000000e+00> : vector<40x8xf32>
    %420 = tpu.matmul %376, %419, %cst_290 {dimension_numbers = #tpu.dot_dimension_numbers<[1], [1], [0], [0], [0, 0, 1, 0], [], []>} : vector<40x32xf32>, vector<8x32xf32>, vector<40x8xf32> -> vector<40x8xf32>
    %c1_291 = arith.constant 1 : index
    %c5_292 = arith.constant 5 : index
    %c0_293 = arith.constant 0 : index
    %c0_294 = arith.constant 0 : index
    %421 = vector.load %arg4[%c1_291, %c5_292, %c0_293, %c0_294] : memref<2x12x1x8xf32, #tpu.memory_space<vmem>>, vector<1x1x1x8xf32>
    %422 = vector.shape_cast %421 : vector<1x1x1x8xf32> to vector<1x8xf32>
    %423 = vector.broadcast %422 : vector<1x8xf32> to vector<40x8xf32>
    %424 = arith.addf %420, %423 : vector<40x8xf32>
    %425 = vector.extract_strided_slice %385 {offsets = [8, 0], sizes = [8, 32], strides = [1, 1]} : vector<32x32xf32> to vector<8x32xf32>
    %cst_295 = arith.constant dense<0.000000e+00> : vector<40x8xf32>
    %426 = tpu.matmul %376, %425, %cst_295 {dimension_numbers = #tpu.dot_dimension_numbers<[1], [1], [0], [0], [0, 0, 1, 0], [], []>} : vector<40x32xf32>, vector<8x32xf32>, vector<40x8xf32> -> vector<40x8xf32>
    %c1_296 = arith.constant 1 : index
    %c9_297 = arith.constant 9 : index
    %c0_298 = arith.constant 0 : index
    %c0_299 = arith.constant 0 : index
    %427 = vector.load %arg4[%c1_296, %c9_297, %c0_298, %c0_299] : memref<2x12x1x8xf32, #tpu.memory_space<vmem>>, vector<1x1x1x8xf32>
    %428 = vector.shape_cast %427 : vector<1x1x1x8xf32> to vector<1x8xf32>
    %429 = vector.broadcast %428 : vector<1x8xf32> to vector<40x8xf32>
    %430 = arith.addf %426, %429 : vector<40x8xf32>
    %cst_300 = arith.constant dense<0.000000e+00> : vector<40x40xf32>
    %431 = tpu.matmul %418, %424, %cst_300 {dimension_numbers = #tpu.dot_dimension_numbers<[1], [1], [0], [0], [0, 0, 1, 0], [], []>} : vector<40x8xf32>, vector<40x8xf32>, vector<40x40xf32> -> vector<40x40xf32>
    %cst_301 = arith.constant 0.353553385 : f32
    %432 = vector.broadcast %cst_301 : f32 to vector<40x40xf32>
    %433 = arith.mulf %431, %432 : vector<40x40xf32>
    %434 = arith.addf %433, %63 : vector<40x40xf32>
    %cst_302 = arith.constant -1.000000e+30 : f32
    %435 = vector.broadcast %cst_302 : f32 to vector<40x40xf32>
    %436 = arith.select %10, %434, %435 : vector<40x40xi1>, vector<40x40xf32>
    %c40_303 = arith.constant 40 : index
    %c0_304 = arith.constant 0 : index
    %437 = vector.load %arg9[%c40_303, %c0_304] : memref<160x40xf32, #tpu.memory_space<vmem>>, vector<40x40xf32>
    tpu.vector_store %arg9[%c40_303, %c0_304], %436 {strides = array<i32>} : memref<160x40xf32, #tpu.memory_space<vmem>>, vector<40x40xf32>,
    %438 = vector.extract_strided_slice %381 {offsets = [16, 0], sizes = [8, 32], strides = [1, 1]} : vector<32x32xf32> to vector<8x32xf32>
    %cst_305 = arith.constant dense<0.000000e+00> : vector<40x8xf32>
    %439 = tpu.matmul %376, %438, %cst_305 {dimension_numbers = #tpu.dot_dimension_numbers<[1], [1], [0], [0], [0, 0, 1, 0], [], []>} : vector<40x32xf32>, vector<8x32xf32>, vector<40x8xf32> -> vector<40x8xf32>
    %c1_306 = arith.constant 1 : index
    %c2_307 = arith.constant 2 : index
    %c0_308 = arith.constant 0 : index
    %c0_309 = arith.constant 0 : index
    %440 = vector.load %arg4[%c1_306, %c2_307, %c0_308, %c0_309] : memref<2x12x1x8xf32, #tpu.memory_space<vmem>>, vector<1x1x1x8xf32>
    %441 = vector.shape_cast %440 : vector<1x1x1x8xf32> to vector<1x8xf32>
    %442 = vector.broadcast %441 : vector<1x8xf32> to vector<40x8xf32>
    %443 = arith.addf %439, %442 : vector<40x8xf32>
    %444 = vector.extract_strided_slice %383 {offsets = [16, 0], sizes = [8, 32], strides = [1, 1]} : vector<32x32xf32> to vector<8x32xf32>
    %cst_310 = arith.constant dense<0.000000e+00> : vector<40x8xf32>
    %445 = tpu.matmul %376, %444, %cst_310 {dimension_numbers = #tpu.dot_dimension_numbers<[1], [1], [0], [0], [0, 0, 1, 0], [], []>} : vector<40x32xf32>, vector<8x32xf32>, vector<40x8xf32> -> vector<40x8xf32>
    %c1_311 = arith.constant 1 : index
    %c6_312 = arith.constant 6 : index
    %c0_313 = arith.constant 0 : index
    %c0_314 = arith.constant 0 : index
    %446 = vector.load %arg4[%c1_311, %c6_312, %c0_313, %c0_314] : memref<2x12x1x8xf32, #tpu.memory_space<vmem>>, vector<1x1x1x8xf32>
    %447 = vector.shape_cast %446 : vector<1x1x1x8xf32> to vector<1x8xf32>
    %448 = vector.broadcast %447 : vector<1x8xf32> to vector<40x8xf32>
    %449 = arith.addf %445, %448 : vector<40x8xf32>
    %450 = vector.extract_strided_slice %385 {offsets = [16, 0], sizes = [8, 32], strides = [1, 1]} : vector<32x32xf32> to vector<8x32xf32>
    %cst_315 = arith.constant dense<0.000000e+00> : vector<40x8xf32>
    %451 = tpu.matmul %376, %450, %cst_315 {dimension_numbers = #tpu.dot_dimension_numbers<[1], [1], [0], [0], [0, 0, 1, 0], [], []>} : vector<40x32xf32>, vector<8x32xf32>, vector<40x8xf32> -> vector<40x8xf32>
    %c1_316 = arith.constant 1 : index
    %c10_317 = arith.constant 10 : index
    %c0_318 = arith.constant 0 : index
    %c0_319 = arith.constant 0 : index
    %452 = vector.load %arg4[%c1_316, %c10_317, %c0_318, %c0_319] : memref<2x12x1x8xf32, #tpu.memory_space<vmem>>, vector<1x1x1x8xf32>
    %453 = vector.shape_cast %452 : vector<1x1x1x8xf32> to vector<1x8xf32>
    %454 = vector.broadcast %453 : vector<1x8xf32> to vector<40x8xf32>
    %455 = arith.addf %451, %454 : vector<40x8xf32>
    %cst_320 = arith.constant dense<0.000000e+00> : vector<40x40xf32>
    %456 = tpu.matmul %443, %449, %cst_320 {dimension_numbers = #tpu.dot_dimension_numbers<[1], [1], [0], [0], [0, 0, 1, 0], [], []>} : vector<40x8xf32>, vector<40x8xf32>, vector<40x40xf32> -> vector<40x40xf32>
    %cst_321 = arith.constant 0.353553385 : f32
    %457 = vector.broadcast %cst_321 : f32 to vector<40x40xf32>
    %458 = arith.mulf %456, %457 : vector<40x40xf32>
    %459 = arith.addf %458, %87 : vector<40x40xf32>
    %cst_322 = arith.constant -1.000000e+30 : f32
    %460 = vector.broadcast %cst_322 : f32 to vector<40x40xf32>
    %461 = arith.select %10, %459, %460 : vector<40x40xi1>, vector<40x40xf32>
    %c80_323 = arith.constant 80 : index
    %c0_324 = arith.constant 0 : index
    %462 = vector.load %arg9[%c80_323, %c0_324] : memref<160x40xf32, #tpu.memory_space<vmem>>, vector<40x40xf32>
    tpu.vector_store %arg9[%c80_323, %c0_324], %461 {strides = array<i32>} : memref<160x40xf32, #tpu.memory_space<vmem>>, vector<40x40xf32>,
    %463 = vector.extract_strided_slice %381 {offsets = [24, 0], sizes = [8, 32], strides = [1, 1]} : vector<32x32xf32> to vector<8x32xf32>
    %cst_325 = arith.constant dense<0.000000e+00> : vector<40x8xf32>
    %464 = tpu.matmul %376, %463, %cst_325 {dimension_numbers = #tpu.dot_dimension_numbers<[1], [1], [0], [0], [0, 0, 1, 0], [], []>} : vector<40x32xf32>, vector<8x32xf32>, vector<40x8xf32> -> vector<40x8xf32>
    %c1_326 = arith.constant 1 : index
    %c3_327 = arith.constant 3 : index
    %c0_328 = arith.constant 0 : index
    %c0_329 = arith.constant 0 : index
    %465 = vector.load %arg4[%c1_326, %c3_327, %c0_328, %c0_329] : memref<2x12x1x8xf32, #tpu.memory_space<vmem>>, vector<1x1x1x8xf32>
    %466 = vector.shape_cast %465 : vector<1x1x1x8xf32> to vector<1x8xf32>
    %467 = vector.broadcast %466 : vector<1x8xf32> to vector<40x8xf32>
    %468 = arith.addf %464, %467 : vector<40x8xf32>
    %469 = vector.extract_strided_slice %383 {offsets = [24, 0], sizes = [8, 32], strides = [1, 1]} : vector<32x32xf32> to vector<8x32xf32>
    %cst_330 = arith.constant dense<0.000000e+00> : vector<40x8xf32>
    %470 = tpu.matmul %376, %469, %cst_330 {dimension_numbers = #tpu.dot_dimension_numbers<[1], [1], [0], [0], [0, 0, 1, 0], [], []>} : vector<40x32xf32>, vector<8x32xf32>, vector<40x8xf32> -> vector<40x8xf32>
    %c1_331 = arith.constant 1 : index
    %c7_332 = arith.constant 7 : index
    %c0_333 = arith.constant 0 : index
    %c0_334 = arith.constant 0 : index
    %471 = vector.load %arg4[%c1_331, %c7_332, %c0_333, %c0_334] : memref<2x12x1x8xf32, #tpu.memory_space<vmem>>, vector<1x1x1x8xf32>
    %472 = vector.shape_cast %471 : vector<1x1x1x8xf32> to vector<1x8xf32>
    %473 = vector.broadcast %472 : vector<1x8xf32> to vector<40x8xf32>
    %474 = arith.addf %470, %473 : vector<40x8xf32>
    %475 = vector.extract_strided_slice %385 {offsets = [24, 0], sizes = [8, 32], strides = [1, 1]} : vector<32x32xf32> to vector<8x32xf32>
    %cst_335 = arith.constant dense<0.000000e+00> : vector<40x8xf32>
    %476 = tpu.matmul %376, %475, %cst_335 {dimension_numbers = #tpu.dot_dimension_numbers<[1], [1], [0], [0], [0, 0, 1, 0], [], []>} : vector<40x32xf32>, vector<8x32xf32>, vector<40x8xf32> -> vector<40x8xf32>
    %c1_336 = arith.constant 1 : index
    %c11_337 = arith.constant 11 : index
    %c0_338 = arith.constant 0 : index
    %c0_339 = arith.constant 0 : index
    %477 = vector.load %arg4[%c1_336, %c11_337, %c0_338, %c0_339] : memref<2x12x1x8xf32, #tpu.memory_space<vmem>>, vector<1x1x1x8xf32>
    %478 = vector.shape_cast %477 : vector<1x1x1x8xf32> to vector<1x8xf32>
    %479 = vector.broadcast %478 : vector<1x8xf32> to vector<40x8xf32>
    %480 = arith.addf %476, %479 : vector<40x8xf32>
    %cst_340 = arith.constant dense<0.000000e+00> : vector<40x40xf32>
    %481 = tpu.matmul %468, %474, %cst_340 {dimension_numbers = #tpu.dot_dimension_numbers<[1], [1], [0], [0], [0, 0, 1, 0], [], []>} : vector<40x8xf32>, vector<40x8xf32>, vector<40x40xf32> -> vector<40x40xf32>
    %cst_341 = arith.constant 0.353553385 : f32
    %482 = vector.broadcast %cst_341 : f32 to vector<40x40xf32>
    %483 = arith.mulf %481, %482 : vector<40x40xf32>
    %484 = arith.addf %483, %111 : vector<40x40xf32>
    %cst_342 = arith.constant -1.000000e+30 : f32
    %485 = vector.broadcast %cst_342 : f32 to vector<40x40xf32>
    %486 = arith.select %10, %484, %485 : vector<40x40xi1>, vector<40x40xf32>
    %c120_343 = arith.constant 120 : index
    %c0_344 = arith.constant 0 : index
    %487 = vector.load %arg9[%c120_343, %c0_344] : memref<160x40xf32, #tpu.memory_space<vmem>>, vector<40x40xf32>
    tpu.vector_store %arg9[%c120_343, %c0_344], %486 {strides = array<i32>} : memref<160x40xf32, #tpu.memory_space<vmem>>, vector<40x40xf32>,
    %c0_345 = arith.constant 0 : index
    %c0_346 = arith.constant 0 : index
    %488 = vector.load %arg9[%c0_345, %c0_346] : memref<160x40xf32, #tpu.memory_space<vmem>>, vector<160x40xf32>
    %cst_347 = arith.constant dense<0xFF800000> : vector<160xf32>
    %489 = vector.multi_reduction <maximumf>, %488, %cst_347 [1] : vector<160x40xf32> to vector<160xf32>
    %490 = vector.shape_cast %489 : vector<160xf32> to vector<160x1xf32>
    %491 = vector.broadcast %490 : vector<160x1xf32> to vector<160x40xf32>
    %492 = arith.subf %488, %491 : vector<160x40xf32>
    %493 = math.exp %492 : vector<160x40xf32>
    %cst_348 = arith.constant dense<0.000000e+00> : vector<160xf32>
    %494 = vector.multi_reduction <add>, %493, %cst_348 [1] : vector<160x40xf32> to vector<160xf32>
    %495 = vector.shape_cast %494 : vector<160xf32> to vector<160x1xf32>
    %496 = tpu.reciprocal %495 {approx = true} : vector<160x1xf32> -> vector<160x1xf32>
    %497 = vector.broadcast %496 : vector<160x1xf32> to vector<160x40xf32>
    %498 = arith.mulf %493, %497 : vector<160x40xf32>
    %499 = vector.extract_strided_slice %498 {offsets = [0, 0], sizes = [40, 40], strides = [1, 1]} : vector<160x40xf32> to vector<40x40xf32>
    %cst_349 = arith.constant dense<0.000000e+00> : vector<40x8xf32>
    %500 = tpu.matmul %499, %405, %cst_349 {dimension_numbers = #tpu.dot_dimension_numbers<[1], [0], [0], [1], [0, 0, 1, 1], [], []>} : vector<40x40xf32>, vector<40x8xf32>, vector<40x8xf32> -> vector<40x8xf32>
    %501 = vector.extract_strided_slice %387 {offsets = [0, 0], sizes = [8, 32], strides = [1, 1]} : vector<32x32xf32> to vector<8x32xf32>
    %cst_350 = arith.constant dense<0.000000e+00> : vector<40x32xf32>
    %502 = tpu.matmul %500, %501, %cst_350 {dimension_numbers = #tpu.dot_dimension_numbers<[1], [0], [0], [1], [0, 0, 1, 1], [], []>} : vector<40x8xf32>, vector<8x32xf32>, vector<40x32xf32> -> vector<40x32xf32>
    %503 = vector.extract_strided_slice %499 {offsets = [0, 0], sizes = [5, 5], strides = [1, 1]} : vector<40x40xf32> to vector<5x5xf32>
    %c1_351 = arith.constant 1 : index
    %c0_352 = arith.constant 0 : index
    %c0_353 = arith.constant 0 : index
    %c0_354 = arith.constant 0 : index
    %504 = vector.load %arg8[%c1_351, %c0_352, %c0_353, %c0_354] : memref<2x32x5x5xf32, #tpu.memory_space<vmem>>, vector<1x1x5x5xf32>
    %505 = vector.shape_cast %504 : vector<1x1x5x5xf32> to vector<5x5xf32>
    %506 = vector.shape_cast %503 : vector<5x5xf32> to vector<1x1x5x5xf32>
    tpu.vector_store %arg8[%c1_351, %c0_352, %c0_353, %c0_354], %506 {strides = array<i32>} : memref<2x32x5x5xf32, #tpu.memory_space<vmem>>, vector<1x1x5x5xf32>,
    %507 = vector.extract_strided_slice %499 {offsets = [5, 5], sizes = [5, 5], strides = [1, 1]} : vector<40x40xf32> to vector<5x5xf32>
    %c1_355 = arith.constant 1 : index
    %c4_356 = arith.constant 4 : index
    %c0_357 = arith.constant 0 : index
    %c0_358 = arith.constant 0 : index
    %508 = vector.load %arg8[%c1_355, %c4_356, %c0_357, %c0_358] : memref<2x32x5x5xf32, #tpu.memory_space<vmem>>, vector<1x1x5x5xf32>
    %509 = vector.shape_cast %508 : vector<1x1x5x5xf32> to vector<5x5xf32>
    %510 = vector.shape_cast %507 : vector<5x5xf32> to vector<1x1x5x5xf32>
    tpu.vector_store %arg8[%c1_355, %c4_356, %c0_357, %c0_358], %510 {strides = array<i32>} : memref<2x32x5x5xf32, #tpu.memory_space<vmem>>, vector<1x1x5x5xf32>,
    %511 = vector.extract_strided_slice %499 {offsets = [10, 10], sizes = [5, 5], strides = [1, 1]} : vector<40x40xf32> to vector<5x5xf32>
    %c1_359 = arith.constant 1 : index
    %c8_360 = arith.constant 8 : index
    %c0_361 = arith.constant 0 : index
    %c0_362 = arith.constant 0 : index
    %512 = vector.load %arg8[%c1_359, %c8_360, %c0_361, %c0_362] : memref<2x32x5x5xf32, #tpu.memory_space<vmem>>, vector<1x1x5x5xf32>
    %513 = vector.shape_cast %512 : vector<1x1x5x5xf32> to vector<5x5xf32>
    %514 = vector.shape_cast %511 : vector<5x5xf32> to vector<1x1x5x5xf32>
    tpu.vector_store %arg8[%c1_359, %c8_360, %c0_361, %c0_362], %514 {strides = array<i32>} : memref<2x32x5x5xf32, #tpu.memory_space<vmem>>, vector<1x1x5x5xf32>,
    %515 = vector.extract_strided_slice %499 {offsets = [15, 15], sizes = [5, 5], strides = [1, 1]} : vector<40x40xf32> to vector<5x5xf32>
    %c1_363 = arith.constant 1 : index
    %c12_364 = arith.constant 12 : index
    %c0_365 = arith.constant 0 : index
    %c0_366 = arith.constant 0 : index
    %516 = vector.load %arg8[%c1_363, %c12_364, %c0_365, %c0_366] : memref<2x32x5x5xf32, #tpu.memory_space<vmem>>, vector<1x1x5x5xf32>
    %517 = vector.shape_cast %516 : vector<1x1x5x5xf32> to vector<5x5xf32>
    %518 = vector.shape_cast %515 : vector<5x5xf32> to vector<1x1x5x5xf32>
    tpu.vector_store %arg8[%c1_363, %c12_364, %c0_365, %c0_366], %518 {strides = array<i32>} : memref<2x32x5x5xf32, #tpu.memory_space<vmem>>, vector<1x1x5x5xf32>,
    %519 = vector.extract_strided_slice %499 {offsets = [20, 20], sizes = [5, 5], strides = [1, 1]} : vector<40x40xf32> to vector<5x5xf32>
    %c1_367 = arith.constant 1 : index
    %c16_368 = arith.constant 16 : index
    %c0_369 = arith.constant 0 : index
    %c0_370 = arith.constant 0 : index
    %520 = vector.load %arg8[%c1_367, %c16_368, %c0_369, %c0_370] : memref<2x32x5x5xf32, #tpu.memory_space<vmem>>, vector<1x1x5x5xf32>
    %521 = vector.shape_cast %520 : vector<1x1x5x5xf32> to vector<5x5xf32>
    %522 = vector.shape_cast %519 : vector<5x5xf32> to vector<1x1x5x5xf32>
    tpu.vector_store %arg8[%c1_367, %c16_368, %c0_369, %c0_370], %522 {strides = array<i32>} : memref<2x32x5x5xf32, #tpu.memory_space<vmem>>, vector<1x1x5x5xf32>,
    %523 = vector.extract_strided_slice %499 {offsets = [25, 25], sizes = [5, 5], strides = [1, 1]} : vector<40x40xf32> to vector<5x5xf32>
    %c1_371 = arith.constant 1 : index
    %c20_372 = arith.constant 20 : index
    %c0_373 = arith.constant 0 : index
    %c0_374 = arith.constant 0 : index
    %524 = vector.load %arg8[%c1_371, %c20_372, %c0_373, %c0_374] : memref<2x32x5x5xf32, #tpu.memory_space<vmem>>, vector<1x1x5x5xf32>
    %525 = vector.shape_cast %524 : vector<1x1x5x5xf32> to vector<5x5xf32>
    %526 = vector.shape_cast %523 : vector<5x5xf32> to vector<1x1x5x5xf32>
    tpu.vector_store %arg8[%c1_371, %c20_372, %c0_373, %c0_374], %526 {strides = array<i32>} : memref<2x32x5x5xf32, #tpu.memory_space<vmem>>, vector<1x1x5x5xf32>,
    %527 = vector.extract_strided_slice %499 {offsets = [30, 30], sizes = [5, 5], strides = [1, 1]} : vector<40x40xf32> to vector<5x5xf32>
    %c1_375 = arith.constant 1 : index
    %c24_376 = arith.constant 24 : index
    %c0_377 = arith.constant 0 : index
    %c0_378 = arith.constant 0 : index
    %528 = vector.load %arg8[%c1_375, %c24_376, %c0_377, %c0_378] : memref<2x32x5x5xf32, #tpu.memory_space<vmem>>, vector<1x1x5x5xf32>
    %529 = vector.shape_cast %528 : vector<1x1x5x5xf32> to vector<5x5xf32>
    %530 = vector.shape_cast %527 : vector<5x5xf32> to vector<1x1x5x5xf32>
    tpu.vector_store %arg8[%c1_375, %c24_376, %c0_377, %c0_378], %530 {strides = array<i32>} : memref<2x32x5x5xf32, #tpu.memory_space<vmem>>, vector<1x1x5x5xf32>,
    %531 = vector.extract_strided_slice %499 {offsets = [35, 35], sizes = [5, 5], strides = [1, 1]} : vector<40x40xf32> to vector<5x5xf32>
    %c1_379 = arith.constant 1 : index
    %c28_380 = arith.constant 28 : index
    %c0_381 = arith.constant 0 : index
    %c0_382 = arith.constant 0 : index
    %532 = vector.load %arg8[%c1_379, %c28_380, %c0_381, %c0_382] : memref<2x32x5x5xf32, #tpu.memory_space<vmem>>, vector<1x1x5x5xf32>
    %533 = vector.shape_cast %532 : vector<1x1x5x5xf32> to vector<5x5xf32>
    %534 = vector.shape_cast %531 : vector<5x5xf32> to vector<1x1x5x5xf32>
    tpu.vector_store %arg8[%c1_379, %c28_380, %c0_381, %c0_382], %534 {strides = array<i32>} : memref<2x32x5x5xf32, #tpu.memory_space<vmem>>, vector<1x1x5x5xf32>,
    %535 = vector.extract_strided_slice %498 {offsets = [40, 0], sizes = [40, 40], strides = [1, 1]} : vector<160x40xf32> to vector<40x40xf32>
    %cst_383 = arith.constant dense<0.000000e+00> : vector<40x8xf32>
    %536 = tpu.matmul %535, %430, %cst_383 {dimension_numbers = #tpu.dot_dimension_numbers<[1], [0], [0], [1], [0, 0, 1, 1], [], []>} : vector<40x40xf32>, vector<40x8xf32>, vector<40x8xf32> -> vector<40x8xf32>
    %537 = vector.extract_strided_slice %387 {offsets = [8, 0], sizes = [8, 32], strides = [1, 1]} : vector<32x32xf32> to vector<8x32xf32>
    %cst_384 = arith.constant dense<0.000000e+00> : vector<40x32xf32>
    %538 = tpu.matmul %536, %537, %cst_384 {dimension_numbers = #tpu.dot_dimension_numbers<[1], [0], [0], [1], [0, 0, 1, 1], [], []>} : vector<40x8xf32>, vector<8x32xf32>, vector<40x32xf32> -> vector<40x32xf32>
    %539 = arith.addf %502, %538 : vector<40x32xf32>
    %540 = vector.extract_strided_slice %535 {offsets = [0, 0], sizes = [5, 5], strides = [1, 1]} : vector<40x40xf32> to vector<5x5xf32>
    %c1_385 = arith.constant 1 : index
    %c1_386 = arith.constant 1 : index
    %c0_387 = arith.constant 0 : index
    %c0_388 = arith.constant 0 : index
    %541 = vector.load %arg8[%c1_385, %c1_386, %c0_387, %c0_388] : memref<2x32x5x5xf32, #tpu.memory_space<vmem>>, vector<1x1x5x5xf32>
    %542 = vector.shape_cast %541 : vector<1x1x5x5xf32> to vector<5x5xf32>
    %543 = vector.shape_cast %540 : vector<5x5xf32> to vector<1x1x5x5xf32>
    tpu.vector_store %arg8[%c1_385, %c1_386, %c0_387, %c0_388], %543 {strides = array<i32>} : memref<2x32x5x5xf32, #tpu.memory_space<vmem>>, vector<1x1x5x5xf32>,
    %544 = vector.extract_strided_slice %535 {offsets = [5, 5], sizes = [5, 5], strides = [1, 1]} : vector<40x40xf32> to vector<5x5xf32>
    %c1_389 = arith.constant 1 : index
    %c5_390 = arith.constant 5 : index
    %c0_391 = arith.constant 0 : index
    %c0_392 = arith.constant 0 : index
    %545 = vector.load %arg8[%c1_389, %c5_390, %c0_391, %c0_392] : memref<2x32x5x5xf32, #tpu.memory_space<vmem>>, vector<1x1x5x5xf32>
    %546 = vector.shape_cast %545 : vector<1x1x5x5xf32> to vector<5x5xf32>
    %547 = vector.shape_cast %544 : vector<5x5xf32> to vector<1x1x5x5xf32>
    tpu.vector_store %arg8[%c1_389, %c5_390, %c0_391, %c0_392], %547 {strides = array<i32>} : memref<2x32x5x5xf32, #tpu.memory_space<vmem>>, vector<1x1x5x5xf32>,
    %548 = vector.extract_strided_slice %535 {offsets = [10, 10], sizes = [5, 5], strides = [1, 1]} : vector<40x40xf32> to vector<5x5xf32>
    %c1_393 = arith.constant 1 : index
    %c9_394 = arith.constant 9 : index
    %c0_395 = arith.constant 0 : index
    %c0_396 = arith.constant 0 : index
    %549 = vector.load %arg8[%c1_393, %c9_394, %c0_395, %c0_396] : memref<2x32x5x5xf32, #tpu.memory_space<vmem>>, vector<1x1x5x5xf32>
    %550 = vector.shape_cast %549 : vector<1x1x5x5xf32> to vector<5x5xf32>
    %551 = vector.shape_cast %548 : vector<5x5xf32> to vector<1x1x5x5xf32>
    tpu.vector_store %arg8[%c1_393, %c9_394, %c0_395, %c0_396], %551 {strides = array<i32>} : memref<2x32x5x5xf32, #tpu.memory_space<vmem>>, vector<1x1x5x5xf32>,
    %552 = vector.extract_strided_slice %535 {offsets = [15, 15], sizes = [5, 5], strides = [1, 1]} : vector<40x40xf32> to vector<5x5xf32>
    %c1_397 = arith.constant 1 : index
    %c13_398 = arith.constant 13 : index
    %c0_399 = arith.constant 0 : index
    %c0_400 = arith.constant 0 : index
    %553 = vector.load %arg8[%c1_397, %c13_398, %c0_399, %c0_400] : memref<2x32x5x5xf32, #tpu.memory_space<vmem>>, vector<1x1x5x5xf32>
    %554 = vector.shape_cast %553 : vector<1x1x5x5xf32> to vector<5x5xf32>
    %555 = vector.shape_cast %552 : vector<5x5xf32> to vector<1x1x5x5xf32>
    tpu.vector_store %arg8[%c1_397, %c13_398, %c0_399, %c0_400], %555 {strides = array<i32>} : memref<2x32x5x5xf32, #tpu.memory_space<vmem>>, vector<1x1x5x5xf32>,
    %556 = vector.extract_strided_slice %535 {offsets = [20, 20], sizes = [5, 5], strides = [1, 1]} : vector<40x40xf32> to vector<5x5xf32>
    %c1_401 = arith.constant 1 : index
    %c17_402 = arith.constant 17 : index
    %c0_403 = arith.constant 0 : index
    %c0_404 = arith.constant 0 : index
    %557 = vector.load %arg8[%c1_401, %c17_402, %c0_403, %c0_404] : memref<2x32x5x5xf32, #tpu.memory_space<vmem>>, vector<1x1x5x5xf32>
    %558 = vector.shape_cast %557 : vector<1x1x5x5xf32> to vector<5x5xf32>
    %559 = vector.shape_cast %556 : vector<5x5xf32> to vector<1x1x5x5xf32>
    tpu.vector_store %arg8[%c1_401, %c17_402, %c0_403, %c0_404], %559 {strides = array<i32>} : memref<2x32x5x5xf32, #tpu.memory_space<vmem>>, vector<1x1x5x5xf32>,
    %560 = vector.extract_strided_slice %535 {offsets = [25, 25], sizes = [5, 5], strides = [1, 1]} : vector<40x40xf32> to vector<5x5xf32>
    %c1_405 = arith.constant 1 : index
    %c21_406 = arith.constant 21 : index
    %c0_407 = arith.constant 0 : index
    %c0_408 = arith.constant 0 : index
    %561 = vector.load %arg8[%c1_405, %c21_406, %c0_407, %c0_408] : memref<2x32x5x5xf32, #tpu.memory_space<vmem>>, vector<1x1x5x5xf32>
    %562 = vector.shape_cast %561 : vector<1x1x5x5xf32> to vector<5x5xf32>
    %563 = vector.shape_cast %560 : vector<5x5xf32> to vector<1x1x5x5xf32>
    tpu.vector_store %arg8[%c1_405, %c21_406, %c0_407, %c0_408], %563 {strides = array<i32>} : memref<2x32x5x5xf32, #tpu.memory_space<vmem>>, vector<1x1x5x5xf32>,
    %564 = vector.extract_strided_slice %535 {offsets = [30, 30], sizes = [5, 5], strides = [1, 1]} : vector<40x40xf32> to vector<5x5xf32>
    %c1_409 = arith.constant 1 : index
    %c25_410 = arith.constant 25 : index
    %c0_411 = arith.constant 0 : index
    %c0_412 = arith.constant 0 : index
    %565 = vector.load %arg8[%c1_409, %c25_410, %c0_411, %c0_412] : memref<2x32x5x5xf32, #tpu.memory_space<vmem>>, vector<1x1x5x5xf32>
    %566 = vector.shape_cast %565 : vector<1x1x5x5xf32> to vector<5x5xf32>
    %567 = vector.shape_cast %564 : vector<5x5xf32> to vector<1x1x5x5xf32>
    tpu.vector_store %arg8[%c1_409, %c25_410, %c0_411, %c0_412], %567 {strides = array<i32>} : memref<2x32x5x5xf32, #tpu.memory_space<vmem>>, vector<1x1x5x5xf32>,
    %568 = vector.extract_strided_slice %535 {offsets = [35, 35], sizes = [5, 5], strides = [1, 1]} : vector<40x40xf32> to vector<5x5xf32>
    %c1_413 = arith.constant 1 : index
    %c29_414 = arith.constant 29 : index
    %c0_415 = arith.constant 0 : index
    %c0_416 = arith.constant 0 : index
    %569 = vector.load %arg8[%c1_413, %c29_414, %c0_415, %c0_416] : memref<2x32x5x5xf32, #tpu.memory_space<vmem>>, vector<1x1x5x5xf32>
    %570 = vector.shape_cast %569 : vector<1x1x5x5xf32> to vector<5x5xf32>
    %571 = vector.shape_cast %568 : vector<5x5xf32> to vector<1x1x5x5xf32>
    tpu.vector_store %arg8[%c1_413, %c29_414, %c0_415, %c0_416], %571 {strides = array<i32>} : memref<2x32x5x5xf32, #tpu.memory_space<vmem>>, vector<1x1x5x5xf32>,
    %572 = vector.extract_strided_slice %498 {offsets = [80, 0], sizes = [40, 40], strides = [1, 1]} : vector<160x40xf32> to vector<40x40xf32>
    %cst_417 = arith.constant dense<0.000000e+00> : vector<40x8xf32>
    %573 = tpu.matmul %572, %455, %cst_417 {dimension_numbers = #tpu.dot_dimension_numbers<[1], [0], [0], [1], [0, 0, 1, 1], [], []>} : vector<40x40xf32>, vector<40x8xf32>, vector<40x8xf32> -> vector<40x8xf32>
    %574 = vector.extract_strided_slice %387 {offsets = [16, 0], sizes = [8, 32], strides = [1, 1]} : vector<32x32xf32> to vector<8x32xf32>
    %cst_418 = arith.constant dense<0.000000e+00> : vector<40x32xf32>
    %575 = tpu.matmul %573, %574, %cst_418 {dimension_numbers = #tpu.dot_dimension_numbers<[1], [0], [0], [1], [0, 0, 1, 1], [], []>} : vector<40x8xf32>, vector<8x32xf32>, vector<40x32xf32> -> vector<40x32xf32>
    %576 = arith.addf %539, %575 : vector<40x32xf32>
    %577 = vector.extract_strided_slice %572 {offsets = [0, 0], sizes = [5, 5], strides = [1, 1]} : vector<40x40xf32> to vector<5x5xf32>
    %c1_419 = arith.constant 1 : index
    %c2_420 = arith.constant 2 : index
    %c0_421 = arith.constant 0 : index
    %c0_422 = arith.constant 0 : index
    %578 = vector.load %arg8[%c1_419, %c2_420, %c0_421, %c0_422] : memref<2x32x5x5xf32, #tpu.memory_space<vmem>>, vector<1x1x5x5xf32>
    %579 = vector.shape_cast %578 : vector<1x1x5x5xf32> to vector<5x5xf32>
    %580 = vector.shape_cast %577 : vector<5x5xf32> to vector<1x1x5x5xf32>
    tpu.vector_store %arg8[%c1_419, %c2_420, %c0_421, %c0_422], %580 {strides = array<i32>} : memref<2x32x5x5xf32, #tpu.memory_space<vmem>>, vector<1x1x5x5xf32>,
    %581 = vector.extract_strided_slice %572 {offsets = [5, 5], sizes = [5, 5], strides = [1, 1]} : vector<40x40xf32> to vector<5x5xf32>
    %c1_423 = arith.constant 1 : index
    %c6_424 = arith.constant 6 : index
    %c0_425 = arith.constant 0 : index
    %c0_426 = arith.constant 0 : index
    %582 = vector.load %arg8[%c1_423, %c6_424, %c0_425, %c0_426] : memref<2x32x5x5xf32, #tpu.memory_space<vmem>>, vector<1x1x5x5xf32>
    %583 = vector.shape_cast %582 : vector<1x1x5x5xf32> to vector<5x5xf32>
    %584 = vector.shape_cast %581 : vector<5x5xf32> to vector<1x1x5x5xf32>
    tpu.vector_store %arg8[%c1_423, %c6_424, %c0_425, %c0_426], %584 {strides = array<i32>} : memref<2x32x5x5xf32, #tpu.memory_space<vmem>>, vector<1x1x5x5xf32>,
    %585 = vector.extract_strided_slice %572 {offsets = [10, 10], sizes = [5, 5], strides = [1, 1]} : vector<40x40xf32> to vector<5x5xf32>
    %c1_427 = arith.constant 1 : index
    %c10_428 = arith.constant 10 : index
    %c0_429 = arith.constant 0 : index
    %c0_430 = arith.constant 0 : index
    %586 = vector.load %arg8[%c1_427, %c10_428, %c0_429, %c0_430] : memref<2x32x5x5xf32, #tpu.memory_space<vmem>>, vector<1x1x5x5xf32>
    %587 = vector.shape_cast %586 : vector<1x1x5x5xf32> to vector<5x5xf32>
    %588 = vector.shape_cast %585 : vector<5x5xf32> to vector<1x1x5x5xf32>
    tpu.vector_store %arg8[%c1_427, %c10_428, %c0_429, %c0_430], %588 {strides = array<i32>} : memref<2x32x5x5xf32, #tpu.memory_space<vmem>>, vector<1x1x5x5xf32>,
    %589 = vector.extract_strided_slice %572 {offsets = [15, 15], sizes = [5, 5], strides = [1, 1]} : vector<40x40xf32> to vector<5x5xf32>
    %c1_431 = arith.constant 1 : index
    %c14_432 = arith.constant 14 : index
    %c0_433 = arith.constant 0 : index
    %c0_434 = arith.constant 0 : index
    %590 = vector.load %arg8[%c1_431, %c14_432, %c0_433, %c0_434] : memref<2x32x5x5xf32, #tpu.memory_space<vmem>>, vector<1x1x5x5xf32>
    %591 = vector.shape_cast %590 : vector<1x1x5x5xf32> to vector<5x5xf32>
    %592 = vector.shape_cast %589 : vector<5x5xf32> to vector<1x1x5x5xf32>
    tpu.vector_store %arg8[%c1_431, %c14_432, %c0_433, %c0_434], %592 {strides = array<i32>} : memref<2x32x5x5xf32, #tpu.memory_space<vmem>>, vector<1x1x5x5xf32>,
    %593 = vector.extract_strided_slice %572 {offsets = [20, 20], sizes = [5, 5], strides = [1, 1]} : vector<40x40xf32> to vector<5x5xf32>
    %c1_435 = arith.constant 1 : index
    %c18_436 = arith.constant 18 : index
    %c0_437 = arith.constant 0 : index
    %c0_438 = arith.constant 0 : index
    %594 = vector.load %arg8[%c1_435, %c18_436, %c0_437, %c0_438] : memref<2x32x5x5xf32, #tpu.memory_space<vmem>>, vector<1x1x5x5xf32>
    %595 = vector.shape_cast %594 : vector<1x1x5x5xf32> to vector<5x5xf32>
    %596 = vector.shape_cast %593 : vector<5x5xf32> to vector<1x1x5x5xf32>
    tpu.vector_store %arg8[%c1_435, %c18_436, %c0_437, %c0_438], %596 {strides = array<i32>} : memref<2x32x5x5xf32, #tpu.memory_space<vmem>>, vector<1x1x5x5xf32>,
    %597 = vector.extract_strided_slice %572 {offsets = [25, 25], sizes = [5, 5], strides = [1, 1]} : vector<40x40xf32> to vector<5x5xf32>
    %c1_439 = arith.constant 1 : index
    %c22_440 = arith.constant 22 : index
    %c0_441 = arith.constant 0 : index
    %c0_442 = arith.constant 0 : index
    %598 = vector.load %arg8[%c1_439, %c22_440, %c0_441, %c0_442] : memref<2x32x5x5xf32, #tpu.memory_space<vmem>>, vector<1x1x5x5xf32>
    %599 = vector.shape_cast %598 : vector<1x1x5x5xf32> to vector<5x5xf32>
    %600 = vector.shape_cast %597 : vector<5x5xf32> to vector<1x1x5x5xf32>
    tpu.vector_store %arg8[%c1_439, %c22_440, %c0_441, %c0_442], %600 {strides = array<i32>} : memref<2x32x5x5xf32, #tpu.memory_space<vmem>>, vector<1x1x5x5xf32>,
    %601 = vector.extract_strided_slice %572 {offsets = [30, 30], sizes = [5, 5], strides = [1, 1]} : vector<40x40xf32> to vector<5x5xf32>
    %c1_443 = arith.constant 1 : index
    %c26_444 = arith.constant 26 : index
    %c0_445 = arith.constant 0 : index
    %c0_446 = arith.constant 0 : index
    %602 = vector.load %arg8[%c1_443, %c26_444, %c0_445, %c0_446] : memref<2x32x5x5xf32, #tpu.memory_space<vmem>>, vector<1x1x5x5xf32>
    %603 = vector.shape_cast %602 : vector<1x1x5x5xf32> to vector<5x5xf32>
    %604 = vector.shape_cast %601 : vector<5x5xf32> to vector<1x1x5x5xf32>
    tpu.vector_store %arg8[%c1_443, %c26_444, %c0_445, %c0_446], %604 {strides = array<i32>} : memref<2x32x5x5xf32, #tpu.memory_space<vmem>>, vector<1x1x5x5xf32>,
    %605 = vector.extract_strided_slice %572 {offsets = [35, 35], sizes = [5, 5], strides = [1, 1]} : vector<40x40xf32> to vector<5x5xf32>
    %c1_447 = arith.constant 1 : index
    %c30_448 = arith.constant 30 : index
    %c0_449 = arith.constant 0 : index
    %c0_450 = arith.constant 0 : index
    %606 = vector.load %arg8[%c1_447, %c30_448, %c0_449, %c0_450] : memref<2x32x5x5xf32, #tpu.memory_space<vmem>>, vector<1x1x5x5xf32>
    %607 = vector.shape_cast %606 : vector<1x1x5x5xf32> to vector<5x5xf32>
    %608 = vector.shape_cast %605 : vector<5x5xf32> to vector<1x1x5x5xf32>
    tpu.vector_store %arg8[%c1_447, %c30_448, %c0_449, %c0_450], %608 {strides = array<i32>} : memref<2x32x5x5xf32, #tpu.memory_space<vmem>>, vector<1x1x5x5xf32>,
    %609 = vector.extract_strided_slice %498 {offsets = [120, 0], sizes = [40, 40], strides = [1, 1]} : vector<160x40xf32> to vector<40x40xf32>
    %cst_451 = arith.constant dense<0.000000e+00> : vector<40x8xf32>
    %610 = tpu.matmul %609, %480, %cst_451 {dimension_numbers = #tpu.dot_dimension_numbers<[1], [0], [0], [1], [0, 0, 1, 1], [], []>} : vector<40x40xf32>, vector<40x8xf32>, vector<40x8xf32> -> vector<40x8xf32>
    %611 = vector.extract_strided_slice %387 {offsets = [24, 0], sizes = [8, 32], strides = [1, 1]} : vector<32x32xf32> to vector<8x32xf32>
    %cst_452 = arith.constant dense<0.000000e+00> : vector<40x32xf32>
    %612 = tpu.matmul %610, %611, %cst_452 {dimension_numbers = #tpu.dot_dimension_numbers<[1], [0], [0], [1], [0, 0, 1, 1], [], []>} : vector<40x8xf32>, vector<8x32xf32>, vector<40x32xf32> -> vector<40x32xf32>
    %613 = arith.addf %576, %612 : vector<40x32xf32>
    %614 = vector.extract_strided_slice %609 {offsets = [0, 0], sizes = [5, 5], strides = [1, 1]} : vector<40x40xf32> to vector<5x5xf32>
    %c1_453 = arith.constant 1 : index
    %c3_454 = arith.constant 3 : index
    %c0_455 = arith.constant 0 : index
    %c0_456 = arith.constant 0 : index
    %615 = vector.load %arg8[%c1_453, %c3_454, %c0_455, %c0_456] : memref<2x32x5x5xf32, #tpu.memory_space<vmem>>, vector<1x1x5x5xf32>
    %616 = vector.shape_cast %615 : vector<1x1x5x5xf32> to vector<5x5xf32>
    %617 = vector.shape_cast %614 : vector<5x5xf32> to vector<1x1x5x5xf32>
    tpu.vector_store %arg8[%c1_453, %c3_454, %c0_455, %c0_456], %617 {strides = array<i32>} : memref<2x32x5x5xf32, #tpu.memory_space<vmem>>, vector<1x1x5x5xf32>,
    %618 = vector.extract_strided_slice %609 {offsets = [5, 5], sizes = [5, 5], strides = [1, 1]} : vector<40x40xf32> to vector<5x5xf32>
    %c1_457 = arith.constant 1 : index
    %c7_458 = arith.constant 7 : index
    %c0_459 = arith.constant 0 : index
    %c0_460 = arith.constant 0 : index
    %619 = vector.load %arg8[%c1_457, %c7_458, %c0_459, %c0_460] : memref<2x32x5x5xf32, #tpu.memory_space<vmem>>, vector<1x1x5x5xf32>
    %620 = vector.shape_cast %619 : vector<1x1x5x5xf32> to vector<5x5xf32>
    %621 = vector.shape_cast %618 : vector<5x5xf32> to vector<1x1x5x5xf32>
    tpu.vector_store %arg8[%c1_457, %c7_458, %c0_459, %c0_460], %621 {strides = array<i32>} : memref<2x32x5x5xf32, #tpu.memory_space<vmem>>, vector<1x1x5x5xf32>,
    %622 = vector.extract_strided_slice %609 {offsets = [10, 10], sizes = [5, 5], strides = [1, 1]} : vector<40x40xf32> to vector<5x5xf32>
    %c1_461 = arith.constant 1 : index
    %c11_462 = arith.constant 11 : index
    %c0_463 = arith.constant 0 : index
    %c0_464 = arith.constant 0 : index
    %623 = vector.load %arg8[%c1_461, %c11_462, %c0_463, %c0_464] : memref<2x32x5x5xf32, #tpu.memory_space<vmem>>, vector<1x1x5x5xf32>
    %624 = vector.shape_cast %623 : vector<1x1x5x5xf32> to vector<5x5xf32>
    %625 = vector.shape_cast %622 : vector<5x5xf32> to vector<1x1x5x5xf32>
    tpu.vector_store %arg8[%c1_461, %c11_462, %c0_463, %c0_464], %625 {strides = array<i32>} : memref<2x32x5x5xf32, #tpu.memory_space<vmem>>, vector<1x1x5x5xf32>,
    %626 = vector.extract_strided_slice %609 {offsets = [15, 15], sizes = [5, 5], strides = [1, 1]} : vector<40x40xf32> to vector<5x5xf32>
    %c1_465 = arith.constant 1 : index
    %c15_466 = arith.constant 15 : index
    %c0_467 = arith.constant 0 : index
    %c0_468 = arith.constant 0 : index
    %627 = vector.load %arg8[%c1_465, %c15_466, %c0_467, %c0_468] : memref<2x32x5x5xf32, #tpu.memory_space<vmem>>, vector<1x1x5x5xf32>
    %628 = vector.shape_cast %627 : vector<1x1x5x5xf32> to vector<5x5xf32>
    %629 = vector.shape_cast %626 : vector<5x5xf32> to vector<1x1x5x5xf32>
    tpu.vector_store %arg8[%c1_465, %c15_466, %c0_467, %c0_468], %629 {strides = array<i32>} : memref<2x32x5x5xf32, #tpu.memory_space<vmem>>, vector<1x1x5x5xf32>,
    %630 = vector.extract_strided_slice %609 {offsets = [20, 20], sizes = [5, 5], strides = [1, 1]} : vector<40x40xf32> to vector<5x5xf32>
    %c1_469 = arith.constant 1 : index
    %c19_470 = arith.constant 19 : index
    %c0_471 = arith.constant 0 : index
    %c0_472 = arith.constant 0 : index
    %631 = vector.load %arg8[%c1_469, %c19_470, %c0_471, %c0_472] : memref<2x32x5x5xf32, #tpu.memory_space<vmem>>, vector<1x1x5x5xf32>
    %632 = vector.shape_cast %631 : vector<1x1x5x5xf32> to vector<5x5xf32>
    %633 = vector.shape_cast %630 : vector<5x5xf32> to vector<1x1x5x5xf32>
    tpu.vector_store %arg8[%c1_469, %c19_470, %c0_471, %c0_472], %633 {strides = array<i32>} : memref<2x32x5x5xf32, #tpu.memory_space<vmem>>, vector<1x1x5x5xf32>,
    %634 = vector.extract_strided_slice %609 {offsets = [25, 25], sizes = [5, 5], strides = [1, 1]} : vector<40x40xf32> to vector<5x5xf32>
    %c1_473 = arith.constant 1 : index
    %c23_474 = arith.constant 23 : index
    %c0_475 = arith.constant 0 : index
    %c0_476 = arith.constant 0 : index
    %635 = vector.load %arg8[%c1_473, %c23_474, %c0_475, %c0_476] : memref<2x32x5x5xf32, #tpu.memory_space<vmem>>, vector<1x1x5x5xf32>
    %636 = vector.shape_cast %635 : vector<1x1x5x5xf32> to vector<5x5xf32>
    %637 = vector.shape_cast %634 : vector<5x5xf32> to vector<1x1x5x5xf32>
    tpu.vector_store %arg8[%c1_473, %c23_474, %c0_475, %c0_476], %637 {strides = array<i32>} : memref<2x32x5x5xf32, #tpu.memory_space<vmem>>, vector<1x1x5x5xf32>,
    %638 = vector.extract_strided_slice %609 {offsets = [30, 30], sizes = [5, 5], strides = [1, 1]} : vector<40x40xf32> to vector<5x5xf32>
    %c1_477 = arith.constant 1 : index
    %c27_478 = arith.constant 27 : index
    %c0_479 = arith.constant 0 : index
    %c0_480 = arith.constant 0 : index
    %639 = vector.load %arg8[%c1_477, %c27_478, %c0_479, %c0_480] : memref<2x32x5x5xf32, #tpu.memory_space<vmem>>, vector<1x1x5x5xf32>
    %640 = vector.shape_cast %639 : vector<1x1x5x5xf32> to vector<5x5xf32>
    %641 = vector.shape_cast %638 : vector<5x5xf32> to vector<1x1x5x5xf32>
    tpu.vector_store %arg8[%c1_477, %c27_478, %c0_479, %c0_480], %641 {strides = array<i32>} : memref<2x32x5x5xf32, #tpu.memory_space<vmem>>, vector<1x1x5x5xf32>,
    %642 = vector.extract_strided_slice %609 {offsets = [35, 35], sizes = [5, 5], strides = [1, 1]} : vector<40x40xf32> to vector<5x5xf32>
    %c1_481 = arith.constant 1 : index
    %c31_482 = arith.constant 31 : index
    %c0_483 = arith.constant 0 : index
    %c0_484 = arith.constant 0 : index
    %643 = vector.load %arg8[%c1_481, %c31_482, %c0_483, %c0_484] : memref<2x32x5x5xf32, #tpu.memory_space<vmem>>, vector<1x1x5x5xf32>
    %644 = vector.shape_cast %643 : vector<1x1x5x5xf32> to vector<5x5xf32>
    %645 = vector.shape_cast %642 : vector<5x5xf32> to vector<1x1x5x5xf32>
    tpu.vector_store %arg8[%c1_481, %c31_482, %c0_483, %c0_484], %645 {strides = array<i32>} : memref<2x32x5x5xf32, #tpu.memory_space<vmem>>, vector<1x1x5x5xf32>,
    %c1_485 = arith.constant 1 : index
    %c0_486 = arith.constant 0 : index
    %c0_487 = arith.constant 0 : index
    %646 = vector.load %arg6[%c1_485, %c0_486, %c0_487] : memref<2x8x64xf32, #tpu.memory_space<vmem>>, vector<1x8x64xf32>
    %647 = vector.shape_cast %646 : vector<1x8x64xf32> to vector<8x64xf32>
    %648 = vector.extract_strided_slice %647 {offsets = [0, 0], sizes = [1, 32], strides = [1, 1]} : vector<8x64xf32> to vector<1x32xf32>
    %649 = vector.extract_strided_slice %647 {offsets = [1, 0], sizes = [1, 64], strides = [1, 1]} : vector<8x64xf32> to vector<1x64xf32>
    %650 = vector.extract_strided_slice %647 {offsets = [2, 0], sizes = [1, 32], strides = [1, 1]} : vector<8x64xf32> to vector<1x32xf32>
    %651 = vector.extract_strided_slice %647 {offsets = [3, 0], sizes = [1, 32], strides = [1, 1]} : vector<8x64xf32> to vector<1x32xf32>
    %652 = vector.extract_strided_slice %647 {offsets = [4, 0], sizes = [1, 32], strides = [1, 1]} : vector<8x64xf32> to vector<1x32xf32>
    %653 = vector.extract_strided_slice %647 {offsets = [5, 0], sizes = [1, 32], strides = [1, 1]} : vector<8x64xf32> to vector<1x32xf32>
    %654 = vector.extract_strided_slice %647 {offsets = [6, 0], sizes = [1, 32], strides = [1, 1]} : vector<8x64xf32> to vector<1x32xf32>
    %655 = arith.addf %376, %613 : vector<40x32xf32>
    %656 = vector.broadcast %648 : vector<1x32xf32> to vector<40x32xf32>
    %657 = arith.addf %655, %656 : vector<40x32xf32>
    %cst_488 = arith.constant dense<0.000000e+00> : vector<32xf32>
    %658 = vector.multi_reduction <add>, %657, %cst_488 [0] : vector<40x32xf32> to vector<32xf32>
    %659 = vector.shape_cast %658 : vector<32xf32> to vector<1x32xf32>
    %cst_489 = arith.constant 4.000000e+01 : f32
    %660 = vector.broadcast %cst_489 : f32 to vector<1x32xf32>
    %661 = arith.divf %659, %660 : vector<1x32xf32>
    %662 = vector.broadcast %661 : vector<1x32xf32> to vector<40x32xf32>
    %663 = arith.subf %657, %662 : vector<40x32xf32>
    %664 = arith.mulf %663, %663 : vector<40x32xf32>
    %cst_490 = arith.constant dense<0.000000e+00> : vector<32xf32>
    %665 = vector.multi_reduction <add>, %664, %cst_490 [0] : vector<40x32xf32> to vector<32xf32>
    %666 = vector.shape_cast %665 : vector<32xf32> to vector<1x32xf32>
    %cst_491 = arith.constant 4.000000e+01 : f32
    %667 = vector.broadcast %cst_491 : f32 to vector<1x32xf32>
    %668 = arith.divf %666, %667 : vector<1x32xf32>
    %cst_492 = arith.constant 9.99999974E-6 : f32
    %669 = vector.broadcast %cst_492 : f32 to vector<1x32xf32>
    %670 = arith.addf %668, %669 : vector<1x32xf32>
    %671 = math.rsqrt %670 : vector<1x32xf32>
    %672 = vector.broadcast %671 : vector<1x32xf32> to vector<40x32xf32>
    %673 = arith.mulf %663, %672 : vector<40x32xf32>
    %674 = vector.broadcast %651 : vector<1x32xf32> to vector<40x32xf32>
    %675 = arith.mulf %673, %674 : vector<40x32xf32>
    %676 = vector.broadcast %652 : vector<1x32xf32> to vector<40x32xf32>
    %677 = arith.addf %675, %676 : vector<40x32xf32>
    %c1_493 = arith.constant 1 : index
    %c0_494 = arith.constant 0 : index
    %c0_495 = arith.constant 0 : index
    %c0_496 = arith.constant 0 : index
    %678 = vector.load %arg5[%c1_493, %c0_494, %c0_495, %c0_496] : memref<2x2x32x64xf32, #tpu.memory_space<vmem>>, vector<1x1x32x64xf32>
    %679 = vector.shape_cast %678 : vector<1x1x32x64xf32> to vector<32x64xf32>
    %cst_497 = arith.constant dense<0.000000e+00> : vector<40x64xf32>
    %680 = tpu.matmul %677, %679, %cst_497 {dimension_numbers = #tpu.dot_dimension_numbers<[1], [0], [0], [1], [0, 0, 1, 1], [], []>} : vector<40x32xf32>, vector<32x64xf32>, vector<40x64xf32> -> vector<40x64xf32>
    %681 = vector.broadcast %649 : vector<1x64xf32> to vector<40x64xf32>
    %682 = arith.addf %680, %681 : vector<40x64xf32>
    %cst_498 = arith.constant 5.000000e-01 : f32
    %683 = vector.broadcast %cst_498 : f32 to vector<40x64xf32>
    %684 = arith.mulf %683, %682 : vector<40x64xf32>
    %cst_499 = arith.constant 0.707106769 : f32
    %685 = vector.broadcast %cst_499 : f32 to vector<40x64xf32>
    %686 = arith.mulf %682, %685 : vector<40x64xf32>
    %cst_500 = arith.constant 0.000000e+00 : f32
    %687 = vector.broadcast %cst_500 : f32 to vector<40x64xf32>
    %688 = arith.cmpf oge, %686, %687 : vector<40x64xf32>
    %cst_501 = arith.constant 1.000000e+00 : f32
    %cst_502 = arith.constant -1.000000e+00 : f32
    %689 = vector.broadcast %cst_501 : f32 to vector<40x64xf32>
    %690 = vector.broadcast %cst_502 : f32 to vector<40x64xf32>
    %691 = arith.select %688, %689, %690 : vector<40x64xi1>, vector<40x64xf32>
    %692 = math.absf %686 : vector<40x64xf32>
    %cst_503 = arith.constant 0.327591091 : f32
    %693 = vector.broadcast %cst_503 : f32 to vector<40x64xf32>
    %694 = arith.mulf %693, %692 : vector<40x64xf32>
    %cst_504 = arith.constant 1.000000e+00 : f32
    %695 = vector.broadcast %cst_504 : f32 to vector<40x64xf32>
    %696 = arith.addf %695, %694 : vector<40x64xf32>
    %cst_505 = arith.constant 1.000000e+00 : f32
    %697 = vector.broadcast %cst_505 : f32 to vector<40x64xf32>
    %698 = arith.divf %697, %696 : vector<40x64xf32>
    %cst_506 = arith.constant 1.06140542 : f32
    %699 = vector.broadcast %cst_506 : f32 to vector<40x64xf32>
    %700 = arith.mulf %699, %698 : vector<40x64xf32>
    %cst_507 = arith.constant -1.45315206 : f32
    %701 = vector.broadcast %cst_507 : f32 to vector<40x64xf32>
    %702 = arith.addf %700, %701 : vector<40x64xf32>
    %703 = arith.mulf %702, %698 : vector<40x64xf32>
    %cst_508 = arith.constant 1.42141378 : f32
    %704 = vector.broadcast %cst_508 : f32 to vector<40x64xf32>
    %705 = arith.addf %703, %704 : vector<40x64xf32>
    %706 = arith.mulf %705, %698 : vector<40x64xf32>
    %cst_509 = arith.constant -0.284496725 : f32
    %707 = vector.broadcast %cst_509 : f32 to vector<40x64xf32>
    %708 = arith.addf %706, %707 : vector<40x64xf32>
    %709 = arith.mulf %708, %698 : vector<40x64xf32>
    %cst_510 = arith.constant 0.254829586 : f32
    %710 = vector.broadcast %cst_510 : f32 to vector<40x64xf32>
    %711 = arith.addf %709, %710 : vector<40x64xf32>
    %712 = arith.mulf %711, %698 : vector<40x64xf32>
    %cst_511 = arith.constant 0.000000e+00 : f32
    %713 = vector.broadcast %cst_511 : f32 to vector<40x64xf32>
    %714 = arith.subf %713, %692 : vector<40x64xf32>
    %715 = arith.mulf %714, %692 : vector<40x64xf32>
    %716 = math.exp %715 : vector<40x64xf32>
    %717 = arith.mulf %712, %716 : vector<40x64xf32>
    %cst_512 = arith.constant 1.000000e+00 : f32
    %718 = vector.broadcast %cst_512 : f32 to vector<40x64xf32>
    %719 = arith.subf %718, %717 : vector<40x64xf32>
    %720 = arith.mulf %691, %719 : vector<40x64xf32>
    %cst_513 = arith.constant 1.000000e+00 : f32
    %721 = vector.broadcast %cst_513 : f32 to vector<40x64xf32>
    %722 = arith.addf %721, %720 : vector<40x64xf32>
    %723 = arith.mulf %684, %722 : vector<40x64xf32>
    %c1_514 = arith.constant 1 : index
    %c1_515 = arith.constant 1 : index
    %c0_516 = arith.constant 0 : index
    %c0_517 = arith.constant 0 : index
    %724 = vector.load %arg5[%c1_514, %c1_515, %c0_516, %c0_517] : memref<2x2x32x64xf32, #tpu.memory_space<vmem>>, vector<1x1x32x64xf32>
    %725 = vector.shape_cast %724 : vector<1x1x32x64xf32> to vector<32x64xf32>
    %cst_518 = arith.constant dense<0.000000e+00> : vector<40x32xf32>
    %726 = tpu.matmul %723, %725, %cst_518 {dimension_numbers = #tpu.dot_dimension_numbers<[1], [1], [0], [0], [0, 0, 1, 0], [], []>} : vector<40x64xf32>, vector<32x64xf32>, vector<40x32xf32> -> vector<40x32xf32>
    %727 = vector.broadcast %650 : vector<1x32xf32> to vector<40x32xf32>
    %728 = arith.addf %726, %727 : vector<40x32xf32>
    %729 = arith.addf %677, %728 : vector<40x32xf32>
    %cst_519 = arith.constant dense<0.000000e+00> : vector<32xf32>
    %730 = vector.multi_reduction <add>, %729, %cst_519 [0] : vector<40x32xf32> to vector<32xf32>
    %731 = vector.shape_cast %730 : vector<32xf32> to vector<1x32xf32>
    %cst_520 = arith.constant 4.000000e+01 : f32
    %732 = vector.broadcast %cst_520 : f32 to vector<1x32xf32>
    %733 = arith.divf %731, %732 : vector<1x32xf32>
    %734 = vector.broadcast %733 : vector<1x32xf32> to vector<40x32xf32>
    %735 = arith.subf %729, %734 : vector<40x32xf32>
    %736 = arith.mulf %735, %735 : vector<40x32xf32>
    %cst_521 = arith.constant dense<0.000000e+00> : vector<32xf32>
    %737 = vector.multi_reduction <add>, %736, %cst_521 [0] : vector<40x32xf32> to vector<32xf32>
    %738 = vector.shape_cast %737 : vector<32xf32> to vector<1x32xf32>
    %cst_522 = arith.constant 4.000000e+01 : f32
    %739 = vector.broadcast %cst_522 : f32 to vector<1x32xf32>
    %740 = arith.divf %738, %739 : vector<1x32xf32>
    %cst_523 = arith.constant 9.99999974E-6 : f32
    %741 = vector.broadcast %cst_523 : f32 to vector<1x32xf32>
    %742 = arith.addf %740, %741 : vector<1x32xf32>
    %743 = math.rsqrt %742 : vector<1x32xf32>
    %744 = vector.broadcast %743 : vector<1x32xf32> to vector<40x32xf32>
    %745 = arith.mulf %735, %744 : vector<40x32xf32>
    %746 = vector.broadcast %653 : vector<1x32xf32> to vector<40x32xf32>
    %747 = arith.mulf %745, %746 : vector<40x32xf32>
    %748 = vector.broadcast %654 : vector<1x32xf32> to vector<40x32xf32>
    %749 = arith.addf %747, %748 : vector<40x32xf32>
    %c1_524 = arith.constant 1 : index
    %c0_525 = arith.constant 0 : index
    %c0_526 = arith.constant 0 : index
    %750 = vector.load %arg7[%c1_524, %c0_525, %c0_526] : memref<2x40x32xf32, #tpu.memory_space<vmem>>, vector<1x40x32xf32>
    %751 = vector.shape_cast %750 : vector<1x40x32xf32> to vector<40x32xf32>
    %752 = vector.shape_cast %749 : vector<40x32xf32> to vector<1x40x32xf32>
    tpu.vector_store %arg7[%c1_524, %c0_525, %c0_526], %752 {strides = array<i32>} : memref<2x40x32xf32, #tpu.memory_space<vmem>>, vector<1x40x32xf32>,
    return
  }
  func.func @transform_0(%arg0: i32) -> (i32, i32) {
    %c0_i32 = arith.constant 0 : i32
    %c0_i32_0 = arith.constant 0 : i32
    %c0_i32_1 = arith.constant 0 : i32
    return %c0_i32, %c0_i32_0 : i32, i32
  }
  func.func @transform_1(%arg0: i32) -> (i32, i32) {
    %c0_i32 = arith.constant 0 : i32
    %c0_i32_0 = arith.constant 0 : i32
    %c0_i32_1 = arith.constant 0 : i32
    return %c0_i32, %c0_i32_0 : i32, i32
  }
  func.func @transform_2(%arg0: i32) -> (i32, i32, i32, i32) {
    %c0_i32 = arith.constant 0 : i32
    %c0_i32_0 = arith.constant 0 : i32
    %c0_i32_1 = arith.constant 0 : i32
    %c0_i32_2 = arith.constant 0 : i32
    %c0_i32_3 = arith.constant 0 : i32
    return %c0_i32, %c0_i32_0, %c0_i32_1, %c0_i32_2 : i32, i32, i32, i32
  }
  func.func @transform_3(%arg0: i32) -> (i32, i32, i32, i32) {
    %c0_i32 = arith.constant 0 : i32
    %c0_i32_0 = arith.constant 0 : i32
    %c0_i32_1 = arith.constant 0 : i32
    %c0_i32_2 = arith.constant 0 : i32
    %c0_i32_3 = arith.constant 0 : i32
    return %c0_i32, %c0_i32_0, %c0_i32_1, %c0_i32_2 : i32, i32, i32, i32
  }
  func.func @transform_4(%arg0: i32) -> (i32, i32, i32, i32) {
    %c0_i32 = arith.constant 0 : i32
    %c0_i32_0 = arith.constant 0 : i32
    %c0_i32_1 = arith.constant 0 : i32
    %c0_i32_2 = arith.constant 0 : i32
    %c0_i32_3 = arith.constant 0 : i32
    return %c0_i32, %c0_i32_0, %c0_i32_1, %c0_i32_2 : i32, i32, i32, i32
  }
  func.func @transform_5(%arg0: i32) -> (i32, i32, i32) {
    %c0_i32 = arith.constant 0 : i32
    %c0_i32_0 = arith.constant 0 : i32
    %c0_i32_1 = arith.constant 0 : i32
    %c0_i32_2 = arith.constant 0 : i32
    return %c0_i32, %c0_i32_0, %c0_i32_1 : i32, i32, i32
  }
  func.func @transform_6(%arg0: i32) -> (i32, i32, i32) {
    %c0_i32 = arith.constant 0 : i32
    %c0_i32_0 = arith.constant 0 : i32
    %c0_i32_1 = arith.constant 0 : i32
    %c0_i32_2 = arith.constant 0 : i32
    return %c0_i32, %c0_i32_0, %c0_i32_1 : i32, i32, i32
  }
  func.func @transform_7(%arg0: i32) -> (i32, i32, i32, i32) {
    %c0_i32 = arith.constant 0 : i32
    %c0_i32_0 = arith.constant 0 : i32
    %c0_i32_1 = arith.constant 0 : i32
    %c0_i32_2 = arith.constant 0 : i32
    %c0_i32_3 = arith.constant 0 : i32
    return %c0_i32, %c0_i32_0, %c0_i32_1, %c0_i32_2 : i32, i32, i32, i32
  }
}

</mosaic_0001>

<bundles_post_ra>
// kernel: tpu_custom_call.1
= control target key start
LH: loop header
LB: loop body
LE: loop exit
PB: predicated region body
PF: predicated region fallthrough
CT: control target
= control target key end

     0   :  { %13 = vsyncpa [#allocation4], 0  ;;  %s13010_s0 = inlined_call_operand.vmem [shape: f32[40,17], index: 0, kind: input, shape index: {}]   ;;  %s13011_s1 = inlined_call_operand.vmem [shape: f32[18,32], index: 1, kind: input, shape index: {}]   ;;  %s13012_s2 = inlined_call_operand.hbm [shape: f32[2,4,32,32], index: 2, kind: input, shape index: {}]   ;;  %s13013_s3 = inlined_call_operand.vmem [shape: f32[2,12,1,8], index: 3, kind: input, shape index: {}]   ;;  %s13014_s4 = inlined_call_operand.hbm [shape: f32[2,2,32,64], index: 4, kind: input, shape index: {}]   ;;  %s13015_s5 = inlined_call_operand.vmem [shape: f32[2,8,64], index: 5, kind: input, shape index: {}]   ;;  %s13016_s6 = inlined_call_operand.vmem [shape: f32[2,40,32], index: 6, kind: output, shape index: {0}]   ;;  %s13017_s7 = inlined_call_operand.vmem [shape: f32[2,32,5,5], index: 7, kind: output, shape index: {1}]  }
   0x1   :  { %14 = vsyncpa [#allocation6], 0  ;;  %s9842_s24 = smov [#allocation3]  }
   0x2   :  { %s24_s25 = sshll.u32 %s9842_s24, 4  ;;  %s25_s25 = int_to_ptr.vmem [resolvable:$true] %s24_s25 }
   0x3   :  { %s9806_s26 = scalar_lea.vmem %s25_s25, 4096  ;;  %p9811_p1 = scmp.lt.s32.totalorder %s25_s25, %s25_s25 }
   0x4   :  { %p9807_p0 = scmp.ne.s32.totalorder %s25_s25, %s9806_s26  ;;  %p9812_p2 = scmp.lt.s32.totalorder %s9806_s26, %s9806_s26 }
   0x6   :  { %p9813_p3 = por %p9812_p2, %p9811_p1 }
   0x8   :  { %p9814_p4 = pnand %p9813_p3, %p9807_p0 }
   0xa   :  { %9817 = shalt.err (!%p9814_p4)
}
   0xb   :  { %s9843_s27 = smov 128   ;;  %s9844_s28 = smov 8  }
   0xc   :  { %30 = dma.hbm_to_vmem [thread:$0]  %s13012_s2, 4096, %s25_s25, [#allocation4], %s9843_s27, %s9843_s27, %s9844_s28  }
   0xd   :  { %s9845_s8 = smov [#allocation5]  }
   0xe   :  { %s38_s9 = sshll.u32 %s9845_s8, 4  ;;  %s39_s9 = int_to_ptr.vmem [resolvable:$true] %s38_s9 }
   0xf   :  { %s9826_s10 = scalar_lea.vmem %s39_s9, 2048  ;;  %p9831_p6 = scmp.lt.s32.totalorder %s39_s9, %s39_s9 }
  0x10   :  { %p9827_p5 = scmp.ne.s32.totalorder %s39_s9, %s9826_s10  ;;  %p9832_p7 = scmp.lt.s32.totalorder %s9826_s10, %s9826_s10 }
  0x12   :  { %p9833_p8 = por %p9832_p7, %p9831_p6 }
  0x14   :  { %p9834_p9 = pnand %p9833_p8, %p9827_p5 }
  0x16   :  { %9837 = shalt.err (!%p9834_p9)
}
  0x17   :  { %44 = dma.hbm_to_vmem [thread:$0]  %s13014_s4, 2048, %s39_s9, [#allocation6], %s9843_s27, %s9843_s27, %s9844_s28  }
  0x18   :  { %9838 = dma.done.wait [#allocation4], 4096  }
  0x19   :  { %9839 = vsyncadd [#allocation4], 4294963200 }
  0x1a   :  { %9840 = dma.done.wait [#allocation6], 2048  }
  0x1b   :  { %9841 = vsyncadd [#allocation6], 4294965248  ;;  %v13018_v0 = vmov 0.0   ;;  %vm9847_vm0 = vmmov 0   ;;  %vm81_vm1 = vcmask 1040384   ;;  %v59_v2 = vld [vmem:[%s13011_s1 + $0x8] sm:$0xff]  ;;  %v61_v16 = vlaneseq }
  0x1c   :  { %8483 = vmatprep.subr.mxu0 %v13018_v0  ;;  %8489 = vmatprep.mubr.msk.f32.mxu0 %vm9847_vm0, %v13018_v0  ;;  %v9912_v1 = vld [vmem:[%s13011_s1 + $0x10] sm:$0x3]  ;;  %v58_v3 = vld [vmem:[%s13011_s1] sm:$0xff]  ;;  %vm65_vm2 = vcmask 138240   ;;  %s9848_s23 = smov 119   ;;  %v56_v7 = vld [vmem:[%s13010_s0 + $0x18] sm:$0xff] }
  0x1d   :  { %9565 = vmatprep.subr.mxu1 %v13018_v0  ;;  %8517 = vmatprep.mubr.msk.f32.mxu1 %vm9847_vm0, %v13018_v0  ;;  %v57_v4 = vld [vmem:[%s13010_s0 + $0x20] sm:$0xff]  ;;  %v55_v6 = vld [vmem:[%s13010_s0 + $0x10] sm:$0xff]  ;;  %v54_v8 = vld [vmem:[%s13010_s0 + $0x8] sm:$0xff]  ;;  %vm185_vm3 = vcmask 64512   ;;  %vm317_vm4 = vcmask 261120   ;;  %v9993_v17 = vshrl.u32 %v61_v16, 7 }
  0x1e   :  { %8484 = vmatpush3.msk.msra.mxu0 %vm81_vm1, %v9912_v1  ;;  %v53_v5 = vld [vmem:[%s13010_s0] sm:$0xff]  ;;  %183 = vrot.lane.b32.xlu0 %v57_v4, %s9848_s23  ;;  %v292_v36 = vld [vmem:[#allocation3 + $0x8] sm:$0xff]  ;;  %v293_v38 = vld [vmem:[#allocation3 + $0x10] sm:$0xff]  ;;  %vm758_vm5 = vcmask 326656   ;;  %vm2423_vm11 = vcmask 36864   ;;  %vm3731_vm12 = vcmask 523264  }
  0x1f   :  { %8485 = vmatprep.subr.mxu0 %v13018_v0  ;;  %179 = vrot.lane.b32.xlu1 %v55_v6, %s9848_s23  ;;  %v296_v14 = vld [vmem:[#allocation3 + $0x20] sm:$0xff]  ;;  %13074 = vst [vmem:[#allocation9_spill] sm:$0xff] %v9993_v17  ;;  %v9996_v18 = vsub.s32 1, %v9993_v17  ;;  %v302_v37 = vld [vmem:[#allocation3 + $0x48] sm:$0xff]  ;;  %v303_v39 = vld [vmem:[#allocation3 + $0x50] sm:$0xff]  ;;  %s9850_s19 = smov 123  }
  0x20   :  { %8486 = vmatpush3.msra.mxu0 %v59_v2  ;;  %v291_v15 = vld [vmem:[#allocation3] sm:$0xff]  ;;  %v294_v40 = vld [vmem:[#allocation3 + $0x18] sm:$0xff]  ;;  %s9851_s20 = smov 118   ;;  %s9852_s21 = smov 113  }
  0x21   :  { %8487 = vmatprep.subr.mxu0 %v13018_v0  ;;  %13075 = vst [vmem:[#allocation10_spill] sm:$0xff] %v9996_v18  ;;  %v64_v19 = vrot.slane %v9912_v1, %v9996_v18  ;;  %v301_v23 = vld [vmem:[#allocation3 + $0x40] sm:$0xff]  ;;  %v304_v41 = vld [vmem:[#allocation3 + $0x58] sm:$0xff]  ;;  %s9853_s22 = smov 108   ;;  %s9855_s1 = smov 98  }
  0x22   :  { %8488 = vmatpush3.msra.mxu0 %v58_v3  ;;  %181 = vrot.lane.b32.xlu0 %v56_v7, %s9848_s23  ;;  %s9856_s26 = smov 93  }
  0x23   :  { %8490 = vmatmul.mubr.msk.f32.vlgmr.msra.gmra.mxu0 %vm65_vm2, %v53_v5  ;;  %8504 = vmatprep.subr.mxu0 %v13018_v0 }
  0x24   :  { %8492 = vmatprep.mubr.msk.f32.mxu0 %vm9847_vm0, %v13018_v0  ;;  %177 = vrot.lane.b32.xlu1 %v54_v8, %s9848_s23 }
  0x26   :  { %175 = vrot.lane.b32.xlu0 %v53_v5, %s9848_s23  ;;  %v7605_v5 = vld [vmem:[%s13013_s3 + $0x4] ss:$0 sm:$0xff]  ;;  %s9854_s23 = smov 103  }
  0x27   :  { %8493 = vmatmul.mubr.msk.f32.gmra.mxu0 %vm65_vm2, %v54_v8 }
  0x28   :  { %8495 = vmatprep.mubr.msk.f32.mxu0 %vm9847_vm0, %v13018_v0 }
  0x2b   :  { %8496 = vmatmul.mubr.msk.f32.gmra.mxu0 %vm65_vm2, %v55_v6 }
  0x2c   :  { %8498 = vmatprep.mubr.msk.f32.mxu0 %vm9847_vm0, %v13018_v0 }
  0x2f   :  { %8499 = vmatmul.mubr.msk.f32.gmra.mxu0 %vm65_vm2, %v56_v7 }
  0x30   :  { %8501 = vmatprep.mubr.msk.f32.mxu0 %vm9847_vm0, %v13018_v0 }
  0x33   :  { %8502 = vmatmul.mubr.msk.f32.gmra.mxu0 %vm65_vm2, %v57_v4 }
  0x34   :  { %8514 = vmatprep.mubr.msk.f32.mxu0 %vm9847_vm0, %v13018_v0 }
  0x90   :  { %v184_v9 = vpop.permute.xlu0 %183 }
  0x91   :  { %9570 = vmatpush3.xpose.msk.msra.mxu1 %vm185_vm3, %v184_v9  ;;  %8505 = vmatpush3.xpose.msk.msra.mxu0 %vm185_vm3, %v184_v9  ;;  %v180_v11 = vpop.permute.xlu1 %179 }
  0x92   :  { %9566 = vmatprep.subr.mxu1 %v13018_v0  ;;  %8506 = vmatprep.subr.mxu0 %v13018_v0 }
  0x94   :  { %v182_v10 = vpop.permute.xlu0 %181 }
  0x95   :  { %9571 = vmatpush3.xpose.msk.msra.mxu1 %vm185_vm3, %v182_v10  ;;  %8507 = vmatpush3.xpose.msk.msra.mxu0 %vm185_vm3, %v182_v10 }
  0x96   :  { %9567 = vmatprep.subr.mxu1 %v13018_v0  ;;  %8508 = vmatprep.subr.mxu0 %v13018_v0  ;;  %v178_v12 = vpop.permute.xlu1 %177 }
  0x98   :  { %v176_v13 = vpop.permute.xlu0 %175 }
  0x99   :  { %9572 = vmatpush3.xpose.msk.msra.mxu1 %vm185_vm3, %v180_v11  ;;  %8509 = vmatpush3.xpose.msk.msra.mxu0 %vm185_vm3, %v180_v11 }
  0x9a   :  { %9568 = vmatprep.subr.mxu1 %v13018_v0  ;;  %8510 = vmatprep.subr.mxu0 %v13018_v0 }
  0x9d   :  { %9573 = vmatpush3.xpose.msk.msra.mxu1 %vm185_vm3, %v178_v12  ;;  %8511 = vmatpush3.xpose.msk.msra.mxu0 %vm185_vm3, %v178_v12 }
  0x9e   :  { %9569 = vmatprep.subr.mxu1 %v13018_v0  ;;  %8512 = vmatprep.subr.mxu0 %v13018_v0 }
  0xa1   :  { %9574 = vmatpush3.xpose.msk.msra.mxu1 %vm185_vm3, %v176_v13  ;;  %8513 = vmatpush3.xpose.msk.msra.mxu0 %vm185_vm3, %v176_v13 }
  0xa2   :  { %8546 = vmatprep.subr.mxu1 %v13018_v0  ;;  %8529 = vmatprep.subr.mxu0 %v13018_v0 }
  0xa4   :  { %8518 = vmatmul.mubr.msk.f32.vlgmr.msra.gmra.mxu1 %vm185_vm3, %v178_v12  ;;  %8515 = vmatmul.mubr.msk.f32.vlgmr.msra.gmra.mxu0 %vm185_vm3, %v176_v13 }
  0xa5   :  { %8520 = vmatprep.mubr.msk.f32.mxu1 %vm9847_vm0, %v13018_v0  ;;  %8547 = vmatpush3.xpose.msk.msra.mxu1 %vm317_vm4, %v296_v14 }
  0xa6   :  { %8530 = vmatpush3.xpose.msk.msra.mxu0 %vm317_vm4, %v291_v15  ;;  %8531 = vmatprep.mubr.msk.f32.mxu0 %vm9847_vm0, %v13018_v0 }
  0xa7   :  { %8563 = vmatprep.subr.mxu0 %v13018_v0  ;;  %8580 = vmatprep.subr.mxu1 %v13018_v0 }
  0xa8   :  { %8521 = vmatmul.mubr.msk.f32.gmra.mxu1 %vm185_vm3, %v180_v11 }
  0xa9   :  { %8523 = vmatprep.mubr.msk.f32.mxu1 %vm9847_vm0, %v13018_v0 }
  0xac   :  { %8524 = vmatmul.mubr.msk.f32.gmra.mxu1 %vm185_vm3, %v182_v10 }
  0xad   :  { %8526 = vmatprep.mubr.msk.f32.mxu1 %vm9847_vm0, %v13018_v0 }
  0xb0   :  { %8527 = vmatmul.mubr.msk.f32.gmra.mxu1 %vm185_vm3, %v184_v9 }
  0xb1   :  { %8548 = vmatprep.mubr.msk.f32.mxu1 %vm9847_vm0, %v13018_v0 }
  0xe3   :  { %v151_v20 = vpop.f32.mrf.mxu0 }
  0xe4   :  { %v10000_v21 = vadd.f32 %v151_v20, %v64_v19 }
  0xe5   :  { %v8491_v22 = vpop.f32.mrf.mxu0 }
  0xe6   :  { %8532 = vmatmul.mubr.msk.f32.vlgmr.msra.gmra.mxu0 %vm317_vm4, %v10000_v21  ;;  %8549 = vmatmul.mubr.msk.f32.vlgmr.msra.gmra.mxu1 %vm317_vm4, %v10000_v21 }
  0xe7   :  { %v156_v24 = vpop.f32.mrf.mxu0  ;;  %8534 = vmatprep.mubr.msk.f32.mxu0 %vm9847_vm0, %v13018_v0  ;;  %8551 = vmatprep.mubr.msk.f32.mxu1 %vm9847_vm0, %v13018_v0 }
  0xe8   :  { %v10010_v25 = vadd.f32 %v156_v24, %v64_v19  ;;  %8564 = vmatpush3.xpose.msk.msra.mxu0 %vm317_vm4, %v301_v23  ;;  %v7597_v24 = vld [vmem:[%s13013_s3] ss:$0 sm:$0xff] }
  0xe9   :  { %v8494_v26 = vpop.f32.mrf.mxu0  ;;  %8605 = vmatprep.subr.mxu0 %v13018_v0 }
  0xea   :  { %8535 = vmatmul.mubr.msk.f32.gmra.mxu0 %vm317_vm4, %v10010_v25  ;;  %8552 = vmatmul.mubr.msk.f32.gmra.mxu1 %vm317_vm4, %v10010_v25 }
  0xeb   :  { %v161_v27 = vpop.f32.mrf.mxu0  ;;  %8537 = vmatprep.mubr.msk.f32.mxu0 %vm9847_vm0, %v13018_v0  ;;  %8554 = vmatprep.mubr.msk.f32.mxu1 %vm9847_vm0, %v13018_v0 }
  0xec   :  { %v10022_v28 = vadd.f32 %v161_v27, %v64_v19 }
  0xed   :  { %v8497_v29 = vpop.f32.mrf.mxu0 }
  0xee   :  { %8538 = vmatmul.mubr.msk.f32.gmra.mxu0 %vm317_vm4, %v10022_v28  ;;  %8555 = vmatmul.mubr.msk.f32.gmra.mxu1 %vm317_vm4, %v10022_v28 }
  0xef   :  { %v166_v30 = vpop.f32.mrf.mxu0  ;;  %8540 = vmatprep.mubr.msk.f32.mxu0 %vm9847_vm0, %v13018_v0  ;;  %8557 = vmatprep.mubr.msk.f32.mxu1 %vm9847_vm0, %v13018_v0 }
  0xf0   :  { %v10032_v31 = vadd.f32 %v166_v30, %v64_v19  ;;  %v7613_v30 = vld [vmem:[%s13013_s3 + $0x8] ss:$0 sm:$0xff] }
  0xf1   :  { %v8500_v32 = vpop.f32.mrf.mxu0 }
  0xf2   :  { %8541 = vmatmul.mubr.msk.f32.gmra.mxu0 %vm317_vm4, %v10032_v31  ;;  %8558 = vmatmul.mubr.msk.f32.gmra.mxu1 %vm317_vm4, %v10032_v31 }
  0xf3   :  { %v171_v33 = vpop.f32.mrf.mxu0  ;;  %8543 = vmatprep.mubr.msk.f32.mxu0 %vm9847_vm0, %v13018_v0  ;;  %8560 = vmatprep.mubr.msk.f32.mxu1 %vm9847_vm0, %v13018_v0 }
  0xf4   :  { %v10042_v34 = vadd.f32 %v171_v33, %v64_v19  ;;  %v297_v33 = vld [vmem:[#allocation3 + $0x28] sm:$0xff] }
  0xf5   :  { %v8503_v35 = vpop.f32.mrf.mxu0 }
  0xf6   :  { %8544 = vmatmul.mubr.msk.f32.gmra.mxu0 %vm317_vm4, %v10042_v34  ;;  %8561 = vmatmul.mubr.msk.f32.gmra.mxu1 %vm317_vm4, %v10042_v34 }
  0xf7   :  { %8565 = vmatprep.mubr.msk.f32.mxu0 %vm9847_vm0, %v13018_v0  ;;  %8590 = vmatprep.mubr.msk.f32.mxu1 %vm9847_vm0, %v13018_v0 }
  0xfa   :  { %8566 = vmatmul.mubr.msk.f32.vlgmr.msra.gmra.mxu0 %vm317_vm4, %v10000_v21 }
  0xfb   :  { %8568 = vmatprep.mubr.msk.f32.mxu0 %vm9847_vm0, %v13018_v0  ;;  %8606 = vmatpush3.xpose.msk.msra.mxu0 %vm317_vm4, %v292_v36 }
  0xfc   :  { %8639 = vmatprep.subr.mxu0 %v13018_v0 }
  0xfe   :  { %8569 = vmatmul.mubr.msk.f32.gmra.mxu0 %vm317_vm4, %v10010_v25 }
  0xff   :  { %8571 = vmatprep.mubr.msk.f32.mxu0 %vm9847_vm0, %v13018_v0 }
 0x102   :  { %8572 = vmatmul.mubr.msk.f32.gmra.mxu0 %vm317_vm4, %v10022_v28 }
 0x103   :  { %8574 = vmatprep.mubr.msk.f32.mxu0 %vm9847_vm0, %v13018_v0 }
 0x106   :  { %8575 = vmatmul.mubr.msk.f32.gmra.mxu0 %vm317_vm4, %v10032_v31 }
 0x107   :  { %8577 = vmatprep.mubr.msk.f32.mxu0 %vm9847_vm0, %v13018_v0 }
 0x10a   :  { %8578 = vmatmul.mubr.msk.f32.gmra.mxu0 %vm317_vm4, %v10042_v34 }
 0x10b   :  { %8607 = vmatprep.mubr.msk.f32.mxu0 %vm9847_vm0, %v13018_v0 }
 0x10e   :  { %8608 = vmatmul.mubr.msk.f32.vlgmr.msra.gmra.mxu0 %vm317_vm4, %v10000_v21 }
 0x10f   :  { %8610 = vmatprep.mubr.msk.f32.mxu0 %vm9847_vm0, %v13018_v0  ;;  %8640 = vmatpush3.xpose.msk.msra.mxu0 %vm317_vm4, %v302_v37 }
 0x110   :  { %8681 = vmatprep.subr.mxu0 %v13018_v0 }
 0x112   :  { %8611 = vmatmul.mubr.msk.f32.gmra.mxu0 %vm317_vm4, %v10010_v25 }
 0x113   :  { %8613 = vmatprep.mubr.msk.f32.mxu0 %vm9847_vm0, %v13018_v0 }
 0x116   :  { %8614 = vmatmul.mubr.msk.f32.gmra.mxu0 %vm317_vm4, %v10022_v28 }
 0x117   :  { %8616 = vmatprep.mubr.msk.f32.mxu0 %vm9847_vm0, %v13018_v0 }
 0x11a   :  { %8617 = vmatmul.mubr.msk.f32.gmra.mxu0 %vm317_vm4, %v10032_v31 }
 0x11b   :  { %8619 = vmatprep.mubr.msk.f32.mxu0 %vm9847_vm0, %v13018_v0 }
 0x11e   :  { %8620 = vmatmul.mubr.msk.f32.gmra.mxu0 %vm317_vm4, %v10042_v34 }
 0x11f   :  { %8641 = vmatprep.mubr.msk.f32.mxu0 %vm9847_vm0, %v13018_v0 }
 0x122   :  { %8642 = vmatmul.mubr.msk.f32.vlgmr.msra.gmra.mxu0 %vm317_vm4, %v10000_v21 }
 0x123   :  { %8644 = vmatprep.mubr.msk.f32.mxu0 %vm9847_vm0, %v13018_v0  ;;  %8682 = vmatpush3.xpose.msk.msra.mxu0 %vm317_vm4, %v293_v38 }
 0x124   :  { %8715 = vmatprep.subr.mxu0 %v13018_v0 }
 0x126   :  { %8645 = vmatmul.mubr.msk.f32.gmra.mxu0 %vm317_vm4, %v10010_v25 }
 0x127   :  { %8647 = vmatprep.mubr.msk.f32.mxu0 %vm9847_vm0, %v13018_v0 }
 0x12a   :  { %8648 = vmatmul.mubr.msk.f32.gmra.mxu0 %vm317_vm4, %v10022_v28 }
 0x12b   :  { %8650 = vmatprep.mubr.msk.f32.mxu0 %vm9847_vm0, %v13018_v0 }
 0x12e   :  { %8651 = vmatmul.mubr.msk.f32.gmra.mxu0 %vm317_vm4, %v10032_v31 }
 0x12f   :  { %8653 = vmatprep.mubr.msk.f32.mxu0 %vm9847_vm0, %v13018_v0 }
 0x132   :  { %8654 = vmatmul.mubr.msk.f32.gmra.mxu0 %vm317_vm4, %v10042_v34 }
 0x133   :  { %8683 = vmatprep.mubr.msk.f32.mxu0 %vm9847_vm0, %v13018_v0 }
 0x136   :  { %8684 = vmatmul.mubr.msk.f32.vlgmr.msra.gmra.mxu0 %vm317_vm4, %v10000_v21 }
 0x137   :  { %8686 = vmatprep.mubr.msk.f32.mxu0 %vm9847_vm0, %v13018_v0  ;;  %8716 = vmatpush3.xpose.msk.msra.mxu0 %vm317_vm4, %v303_v39 }
 0x138   :  { %8757 = vmatprep.subr.mxu0 %v13018_v0 }
 0x13a   :  { %8687 = vmatmul.mubr.msk.f32.gmra.mxu0 %vm317_vm4, %v10010_v25 }
 0x13b   :  { %8689 = vmatprep.mubr.msk.f32.mxu0 %vm9847_vm0, %v13018_v0 }
 0x13e   :  { %8690 = vmatmul.mubr.msk.f32.gmra.mxu0 %vm317_vm4, %v10022_v28 }
 0x13f   :  { %8692 = vmatprep.mubr.msk.f32.mxu0 %vm9847_vm0, %v13018_v0 }
 0x142   :  { %8693 = vmatmul.mubr.msk.f32.gmra.mxu0 %vm317_vm4, %v10032_v31 }
 0x143   :  { %8695 = vmatprep.mubr.msk.f32.mxu0 %vm9847_vm0, %v13018_v0 }
 0x146   :  { %8696 = vmatmul.mubr.msk.f32.gmra.mxu0 %vm317_vm4, %v10042_v34 }
 0x147   :  { %8717 = vmatprep.mubr.msk.f32.mxu0 %vm9847_vm0, %v13018_v0 }
 0x14a   :  { %8718 = vmatmul.mubr.msk.f32.vlgmr.msra.gmra.mxu0 %vm317_vm4, %v10000_v21 }
 0x14b   :  { %8720 = vmatprep.mubr.msk.f32.mxu0 %vm9847_vm0, %v13018_v0  ;;  %8758 = vmatpush3.xpose.msk.msra.mxu0 %vm317_vm4, %v294_v40 }
 0x14c   :  { %8791 = vmatprep.subr.mxu0 %v13018_v0 }
 0x14e   :  { %8721 = vmatmul.mubr.msk.f32.gmra.mxu0 %vm317_vm4, %v10010_v25 }
 0x14f   :  { %8723 = vmatprep.mubr.msk.f32.mxu0 %vm9847_vm0, %v13018_v0 }
 0x152   :  { %8724 = vmatmul.mubr.msk.f32.gmra.mxu0 %vm317_vm4, %v10022_v28 }
 0x153   :  { %8726 = vmatprep.mubr.msk.f32.mxu0 %vm9847_vm0, %v13018_v0 }
 0x156   :  { %8727 = vmatmul.mubr.msk.f32.gmra.mxu0 %vm317_vm4, %v10032_v31 }
 0x157   :  { %8729 = vmatprep.mubr.msk.f32.mxu0 %vm9847_vm0, %v13018_v0 }
 0x15a   :  { %8730 = vmatmul.mubr.msk.f32.gmra.mxu0 %vm317_vm4, %v10042_v34 }
 0x15b   :  { %8759 = vmatprep.mubr.msk.f32.mxu0 %vm9847_vm0, %v13018_v0 }
 0x15e   :  { %8760 = vmatmul.mubr.msk.f32.vlgmr.msra.gmra.mxu0 %vm317_vm4, %v10000_v21 }
 0x15f   :  { %8762 = vmatprep.mubr.msk.f32.mxu0 %vm9847_vm0, %v13018_v0  ;;  %8792 = vmatpush3.xpose.msk.msra.mxu0 %vm317_vm4, %v304_v41 }
 0x160   :  { %8833 = vmatprep.subr.mxu0 %v13018_v0 }
 0x162   :  { %8763 = vmatmul.mubr.msk.f32.gmra.mxu0 %vm317_vm4, %v10010_v25 }
 0x163   :  { %8765 = vmatprep.mubr.msk.f32.mxu0 %vm9847_vm0, %v13018_v0 }
 0x164   :  { %v10174_v42 = vpop.f32.mrf.mxu1  ;;  %v10176_v43 = vpop.f32.mrf.mxu0 }
 0x165   :  { %vm286_vm6 = vcmp.gt.f32.partialorder %v10176_v43, 0.5  ;;  %vm287_vm7 = vcmp.gt.f32.partialorder %v10174_v42, 0.5 }
 0x166   :  { %8766 = vmatmul.mubr.msk.f32.gmra.mxu0 %vm317_vm4, %v10022_v28  ;;  %v8519_v44 = vpop.f32.mrf.mxu1  ;;  %v8516_v45 = vpop.f32.mrf.mxu0 }
 0x167   :  { %8768 = vmatprep.mubr.msk.f32.mxu0 %vm9847_vm0, %v13018_v0 }
 0x168   :  { %v10182_v46 = vpop.f32.mrf.mxu1 }
 0x169   :  { %vm288_vm8 = vcmp.gt.f32.partialorder %v10182_v46, 0.5 }
 0x16a   :  { %8769 = vmatmul.mubr.msk.f32.gmra.mxu0 %vm317_vm4, %v10032_v31  ;;  %v8522_v47 = vpop.f32.mrf.mxu1 }
 0x16b   :  { %8771 = vmatprep.mubr.msk.f32.mxu0 %vm9847_vm0, %v13018_v0 }
 0x16c   :  { %v10188_v48 = vpop.f32.mrf.mxu1 }
 0x16d   :  { %vm289_vm9 = vcmp.gt.f32.partialorder %v10188_v48, 0.5 }
 0x16e   :  { %8772 = vmatmul.mubr.msk.f32.gmra.mxu0 %vm317_vm4, %v10042_v34  ;;  %v8525_v49 = vpop.f32.mrf.mxu1 }
 0x16f   :  { %8793 = vmatprep.mubr.msk.f32.mxu0 %vm9847_vm0, %v13018_v0 }
 0x170   :  { %v10194_v50 = vpop.f32.mrf.mxu1 }
 0x171   :  { %vm290_vm10 = vcmp.gt.f32.partialorder %v10194_v50, 0.5 }
 0x172   :  { %8794 = vmatmul.mubr.msk.f32.vlgmr.msra.gmra.mxu0 %vm317_vm4, %v10000_v21  ;;  %v8528_v51 = vpop.f32.mrf.mxu1 }
 0x173   :  { %8796 = vmatprep.mubr.msk.f32.mxu0 %vm9847_vm0, %v13018_v0 }
 0x176   :  { %8797 = vmatmul.mubr.msk.f32.gmra.mxu0 %vm317_vm4, %v10010_v25 }
 0x177   :  { %8799 = vmatprep.mubr.msk.f32.mxu0 %vm9847_vm0, %v13018_v0 }
 0x17a   :  { %8800 = vmatmul.mubr.msk.f32.gmra.mxu0 %vm317_vm4, %v10022_v28 }
 0x17b   :  { %8802 = vmatprep.mubr.msk.f32.mxu0 %vm9847_vm0, %v13018_v0 }
 0x17e   :  { %8803 = vmatmul.mubr.msk.f32.gmra.mxu0 %vm317_vm4, %v10032_v31 }
 0x17f   :  { %8805 = vmatprep.mubr.msk.f32.mxu0 %vm9847_vm0, %v13018_v0 }
 0x182   :  { %8806 = vmatmul.mubr.msk.f32.gmra.mxu0 %vm317_vm4, %v10042_v34 }
 0x183   :  { %8843 = vmatprep.mubr.msk.f32.mxu0 %vm9847_vm0, %v13018_v0 }
 0x1a6   :  { %v402_v52 = vpop.f32.mrf.mxu0  ;;  %v503_v53 = vpop.f32.mrf.mxu1 }
 0x1a7   :  { %v504_v26 = vadd.f32 %v7605_v5, %v503_v53  ;;  %v403_v29 = vadd.f32 %v7597_v24, %v402_v52 }
 0x1a8   :  { %v8533_v54 = vpop.f32.mrf.mxu0  ;;  %v8550_v55 = vpop.f32.mrf.mxu1 }
 0x1aa   :  { %v407_v56 = vpop.f32.mrf.mxu0  ;;  %v508_v57 = vpop.f32.mrf.mxu1 }
 0x1ab   :  { %v509_v20 = vadd.f32 %v7605_v5, %v508_v57  ;;  %v408_v38 = vadd.f32 %v7597_v24, %v407_v56 }
 0x1ac   :  { %v8536_v58 = vpop.f32.mrf.mxu0  ;;  %v8553_v59 = vpop.f32.mrf.mxu1 }
 0x1ae   :  { %v412_v60 = vpop.f32.mrf.mxu0  ;;  %v513_v61 = vpop.f32.mrf.mxu1 }
 0x1af   :  { %v514_v15 = vadd.f32 %v7605_v5, %v513_v61  ;;  %v413_v45 = vadd.f32 %v7597_v24, %v412_v60 }
 0x1b0   :  { %v8539_v62 = vpop.f32.mrf.mxu0  ;;  %v8556_v63 = vpop.f32.mrf.mxu1 }
 0x1b2   :  { %v10214_v1 = vpop.f32.mrf.mxu0  ;;  %v518_v2 = vpop.f32.mrf.mxu1 }
 0x1b3   :  { %v519_v12 = vadd.f32 %v7605_v5, %v518_v2  ;;  %v418_v52 = vadd.f32 %v7597_v24, %v10214_v1 }
 0x1b4   :  { %v8542_v3 = vpop.f32.mrf.mxu0  ;;  %v8559_v4 = vpop.f32.mrf.mxu1 }
 0x1b6   :  { %v10219_v6 = vpop.f32.mrf.mxu0  ;;  %v523_v7 = vpop.f32.mrf.mxu1 }
 0x1b7   :  { %v524_v8 = vadd.f32 %v7605_v5, %v523_v7  ;;  %v423_v55 = vadd.f32 %v7597_v24, %v10219_v6 }
 0x1b8   :  { %v8545_v9 = vpop.f32.mrf.mxu0  ;;  %v8562_v10 = vpop.f32.mrf.mxu1 }
 0x1b9   :  { %8581 = vmatpush3.xpose.msk.msra.mxu1 %vm185_vm3, %v524_v8 }
 0x1ba   :  { %v604_v11 = vpop.f32.mrf.mxu0  ;;  %8582 = vmatprep.subr.mxu1 %v13018_v0 }
 0x1bb   :  { %v605_v49 = vadd.f32 %v7613_v30, %v604_v11 }
 0x1bc   :  { %v8567_v13 = vpop.f32.mrf.mxu0 }
 0x1bd   :  { %8583 = vmatpush3.xpose.msk.msra.mxu1 %vm185_vm3, %v519_v12 }
 0x1be   :  { %v609_v14 = vpop.f32.mrf.mxu0  ;;  %8584 = vmatprep.subr.mxu1 %v13018_v0 }
 0x1bf   :  { %v610_v44 = vadd.f32 %v7613_v30, %v609_v14 }
 0x1c0   :  { %v8570_v16 = vpop.f32.mrf.mxu0 }
 0x1c1   :  { %8585 = vmatpush3.xpose.msk.msra.mxu1 %vm185_vm3, %v514_v15 }
 0x1c2   :  { %v614_v19 = vpop.f32.mrf.mxu0  ;;  %8586 = vmatprep.subr.mxu1 %v13018_v0 }
 0x1c3   :  { %v615_v40 = vadd.f32 %v7613_v30, %v614_v19 }
 0x1c4   :  { %v8573_v22 = vpop.f32.mrf.mxu0 }
 0x1c5   :  { %8587 = vmatpush3.xpose.msk.msra.mxu1 %vm185_vm3, %v509_v20 }
 0x1c6   :  { %v619_v23 = vpop.f32.mrf.mxu0  ;;  %8588 = vmatprep.subr.mxu1 %v13018_v0 }
 0x1c7   :  { %v620_v37 = vadd.f32 %v7613_v30, %v619_v23 }
 0x1c8   :  { %v8576_v27 = vpop.f32.mrf.mxu0 }
 0x1c9   :  { %8589 = vmatpush3.xpose.msk.msra.mxu1 %vm185_vm3, %v504_v26 }
 0x1ca   :  { %v624_v32 = vpop.f32.mrf.mxu0  ;;  %8622 = vmatprep.subr.mxu1 %v13018_v0 }
 0x1cb   :  { %v625_v35 = vadd.f32 %v7613_v30, %v624_v32 }
 0x1cc   :  { %v8579_v36 = vpop.f32.mrf.mxu0  ;;  %8591 = vmatmul.mubr.msk.f32.vlgmr.msra.gmra.mxu1 %vm185_vm3, %v403_v29 }
 0x1cd   :  { %8623 = vmatpush3.xpose.msk.msra.mxu1 %vm317_vm4, %v297_v33  ;;  %8834 = vmatpush3.msra.mxu0 %v625_v35 }
 0x1ce   :  { %v10239_v39 = vpop.f32.mrf.mxu0  ;;  %8835 = vmatprep.subr.mxu0 %v13018_v0  ;;  %8593 = vmatprep.mubr.msk.f32.mxu1 %vm9847_vm0, %v13018_v0 }
 0x1cf   :  { %8836 = vmatpush3.msra.mxu0 %v620_v37  ;;  %8656 = vmatprep.subr.mxu1 %v13018_v0 }
 0x1d0   :  { %8594 = vmatmul.mubr.msk.f32.gmra.mxu1 %vm185_vm3, %v408_v38  ;;  %v8609_v41 = vpop.f32.mrf.mxu0  ;;  %8837 = vmatprep.subr.mxu0 %v13018_v0 }
 0x1d1   :  { %8838 = vmatpush3.msra.mxu0 %v615_v40  ;;  %8596 = vmatprep.mubr.msk.f32.mxu1 %vm9847_vm0, %v13018_v0 }
 0x1d2   :  { %v10249_v47 = vpop.f32.mrf.mxu0  ;;  %8839 = vmatprep.subr.mxu0 %v13018_v0 }
 0x1d3   :  { %8840 = vmatpush3.msra.mxu0 %v610_v44 }
 0x1d4   :  { %8597 = vmatmul.mubr.msk.f32.gmra.mxu1 %vm185_vm3, %v413_v45  ;;  %v8612_v51 = vpop.f32.mrf.mxu0  ;;  %8841 = vmatprep.subr.mxu0 %v13018_v0 }
 0x1d5   :  { %8842 = vmatpush3.msra.mxu0 %v605_v49  ;;  %8599 = vmatprep.mubr.msk.f32.mxu1 %vm9847_vm0, %v13018_v0 }
 0x1d6   :  { %v10257_v53 = vpop.f32.mrf.mxu0  ;;  %8883 = vmatprep.subr.mxu0 %v13018_v0 }
 0x1d8   :  { %8600 = vmatmul.mubr.msk.f32.gmra.mxu1 %vm185_vm3, %v418_v52  ;;  %v8615_v54 = vpop.f32.mrf.mxu0 }
 0x1d9   :  { %8602 = vmatprep.mubr.msk.f32.mxu1 %vm9847_vm0, %v13018_v0 }
 0x1da   :  { %v10264_v56 = vpop.f32.mrf.mxu0 }
 0x1dc   :  { %8603 = vmatmul.mubr.msk.f32.gmra.mxu1 %vm185_vm3, %v423_v55  ;;  %v8618_v57 = vpop.f32.mrf.mxu0 }
 0x1dd   :  { %8624 = vmatprep.mubr.msk.f32.mxu1 %vm9847_vm0, %v13018_v0 }
 0x1de   :  { %v10269_v58 = vpop.f32.mrf.mxu0 }
 0x1e0   :  { %v8621_v59 = vpop.f32.mrf.mxu0  ;;  %8625 = vmatmul.mubr.msk.f32.vlgmr.msra.gmra.mxu1 %vm317_vm4, %v10000_v21 }
 0x1e1   :  { %8627 = vmatprep.mubr.msk.f32.mxu1 %vm9847_vm0, %v13018_v0 }
 0x1e2   :  { %v10275_v60 = vpop.f32.mrf.mxu0 }
 0x1e4   :  { %8628 = vmatmul.mubr.msk.f32.gmra.mxu1 %vm317_vm4, %v10010_v25  ;;  %v8643_v61 = vpop.f32.mrf.mxu0 }
 0x1e5   :  { %8630 = vmatprep.mubr.msk.f32.mxu1 %vm9847_vm0, %v13018_v0 }
 0x1e6   :  { %v10281_v62 = vpop.f32.mrf.mxu0 }
 0x1e8   :  { %8631 = vmatmul.mubr.msk.f32.gmra.mxu1 %vm317_vm4, %v10022_v28  ;;  %v8646_v63 = vpop.f32.mrf.mxu0 }
 0x1e9   :  { %8633 = vmatprep.mubr.msk.f32.mxu1 %vm9847_vm0, %v13018_v0 }
 0x1ea   :  { %v10287_v1 = vpop.f32.mrf.mxu0 }
 0x1ec   :  { %8634 = vmatmul.mubr.msk.f32.gmra.mxu1 %vm317_vm4, %v10032_v31  ;;  %v8649_v2 = vpop.f32.mrf.mxu0 }
 0x1ed   :  { %8636 = vmatprep.mubr.msk.f32.mxu1 %vm9847_vm0, %v13018_v0 }
 0x1ee   :  { %v10293_v3 = vpop.f32.mrf.mxu0 }
 0x1f0   :  { %8637 = vmatmul.mubr.msk.f32.gmra.mxu1 %vm317_vm4, %v10042_v34  ;;  %v8652_v4 = vpop.f32.mrf.mxu0 }
 0x1f1   :  { %8666 = vmatprep.mubr.msk.f32.mxu1 %vm9847_vm0, %v13018_v0 }
 0x1f2   :  { %v10299_v5 = vpop.f32.mrf.mxu0 }
 0x1f4   :  { %v8655_v6 = vpop.f32.mrf.mxu0 }
 0x1f6   :  { %v10301_v7 = vpop.f32.mrf.mxu0 }
 0x1f8   :  { %v8685_v8 = vpop.f32.mrf.mxu0 }
 0x1fa   :  { %v10303_v9 = vpop.f32.mrf.mxu0 }
 0x1fc   :  { %v8688_v10 = vpop.f32.mrf.mxu0 }
 0x1fe   :  { %v10305_v11 = vpop.f32.mrf.mxu0 }
 0x200   :  { %v8691_v12 = vpop.f32.mrf.mxu0 }
 0x202   :  { %v10307_v13 = vpop.f32.mrf.mxu0 }
 0x204   :  { %v8694_v14 = vpop.f32.mrf.mxu0 }
 0x206   :  { %v10309_v15 = vpop.f32.mrf.mxu0 }
 0x208   :  { %v8697_v16 = vpop.f32.mrf.mxu0 }
 0x20a   :  { %v10311_v19 = vpop.f32.mrf.mxu0 }
 0x20c   :  { %v8719_v20 = vpop.f32.mrf.mxu0 }
 0x20e   :  { %v10313_v22 = vpop.f32.mrf.mxu0 }
 0x210   :  { %v8722_v23 = vpop.f32.mrf.mxu0 }
 0x212   :  { %v10315_v24 = vpop.f32.mrf.mxu0 }
 0x214   :  { %v8725_v26 = vpop.f32.mrf.mxu0 }
 0x216   :  { %v10317_v27 = vpop.f32.mrf.mxu0 }
 0x218   :  { %v8728_v29 = vpop.f32.mrf.mxu0 }
 0x21a   :  { %v10319_v30 = vpop.f32.mrf.mxu0 }
 0x21c   :  { %v8731_v32 = vpop.f32.mrf.mxu0 }
 0x21e   :  { %v10321_v33 = vpop.f32.mrf.mxu0 }
 0x220   :  { %v8761_v35 = vpop.f32.mrf.mxu0 }
 0x222   :  { %v10323_v36 = vpop.f32.mrf.mxu0 }
 0x224   :  { %v8764_v37 = vpop.f32.mrf.mxu0 }
 0x226   :  { %v10325_v38 = vpop.f32.mrf.mxu0 }
 0x228   :  { %v8767_v40 = vpop.f32.mrf.mxu0 }
 0x22a   :  { %v10327_v41 = vpop.f32.mrf.mxu0 }
 0x22c   :  { %v8770_v44 = vpop.f32.mrf.mxu0 }
 0x22e   :  { %v10329_v45 = vpop.f32.mrf.mxu0 }
 0x230   :  { %v8773_v49 = vpop.f32.mrf.mxu0 }
 0x232   :  { %v10331_v51 = vpop.f32.mrf.mxu0 }
 0x234   :  { %v8795_v52 = vpop.f32.mrf.mxu0 }
 0x236   :  { %v10333_v54 = vpop.f32.mrf.mxu0 }
 0x238   :  { %v8798_v55 = vpop.f32.mrf.mxu0 }
 0x23a   :  { %v10335_v57 = vpop.f32.mrf.mxu0 }
 0x23c   :  { %v8801_v59 = vpop.f32.mrf.mxu0 }
 0x23e   :  { %v10337_v61 = vpop.f32.mrf.mxu0 }
 0x240   :  { %v8804_v63 = vpop.f32.mrf.mxu0 }
 0x242   :  { %v10339_v2 = vpop.f32.mrf.mxu0 }
 0x244   :  { %v8807_v4 = vpop.f32.mrf.mxu0 }
 0x28c   :  { %v724_v6 = vpop.f32.mrf.mxu1 }
 0x28d   :  { %v10341_v8 = vmul.f32 0.35355338, %v724_v6 }
 0x28e   :  { %v8592_v10 = vpop.f32.mrf.mxu1 }
 0x28f   :  { %v753_v12 = vsel %vm286_vm6, %v10341_v8, -1e+30 }
 0x290   :  { %759 = vst.msk [vmem:[#allocation2] sm:$0xff] %vm758_vm5, %v753_v12  ;;  %v729_v14 = vpop.f32.mrf.mxu1 }
 0x291   :  { %v10348_v16 = vmul.f32 0.35355338, %v729_v14 }
 0x292   :  { %v8595_v20 = vpop.f32.mrf.mxu1 }
 0x293   :  { %v754_v23 = vsel %vm287_vm7, %v10348_v16, -1e+30 }
 0x294   :  { %760 = vst.msk [vmem:[#allocation2 + $0x8] sm:$0xff] %vm758_vm5, %v754_v23  ;;  %v734_v26 = vpop.f32.mrf.mxu1 }
 0x295   :  { %v10355_v29 = vmul.f32 0.35355338, %v734_v26 }
 0x296   :  { %v8598_v32 = vpop.f32.mrf.mxu1 }
 0x297   :  { %v755_v35 = vsel %vm288_vm8, %v10355_v29, -1e+30  ;;  %v7639_v32 = vld [vmem:[%s13013_s3 + $0x5] ss:$0 sm:$0xff] }
 0x298   :  { %761 = vst.msk [vmem:[#allocation2 + $0x10] sm:$0xff] %vm758_vm5, %v755_v35  ;;  %v739_v37 = vpop.f32.mrf.mxu1 }
 0x299   :  { %v10362_v40 = vmul.f32 0.35355338, %v739_v37 }
 0x29a   :  { %v8601_v44 = vpop.f32.mrf.mxu1 }
 0x29b   :  { %13076 = vst [vmem:[#allocation11_spill] sm:$0xff] %v10362_v40  ;;  %v756_v49 = vsel %vm289_vm9, %v10362_v40, -1e+30 }
 0x29c   :  { %762 = vst.msk [vmem:[#allocation2 + $0x18] sm:$0xff] %vm758_vm5, %v756_v49  ;;  %v744_v52 = vpop.f32.mrf.mxu1 }
 0x29d   :  { %v10369_v55 = vmul.f32 0.35355338, %v744_v52 }
 0x29e   :  { %v8604_v59 = vpop.f32.mrf.mxu1 }
 0x29f   :  { %13077 = vst [vmem:[#allocation12_spill] sm:$0xff] %v10369_v55  ;;  %v757_v63 = vsel %vm290_vm10, %v10369_v55, -1e+30 }
 0x2a0   :  { %763 = vst.msk [vmem:[#allocation2 + $0x20] sm:$0xff] %vm758_vm5, %v757_v63  ;;  %v942_v4 = vpop.f32.mrf.mxu1  ;;  %v7631_v63 = vld [vmem:[%s13013_s3 + $0x1] ss:$0 sm:$0xff] }
 0x2a2   :  { %v8626_v6 = vpop.f32.mrf.mxu1 }
 0x2a3   :  { %v943_v6 = vadd.f32 %v7639_v32, %v942_v4  ;;  %v857_v4 = vadd.f32 %v7631_v63, %v10264_v56 }
 0x2a4   :  { %v947_v10 = vpop.f32.mrf.mxu1 }
 0x2a5   :  { %v948_v59 = vadd.f32 %v7639_v32, %v947_v10  ;;  %v847_v10 = vadd.f32 %v7631_v63, %v10249_v47  ;;  %v862_v47 = vadd.f32 %v7631_v63, %v10269_v58 }
 0x2a6   :  { %v8629_v12 = vpop.f32.mrf.mxu1 }
 0x2a7   :  { %v842_v12 = vadd.f32 %v7631_v63, %v10239_v39  ;;  %v852_v39 = vadd.f32 %v7631_v63, %v10257_v53 }
 0x2a8   :  { %v952_v14 = vpop.f32.mrf.mxu1 }
 0x2a9   :  { %v953_v52 = vadd.f32 %v7639_v32, %v952_v14  ;;  %v298_v14 = vld [vmem:[#allocation3 + $0x30] sm:$0xff] }
 0x2aa   :  { %v8632_v20 = vpop.f32.mrf.mxu1 }
 0x2ac   :  { %v957_v23 = vpop.f32.mrf.mxu1 }
 0x2ad   :  { %v958_v49 = vadd.f32 %v7639_v32, %v957_v23 }
 0x2ae   :  { %v8635_v26 = vpop.f32.mrf.mxu1 }
 0x2b0   :  { %v962_v35 = vpop.f32.mrf.mxu1 }
 0x2b1   :  { %v963_v37 = vadd.f32 %v7639_v32, %v962_v35 }
 0x2b2   :  { %v8638_v44 = vpop.f32.mrf.mxu1 }
 0x2b3   :  { %8657 = vmatpush3.xpose.msk.msra.mxu1 %vm185_vm3, %v963_v37 }
 0x2b4   :  { %8658 = vmatprep.subr.mxu1 %v13018_v0 }
 0x2b7   :  { %8659 = vmatpush3.xpose.msk.msra.mxu1 %vm185_vm3, %v958_v49 }
 0x2b8   :  { %8660 = vmatprep.subr.mxu1 %v13018_v0 }
 0x2bb   :  { %8661 = vmatpush3.xpose.msk.msra.mxu1 %vm185_vm3, %v953_v52 }
 0x2bc   :  { %8662 = vmatprep.subr.mxu1 %v13018_v0 }
 0x2bf   :  { %8663 = vmatpush3.xpose.msk.msra.mxu1 %vm185_vm3, %v948_v59 }
 0x2c0   :  { %8664 = vmatprep.subr.mxu1 %v13018_v0 }
 0x2c3   :  { %8665 = vmatpush3.xpose.msk.msra.mxu1 %vm185_vm3, %v943_v6 }
 0x2c4   :  { %8698 = vmatprep.subr.mxu1 %v13018_v0 }
 0x2c6   :  { %8667 = vmatmul.mubr.msk.f32.vlgmr.msra.gmra.mxu1 %vm185_vm3, %v842_v12 }
 0x2c7   :  { %8699 = vmatpush3.xpose.msk.msra.mxu1 %vm317_vm4, %v298_v14  ;;  %8669 = vmatprep.mubr.msk.f32.mxu1 %vm9847_vm0, %v13018_v0 }
 0x2c8   :  { %8732 = vmatprep.subr.mxu1 %v13018_v0 }
 0x2ca   :  { %8670 = vmatmul.mubr.msk.f32.gmra.mxu1 %vm185_vm3, %v847_v10 }
 0x2cb   :  { %8672 = vmatprep.mubr.msk.f32.mxu1 %vm9847_vm0, %v13018_v0 }
 0x2ce   :  { %8673 = vmatmul.mubr.msk.f32.gmra.mxu1 %vm185_vm3, %v852_v39 }
 0x2cf   :  { %8675 = vmatprep.mubr.msk.f32.mxu1 %vm9847_vm0, %v13018_v0 }
 0x2d2   :  { %8676 = vmatmul.mubr.msk.f32.gmra.mxu1 %vm185_vm3, %v857_v4 }
 0x2d3   :  { %8678 = vmatprep.mubr.msk.f32.mxu1 %vm9847_vm0, %v13018_v0 }
 0x2d6   :  { %8679 = vmatmul.mubr.msk.f32.gmra.mxu1 %vm185_vm3, %v862_v47 }
 0x2d7   :  { %8700 = vmatprep.mubr.msk.f32.mxu1 %vm9847_vm0, %v13018_v0 }
 0x2da   :  { %8701 = vmatmul.mubr.msk.f32.vlgmr.msra.gmra.mxu1 %vm317_vm4, %v10000_v21 }
 0x2db   :  { %8703 = vmatprep.mubr.msk.f32.mxu1 %vm9847_vm0, %v13018_v0 }
 0x2de   :  { %8704 = vmatmul.mubr.msk.f32.gmra.mxu1 %vm317_vm4, %v10010_v25 }
 0x2df   :  { %8706 = vmatprep.mubr.msk.f32.mxu1 %vm9847_vm0, %v13018_v0 }
 0x2e2   :  { %8707 = vmatmul.mubr.msk.f32.gmra.mxu1 %vm317_vm4, %v10022_v28 }
 0x2e3   :  { %8709 = vmatprep.mubr.msk.f32.mxu1 %vm9847_vm0, %v13018_v0 }
 0x2e6   :  { %8710 = vmatmul.mubr.msk.f32.gmra.mxu1 %vm317_vm4, %v10032_v31 }
 0x2e7   :  { %8712 = vmatprep.mubr.msk.f32.mxu1 %vm9847_vm0, %v13018_v0 }
 0x2ea   :  { %8713 = vmatmul.mubr.msk.f32.gmra.mxu1 %vm317_vm4, %v10042_v34 }
 0x2eb   :  { %8742 = vmatprep.mubr.msk.f32.mxu1 %vm9847_vm0, %v13018_v0 }
 0x386   :  { %v1163_v53 = vpop.f32.mrf.mxu1 }
 0x387   :  { %v10434_v56 = vmul.f32 0.35355338, %v1163_v53 }
 0x388   :  { %v8668_v58 = vpop.f32.mrf.mxu1 }
 0x389   :  { %13078 = vst [vmem:[#allocation13_spill] sm:$0xff] %v10434_v56  ;;  %v1192_v20 = vsel %vm286_vm6, %v10434_v56, -1e+30 }
 0x38a   :  { %1197 = vst.msk [vmem:[#allocation2 + $0x28] sm:$0xff] %vm758_vm5, %v1192_v20  ;;  %v1168_v23 = vpop.f32.mrf.mxu1 }
 0x38b   :  { %v10440_v26 = vmul.f32 0.35355338, %v1168_v23 }
 0x38c   :  { %v8671_v32 = vpop.f32.mrf.mxu1 }
 0x38d   :  { %13079 = vst [vmem:[#allocation14_spill] sm:$0xff] %v10440_v26  ;;  %v1193_v35 = vsel %vm287_vm7, %v10440_v26, -1e+30 }
 0x38e   :  { %1198 = vst.msk [vmem:[#allocation2 + $0x30] sm:$0xff] %vm758_vm5, %v1193_v35  ;;  %v1173_v37 = vpop.f32.mrf.mxu1 }
 0x38f   :  { %v10446_v44 = vmul.f32 0.35355338, %v1173_v37 }
 0x390   :  { %v8674_v49 = vpop.f32.mrf.mxu1 }
 0x391   :  { %13080 = vst [vmem:[#allocation15_spill] sm:$0xff] %v10446_v44  ;;  %v1194_v52 = vsel %vm288_vm8, %v10446_v44, -1e+30  ;;  %v10451_v59 = vld [vmem:[#allocation2 + $0x28] sm:$0xff] }
 0x392   :  { %1199 = vst.msk [vmem:[#allocation2 + $0x38] sm:$0xff] %vm758_vm5, %v1194_v52  ;;  %v1178_v63 = vpop.f32.mrf.mxu1  ;;  %v2113_v6 = vsel %vm758_vm5, %v10451_v59, -inf }
 0x393   :  { %v10456_v12 = vmul.f32 0.35355338, %v1178_v63  ;;  %2114 = vmax.xlane.f32.xlu1 %v2113_v6 }
 0x394   :  { %v8677_v14 = vpop.f32.mrf.mxu1 }
 0x395   :  { %13081 = vst [vmem:[#allocation16_spill] sm:$0xff] %v10456_v12  ;;  %v1195_v10 = vsel %vm289_vm9, %v10456_v12, -1e+30  ;;  %v10461_v39 = vld [vmem:[#allocation2 + $0x30] sm:$0xff] }
 0x396   :  { %1200 = vst.msk [vmem:[#allocation2 + $0x40] sm:$0xff] %vm758_vm5, %v1195_v10  ;;  %v1183_v4 = vpop.f32.mrf.mxu1  ;;  %v2116_v47 = vsel %vm758_vm5, %v10461_v39, -inf }
 0x397   :  { %v10466_v53 = vmul.f32 0.35355338, %v1183_v4  ;;  %2117 = vmax.xlane.f32.xlu0 %v2116_v47 }
 0x398   :  { %v8680_v58 = vpop.f32.mrf.mxu1 }
 0x399   :  { %13082 = vst [vmem:[#allocation17_spill] sm:$0xff] %v10466_v53  ;;  %v1196_v20 = vsel %vm290_vm10, %v10466_v53, -1e+30  ;;  %v10471_v23 = vld [vmem:[#allocation2 + $0x38] sm:$0xff] }
 0x39a   :  { %1201 = vst.msk [vmem:[#allocation2 + $0x48] sm:$0xff] %vm758_vm5, %v1196_v20  ;;  %v1380_v32 = vpop.f32.mrf.mxu1  ;;  %v2119_v35 = vsel %vm758_vm5, %v10471_v23, -inf }
 0x39b   :  { %2120 = vmax.xlane.f32.xlu0 %v2119_v35  ;;  %v7673_v35 = vld [vmem:[%s13013_s3 + $0x6] ss:$0 sm:$0xff] }
 0x39c   :  { %v8702_v37 = vpop.f32.mrf.mxu1 }
 0x39d   :  { %v10476_v49 = vld [vmem:[#allocation2 + $0x40] sm:$0xff] }
 0x39e   :  { %v1385_v52 = vpop.f32.mrf.mxu1  ;;  %v2122_v63 = vsel %vm758_vm5, %v10476_v49, -inf }
 0x39f   :  { %2123 = vmax.xlane.f32.xlu1 %v2122_v63  ;;  %v13083_v63 = vmov 0.0  }
 0x3a0   :  { %v8705_v6 = vpop.f32.mrf.mxu1 }
 0x3a1   :  { %v10480_v14 = vld [vmem:[#allocation2 + $0x48] sm:$0xff] }
 0x3a2   :  { %v1390_v10 = vpop.f32.mrf.mxu1  ;;  %v2125_v4 = vsel %vm758_vm5, %v10480_v14, -inf }
 0x3a3   :  { %2126 = vmax.xlane.f32.xlu0 %v2125_v4  ;;  %v1391_v4 = vadd.f32 %v7673_v35, %v1390_v10  ;;  %v299_v10 = vld [vmem:[#allocation3 + $0x38] sm:$0xff] }
 0x3a4   :  { %v8708_v47 = vpop.f32.mrf.mxu1 }
 0x3a5   :  { %v1386_v47 = vadd.f32 %v7673_v35, %v1385_v52 }
 0x3a6   :  { %v1395_v58 = vpop.f32.mrf.mxu1 }
 0x3a7   :  { %v1396_v6 = vadd.f32 %v7673_v35, %v1395_v58 }
 0x3a8   :  { %v8711_v20 = vpop.f32.mrf.mxu1 }
 0x3aa   :  { %v1400_v37 = vpop.f32.mrf.mxu1 }
 0x3ab   :  { %v1401_v0 = vadd.f32 %v7673_v35, %v1400_v37 }
 0x3ac   :  { %v8714_v53 = vpop.f32.mrf.mxu1 }
 0x3ad   :  { %8733 = vmatpush3.xpose.msk.msra.mxu1 %vm185_vm3, %v1401_v0  ;;  %v7665_v0 = vld [vmem:[%s13013_s3 + $0x2] ss:$0 sm:$0xff]  ;;  %v1381_v53 = vadd.f32 %v7673_v35, %v1380_v32 }
 0x3ae   :  { %8734 = vmatprep.subr.mxu1 %v13083_v63  ;;  %v1280_v58 = vadd.f32 %v7665_v0, %v10301_v7  ;;  %v1285_v52 = vadd.f32 %v7665_v0, %v10303_v9  ;;  %v1290_v7 = vadd.f32 %v7665_v0, %v10305_v11  ;;  %v1295_v32 = vadd.f32 %v7665_v0, %v10307_v13 }
 0x3af   :  { %v1300_v9 = vadd.f32 %v7665_v0, %v10309_v15 }
 0x3b1   :  { %8735 = vmatpush3.xpose.msk.msra.mxu1 %vm185_vm3, %v1396_v6 }
 0x3b2   :  { %8736 = vmatprep.subr.mxu1 %v13083_v63 }
 0x3b5   :  { %8737 = vmatpush3.xpose.msk.msra.mxu1 %vm185_vm3, %v1391_v4 }
 0x3b6   :  { %8738 = vmatprep.subr.mxu1 %v13083_v63 }
 0x3b9   :  { %8739 = vmatpush3.xpose.msk.msra.mxu1 %vm185_vm3, %v1386_v47 }
 0x3ba   :  { %8740 = vmatprep.subr.mxu1 %v13083_v63 }
 0x3bd   :  { %8741 = vmatpush3.xpose.msk.msra.mxu1 %vm185_vm3, %v1381_v53 }
 0x3be   :  { %8774 = vmatprep.subr.mxu1 %v13083_v63 }
 0x3c0   :  { %8743 = vmatmul.mubr.msk.f32.vlgmr.msra.gmra.mxu1 %vm185_vm3, %v1280_v58 }
 0x3c1   :  { %8775 = vmatpush3.xpose.msk.msra.mxu1 %vm317_vm4, %v299_v10  ;;  %8745 = vmatprep.mubr.msk.f32.mxu1 %vm9847_vm0, %v13083_v63 }
 0x3c2   :  { %8808 = vmatprep.subr.mxu1 %v13083_v63 }
 0x3c4   :  { %8746 = vmatmul.mubr.msk.f32.gmra.mxu1 %vm185_vm3, %v1285_v52 }
 0x3c5   :  { %8748 = vmatprep.mubr.msk.f32.mxu1 %vm9847_vm0, %v13083_v63 }
 0x3c8   :  { %8749 = vmatmul.mubr.msk.f32.gmra.mxu1 %vm185_vm3, %v1290_v7 }
 0x3c9   :  { %8751 = vmatprep.mubr.msk.f32.mxu1 %vm9847_vm0, %v13083_v63 }
 0x3cc   :  { %8752 = vmatmul.mubr.msk.f32.gmra.mxu1 %vm185_vm3, %v1295_v32 }
 0x3cd   :  { %8754 = vmatprep.mubr.msk.f32.mxu1 %vm9847_vm0, %v13083_v63 }
 0x3d0   :  { %8755 = vmatmul.mubr.msk.f32.gmra.mxu1 %vm185_vm3, %v1300_v9 }
 0x3d1   :  { %8776 = vmatprep.mubr.msk.f32.mxu1 %vm9847_vm0, %v13083_v63 }
 0x3d4   :  { %8777 = vmatmul.mubr.msk.f32.vlgmr.msra.gmra.mxu1 %vm317_vm4, %v10000_v21 }
 0x3d5   :  { %8779 = vmatprep.mubr.msk.f32.mxu1 %vm9847_vm0, %v13083_v63 }
 0x3d8   :  { %8780 = vmatmul.mubr.msk.f32.gmra.mxu1 %vm317_vm4, %v10010_v25 }
 0x3d9   :  { %8782 = vmatprep.mubr.msk.f32.mxu1 %vm9847_vm0, %v13083_v63 }
 0x3dc   :  { %8783 = vmatmul.mubr.msk.f32.gmra.mxu1 %vm317_vm4, %v10022_v28 }
 0x3dd   :  { %8785 = vmatprep.mubr.msk.f32.mxu1 %vm9847_vm0, %v13083_v63 }
 0x3e0   :  { %8786 = vmatmul.mubr.msk.f32.gmra.mxu1 %vm317_vm4, %v10032_v31 }
 0x3e1   :  { %8788 = vmatprep.mubr.msk.f32.mxu1 %vm9847_vm0, %v13083_v63 }
 0x3e4   :  { %8789 = vmatmul.mubr.msk.f32.gmra.mxu1 %vm317_vm4, %v10042_v34 }
 0x3e5   :  { %8818 = vmatprep.mubr.msk.f32.mxu1 %vm9847_vm0, %v13083_v63 }
 0x41c   :  { %v2115_v11 = vpop.xlane.xlu1 %2114 }
 0x41d   :  { %v2163_v13 = vsub.f32 %v10451_v59, %v2115_v11 }
 0x41f   :  { %v2188_v15 = vmul.f32 1.442695, %v2163_v13  ;;  %v10563_v13 = vld [vmem:[#allocation2] sm:$0xff] }
 0x420   :  { %v2118_v20 = vpop.xlane.xlu0 %2117 }
 0x421   :  { %9590 = vpow2.f32 %v2188_v15  ;;  %v2164_v35 = vsub.f32 %v10461_v39, %v2118_v20  ;;  %v2098_v20 = vsel %vm758_vm5, %v10563_v13, -inf }
 0x423   :  { %v2190_v37 = vmul.f32 1.442695, %v2164_v35 }
 0x424   :  { %v2121_v6 = vpop.xlane.xlu0 %2120 }
 0x425   :  { %9592 = vpow2.f32 %v2190_v37  ;;  %v2165_v4 = vsub.f32 %v10471_v23, %v2121_v6  ;;  %v10571_v37 = vld [vmem:[#allocation2 + $0x10] sm:$0xff]  ;;  %v10573_v6 = vld [vmem:[#allocation2 + $0x8] sm:$0xff] }
 0x427   :  { %v2192_v47 = vmul.f32 1.442695, %v2165_v4  ;;  %v2104_v4 = vsel %vm758_vm5, %v10571_v37, -inf }
 0x428   :  { %v2124_v0 = vpop.xlane.xlu1 %2123 }
 0x429   :  { %9594 = vpow2.f32 %v2192_v47  ;;  %v2166_v53 = vsub.f32 %v10476_v49, %v2124_v0  ;;  %v2101_v47 = vsel %vm758_vm5, %v10573_v6, -inf  ;;  %v10579_v0 = vld [vmem:[#allocation2 + $0x20] sm:$0xff] }
 0x42b   :  { %v2194_v58 = vmul.f32 1.442695, %v2166_v53  ;;  %v10581_v53 = vld [vmem:[#allocation2 + $0x18] sm:$0xff] }
 0x42c   :  { %v2127_v10 = vpop.xlane.xlu0 %2126 }
 0x42d   :  { %9596 = vpow2.f32 %v2194_v58  ;;  %v2167_v59 = vsub.f32 %v10480_v14, %v2127_v10  ;;  %v2110_v58 = vsel %vm758_vm5, %v10579_v0, -inf  ;;  %v2107_v10 = vsel %vm758_vm5, %v10581_v53, -inf }
 0x42e   :  { %v10547_v52 = vpop.eup %9590 }
 0x42f   :  { %v2196_v7 = vmul.f32 1.442695, %v2167_v59  ;;  %v2233_v39 = vsel %vm758_vm5, %v10547_v52, 0.0 }
 0x430   :  { %2234 = vadd.xlane.f32.xlu1 %v2233_v39 }
 0x431   :  { %9598 = vpow2.f32 %v2196_v7 }
 0x432   :  { %v10551_v32 = vpop.eup %9592 }
 0x433   :  { %v2236_v23 = vsel %vm758_vm5, %v10551_v32, 0.0 }
 0x434   :  { %2237 = vadd.xlane.f32.xlu0 %v2236_v23 }
 0x436   :  { %v10555_v49 = vpop.eup %9594 }
 0x437   :  { %v2239_v9 = vsel %vm758_vm5, %v10555_v49, 0.0 }
 0x438   :  { %2240 = vadd.xlane.f32.xlu1 %v2239_v9 }
 0x43a   :  { %v10559_v14 = vpop.eup %9596 }
 0x43b   :  { %v2242_v11 = vsel %vm758_vm5, %v10559_v14, 0.0 }
 0x43c   :  { %2243 = vadd.xlane.f32.xlu0 %v2242_v11 }
 0x43e   :  { %v10565_v15 = vpop.eup %9598 }
 0x43f   :  { %v2245_v35 = vsel %vm758_vm5, %v10565_v15, 0.0 }
 0x440   :  { %2099 = vmax.xlane.f32.xlu0 %v2098_v20  ;;  %2246 = vadd.xlane.f32.xlu1 %v2245_v35 }
 0x444   :  { %2105 = vmax.xlane.f32.xlu0 %v2104_v4  ;;  %2102 = vmax.xlane.f32.xlu1 %v2101_v47 }
 0x448   :  { %2111 = vmax.xlane.f32.xlu0 %v2110_v58  ;;  %2108 = vmax.xlane.f32.xlu1 %v2107_v10 }
 0x480   :  { %v1601_v59 = vpop.f32.mrf.mxu1 }
 0x481   :  { %v10587_v7 = vmul.f32 0.35355338, %v1601_v59 }
 0x482   :  { %v8744_v39 = vpop.f32.mrf.mxu1 }
 0x483   :  { %13084 = vst [vmem:[#allocation18_spill] sm:$0xff] %v10587_v7  ;;  %v1630_v23 = vsel %vm286_vm6, %v10587_v7, -1e+30 }
 0x484   :  { %1635 = vst.msk [vmem:[#allocation2 + $0x50] sm:$0xff] %vm758_vm5, %v1630_v23  ;;  %v1606_v9 = vpop.f32.mrf.mxu1 }
 0x485   :  { %v10593_v11 = vmul.f32 0.35355338, %v1606_v9 }
 0x486   :  { %v8747_v20 = vpop.f32.mrf.mxu1 }
 0x487   :  { %13085 = vst [vmem:[#allocation19_spill] sm:$0xff] %v10593_v11  ;;  %v1631_v35 = vsel %vm287_vm7, %v10593_v11, -1e+30 }
 0x488   :  { %1636 = vst.msk [vmem:[#allocation2 + $0x58] sm:$0xff] %vm758_vm5, %v1631_v35  ;;  %v1611_v4 = vpop.f32.mrf.mxu1 }
 0x489   :  { %v10599_v47 = vmul.f32 0.35355338, %v1611_v4 }
 0x48a   :  { %v8750_v58 = vpop.f32.mrf.mxu1 }
 0x48b   :  { %13086 = vst [vmem:[#allocation20_spill] sm:$0xff] %v10599_v47  ;;  %v1632_v10 = vsel %vm288_vm8, %v10599_v47, -1e+30  ;;  %v10604_v59 = vld [vmem:[#allocation2 + $0x50] sm:$0xff] }
 0x48c   :  { %1637 = vst.msk [vmem:[#allocation2 + $0x60] sm:$0xff] %vm758_vm5, %v1632_v10  ;;  %v1616_v39 = vpop.f32.mrf.mxu1  ;;  %v2128_v23 = vsel %vm758_vm5, %v10604_v59, -inf }
 0x48d   :  { %v10609_v9 = vmul.f32 0.35355338, %v1616_v39  ;;  %2129 = vmax.xlane.f32.xlu1 %v2128_v23 }
 0x48e   :  { %v8753_v20 = vpop.f32.mrf.mxu1 }
 0x48f   :  { %13087 = vst [vmem:[#allocation21_spill] sm:$0xff] %v10609_v9  ;;  %v1633_v35 = vsel %vm289_vm9, %v10609_v9, -1e+30  ;;  %v10614_v4 = vld [vmem:[#allocation2 + $0x58] sm:$0xff] }
 0x490   :  { %1638 = vst.msk [vmem:[#allocation2 + $0x68] sm:$0xff] %vm758_vm5, %v1633_v35  ;;  %v1621_v58 = vpop.f32.mrf.mxu1  ;;  %v2131_v10 = vsel %vm758_vm5, %v10614_v4, -inf }
 0x491   :  { %v10619_v47 = vmul.f32 0.35355338, %v1621_v58  ;;  %2132 = vmax.xlane.f32.xlu0 %v2131_v10 }
 0x492   :  { %v8756_v11 = vpop.f32.mrf.mxu1 }
 0x493   :  { %13088 = vst [vmem:[#allocation22_spill] sm:$0xff] %v10619_v47  ;;  %v1634_v39 = vsel %vm290_vm10, %v10619_v47, -1e+30  ;;  %v10624_v23 = vld [vmem:[#allocation2 + $0x60] sm:$0xff] }
 0x494   :  { %1639 = vst.msk [vmem:[#allocation2 + $0x70] sm:$0xff] %vm758_vm5, %v1634_v39  ;;  %v1818_v20 = vpop.f32.mrf.mxu1  ;;  %v2134_v35 = vsel %vm758_vm5, %v10624_v23, -inf }
 0x495   :  { %2135 = vmax.xlane.f32.xlu1 %v2134_v35 }
 0x496   :  { %v8778_v9 = vpop.f32.mrf.mxu1 }
 0x497   :  { %v10629_v7 = vld [vmem:[#allocation2 + $0x68] sm:$0xff]  ;;  %v7707_v9 = vld [vmem:[%s13013_s3 + $0x7] ss:$0 sm:$0xff] }
 0x498   :  { %v1823_v58 = vpop.f32.mrf.mxu1  ;;  %v2137_v11 = vsel %vm758_vm5, %v10629_v7, -inf }
 0x499   :  { %2138 = vmax.xlane.f32.xlu0 %v2137_v11 }
 0x49a   :  { %v8781_v10 = vpop.f32.mrf.mxu1 }
 0x49b   :  { %v10633_v12 = vld [vmem:[#allocation2 + $0x70] sm:$0xff] }
 0x49c   :  { %v1828_v47 = vpop.f32.mrf.mxu1  ;;  %v2140_v39 = vsel %vm758_vm5, %v10633_v12, -inf }
 0x49d   :  { %2141 = vmax.xlane.f32.xlu1 %v2140_v39  ;;  %v1829_v10 = vadd.f32 %v7707_v9, %v1828_v47 }
 0x49e   :  { %v8784_v44 = vpop.f32.mrf.mxu1 }
 0x4a0   :  { %v1833_v26 = vpop.f32.mrf.mxu1 }
 0x4a1   :  { %v1834_v11 = vadd.f32 %v7707_v9, %v1833_v26  ;;  %v7647_v26 = vld [vmem:[%s13013_s3 + $0x9] ss:$0 sm:$0xff] }
 0x4a2   :  { %v8787_v56 = vpop.f32.mrf.mxu1  ;;  %v1064_v47 = vadd.f32 %v7647_v26, %v10299_v5  ;;  %v1059_v39 = vadd.f32 %v7647_v26, %v10293_v3  ;;  %v1049_v5 = vadd.f32 %v7647_v26, %v10281_v62 }
 0x4a3   :  { %v1824_v56 = vadd.f32 %v7707_v9, %v1823_v58 }
 0x4a4   :  { %v1838_v35 = vpop.f32.mrf.mxu1 }
 0x4a5   :  { %v1839_v55 = vadd.f32 %v7707_v9, %v1838_v35 }
 0x4a6   :  { %v8790_v40 = vpop.f32.mrf.mxu1 }
 0x4a7   :  { %8809 = vmatpush3.xpose.msk.msra.mxu1 %vm185_vm3, %v1839_v55  ;;  %v7699_v40 = vld [vmem:[%s13013_s3 + $0x3] ss:$0 sm:$0xff]  ;;  %v1819_v55 = vadd.f32 %v7707_v9, %v1818_v20 }
 0x4a8   :  { %8810 = vmatprep.subr.mxu1 %v13083_v63  ;;  %v1718_v44 = vadd.f32 %v7699_v40, %v10321_v33  ;;  %v1723_v20 = vadd.f32 %v7699_v40, %v10323_v36  ;;  %v1054_v33 = vadd.f32 %v7647_v26, %v10287_v1  ;;  %v1728_v3 = vadd.f32 %v7699_v40, %v10325_v38 }
 0x4a9   :  { %v1044_v36 = vadd.f32 %v7647_v26, %v10275_v60  ;;  %v1733_v62 = vadd.f32 %v7699_v40, %v10327_v41  ;;  %v1738_v60 = vadd.f32 %v7699_v40, %v10329_v45 }
 0x4ab   :  { %8811 = vmatpush3.xpose.msk.msra.mxu1 %vm185_vm3, %v1834_v11 }
 0x4ac   :  { %8812 = vmatprep.subr.mxu1 %v13083_v63 }
 0x4af   :  { %8813 = vmatpush3.xpose.msk.msra.mxu1 %vm185_vm3, %v1829_v10 }
 0x4b0   :  { %8814 = vmatprep.subr.mxu1 %v13083_v63 }
 0x4b3   :  { %8815 = vmatpush3.xpose.msk.msra.mxu1 %vm185_vm3, %v1824_v56 }
 0x4b4   :  { %8816 = vmatprep.subr.mxu1 %v13083_v63 }
 0x4b7   :  { %8817 = vmatpush3.xpose.msk.msra.mxu1 %vm185_vm3, %v1819_v55 }
 0x4b8   :  { %8858 = vmatprep.subr.mxu1 %v13083_v63 }
 0x4b9   :  { %v2235_v58 = vpop.xlane.xlu1 %2234 }
 0x4ba   :  { %9600 = vrcp.f32 %v2235_v58  ;;  %8819 = vmatmul.mubr.msk.f32.vlgmr.msra.gmra.mxu1 %vm185_vm3, %v1718_v44 }
 0x4bb   :  { %8859 = vmatpush3.msra.mxu1 %v1064_v47  ;;  %8821 = vmatprep.mubr.msk.f32.mxu1 %vm9847_vm0, %v13083_v63 }
 0x4bc   :  { %8860 = vmatprep.subr.mxu1 %v13083_v63 }
 0x4bd   :  { %v2238_v9 = vpop.xlane.xlu0 %2237  ;;  %8861 = vmatpush3.msra.mxu1 %v1059_v39 }
 0x4be   :  { %8822 = vmatmul.mubr.msk.f32.gmra.mxu1 %vm185_vm3, %v1723_v20  ;;  %8862 = vmatprep.subr.mxu1 %v13083_v63  ;;  %9602 = vrcp.f32 %v2238_v9 }
 0x4bf   :  { %8863 = vmatpush3.msra.mxu1 %v1054_v33  ;;  %8824 = vmatprep.mubr.msk.f32.mxu1 %vm9847_vm0, %v13083_v63 }
 0x4c0   :  { %8864 = vmatprep.subr.mxu1 %v13083_v63 }
 0x4c1   :  { %v2241_v1 = vpop.xlane.xlu1 %2240  ;;  %8865 = vmatpush3.msra.mxu1 %v1049_v5 }
 0x4c2   :  { %8825 = vmatmul.mubr.msk.f32.gmra.mxu1 %vm185_vm3, %v1728_v3  ;;  %8866 = vmatprep.subr.mxu1 %v13083_v63  ;;  %9604 = vrcp.f32 %v2241_v1 }
 0x4c3   :  { %8867 = vmatpush3.msra.mxu1 %v1044_v36  ;;  %8827 = vmatprep.mubr.msk.f32.mxu1 %vm9847_vm0, %v13083_v63 }
 0x4c4   :  { %8900 = vmatprep.subr.mxu1 %v13083_v63 }
 0x4c5   :  { %v2244_v38 = vpop.xlane.xlu0 %2243 }
 0x4c6   :  { %8828 = vmatmul.mubr.msk.f32.gmra.mxu1 %vm185_vm3, %v1733_v62  ;;  %9606 = vrcp.f32 %v2244_v38 }
 0x4c7   :  { %v9601_v35 = vpop.eup %9600  ;;  %8830 = vmatprep.mubr.msk.f32.mxu1 %vm9847_vm0, %v13083_v63 }
 0x4c8   :  { %v10684_v11 = vmul.f32 %v9601_v35, %v10547_v52 }
 0x4c9   :  { %v2247_v10 = vpop.xlane.xlu1 %2246  ;;  %v2100_v26 = vpop.xlane.xlu0 %2099 }
 0x4ca   :  { %13089 = vst [vmem:[#allocation23_spill] sm:$0xff] %v10684_v11  ;;  %7763 = vst.msk [vmem:[%s13017_s7 + $0x8] sm:$0x1f] %vm2423_vm11, %v10684_v11  ;;  %8831 = vmatmul.mubr.msk.f32.gmra.mxu1 %vm185_vm3, %v1738_v60  ;;  %9608 = vrcp.f32 %v2247_v10 }
 0x4cb   :  { %8868 = vmatprep.mubr.msk.f32.mxu1 %vm9847_vm0, %v13083_v63  ;;  %v9603_v41 = vpop.eup %9602 }
 0x4cc   :  { %v10699_v45 = vmul.f32 %v9603_v41, %v10551_v32 }
 0x4cd   :  { %v2103_v47 = vpop.xlane.xlu1 %2102  ;;  %v2106_v39 = vpop.xlane.xlu0 %2105 }
 0x4ce   :  { %8869 = vmatmul.mubr.msk.f32.vlgmr.msra.gmra.mxu1 %vm758_vm5, %v10684_v11  ;;  %13090 = vst [vmem:[#allocation24_spill] sm:$0xff] %v10699_v45  ;;  %v2159_v3 = vsub.f32 %v10573_v6, %v2103_v47  ;;  %v2160_v62 = vsub.f32 %v10571_v37, %v2106_v39 }
 0x4cf   :  { %8871 = vmatprep.mubr.msk.f32.mxu1 %vm9847_vm0, %v13083_v63  ;;  %v9605_v52 = vpop.eup %9604 }
 0x4d0   :  { %v10706_v56 = vmul.f32 %v9605_v52, %v10555_v49  ;;  %v2180_v41 = vmul.f32 1.442695, %v2159_v3 }
 0x4d1   :  { %v2109_v38 = vpop.xlane.xlu1 %2108 }
 0x4d2   :  { %8872 = vmatmul.mubr.msk.f32.gmra.mxu1 %vm758_vm5, %v10699_v45  ;;  %13091 = vst [vmem:[#allocation25_spill] sm:$0xff] %v10706_v56  ;;  %v2161_v52 = vsub.f32 %v10581_v53, %v2109_v38 }
 0x4d3   :  { %8874 = vmatprep.mubr.msk.f32.mxu1 %vm9847_vm0, %v13083_v63  ;;  %v9607_v40 = vpop.eup %9606 }
 0x4d4   :  { %v10713_v32 = vmul.f32 %v9607_v40, %v10559_v14 }
 0x4d6   :  { %8875 = vmatmul.mubr.msk.f32.gmra.mxu1 %vm758_vm5, %v10706_v56  ;;  %13092 = vst [vmem:[#allocation26_spill] sm:$0xff] %v10713_v32 }
 0x4d7   :  { %8877 = vmatprep.mubr.msk.f32.mxu1 %vm9847_vm0, %v13083_v63  ;;  %v9609_v55 = vpop.eup %9608 }
 0x4d8   :  { %v10720_v49 = vmul.f32 %v9609_v55, %v10565_v15  ;;  %v2158_v15 = vsub.f32 %v10563_v13, %v2100_v26  ;;  %v2112_v13 = vpop.xlane.xlu0 %2111  ;;  %v2182_v55 = vmul.f32 1.442695, %v2160_v62 }
 0x4d9   :  { %v2162_v37 = vsub.f32 %v10579_v0, %v2112_v13 }
 0x4da   :  { %8878 = vmatmul.mubr.msk.f32.gmra.mxu1 %vm758_vm5, %v10713_v32  ;;  %13093 = vst [vmem:[#allocation27_spill] sm:$0xff] %v10720_v49  ;;  %v2178_v1 = vmul.f32 1.442695, %v2158_v15 }
 0x4db   :  { %8880 = vmatprep.mubr.msk.f32.mxu1 %vm9847_vm0, %v13083_v63 }
 0x4dc   :  { %9610 = vpow2.f32 %v2178_v1 }
 0x4dd   :  { %9612 = vpow2.f32 %v2180_v41 }
 0x4de   :  { %8881 = vmatmul.mubr.msk.f32.gmra.mxu1 %vm758_vm5, %v10720_v49  ;;  %9614 = vpow2.f32 %v2182_v55 }
 0x4df   :  { %8902 = vmatprep.mubr.msk.f32.mxu1 %vm9847_vm0, %v13083_v63 }
 0x516   :  { %v2130_v26 = vpop.xlane.xlu1 %2129 }
 0x517   :  { %v2168_v15 = vsub.f32 %v10604_v59, %v2130_v26 }
 0x519   :  { %v2198_v13 = vmul.f32 1.442695, %v2168_v15  ;;  %v10786_v15 = vpop.eup %9610 }
 0x57a   :  { %v2039_v44 = vpop.f32.mrf.mxu1 }
 0x57b   :  { %v10726_v14 = vmul.f32 0.35355338, %v2039_v44 }
 0x57c   :  { %v8820_v58 = vpop.f32.mrf.mxu1 }
 0x57d   :  { %v2068_v20 = vsel %vm286_vm6, %v10726_v14, -1e+30  ;;  %v2133_v58 = vpop.xlane.xlu0 %2132 }
 0x57e   :  { %2073 = vst.msk [vmem:[#allocation2 + $0x78] sm:$0xff] %vm758_vm5, %v2068_v20  ;;  %v2044_v33 = vpop.f32.mrf.mxu1  ;;  %v2184_v20 = vmul.f32 1.442695, %v2161_v52  ;;  %v2169_v3 = vsub.f32 %v10614_v4, %v2133_v58 }
 0x57f   :  { %v10733_v9 = vmul.f32 0.35355338, %v2044_v33 }
 0x580   :  { %v8823_v5 = vpop.f32.mrf.mxu1  ;;  %9616 = vpow2.f32 %v2184_v20  ;;  %v2200_v52 = vmul.f32 1.442695, %v2169_v3  ;;  %v10788_v3 = vpop.eup %9612 }
 0x581   :  { %v2069_v36 = vsel %vm287_vm7, %v10733_v9, -1e+30  ;;  %v2186_v5 = vmul.f32 1.442695, %v2162_v37  ;;  %v2139_v38 = vpop.xlane.xlu0 %2138 }
 0x582   :  { %2074 = vst.msk [vmem:[#allocation2 + $0x80] sm:$0xff] %vm758_vm5, %v2069_v36  ;;  %v2049_v35 = vpop.f32.mrf.mxu1  ;;  %v2136_v36 = vpop.xlane.xlu1 %2135 }
 0x583   :  { %v10741_v60 = vmul.f32 0.35355338, %v2049_v35  ;;  %9618 = vpow2.f32 %v2186_v5 }
 0x584   :  { %v8826_v10 = vpop.f32.mrf.mxu1  ;;  %9620 = vpow2.f32 %v2198_v13 }
 0x585   :  { %v2070_v6 = vsel %vm288_vm8, %v10741_v60, -1e+30  ;;  %v10747_v40 = vld [vmem:[#allocation2 + $0x78] sm:$0xff]  ;;  %v2170_v10 = vsub.f32 %v10624_v23, %v2136_v36  ;;  %9622 = vpow2.f32 %v2200_v52  ;;  %v2221_v52 = vsel %vm758_vm5, %v10788_v3, 0.0 }
 0x586   :  { %2075 = vst.msk [vmem:[#allocation2 + $0x88] sm:$0xff] %vm758_vm5, %v2070_v6  ;;  %v2054_v44 = vpop.f32.mrf.mxu1  ;;  %v2143_v47 = vsel %vm758_vm5, %v10747_v40, -inf  ;;  %v2171_v6 = vsub.f32 %v10629_v7, %v2139_v38  ;;  %v2142_v26 = vpop.xlane.xlu1 %2141 }
 0x587   :  { %v10753_v39 = vmul.f32 0.35355338, %v2054_v44  ;;  %2144 = vmax.xlane.f32.xlu0 %v2143_v47  ;;  %v2202_v44 = vmul.f32 1.442695, %v2170_v10  ;;  %v10795_v38 = vpop.eup %9614 }
 0x588   :  { %v8829_v53 = vpop.f32.mrf.mxu1  ;;  %v2204_v58 = vmul.f32 1.442695, %v2171_v6 }
 0x589   :  { %v2071_v0 = vsel %vm289_vm9, %v10753_v39, -1e+30  ;;  %v10759_v33 = vld [vmem:[#allocation2 + $0x80] sm:$0xff]  ;;  %v2172_v53 = vsub.f32 %v10633_v12, %v2142_v26  ;;  %9624 = vpow2.f32 %v2202_v44  ;;  %v2218_v12 = vsel %vm758_vm5, %v10786_v15, 0.0 }
 0x58a   :  { %2076 = vst.msk [vmem:[#allocation2 + $0x90] sm:$0xff] %vm758_vm5, %v2071_v0  ;;  %v2059_v1 = vpop.f32.mrf.mxu1  ;;  %v2146_v62 = vsel %vm758_vm5, %v10759_v33, -inf  ;;  %9626 = vpow2.f32 %v2204_v58 }
 0x58b   :  { %v10765_v35 = vmul.f32 0.35355338, %v2059_v1  ;;  %2147 = vmax.xlane.f32.xlu1 %v2146_v62  ;;  %v2206_v36 = vmul.f32 1.442695, %v2172_v53 }
 0x58c   :  { %v8832_v59 = vpop.f32.mrf.mxu1 }
 0x58d   :  { %13094 = vst [vmem:[#allocation28_spill] sm:$0xff] %v10765_v35  ;;  %v2072_v4 = vsel %vm290_vm10, %v10765_v35, -1e+30  ;;  %v10771_v41 = vld [vmem:[#allocation2 + $0x88] sm:$0xff]  ;;  %v10797_v13 = vpop.eup %9616  ;;  %9628 = vpow2.f32 %v2206_v36 }
 0x58e   :  { %2077 = vst.msk [vmem:[#allocation2 + $0x98] sm:$0xff] %vm758_vm5, %v2072_v4  ;;  %v10775_v55 = vpop.f32.mrf.mxu1  ;;  %v2149_v37 = vsel %vm758_vm5, %v10771_v41, -inf  ;;  %v2224_v4 = vsel %vm758_vm5, %v10795_v38, 0.0  ;;  %v2227_v58 = vsel %vm758_vm5, %v10797_v13, 0.0 }
 0x58f   :  { %2150 = vmax.xlane.f32.xlu0 %v2149_v37 }
 0x590   :  { %v8870_v23 = vpop.f32.mrf.mxu1  ;;  %v10805_v6 = vpop.eup %9618 }
 0x591   :  { %v10779_v47 = vld [vmem:[#allocation2 + $0x90] sm:$0xff]  ;;  %v10807_v26 = vpop.eup %9620  ;;  %v2230_v44 = vsel %vm758_vm5, %v10805_v6, 0.0 }
 0x592   :  { %v10782_v20 = vpop.f32.mrf.mxu1  ;;  %v2152_v7 = vsel %vm758_vm5, %v10779_v47, -inf  ;;  %v10815_v53 = vpop.eup %9622 }
 0x593   :  { %2153 = vmax.xlane.f32.xlu1 %v2152_v7  ;;  %v2251_v36 = vsel %vm758_vm5, %v10815_v53, 0.0 }
 0x594   :  { %v8873_v0 = vpop.f32.mrf.mxu1 }
 0x595   :  { %v2097_v5 = vld [vmem:[#allocation2 + $0x98] sm:$0xff] }
 0x596   :  { %v10790_v1 = vpop.f32.mrf.mxu1  ;;  %v2155_v62 = vsel %vm758_vm5, %v2097_v5, -inf  ;;  %v10817_v0 = vpop.eup %9624 }
 0x597   :  { %2219 = vadd.xlane.f32.xlu1 %v2218_v12  ;;  %2156 = vmax.xlane.f32.xlu0 %v2155_v62  ;;  %v2248_v12 = vsel %vm758_vm5, %v10807_v26, 0.0  ;;  %v10823_v62 = vpop.eup %9626 }
 0x598   :  { %v8876_v59 = vpop.f32.mrf.mxu1 }
 0x599   :  { %v2257_v59 = vsel %vm758_vm5, %v10823_v62, 0.0 }
 0x59a   :  { %v10799_v10 = vpop.f32.mrf.mxu1 }
 0x59b   :  { %2225 = vadd.xlane.f32.xlu1 %v2224_v4  ;;  %2222 = vadd.xlane.f32.xlu0 %v2221_v52  ;;  %v2254_v4 = vsel %vm758_vm5, %v10817_v0, 0.0  ;;  %v10829_v52 = vpop.eup %9628 }
 0x59c   :  { %v8879_v37 = vpop.f32.mrf.mxu1 }
 0x59d   :  { %v2260_v37 = vsel %vm758_vm5, %v10829_v52, 0.0 }
 0x59e   :  { %v10809_v23 = vpop.f32.mrf.mxu1 }
 0x59f   :  { %2231 = vadd.xlane.f32.xlu1 %v2230_v44  ;;  %2228 = vadd.xlane.f32.xlu0 %v2227_v58 }
 0x5a0   :  { %v8882_v7 = vpop.f32.mrf.mxu1 }
 0x5a3   :  { %2252 = vadd.xlane.f32.xlu1 %v2251_v36  ;;  %2249 = vadd.xlane.f32.xlu0 %v2248_v12 }
 0x5a7   :  { %2258 = vadd.xlane.f32.xlu1 %v2257_v59  ;;  %2255 = vadd.xlane.f32.xlu0 %v2254_v4 }
 0x5ab   :  { %2261 = vadd.xlane.f32.xlu0 %v2260_v37 }
 0x610   :  { %v2145_v44 = vpop.xlane.xlu0 %2144 }
 0x611   :  { %v2173_v58 = vsub.f32 %v10747_v40, %v2145_v44 }
 0x613   :  { %v2208_v7 = vmul.f32 1.442695, %v2173_v58 }
 0x614   :  { %v2148_v36 = vpop.xlane.xlu1 %2147 }
 0x615   :  { %9630 = vpow2.f32 %v2208_v7  ;;  %v2174_v12 = vsub.f32 %v10759_v33, %v2148_v36 }
 0x617   :  { %v2210_v49 = vmul.f32 1.442695, %v2174_v12 }
 0x618   :  { %v2151_v32 = vpop.xlane.xlu0 %2150 }
 0x619   :  { %9632 = vpow2.f32 %v2210_v49  ;;  %v2175_v56 = vsub.f32 %v10771_v41, %v2151_v32 }
 0x61b   :  { %v2212_v45 = vmul.f32 1.442695, %v2175_v56 }
 0x61c   :  { %v2154_v59 = vpop.xlane.xlu1 %2153 }
 0x61d   :  { %9634 = vpow2.f32 %v2212_v45  ;;  %v2176_v4 = vsub.f32 %v10779_v47, %v2154_v59 }
 0x61f   :  { %v2214_v11 = vmul.f32 1.442695, %v2176_v4  ;;  %v307_v4 = vld [vmem:[#allocation3 + $0x68] sm:$0xff] }
 0x620   :  { %v2220_v37 = vpop.xlane.xlu1 %2219  ;;  %v2157_v35 = vpop.xlane.xlu0 %2156 }
 0x621   :  { %9636 = vpow2.f32 %v2214_v11  ;;  %v2177_v40 = vsub.f32 %v2097_v5, %v2157_v35 }
 0x622   :  { %v10837_v44 = vpop.eup %9630  ;;  %9638 = vrcp.f32 %v2220_v37 }
 0x623   :  { %v2216_v58 = vmul.f32 1.442695, %v2177_v40  ;;  %v2263_v33 = vsel %vm758_vm5, %v10837_v44, 0.0 }
 0x624   :  { %2264 = vadd.xlane.f32.xlu1 %v2263_v33  ;;  %v2223_v49 = vpop.xlane.xlu0 %2222  ;;  %v2226_v45 = vpop.xlane.xlu1 %2225 }
 0x625   :  { %9640 = vpow2.f32 %v2216_v58 }
 0x626   :  { %v10841_v56 = vpop.eup %9632  ;;  %9642 = vrcp.f32 %v2223_v49 }
 0x627   :  { %v2266_v32 = vsel %vm758_vm5, %v10841_v56, 0.0  ;;  %9644 = vrcp.f32 %v2226_v45 }
 0x628   :  { %2267 = vadd.xlane.f32.xlu0 %v2266_v32  ;;  %v2229_v11 = vpop.xlane.xlu0 %2228  ;;  %v2232_v7 = vpop.xlane.xlu1 %2231 }
 0x629   :  { %9646 = vrcp.f32 %v2229_v11 }
 0x62a   :  { %v10845_v35 = vpop.eup %9634 }
 0x62b   :  { %v2269_v41 = vsel %vm758_vm5, %v10845_v35, 0.0 }
 0x62c   :  { %2270 = vadd.xlane.f32.xlu1 %v2269_v41  ;;  %v2250_v47 = vpop.xlane.xlu0 %2249 }
 0x62d   :  { %9648 = vrcp.f32 %v2250_v47 }
 0x62e   :  { %v10849_v5 = vpop.eup %9636  ;;  %9650 = vrcp.f32 %v2232_v7  ;;  %v2253_v7 = vpop.xlane.xlu1 %2252 }
 0x62f   :  { %v9639_v36 = vpop.eup %9638  ;;  %v2272_v12 = vsel %vm758_vm5, %v10849_v5, 0.0  ;;  %9652 = vrcp.f32 %v2253_v7  ;;  %v308_v7 = vld [vmem:[#allocation3 + $0x70] sm:$0xff] }
 0x630   :  { %v10854_v59 = vmul.f32 %v9639_v36, %v10786_v15  ;;  %2273 = vadd.xlane.f32.xlu0 %v2272_v12 }
 0x632   :  { %v10856_v37 = vpop.eup %9640  ;;  %2424 = vst.msk [vmem:[%s13017_s7] sm:$0x1f] %vm2423_vm11, %v10854_v59  ;;  %8844 = vmatmul.mubr.msk.f32.vlgmr.msra.gmra.mxu0 %vm758_vm5, %v10854_v59 }
 0x633   :  { %8846 = vmatprep.mubr.msk.f32.mxu0 %vm9847_vm0, %v13083_v63  ;;  %v2275_v15 = vsel %vm758_vm5, %v10856_v37, 0.0  ;;  %8884 = vmatpush3.msra.mxu0 %v307_v4  ;;  %v9643_v40 = vpop.eup %9642 }
 0x634   :  { %2276 = vadd.xlane.f32.xlu1 %v2275_v15  ;;  %8917 = vmatprep.subr.mxu0 %v13083_v63  ;;  %v10871_v58 = vmul.f32 %v9643_v40, %v10788_v3  ;;  %v9645_v33 = vpop.eup %9644 }
 0x635   :  { %v10878_v49 = vmul.f32 %v9645_v33, %v10795_v38 }
 0x636   :  { %8847 = vmatmul.mubr.msk.f32.gmra.mxu0 %vm758_vm5, %v10871_v58  ;;  %v9647_v45 = vpop.eup %9646 }
 0x637   :  { %8849 = vmatprep.mubr.msk.f32.mxu0 %vm9847_vm0, %v13083_v63  ;;  %v10888_v3 = vmul.f32 %v9647_v45, %v10797_v13  ;;  %v7681_v13 = vld [vmem:[%s13013_s3 + $0xa] ss:$0 sm:$0xff] }
 0x638   :  { %v1497_v47 = vadd.f32 %v7681_v13, %v10317_v27  ;;  %v1482_v27 = vadd.f32 %v7681_v13, %v10311_v19 }
 0x63a   :  { %v9649_v32 = vpop.eup %9648  ;;  %8850 = vmatmul.mubr.msk.f32.gmra.mxu0 %vm758_vm5, %v10878_v49 }
 0x63b   :  { %v10883_v11 = vmul.f32 %v9649_v32, %v10807_v26  ;;  %8852 = vmatprep.mubr.msk.f32.mxu0 %vm9847_vm0, %v13083_v63  ;;  %v9651_v41 = vpop.eup %9650  ;;  %v1502_v26 = vadd.f32 %v7681_v13, %v10319_v30  ;;  %v1487_v30 = vadd.f32 %v7681_v13, %v10313_v22  ;;  %v2259_v22 = vpop.xlane.xlu1 %2258 }
 0x63c   :  { %v10900_v38 = vmul.f32 %v9651_v41, %v10805_v6  ;;  %v1492_v6 = vadd.f32 %v7681_v13, %v10315_v24  ;;  %v7715_v24 = vld [vmem:[%s13013_s3 + $0xb] ss:$0 sm:$0xff] }
 0x63d   :  { %13095 = vst [vmem:[#allocation29_spill] sm:$0xff] %v10883_v11  ;;  %7785 = vst.msk [vmem:[%s13017_s7 + $0x10] sm:$0x1f] %vm2423_vm11, %v10883_v11  ;;  %v1930_v12 = vadd.f32 %v7715_v24, %v10335_v57  ;;  %v1920_v57 = vadd.f32 %v7715_v24, %v10331_v51 }
 0x63e   :  { %8853 = vmatmul.mubr.msk.f32.gmra.mxu0 %vm758_vm5, %v10888_v3  ;;  %13096 = vst [vmem:[#allocation30_spill] sm:$0xff] %v10900_v38 }
 0x63f   :  { %8855 = vmatprep.mubr.msk.f32.mxu0 %vm9847_vm0, %v13083_v63 }
 0x642   :  { %8856 = vmatmul.mubr.msk.f32.gmra.mxu0 %vm758_vm5, %v10900_v38 }
 0x643   :  { %8885 = vmatprep.mubr.msk.f32.mxu0 %vm9847_vm0, %v13083_v63 }
 0x646   :  { %8886 = vmatmul.mubr.msk.f32.vlgmr.msra.gmra.mxu0 %vm185_vm3, %v10775_v55  ;;  %v2256_v55 = vpop.xlane.xlu0 %2255 }
 0x647   :  { %8918 = vmatpush3.msra.mxu0 %v1502_v26  ;;  %8888 = vmatprep.mubr.msk.f32.mxu0 %vm9847_vm0, %v13083_v63  ;;  %9654 = vrcp.f32 %v2256_v55 }
 0x648   :  { %8919 = vmatprep.subr.mxu0 %v13083_v63  ;;  %9656 = vrcp.f32 %v2259_v22 }
 0x649   :  { %8920 = vmatpush3.msra.mxu0 %v1497_v47 }
 0x64a   :  { %8921 = vmatprep.subr.mxu0 %v13083_v63  ;;  %8889 = vmatmul.mubr.msk.f32.gmra.mxu0 %vm185_vm3, %v10782_v20  ;;  %v2262_v19 = vpop.xlane.xlu0 %2261  ;;  %v9653_v20 = vpop.eup %9652 }
 0x64b   :  { %8922 = vmatpush3.msra.mxu0 %v1492_v6  ;;  %8891 = vmatprep.mubr.msk.f32.mxu0 %vm9847_vm0, %v13083_v63  ;;  %9658 = vrcp.f32 %v2262_v19 }
 0x64c   :  { %8923 = vmatprep.subr.mxu0 %v13083_v63 }
 0x64d   :  { %8924 = vmatpush3.msra.mxu0 %v1487_v30 }
 0x64e   :  { %8925 = vmatprep.subr.mxu0 %v13083_v63  ;;  %8892 = vmatmul.mubr.msk.f32.gmra.mxu0 %vm185_vm3, %v10790_v1  ;;  %v1940_v1 = vadd.f32 %v7715_v24, %v10339_v2 }
 0x64f   :  { %8926 = vmatpush3.msra.mxu0 %v1482_v27  ;;  %8894 = vmatprep.mubr.msk.f32.mxu0 %vm9847_vm0, %v13083_v63 }
 0x650   :  { %8959 = vmatprep.subr.mxu0 %v13083_v63 }
 0x652   :  { %8895 = vmatmul.mubr.msk.f32.gmra.mxu0 %vm185_vm3, %v10799_v10  ;;  %v1935_v10 = vadd.f32 %v7715_v24, %v10337_v61  ;;  %v1925_v61 = vadd.f32 %v7715_v24, %v10333_v54 }
 0x653   :  { %8897 = vmatprep.mubr.msk.f32.mxu0 %vm9847_vm0, %v13083_v63 }
 0x654   :  { %v9655_v36 = vpop.eup %9654 }
 0x655   :  { %v10961_v2 = vmul.f32 %v9655_v36, %v10817_v0 }
 0x656   :  { %8898 = vmatmul.mubr.msk.f32.gmra.mxu0 %vm185_vm3, %v10809_v23  ;;  %v10950_v23 = vmul.f32 %v9653_v20, %v10815_v53  ;;  %v9657_v53 = vpop.eup %9656 }
 0x657   :  { %8927 = vmatprep.mubr.msk.f32.mxu0 %vm9847_vm0, %v13083_v63  ;;  %13098 = vst [vmem:[#allocation32_spill] sm:$0xff] %v10961_v2  ;;  %v10970_v54 = vmul.f32 %v9657_v53, %v10823_v62  ;;  %v306_v62 = vld [vmem:[#allocation3 + $0x60] sm:$0xff] }
 0x658   :  { %13097 = vst [vmem:[#allocation31_spill] sm:$0xff] %v10950_v23  ;;  %v9659_v0 = vpop.eup %9658  ;;  %8901 = vmatpush3.msra.mxu1 %v306_v62 }
 0x659   :  { %13099 = vst [vmem:[#allocation33_spill] sm:$0xff] %v10970_v54  ;;  %v10978_v51 = vmul.f32 %v9659_v0, %v10829_v52  ;;  %8942 = vmatprep.subr.mxu1 %v13083_v63 }
 0x65a   :  { %8928 = vmatmul.mubr.msk.f32.vlgmr.msra.gmra.mxu0 %vm758_vm5, %v10883_v11 }
 0x65b   :  { %8960 = vmatpush3.msra.mxu0 %v1940_v1  ;;  %8930 = vmatprep.mubr.msk.f32.mxu0 %vm9847_vm0, %v13083_v63  ;;  %13100 = vst [vmem:[#allocation34_spill] sm:$0xff] %v10978_v51 }
 0x65c   :  { %8961 = vmatprep.subr.mxu0 %v13083_v63 }
 0x65d   :  { %8962 = vmatpush3.msra.mxu0 %v1935_v10 }
 0x65e   :  { %8963 = vmatprep.subr.mxu0 %v13083_v63  ;;  %8931 = vmatmul.mubr.msk.f32.gmra.mxu0 %vm758_vm5, %v10950_v23 }
 0x65f   :  { %8964 = vmatpush3.msra.mxu0 %v1930_v12  ;;  %8933 = vmatprep.mubr.msk.f32.mxu0 %vm9847_vm0, %v13083_v63 }
 0x660   :  { %8965 = vmatprep.subr.mxu0 %v13083_v63 }
 0x661   :  { %8966 = vmatpush3.msra.mxu0 %v1925_v61 }
 0x662   :  { %8967 = vmatprep.subr.mxu0 %v13083_v63  ;;  %8934 = vmatmul.mubr.msk.f32.gmra.mxu0 %vm758_vm5, %v10961_v2 }
 0x663   :  { %8968 = vmatpush3.msra.mxu0 %v1920_v57  ;;  %8936 = vmatprep.mubr.msk.f32.mxu0 %vm9847_vm0, %v13083_v63 }
 0x664   :  { %9001 = vmatprep.subr.mxu0 %v13083_v63 }
 0x666   :  { %8937 = vmatmul.mubr.msk.f32.gmra.mxu0 %vm758_vm5, %v10970_v54 }
 0x667   :  { %8939 = vmatprep.mubr.msk.f32.mxu0 %vm9847_vm0, %v13083_v63 }
 0x66a   :  { %8940 = vmatmul.mubr.msk.f32.gmra.mxu0 %vm758_vm5, %v10978_v51 }
 0x66b   :  { %8969 = vmatprep.mubr.msk.f32.mxu0 %vm9847_vm0, %v13083_v63 }
 0x6ad   :  { %v2265_v4 = vpop.xlane.xlu1 %2264 }
 0x6ae   :  { %9660 = vrcp.f32 %v2265_v4 }
 0x6b1   :  { %v2268_v15 = vpop.xlane.xlu0 %2267 }
 0x6b2   :  { %9662 = vrcp.f32 %v2268_v15 }
 0x6b5   :  { %v2271_v40 = vpop.xlane.xlu1 %2270 }
 0x6b6   :  { %9664 = vrcp.f32 %v2271_v40  ;;  %v309_v40 = vld [vmem:[#allocation3 + $0x78] sm:$0xff] }
 0x6b9   :  { %v2274_v33 = vpop.xlane.xlu0 %2273 }
 0x6ba   :  { %9666 = vrcp.f32 %v2274_v33 }
 0x6bb   :  { %v9661_v52 = vpop.eup %9660 }
 0x6bc   :  { %v10986_v45 = vmul.f32 %v9661_v52, %v10837_v44 }
 0x6bd   :  { %v2277_v32 = vpop.xlane.xlu1 %2276 }
 0x6be   :  { %13101 = vst [vmem:[#allocation35_spill] sm:$0xff] %v10986_v45  ;;  %7807 = vst.msk [vmem:[%s13017_s7 + $0x18] sm:$0x1f] %vm2423_vm11, %v10986_v45  ;;  %9668 = vrcp.f32 %v2277_v32  ;;  %8970 = vmatmul.mubr.msk.f32.vlgmr.msra.gmra.mxu0 %vm758_vm5, %v10986_v45 }
 0x6bf   :  { %v9663_v41 = vpop.eup %9662  ;;  %8972 = vmatprep.mubr.msk.f32.mxu0 %vm9847_vm0, %v13083_v63 }
 0x6c0   :  { %v10998_v13 = vmul.f32 %v9663_v41, %v10841_v56 }
 0x6c2   :  { %13102 = vst [vmem:[#allocation36_spill] sm:$0xff] %v10998_v13  ;;  %8973 = vmatmul.mubr.msk.f32.gmra.mxu0 %vm758_vm5, %v10998_v13 }
 0x6c3   :  { %v9665_v44 = vpop.eup %9664  ;;  %8975 = vmatprep.mubr.msk.f32.mxu0 %vm9847_vm0, %v13083_v63 }
 0x6c4   :  { %v11005_v26 = vmul.f32 %v9665_v44, %v10845_v35 }
 0x6c6   :  { %13103 = vst [vmem:[#allocation37_spill] sm:$0xff] %v11005_v26  ;;  %8976 = vmatmul.mubr.msk.f32.gmra.mxu0 %vm758_vm5, %v11005_v26 }
 0x6c7   :  { %v9667_v47 = vpop.eup %9666  ;;  %8978 = vmatprep.mubr.msk.f32.mxu0 %vm9847_vm0, %v13083_v63 }
 0x6c8   :  { %v11012_v56 = vmul.f32 %v9667_v47, %v10849_v5 }
 0x6ca   :  { %13104 = vst [vmem:[#allocation38_spill] sm:$0xff] %v11012_v56  ;;  %8979 = vmatmul.mubr.msk.f32.gmra.mxu0 %vm758_vm5, %v11012_v56 }
 0x6cb   :  { %v9669_v6 = vpop.eup %9668  ;;  %8981 = vmatprep.mubr.msk.f32.mxu0 %vm9847_vm0, %v13083_v63 }
 0x6cc   :  { %v11019_v35 = vmul.f32 %v9669_v6, %v10856_v37 }
 0x6ce   :  { %13105 = vst [vmem:[#allocation39_spill] sm:$0xff] %v11019_v35  ;;  %8982 = vmatmul.mubr.msk.f32.gmra.mxu0 %vm758_vm5, %v11019_v35 }
 0x6cf   :  { %9009 = vmatprep.mubr.msk.f32.mxu0 %vm9847_vm0, %v13083_v63 }
 0x6f2   :  { %v2399_v30 = vpop.f32.mrf.mxu0 }
 0x6f3   :  { %8903 = vmatmul.mubr.msk.f32.vlgmr.msra.gmra.mxu1 %vm185_vm3, %v2399_v30 }
 0x6f4   :  { %v8845_v5 = vpop.f32.mrf.mxu0  ;;  %8905 = vmatprep.mubr.msk.f32.mxu1 %vm9847_vm0, %v13083_v63  ;;  %8943 = vmatpush3.msra.mxu1 %v308_v7 }
 0x6f5   :  { %8984 = vmatprep.subr.mxu1 %v13083_v63 }
 0x6f6   :  { %v2404_v27 = vpop.f32.mrf.mxu0 }
 0x6f7   :  { %8906 = vmatmul.mubr.msk.f32.gmra.mxu1 %vm185_vm3, %v2404_v27 }
 0x6f8   :  { %v8848_v37 = vpop.f32.mrf.mxu0  ;;  %8908 = vmatprep.mubr.msk.f32.mxu1 %vm9847_vm0, %v13083_v63 }
 0x6fa   :  { %v2409_v55 = vpop.f32.mrf.mxu0 }
 0x6fb   :  { %8909 = vmatmul.mubr.msk.f32.gmra.mxu1 %vm185_vm3, %v2409_v55 }
 0x6fc   :  { %v8851_v22 = vpop.f32.mrf.mxu0  ;;  %8911 = vmatprep.mubr.msk.f32.mxu1 %vm9847_vm0, %v13083_v63 }
 0x6fe   :  { %v2414_v19 = vpop.f32.mrf.mxu0 }
 0x6ff   :  { %8912 = vmatmul.mubr.msk.f32.gmra.mxu1 %vm185_vm3, %v2414_v19 }
 0x700   :  { %v8854_v24 = vpop.f32.mrf.mxu0  ;;  %8914 = vmatprep.mubr.msk.f32.mxu1 %vm9847_vm0, %v13083_v63 }
 0x702   :  { %v2419_v20 = vpop.f32.mrf.mxu0 }
 0x703   :  { %8915 = vmatmul.mubr.msk.f32.gmra.mxu1 %vm185_vm3, %v2419_v20 }
 0x704   :  { %v8857_v1 = vpop.f32.mrf.mxu0  ;;  %8944 = vmatprep.mubr.msk.f32.mxu1 %vm9847_vm0, %v13083_v63 }
 0x706   :  { %v11041_v10 = vpop.f32.mrf.mxu0 }
 0x708   :  { %v8887_v36 = vpop.f32.mrf.mxu0 }
 0x70a   :  { %v11043_v12 = vpop.f32.mrf.mxu0 }
 0x70c   :  { %v8890_v61 = vpop.f32.mrf.mxu0 }
 0x70e   :  { %v11045_v53 = vpop.f32.mrf.mxu0 }
 0x710   :  { %v8893_v57 = vpop.f32.mrf.mxu0 }
 0x712   :  { %v11047_v0 = vpop.f32.mrf.mxu0 }
 0x714   :  { %v8896_v62 = vpop.f32.mrf.mxu0 }
 0x716   :  { %v11049_v4 = vpop.f32.mrf.mxu0 }
 0x718   :  { %v8899_v15 = vpop.f32.mrf.mxu0 }
 0x71a   :  { %v2936_v33 = vpop.f32.mrf.mxu0 }
 0x71b   :  { %8945 = vmatmul.mubr.msk.f32.vlgmr.msra.gmra.mxu1 %vm185_vm3, %v2936_v33 }
 0x71c   :  { %v8929_v52 = vpop.f32.mrf.mxu0  ;;  %8947 = vmatprep.mubr.msk.f32.mxu1 %vm9847_vm0, %v13083_v63  ;;  %8985 = vmatpush3.msra.mxu1 %v309_v40 }
 0x71d   :  { %9024 = vmatprep.subr.mxu1 %v13083_v63 }
 0x71e   :  { %v2941_v32 = vpop.f32.mrf.mxu0 }
 0x71f   :  { %8948 = vmatmul.mubr.msk.f32.gmra.mxu1 %vm185_vm3, %v2941_v32 }
 0x720   :  { %v8932_v41 = vpop.f32.mrf.mxu0  ;;  %8950 = vmatprep.mubr.msk.f32.mxu1 %vm9847_vm0, %v13083_v63 }
 0x722   :  { %v2946_v44 = vpop.f32.mrf.mxu0 }
 0x723   :  { %8951 = vmatmul.mubr.msk.f32.gmra.mxu1 %vm185_vm3, %v2946_v44 }
 0x724   :  { %v8935_v47 = vpop.f32.mrf.mxu0  ;;  %8953 = vmatprep.mubr.msk.f32.mxu1 %vm9847_vm0, %v13083_v63 }
 0x726   :  { %v2951_v6 = vpop.f32.mrf.mxu0 }
 0x727   :  { %8954 = vmatmul.mubr.msk.f32.gmra.mxu1 %vm185_vm3, %v2951_v6 }
 0x728   :  { %v8938_v7 = vpop.f32.mrf.mxu0  ;;  %8956 = vmatprep.mubr.msk.f32.mxu1 %vm9847_vm0, %v13083_v63 }
 0x72a   :  { %v2956_v30 = vpop.f32.mrf.mxu0 }
 0x72b   :  { %8957 = vmatmul.mubr.msk.f32.gmra.mxu1 %vm185_vm3, %v2956_v30 }
 0x72c   :  { %v8941_v5 = vpop.f32.mrf.mxu0  ;;  %8986 = vmatprep.mubr.msk.f32.mxu1 %vm9847_vm0, %v13083_v63 }
 0x77e   :  { %v3204_v27 = vpop.f32.mrf.mxu0 }
 0x77f   :  { %8987 = vmatmul.mubr.msk.f32.vlgmr.msra.gmra.mxu1 %vm185_vm3, %v3204_v27 }
 0x780   :  { %v8971_v37 = vpop.f32.mrf.mxu0  ;;  %8989 = vmatprep.mubr.msk.f32.mxu1 %vm9847_vm0, %v13083_v63 }
 0x782   :  { %v3209_v55 = vpop.f32.mrf.mxu0 }
 0x783   :  { %8990 = vmatmul.mubr.msk.f32.gmra.mxu1 %vm185_vm3, %v3209_v55 }
 0x784   :  { %v8974_v22 = vpop.f32.mrf.mxu0  ;;  %8992 = vmatprep.mubr.msk.f32.mxu1 %vm9847_vm0, %v13083_v63 }
 0x786   :  { %v3214_v19 = vpop.f32.mrf.mxu0 }
 0x787   :  { %8993 = vmatmul.mubr.msk.f32.gmra.mxu1 %vm185_vm3, %v3214_v19 }
 0x788   :  { %v8977_v24 = vpop.f32.mrf.mxu0  ;;  %8995 = vmatprep.mubr.msk.f32.mxu1 %vm9847_vm0, %v13083_v63 }
 0x78a   :  { %v3219_v20 = vpop.f32.mrf.mxu0 }
 0x78b   :  { %8996 = vmatmul.mubr.msk.f32.gmra.mxu1 %vm185_vm3, %v3219_v20 }
 0x78c   :  { %v8980_v1 = vpop.f32.mrf.mxu0  ;;  %8998 = vmatprep.mubr.msk.f32.mxu1 %vm9847_vm0, %v13083_v63 }
 0x78e   :  { %v3224_v36 = vpop.f32.mrf.mxu0 }
 0x78f   :  { %8999 = vmatmul.mubr.msk.f32.gmra.mxu1 %vm185_vm3, %v3224_v36 }
 0x790   :  { %v8983_v61 = vpop.f32.mrf.mxu0  ;;  %9032 = vmatprep.mubr.msk.f32.mxu1 %vm9847_vm0, %v13083_v63 }
 0x7b3   :  { %v2778_v57 = vpop.f32.mrf.mxu1 }
 0x7b4   :  { %v2779_v6 = vadd.f32 %v2778_v57, %v11041_v10 }
 0x7b5   :  { %v8904_v62 = vpop.f32.mrf.mxu1 }
 0x7b7   :  { %v2783_v15 = vpop.f32.mrf.mxu1 }
 0x7b8   :  { %v2784_v27 = vadd.f32 %v2783_v15, %v11043_v12  ;;  %v3476_v12 = vld [vmem:[#allocation5 + $0x10] sm:$0xff]  ;;  %v3475_v15 = vld [vmem:[#allocation5 + $0x8] sm:$0xff] }
 0x7b9   :  { %v8907_v40 = vpop.f32.mrf.mxu1 }
 0x7bb   :  { %v2788_v33 = vpop.f32.mrf.mxu1 }
 0x7bc   :  { %v2789_v19 = vadd.f32 %v2788_v33, %v11045_v53  ;;  %v3474_v53 = vld [vmem:[#allocation5] sm:$0xff] }
 0x7bd   :  { %v8910_v52 = vpop.f32.mrf.mxu1 }
 0x7bf   :  { %v2793_v32 = vpop.f32.mrf.mxu1 }
 0x7c0   :  { %v2794_v36 = vadd.f32 %v2793_v32, %v11047_v0  ;;  %v13044_v0 = vsub.s32 0, %v9993_v17 }
 0x7c1   :  { %v8913_v41 = vpop.f32.mrf.mxu1 }
 0x7c3   :  { %v2798_v44 = vpop.f32.mrf.mxu1 }
 0x7c4   :  { %v2799_v10 = vadd.f32 %v2798_v44, %v11049_v4  ;;  %v11095_v4 = vld [vmem:[%s13015_s5] sm:$0xff] }
 0x7c5   :  { %v8916_v47 = vpop.f32.mrf.mxu1 }
 0x7c6   :  { %v3477_v47 = vld [vmem:[#allocation5 + $0x18] sm:$0xff] }
 0x7c7   :  { %9002 = vmatpush3.msra.mxu0 %v3477_v47 }
 0x7c8   :  { %9003 = vmatprep.subr.mxu0 %v13083_v63 }
 0x7c9   :  { %9004 = vmatpush3.msra.mxu0 %v3476_v12 }
 0x7ca   :  { %9005 = vmatprep.subr.mxu0 %v13083_v63 }
 0x7cb   :  { %9006 = vmatpush3.msra.mxu0 %v3475_v15 }
 0x7cc   :  { %9007 = vmatprep.subr.mxu0 %v13083_v63 }
 0x7cd   :  { %9008 = vmatpush3.msra.mxu0 %v3474_v53 }
 0x7ce   :  { %9047 = vmatprep.subr.mxu0 %v13083_v63 }
 0x7db   :  { %v3041_v7 = vpop.f32.mrf.mxu1 }
 0x7dc   :  { %v3065_v30 = vadd.f32 %v3041_v7, %v2779_v6  ;;  %v3400_v7 = vrot.slane %v11095_v4, %v13044_v0 }
 0x7dd   :  { %v8946_v5 = vpop.f32.mrf.mxu1 }
 0x7df   :  { %v3046_v37 = vpop.f32.mrf.mxu1 }
 0x7e0   :  { %v3066_v55 = vadd.f32 %v3046_v37, %v2784_v27 }
 0x7e1   :  { %v8949_v22 = vpop.f32.mrf.mxu1 }
 0x7e3   :  { %v3051_v24 = vpop.f32.mrf.mxu1 }
 0x7e4   :  { %v3067_v20 = vadd.f32 %v3051_v24, %v2789_v19 }
 0x7e5   :  { %v8952_v1 = vpop.f32.mrf.mxu1 }
 0x7e7   :  { %v3056_v61 = vpop.f32.mrf.mxu1 }
 0x7e8   :  { %v3068_v62 = vadd.f32 %v3056_v61, %v2794_v36 }
 0x7e9   :  { %v8955_v40 = vpop.f32.mrf.mxu1 }
 0x7eb   :  { %v3061_v57 = vpop.f32.mrf.mxu1 }
 0x7ec   :  { %v3069_v52 = vadd.f32 %v3061_v57, %v2799_v10 }
 0x7ed   :  { %v8958_v41 = vpop.f32.mrf.mxu1 }
 0x83f   :  { %v3309_v33 = vpop.f32.mrf.mxu1 }
 0x840   :  { %v3333_v32 = vadd.f32 %v3309_v33, %v3065_v30 }
 0x841   :  { %v8988_v44 = vpop.f32.mrf.mxu1 }
 0x842   :  { %v3392_v6 = vadd.f32 %v3333_v32, %v10000_v21 }
 0x843   :  { %v3314_v5 = vpop.f32.mrf.mxu1 }
 0x844   :  { %v3334_v27 = vadd.f32 %v3314_v5, %v3066_v55  ;;  %v3401_v22 = vadd.f32 %v3400_v7, %v3392_v6 }
 0x845   :  { %v8991_v37 = vpop.f32.mrf.mxu1 }
 0x846   :  { %v3393_v19 = vadd.f32 %v3334_v27, %v10010_v25  ;;  %v3406_v40 = vsel %vm317_vm4, %v3401_v22, 0.0 }
 0x847   :  { %v3319_v24 = vpop.f32.mrf.mxu1 }
 0x848   :  { %v3402_v1 = vadd.f32 %v3400_v7, %v3393_v19  ;;  %v3335_v36 = vadd.f32 %v3319_v24, %v3067_v20 }
 0x849   :  { %v8994_v61 = vpop.f32.mrf.mxu1 }
 0x84a   :  { %v3407_v30 = vsel %vm317_vm4, %v3402_v1, 0.0  ;;  %v3394_v21 = vadd.f32 %v3335_v36, %v10022_v28 }
 0x84b   :  { %v3408_v10 = vadd.f32 %v3407_v30, %v3406_v40  ;;  %v3324_v57 = vpop.f32.mrf.mxu1 }
 0x84c   :  { %v3403_v41 = vadd.f32 %v3400_v7, %v3394_v21  ;;  %v3336_v47 = vadd.f32 %v3324_v57, %v3068_v62 }
 0x84d   :  { %v8997_v12 = vpop.f32.mrf.mxu1 }
 0x84e   :  { %v3409_v55 = vsel %vm317_vm4, %v3403_v41, 0.0  ;;  %v3395_v15 = vadd.f32 %v3336_v47, %v10032_v31 }
 0x84f   :  { %v3410_v25 = vadd.f32 %v3409_v55, %v3408_v10  ;;  %v3329_v53 = vpop.f32.mrf.mxu1 }
 0x850   :  { %v3404_v33 = vadd.f32 %v3400_v7, %v3395_v15  ;;  %v3337_v20 = vadd.f32 %v3329_v53, %v3069_v52 }
 0x851   :  { %v9000_v32 = vpop.f32.mrf.mxu1 }
 0x852   :  { %v3411_v44 = vsel %vm317_vm4, %v3404_v33, 0.0  ;;  %v3396_v6 = vadd.f32 %v3337_v20, %v10042_v34 }
 0x853   :  { %v3412_v5 = vadd.f32 %v3411_v44, %v3410_v25 }
 0x854   :  { %v3405_v28 = vadd.f32 %v3400_v7, %v3396_v6 }
 0x856   :  { %v3413_v27 = vsel %vm317_vm4, %v3405_v28, 0.0 }
 0x857   :  { %v3414_v37 = vadd.f32 %v3413_v27, %v3412_v5 }
 0x859   :  { %v3415_v62 = vrot.slane %v3414_v37, 4 }
 0x85b   :  { %v3416_v19 = vadd.f32 %v3415_v62, %v3414_v37 }
 0x85d   :  { %v3417_v24 = vrot.slane %v3416_v19, 2 }
 0x85f   :  { %v3418_v36 = vadd.f32 %v3417_v24, %v3416_v19  ;;  %v13043_v24 = vsub.s32 3, %v9993_v17 }
 0x861   :  { %v3419_v61 = vrot.slane %v3418_v36, 1 }
 0x863   :  { %v3420_v31 = vadd.f32 %v3419_v61, %v3418_v36  ;;  %v13042_v36 = vsub.s32 4, %v9993_v17  ;;  %v3459_v61 = vrot.slane %v11095_v4, %v13043_v24 }
 0x865   :  { %v3422_v40 = vmul.f32 0.025, %v3420_v31 }
 0x867   :  { %v3423_v30 = vsub.f32 %v3401_v22, %v3422_v40  ;;  %v3424_v21 = vsub.f32 %v3402_v1, %v3422_v40  ;;  %v3425_v52 = vsub.f32 %v3403_v41, %v3422_v40  ;;  %v3426_v10 = vsub.f32 %v3404_v33, %v3422_v40 }
 0x868   :  { %v3427_v57 = vsub.f32 %v3405_v28, %v3422_v40  ;;  %v3468_v40 = vrot.slane %v11095_v4, %v13042_v36 }
 0x869   :  { %v3428_v47 = vmul.f32 %v3423_v30, %v3423_v30  ;;  %v3429_v12 = vmul.f32 %v3424_v21, %v3424_v21  ;;  %v3430_v34 = vmul.f32 %v3425_v52, %v3425_v52  ;;  %v3431_v55 = vmul.f32 %v3426_v10, %v3426_v10 }
 0x86a   :  { %v3432_v53 = vmul.f32 %v3427_v57, %v3427_v57 }
 0x86b   :  { %v3433_v7 = vsel %vm317_vm4, %v3428_v47, 0.0  ;;  %v3434_v15 = vsel %vm317_vm4, %v3429_v12, 0.0  ;;  %v3436_v20 = vsel %vm317_vm4, %v3430_v34, 0.0  ;;  %v3438_v44 = vsel %vm317_vm4, %v3431_v55, 0.0 }
 0x86c   :  { %v3435_v25 = vadd.f32 %v3434_v15, %v3433_v7  ;;  %v3440_v1 = vsel %vm317_vm4, %v3432_v53, 0.0 }
 0x86e   :  { %v3437_v32 = vadd.f32 %v3436_v20, %v3435_v25 }
 0x870   :  { %v3439_v22 = vadd.f32 %v3438_v44, %v3437_v32  ;;  %v3726_v44 = vld [vmem:[#allocation5 + $0x38] sm:$0xff] }
 0x871   :  { %9025 = vmatpush3.xpose.msk.msra.mxu1 %vm3731_vm12, %v3726_v44 }
 0x872   :  { %v3441_v41 = vadd.f32 %v3440_v1, %v3439_v22  ;;  %9026 = vmatprep.subr.mxu1 %v13083_v63  ;;  %v3725_v22 = vld [vmem:[#allocation5 + $0x30] sm:$0xff]  ;;  %v3724_v1 = vld [vmem:[#allocation5 + $0x28] sm:$0xff] }
 0x874   :  { %v3442_v33 = vrot.slane %v3441_v41, 4 }
 0x875   :  { %9027 = vmatpush3.xpose.msk.msra.mxu1 %vm3731_vm12, %v3725_v22 }
 0x876   :  { %v3443_v6 = vadd.f32 %v3442_v33, %v3441_v41  ;;  %9028 = vmatprep.subr.mxu1 %v13083_v63  ;;  %v3723_v41 = vld [vmem:[#allocation5 + $0x20] sm:$0xff]  ;;  %v3481_v33 = vrot.slane %v11095_v4, %v9996_v18 }
 0x878   :  { %v3444_v5 = vrot.slane %v3443_v6, 2 }
 0x879   :  { %9029 = vmatpush3.xpose.msk.msra.mxu1 %vm3731_vm12, %v3724_v1 }
 0x87a   :  { %v3445_v28 = vadd.f32 %v3444_v5, %v3443_v6  ;;  %9030 = vmatprep.subr.mxu1 %v13083_v63 }
 0x87c   :  { %v3446_v27 = vrot.slane %v3445_v28, 1 }
 0x87d   :  { %9031 = vmatpush3.xpose.msk.msra.mxu1 %vm3731_vm12, %v3723_v41 }
 0x87e   :  { %v3447_v37 = vadd.f32 %v3446_v27, %v3445_v28  ;;  %9064 = vmatprep.subr.mxu1 %v13083_v63 }
 0x880   :  { %v3448_v62 = vmul.f32 0.025, %v3447_v37 }
 0x882   :  { %v3449_v19 = vadd.f32 1e-05, %v3448_v62 }
 0x884   :  { %9670 = vrsqrt.f32 %v3449_v19 }
 0x891   :  { %v9671_v31 = vpop.eup %9670 }
 0x892   :  { %v3451_v47 = vmul.f32 %v9671_v31, %v3423_v30  ;;  %v3455_v12 = vmul.f32 %v9671_v31, %v3427_v57  ;;  %v3452_v34 = vmul.f32 %v9671_v31, %v3424_v21  ;;  %v3453_v55 = vmul.f32 %v9671_v31, %v3425_v52 }
 0x893   :  { %v3454_v7 = vmul.f32 %v9671_v31, %v3426_v10 }
 0x894   :  { %v3460_v15 = vmul.f32 %v3459_v61, %v3451_v47  ;;  %v3461_v53 = vmul.f32 %v3459_v61, %v3452_v34  ;;  %v3462_v32 = vmul.f32 %v3459_v61, %v3453_v55  ;;  %v3464_v52 = vmul.f32 %v3459_v61, %v3455_v12 }
 0x895   :  { %v3463_v21 = vmul.f32 %v3459_v61, %v3454_v7 }
 0x896   :  { %v11123_v25 = vadd.f32 %v3468_v40, %v3460_v15  ;;  %v11129_v20 = vadd.f32 %v3468_v40, %v3461_v53  ;;  %v11135_v30 = vadd.f32 %v3468_v40, %v3462_v32  ;;  %v11147_v57 = vadd.f32 %v3468_v40, %v3464_v52 }
 0x897   :  { %v11141_v10 = vadd.f32 %v3468_v40, %v3463_v21 }
 0x898   :  { %9010 = vmatmul.mubr.msk.f32.vlgmr.msra.gmra.mxu0 %vm317_vm4, %v11123_v25 }
 0x899   :  { %9012 = vmatprep.mubr.msk.f32.mxu0 %vm9847_vm0, %v13083_v63 }
 0x89c   :  { %9013 = vmatmul.mubr.msk.f32.gmra.mxu0 %vm317_vm4, %v11129_v20 }
 0x89d   :  { %9015 = vmatprep.mubr.msk.f32.mxu0 %vm9847_vm0, %v13083_v63 }
 0x8a0   :  { %9016 = vmatmul.mubr.msk.f32.gmra.mxu0 %vm317_vm4, %v11135_v30 }
 0x8a1   :  { %9018 = vmatprep.mubr.msk.f32.mxu0 %vm9847_vm0, %v13083_v63 }
 0x8a4   :  { %9019 = vmatmul.mubr.msk.f32.gmra.mxu0 %vm317_vm4, %v11141_v10 }
 0x8a5   :  { %9021 = vmatprep.mubr.msk.f32.mxu0 %vm9847_vm0, %v13083_v63 }
 0x8a8   :  { %9022 = vmatmul.mubr.msk.f32.gmra.mxu0 %vm317_vm4, %v11147_v57 }
 0x8a9   :  { %9049 = vmatprep.mubr.msk.f32.mxu0 %vm9847_vm0, %v13083_v63 }
 0x958   :  { %v3563_v6 = vpop.f32.mrf.mxu0 }
 0x959   :  { %v11163_v5 = vadd.f32 %v3563_v6, %v3481_v33 }
 0x95a   :  { %v9011_v28 = vpop.f32.mrf.mxu0 }
 0x95b   :  { %v11166_v27 = vmul.f32 0.70710677, %v11163_v5 }
 0x95c   :  { %v3568_v37 = vpop.f32.mrf.mxu0 }
 0x95d   :  { %v3607_v62 = vand.u32 2147483647, %v11166_v27  ;;  %v11169_v19 = vadd.f32 %v3568_v37, %v3481_v33  ;;  %vm3597_vm13 = vcmp.ge.f32.partialorder %v11166_v27, 0.0 }
 0x95e   :  { %v9014_v61 = vpop.f32.mrf.mxu0 }
 0x95f   :  { %v3612_v31 = vmul.f32 0.3275911, %v3607_v62  ;;  %v11172_v40 = vmul.f32 0.70710677, %v11169_v19  ;;  %v3677_v28 = vsub.f32 0.0, %v3607_v62 }
 0x960   :  { %v3573_v47 = vpop.f32.mrf.mxu0 }
 0x961   :  { %v3617_v12 = vadd.f32 1.0, %v3612_v31  ;;  %v3608_v34 = vand.u32 2147483647, %v11172_v40  ;;  %v11175_v55 = vadd.f32 %v3573_v47, %v3481_v33  ;;  %vm3598_vm14 = vcmp.ge.f32.partialorder %v11172_v40, 0.0 }
 0x962   :  { %v9017_v7 = vpop.f32.mrf.mxu0 }
 0x963   :  { %9672 = vrcp.f32 %v3617_v12  ;;  %v3613_v15 = vmul.f32 0.3275911, %v3608_v34  ;;  %v11178_v53 = vmul.f32 0.70710677, %v11175_v55 }
 0x964   :  { %v3578_v32 = vpop.f32.mrf.mxu0 }
 0x965   :  { %v3618_v21 = vadd.f32 1.0, %v3613_v15  ;;  %v11180_v52 = vadd.f32 %v3578_v32, %v3481_v33  ;;  %v3609_v44 = vand.u32 2147483647, %v11178_v53  ;;  %v3682_v15 = vmul.f32 %v3677_v28, %v3607_v62 }
 0x966   :  { %v9020_v22 = vpop.f32.mrf.mxu0  ;;  %v3678_v32 = vsub.f32 0.0, %v3608_v34  ;;  %vm3599_vm15 = vcmp.ge.f32.partialorder %v11178_v53, 0.0 }
 0x967   :  { %9674 = vrcp.f32 %v3618_v21  ;;  %v3614_v1 = vmul.f32 0.3275911, %v3609_v44  ;;  %v11184_v41 = vmul.f32 0.70710677, %v11180_v52  ;;  %v3679_v18 = vsub.f32 0.0, %v3609_v44 }
 0x968   :  { %v3583_v6 = vpop.f32.mrf.mxu0 }
 0x969   :  { %v11186_v37 = vadd.f32 %v3583_v6, %v3481_v33  ;;  %v3619_v61 = vadd.f32 1.0, %v3614_v1  ;;  %v3610_v31 = vand.u32 2147483647, %v11184_v41  ;;  %v3687_v33 = vmul.f32 1.442695, %v3682_v15 }
 0x96a   :  { %v9023_v47 = vpop.f32.mrf.mxu0  ;;  %v3683_v6 = vmul.f32 %v3678_v32, %v3608_v34  ;;  %v3684_v62 = vmul.f32 %v3679_v18, %v3609_v44  ;;  %vm3600_vm1 = vcmp.ge.f32.partialorder %v11184_v41, 0.0 }
 0x96b   :  { %v11190_v12 = vmul.f32 0.70710677, %v11186_v37  ;;  %9676 = vrcp.f32 %v3619_v61  ;;  %v3615_v7 = vmul.f32 0.3275911, %v3610_v31  ;;  %v3680_v28 = vsub.f32 0.0, %v3610_v31 }
 0x96c   :  { %v3689_v26 = vmul.f32 1.442695, %v3683_v6  ;;  %v3691_v34 = vmul.f32 1.442695, %v3684_v62 }
 0x96d   :  { %v3611_v21 = vand.u32 2147483647, %v11190_v12  ;;  %v3620_v22 = vadd.f32 1.0, %v3615_v7  ;;  %vm3601_vm2 = vcmp.ge.f32.partialorder %v11190_v12, 0.0 }
 0x96f   :  { %v3616_v36 = vmul.f32 0.3275911, %v3611_v21  ;;  %9678 = vrcp.f32 %v3620_v22  ;;  %v3681_v22 = vsub.f32 0.0, %v3611_v21 }
 0x970   :  { %v9673_v24 = vpop.eup %9672 }
 0x971   :  { %v3632_v0 = vmul.f32 1.0614054, %v9673_v24  ;;  %v3621_v1 = vadd.f32 1.0, %v3616_v36  ;;  %v3685_v36 = vmul.f32 %v3680_v28, %v3610_v31  ;;  %v3686_v23 = vmul.f32 %v3681_v22, %v3611_v21 }
 0x973   :  { %v3637_v35 = vadd.f32 -1.4531521, %v3632_v0  ;;  %9680 = vrcp.f32 %v3621_v1  ;;  %v3695_v31 = vmul.f32 1.442695, %v3686_v23 }
 0x974   :  { %v9675_v47 = vpop.eup %9674  ;;  %9682 = vpow2.f32 %v3687_v33 }
 0x975   :  { %v3642_v56 = vmul.f32 %v9673_v24, %v3637_v35  ;;  %v3633_v61 = vmul.f32 1.0614054, %v9675_v47  ;;  %9684 = vpow2.f32 %v3689_v26 }
 0x976   :  { %9686 = vpow2.f32 %v3691_v34 }
 0x977   :  { %v3647_v13 = vadd.f32 1.4214138, %v3642_v56  ;;  %v3638_v45 = vadd.f32 -1.4531521, %v3633_v61  ;;  %v3693_v56 = vmul.f32 1.442695, %v3685_v36 }
 0x978   :  { %v9677_v7 = vpop.eup %9676 }
 0x979   :  { %v3652_v51 = vmul.f32 %v9673_v24, %v3647_v13  ;;  %v3643_v54 = vmul.f32 %v9675_v47, %v3638_v45  ;;  %v3634_v15 = vmul.f32 1.0614054, %v9677_v7  ;;  %9688 = vpow2.f32 %v3693_v56 }
 0x97a   :  { %9690 = vpow2.f32 %v3695_v31 }
 0x97b   :  { %v3657_v32 = vadd.f32 -0.28449672, %v3652_v51  ;;  %v3648_v0 = vadd.f32 1.4214138, %v3643_v54  ;;  %v3639_v1 = vadd.f32 -1.4531521, %v3634_v15 }
 0x97c   :  { %v9679_v2 = vpop.eup %9678 }
 0x97d   :  { %v3662_v35 = vmul.f32 %v9673_v24, %v3657_v32  ;;  %v3653_v33 = vmul.f32 %v9675_v47, %v3648_v0  ;;  %v3644_v6 = vmul.f32 %v9677_v7, %v3639_v1  ;;  %v3635_v18 = vmul.f32 1.0614054, %v9679_v2 }
 0x97f   :  { %v3667_v44 = vadd.f32 0.2548296, %v3662_v35  ;;  %v3658_v61 = vadd.f32 -0.28449672, %v3653_v33  ;;  %v3649_v45 = vadd.f32 1.4214138, %v3644_v6 }
 0x980   :  { %v9681_v13 = vpop.eup %9680  ;;  %v3640_v26 = vadd.f32 -1.4531521, %v3635_v18 }
 0x981   :  { %v3672_v11 = vmul.f32 %v9673_v24, %v3667_v44  ;;  %v3663_v38 = vmul.f32 %v9675_v47, %v3658_v61  ;;  %v3636_v62 = vmul.f32 1.0614054, %v9681_v13  ;;  %v9683_v51 = vpop.eup %9682  ;;  %v3654_v54 = vmul.f32 %v9677_v7, %v3649_v45 }
 0x982   :  { %v3645_v28 = vmul.f32 %v9679_v2, %v3640_v26  ;;  %v9685_v35 = vpop.eup %9684  ;;  %v13069_v24 = vmov -1.0   ;;  %v3587_v44 = vmul.f32 0.5, %v11163_v5 }
 0x983   :  { %v3697_v21 = vmul.f32 %v9683_v51, %v3672_v11  ;;  %v3668_v22 = vadd.f32 0.2548296, %v3663_v38  ;;  %v3641_v15 = vadd.f32 -1.4531521, %v3636_v62  ;;  %v3659_v34 = vadd.f32 -0.28449672, %v3654_v54  ;;  %v9687_v51 = vpop.eup %9686 }
 0x984   :  { %v3650_v36 = vadd.f32 1.4214138, %v3645_v28  ;;  %v3602_v33 = vsel %vm3597_vm13, 1.0, %v13069_v24  ;;  %v3603_v26 = vsel %vm3598_vm14, 1.0, %v13069_v24  ;;  %vm2468_vm13 = vcmask 37889  }
 0x985   :  { %v3702_v32 = vsub.f32 1.0, %v3697_v21  ;;  %v3673_v0 = vmul.f32 %v9675_v47, %v3668_v22  ;;  %v3646_v1 = vmul.f32 %v9681_v13, %v3641_v15  ;;  %v3664_v23 = vmul.f32 %v9677_v7, %v3659_v34 }
 0x986   :  { %v3655_v6 = vmul.f32 %v9679_v2, %v3650_v36  ;;  %v3588_v15 = vmul.f32 0.5, %v11169_v19  ;;  %vm2462_vm14 = vcmask 32768  }
 0x987   :  { %v3707_v18 = vmul.f32 %v3702_v32, %v3602_v33  ;;  %v3698_v56 = vmul.f32 %v9685_v35, %v3673_v0  ;;  %v3651_v27 = vadd.f32 1.4214138, %v3646_v1  ;;  %v3669_v11 = vadd.f32 0.2548296, %v3664_v23 }
 0x988   :  { %v3660_v38 = vadd.f32 -0.28449672, %v3655_v6  ;;  %v3604_v1 = vsel %vm3599_vm15, 1.0, %v13069_v24  ;;  %v3589_v6 = vmul.f32 0.5, %v11175_v55  ;;  %vm2479_vm15 = vcmask 34816  }
 0x989   :  { %v3712_v61 = vadd.f32 1.0, %v3707_v18  ;;  %v3703_v45 = vsub.f32 1.0, %v3698_v56  ;;  %v3656_v47 = vmul.f32 %v9681_v13, %v3651_v27  ;;  %v3674_v62 = vmul.f32 %v9677_v7, %v3669_v11  ;;  %v9689_v7 = vpop.eup %9688 }
 0x98a   :  { %v3665_v31 = vmul.f32 %v9679_v2, %v3660_v38  ;;  %v9691_v19 = vpop.eup %9690  ;;  %v3605_v56 = vsel %vm3600_vm1, 1.0, %v13069_v24  ;;  %vm2477_vm1 = vcmask 39942  }
 0x98b   :  { %v3717_v54 = vmul.f32 %v3712_v61, %v3587_v44  ;;  %v3708_v28 = vmul.f32 %v3703_v45, %v3603_v26  ;;  %v3661_v21 = vadd.f32 -0.28449672, %v3656_v47  ;;  %v3699_v40 = vmul.f32 %v9687_v51, %v3674_v62  ;;  %v3927_v62 = vld [vmem:[#allocation3 + $0x80] sm:$0xff] }
 0x98c   :  { %v3670_v22 = vadd.f32 0.2548296, %v3665_v31  ;;  %v3606_v61 = vsel %vm3601_vm2, 1.0, %v13069_v24  ;;  %v3591_v47 = vmul.f32 0.5, %v11186_v37  ;;  %9048 = vmatpush3.xpose.msk.msra.mxu0 %vm317_vm4, %v3927_v62  ;;  %v13068_v37 = vsub.s32 2, %v9993_v17 }
 0x98d   :  { %v3713_v34 = vadd.f32 1.0, %v3708_v28  ;;  %v3666_v36 = vmul.f32 %v9681_v13, %v3661_v21  ;;  %9033 = vmatmul.mubr.msk.f32.vlgmr.msra.gmra.mxu1 %vm3731_vm12, %v3717_v54  ;;  %v3704_v5 = vsub.f32 1.0, %v3699_v40  ;;  %9081 = vmatprep.subr.mxu0 %v13083_v63 }
 0x98e   :  { %v3675_v32 = vmul.f32 %v9679_v2, %v3670_v22  ;;  %9035 = vmatprep.mubr.msk.f32.mxu1 %vm9847_vm0, %v13083_v63  ;;  %v3730_v54 = vrot.slane %v11095_v4, %v13068_v37 }
 0x98f   :  { %v3718_v0 = vmul.f32 %v3713_v34, %v3588_v15  ;;  %v3671_v35 = vadd.f32 0.2548296, %v3666_v36  ;;  %v3709_v33 = vmul.f32 %v3704_v5, %v3604_v1 }
 0x990   :  { %v3700_v53 = vmul.f32 %v9689_v7, %v3675_v32 }
 0x991   :  { %v3676_v23 = vmul.f32 %v9681_v13, %v3671_v35  ;;  %9036 = vmatmul.mubr.msk.f32.gmra.mxu1 %vm3731_vm12, %v3718_v0  ;;  %v3714_v18 = vadd.f32 1.0, %v3709_v33  ;;  %v3590_v13 = vmul.f32 0.5, %v11180_v52  ;;  %v3932_v52 = vld [vmem:[#allocation3 + $0xa0] sm:$0xff] }
 0x992   :  { %v3705_v2 = vsub.f32 1.0, %v3700_v53  ;;  %9038 = vmatprep.mubr.msk.f32.mxu1 %vm9847_vm0, %v13083_v63  ;;  %9065 = vmatpush3.xpose.msk.msra.mxu1 %vm317_vm4, %v3932_v52 }
 0x993   :  { %v3701_v27 = vmul.f32 %v9691_v19, %v3676_v23  ;;  %v3719_v11 = vmul.f32 %v3714_v18, %v3589_v6  ;;  %9098 = vmatprep.subr.mxu1 %v13083_v63 }
 0x994   :  { %v3710_v38 = vmul.f32 %v3705_v2, %v3605_v56 }
 0x995   :  { %v3706_v41 = vsub.f32 1.0, %v3701_v27  ;;  %9039 = vmatmul.mubr.msk.f32.gmra.mxu1 %vm3731_vm12, %v3719_v11 }
 0x996   :  { %v3715_v44 = vadd.f32 1.0, %v3710_v38  ;;  %9041 = vmatprep.mubr.msk.f32.mxu1 %vm9847_vm0, %v13083_v63 }
 0x997   :  { %v3711_v55 = vmul.f32 %v3706_v41, %v3606_v61 }
 0x998   :  { %v3720_v45 = vmul.f32 %v3715_v44, %v3590_v13 }
 0x999   :  { %v3716_v26 = vadd.f32 1.0, %v3711_v55 }
 0x99a   :  { %9042 = vmatmul.mubr.msk.f32.gmra.mxu1 %vm3731_vm12, %v3720_v45 }
 0x99b   :  { %v3721_v12 = vmul.f32 %v3716_v26, %v3591_v47  ;;  %9044 = vmatprep.mubr.msk.f32.mxu1 %vm9847_vm0, %v13083_v63 }
 0x99e   :  { %9045 = vmatmul.mubr.msk.f32.gmra.mxu1 %vm3731_vm12, %v3721_v12 }
 0x99f   :  { %9066 = vmatprep.mubr.msk.f32.mxu1 %vm9847_vm0, %v13083_v63 }
 0xa4d   :  { %v3825_v31 = vpop.f32.mrf.mxu1 }
 0xa4e   :  { %v3826_v22 = vadd.f32 %v3825_v31, %v3730_v54 }
 0xa4f   :  { %v9034_v51 = vpop.f32.mrf.mxu1 }
 0xa50   :  { %v3849_v32 = vadd.f32 %v3826_v22, %v11123_v25 }
 0xa51   :  { %v3830_v28 = vpop.f32.mrf.mxu1 }
 0xa52   :  { %v3831_v21 = vadd.f32 %v3830_v28, %v3730_v54  ;;  %v3854_v53 = vsel %vm317_vm4, %v3849_v32, 0.0 }
 0xa53   :  { %v9037_v40 = vpop.f32.mrf.mxu1 }
 0xa54   :  { %v3850_v34 = vadd.f32 %v3831_v21, %v11129_v20 }
 0xa55   :  { %v3835_v15 = vpop.f32.mrf.mxu1 }
 0xa56   :  { %v3836_v36 = vadd.f32 %v3835_v15, %v3730_v54  ;;  %v3855_v1 = vsel %vm317_vm4, %v3850_v34, 0.0 }
 0xa57   :  { %v9040_v5 = vpop.f32.mrf.mxu1  ;;  %v3856_v6 = vadd.f32 %v3855_v1, %v3854_v53 }
 0xa58   :  { %v3851_v7 = vadd.f32 %v3836_v36, %v11135_v30 }
 0xa5a   :  { %v3840_v0 = vpop.f32.mrf.mxu1  ;;  %v3857_v23 = vsel %vm317_vm4, %v3851_v7, 0.0 }
 0xa5b   :  { %v3841_v35 = vadd.f32 %v3840_v0, %v3730_v54  ;;  %v3858_v56 = vadd.f32 %v3857_v23, %v3856_v6 }
 0xa5c   :  { %v9043_v33 = vpop.f32.mrf.mxu1 }
 0xa5d   :  { %v3852_v19 = vadd.f32 %v3841_v35, %v11141_v10 }
 0xa5e   :  { %v3845_v18 = vpop.f32.mrf.mxu1 }
 0xa5f   :  { %v3859_v20 = vsel %vm317_vm4, %v3852_v19, 0.0  ;;  %v3846_v2 = vadd.f32 %v3845_v18, %v3730_v54  ;;  %v13067_v18 = vsub.s32 5, %v9993_v17 }
 0xa60   :  { %v9046_v25 = vpop.f32.mrf.mxu1  ;;  %v3860_v27 = vadd.f32 %v3859_v20, %v3858_v56  ;;  %v13066_v20 = vsub.s32 6, %v9993_v17 }
 0xa61   :  { %v3853_v30 = vadd.f32 %v3846_v2, %v11147_v57  ;;  %v3906_v2 = vrot.slane %v11095_v4, %v13067_v18 }
 0xa62   :  { %v3915_v25 = vrot.slane %v11095_v4, %v13066_v20  ;;  %v3937_v4 = vld [vmem:[#allocation3 + $0xc0] sm:$0xff] }
 0xa63   :  { %v3861_v11 = vsel %vm317_vm4, %v3853_v30, 0.0 }
 0xa64   :  { %v3862_v38 = vadd.f32 %v3861_v11, %v3860_v27 }
 0xa66   :  { %v3863_v41 = vrot.slane %v3862_v38, 4 }
 0xa68   :  { %v3864_v13 = vadd.f32 %v3863_v41, %v3862_v38 }
 0xa6a   :  { %v3865_v44 = vrot.slane %v3864_v13, 2 }
 0xa6c   :  { %v3866_v61 = vadd.f32 %v3865_v44, %v3864_v13 }
 0xa6e   :  { %v3867_v55 = vrot.slane %v3866_v61, 1 }
 0xa70   :  { %v3868_v45 = vadd.f32 %v3867_v55, %v3866_v61 }
 0xa72   :  { %v3869_v10 = vmul.f32 0.025, %v3868_v45 }
 0xa74   :  { %v3870_v47 = vsub.f32 %v3849_v32, %v3869_v10  ;;  %v3871_v26 = vsub.f32 %v3850_v34, %v3869_v10  ;;  %v3872_v12 = vsub.f32 %v3851_v7, %v3869_v10  ;;  %v3873_v52 = vsub.f32 %v3852_v19, %v3869_v10 }
 0xa75   :  { %v3874_v62 = vsub.f32 %v3853_v30, %v3869_v10 }
 0xa76   :  { %v3875_v31 = vmul.f32 %v3870_v47, %v3870_v47  ;;  %v3876_v51 = vmul.f32 %v3871_v26, %v3871_v26  ;;  %v3877_v54 = vmul.f32 %v3872_v12, %v3872_v12  ;;  %v3878_v57 = vmul.f32 %v3873_v52, %v3873_v52 }
 0xa77   :  { %v3879_v22 = vmul.f32 %v3874_v62, %v3874_v62 }
 0xa78   :  { %v3880_v28 = vsel %vm317_vm4, %v3875_v31, 0.0  ;;  %v3881_v21 = vsel %vm317_vm4, %v3876_v51, 0.0  ;;  %v3883_v15 = vsel %vm317_vm4, %v3877_v54, 0.0  ;;  %v3885_v5 = vsel %vm317_vm4, %v3878_v57, 0.0 }
 0xa79   :  { %v3882_v40 = vadd.f32 %v3881_v21, %v3880_v28  ;;  %v3887_v34 = vsel %vm317_vm4, %v3879_v22, 0.0  ;;  %v3940_v28 = vld [vmem:[#allocation3 + $0xd8] sm:$0xff] }
 0xa7b   :  { %v3884_v36 = vadd.f32 %v3883_v15, %v3882_v40 }
 0xa7d   :  { %v3886_v32 = vadd.f32 %v3885_v5, %v3884_v36 }
 0xa7f   :  { %v3888_v7 = vadd.f32 %v3887_v34, %v3886_v32 }
 0xa81   :  { %v3889_v0 = vrot.slane %v3888_v7, 4 }
 0xa83   :  { %v3890_v1 = vadd.f32 %v3889_v0, %v3888_v7 }
 0xa85   :  { %v3891_v35 = vrot.slane %v3890_v1, 2 }
 0xa87   :  { %v3892_v33 = vadd.f32 %v3891_v35, %v3890_v1 }
 0xa89   :  { %v3893_v53 = vrot.slane %v3892_v33, 1 }
 0xa8b   :  { %v3894_v23 = vadd.f32 %v3893_v53, %v3892_v33 }
 0xa8d   :  { %v3895_v19 = vmul.f32 0.025, %v3894_v23 }
 0xa8f   :  { %v3896_v6 = vadd.f32 1e-05, %v3895_v19 }
 0xa91   :  { %9692 = vrsqrt.f32 %v3896_v6  ;;  %v7842_v6 = vld [vmem:[%s13013_s3 + $0x10] ss:$0 sm:$0xff] }
 0xa9e   :  { %v9693_v56 = vpop.eup %9692 }
 0xa9f   :  { %v3898_v30 = vmul.f32 %v9693_v56, %v3870_v47  ;;  %v3899_v27 = vmul.f32 %v9693_v56, %v3871_v26  ;;  %v3900_v11 = vmul.f32 %v9693_v56, %v3872_v12  ;;  %v3901_v38 = vmul.f32 %v9693_v56, %v3873_v52  ;;  %v3928_v47 = vld [vmem:[#allocation3 + $0x88] sm:$0xff]  ;;  %v3929_v12 = vld [vmem:[#allocation3 + $0x90] sm:$0xff] }
 0xaa0   :  { %v3902_v41 = vmul.f32 %v9693_v56, %v3874_v62  ;;  %v3938_v26 = vld [vmem:[#allocation3 + $0xc8] sm:$0xff]  ;;  %v3939_v52 = vld [vmem:[#allocation3 + $0xd0] sm:$0xff]  ;;  %v3930_v62 = vld [vmem:[#allocation3 + $0x98] sm:$0xff] }
 0xaa1   :  { %v3907_v13 = vmul.f32 %v3906_v2, %v3898_v30  ;;  %v3908_v44 = vmul.f32 %v3906_v2, %v3899_v27  ;;  %v3909_v61 = vmul.f32 %v3906_v2, %v3900_v11  ;;  %v3910_v55 = vmul.f32 %v3906_v2, %v3901_v38 }
 0xaa2   :  { %v3911_v45 = vmul.f32 %v3906_v2, %v3902_v41 }
 0xaa3   :  { %v11254_v10 = vadd.f32 %v3915_v25, %v3907_v13  ;;  %v11256_v31 = vadd.f32 %v3915_v25, %v3908_v44  ;;  %v11258_v51 = vadd.f32 %v3915_v25, %v3909_v61  ;;  %v11260_v54 = vadd.f32 %v3915_v25, %v3910_v55 }
 0xaa4   :  { %v11262_v57 = vadd.f32 %v3915_v25, %v3911_v45 }
 0xaa5   :  { %3921 = vst.msk [vmem:[%s13016_s6] sm:$0xff] %vm317_vm4, %v11254_v10  ;;  %3922 = vst.msk [vmem:[%s13016_s6 + $0x8] sm:$0xff] %vm317_vm4, %v11256_v31  ;;  %9050 = vmatmul.mubr.msk.f32.vlgmr.msra.gmra.mxu0 %vm317_vm4, %v11254_v10  ;;  %9067 = vmatmul.mubr.msk.f32.vlgmr.msra.gmra.mxu1 %vm317_vm4, %v11254_v10 }
 0xaa6   :  { %13106 = vst [vmem:[#allocation40_spill] sm:$0xff] %v11262_v57  ;;  %3923 = vst.msk [vmem:[%s13016_s6 + $0x10] sm:$0xff] %vm317_vm4, %v11258_v51  ;;  %9052 = vmatprep.mubr.msk.f32.mxu0 %vm9847_vm0, %v13083_v63  ;;  %9069 = vmatprep.mubr.msk.f32.mxu1 %vm9847_vm0, %v13083_v63 }
 0xaa7   :  { %3924 = vst.msk [vmem:[%s13016_s6 + $0x18] sm:$0xff] %vm317_vm4, %v11260_v54  ;;  %3925 = vst.msk [vmem:[%s13016_s6 + $0x20] sm:$0xff] %vm317_vm4, %v11262_v57  ;;  %9082 = vmatpush3.xpose.msk.msra.mxu0 %vm317_vm4, %v3937_v4 }
 0xaa8   :  { %9123 = vmatprep.subr.mxu0 %v13083_v63 }
 0xaa9   :  { %9053 = vmatmul.mubr.msk.f32.gmra.mxu0 %vm317_vm4, %v11256_v31  ;;  %9070 = vmatmul.mubr.msk.f32.gmra.mxu1 %vm317_vm4, %v11256_v31 }
 0xaaa   :  { %9055 = vmatprep.mubr.msk.f32.mxu0 %vm9847_vm0, %v13083_v63  ;;  %9072 = vmatprep.mubr.msk.f32.mxu1 %vm9847_vm0, %v13083_v63 }
 0xaad   :  { %9056 = vmatmul.mubr.msk.f32.gmra.mxu0 %vm317_vm4, %v11258_v51  ;;  %9073 = vmatmul.mubr.msk.f32.gmra.mxu1 %vm317_vm4, %v11258_v51 }
 0xaae   :  { %9058 = vmatprep.mubr.msk.f32.mxu0 %vm9847_vm0, %v13083_v63  ;;  %9075 = vmatprep.mubr.msk.f32.mxu1 %vm9847_vm0, %v13083_v63 }
 0xab1   :  { %9059 = vmatmul.mubr.msk.f32.gmra.mxu0 %vm317_vm4, %v11260_v54  ;;  %9076 = vmatmul.mubr.msk.f32.gmra.mxu1 %vm317_vm4, %v11260_v54 }
 0xab2   :  { %9061 = vmatprep.mubr.msk.f32.mxu0 %vm9847_vm0, %v13083_v63  ;;  %9078 = vmatprep.mubr.msk.f32.mxu1 %vm9847_vm0, %v13083_v63 }
 0xab5   :  { %9062 = vmatmul.mubr.msk.f32.gmra.mxu0 %vm317_vm4, %v11262_v57  ;;  %9079 = vmatmul.mubr.msk.f32.gmra.mxu1 %vm317_vm4, %v11262_v57 }
 0xab6   :  { %9083 = vmatprep.mubr.msk.f32.mxu0 %vm9847_vm0, %v13083_v63  ;;  %9108 = vmatprep.mubr.msk.f32.mxu1 %vm9847_vm0, %v13083_v63 }
 0xab9   :  { %9084 = vmatmul.mubr.msk.f32.vlgmr.msra.gmra.mxu0 %vm317_vm4, %v11254_v10 }
 0xaba   :  { %9086 = vmatprep.mubr.msk.f32.mxu0 %vm9847_vm0, %v13083_v63  ;;  %9124 = vmatpush3.xpose.msk.msra.mxu0 %vm317_vm4, %v3928_v47 }
 0xabb   :  { %9157 = vmatprep.subr.mxu0 %v13083_v63 }
 0xabd   :  { %9087 = vmatmul.mubr.msk.f32.gmra.mxu0 %vm317_vm4, %v11256_v31 }
 0xabe   :  { %9089 = vmatprep.mubr.msk.f32.mxu0 %vm9847_vm0, %v13083_v63 }
 0xac1   :  { %9090 = vmatmul.mubr.msk.f32.gmra.mxu0 %vm317_vm4, %v11258_v51 }
 0xac2   :  { %9092 = vmatprep.mubr.msk.f32.mxu0 %vm9847_vm0, %v13083_v63 }
 0xac5   :  { %9093 = vmatmul.mubr.msk.f32.gmra.mxu0 %vm317_vm4, %v11260_v54 }
 0xac6   :  { %9095 = vmatprep.mubr.msk.f32.mxu0 %vm9847_vm0, %v13083_v63 }
 0xac9   :  { %9096 = vmatmul.mubr.msk.f32.gmra.mxu0 %vm317_vm4, %v11262_v57 }
 0xaca   :  { %9125 = vmatprep.mubr.msk.f32.mxu0 %vm9847_vm0, %v13083_v63 }
 0xacd   :  { %9126 = vmatmul.mubr.msk.f32.vlgmr.msra.gmra.mxu0 %vm317_vm4, %v11254_v10 }
 0xace   :  { %9128 = vmatprep.mubr.msk.f32.mxu0 %vm9847_vm0, %v13083_v63  ;;  %9158 = vmatpush3.xpose.msk.msra.mxu0 %vm317_vm4, %v3938_v26  ;;  %v7834_v26 = vld [vmem:[%s13013_s3 + $0xc] ss:$0 sm:$0xff] }
 0xacf   :  { %9199 = vmatprep.subr.mxu0 %v13083_v63 }
 0xad1   :  { %9129 = vmatmul.mubr.msk.f32.gmra.mxu0 %vm317_vm4, %v11256_v31 }
 0xad2   :  { %9131 = vmatprep.mubr.msk.f32.mxu0 %vm9847_vm0, %v13083_v63 }
 0xad5   :  { %9132 = vmatmul.mubr.msk.f32.gmra.mxu0 %vm317_vm4, %v11258_v51 }
 0xad6   :  { %9134 = vmatprep.mubr.msk.f32.mxu0 %vm9847_vm0, %v13083_v63 }
 0xad9   :  { %9135 = vmatmul.mubr.msk.f32.gmra.mxu0 %vm317_vm4, %v11260_v54 }
 0xada   :  { %9137 = vmatprep.mubr.msk.f32.mxu0 %vm9847_vm0, %v13083_v63 }
 0xadd   :  { %9138 = vmatmul.mubr.msk.f32.gmra.mxu0 %vm317_vm4, %v11262_v57 }
 0xade   :  { %9159 = vmatprep.mubr.msk.f32.mxu0 %vm9847_vm0, %v13083_v63 }
 0xae1   :  { %9160 = vmatmul.mubr.msk.f32.vlgmr.msra.gmra.mxu0 %vm317_vm4, %v11254_v10 }
 0xae2   :  { %9162 = vmatprep.mubr.msk.f32.mxu0 %vm9847_vm0, %v13083_v63  ;;  %9200 = vmatpush3.xpose.msk.msra.mxu0 %vm317_vm4, %v3929_v12 }
 0xae3   :  { %9233 = vmatprep.subr.mxu0 %v13083_v63 }
 0xae5   :  { %9163 = vmatmul.mubr.msk.f32.gmra.mxu0 %vm317_vm4, %v11256_v31 }
 0xae6   :  { %9165 = vmatprep.mubr.msk.f32.mxu0 %vm9847_vm0, %v13083_v63 }
 0xae9   :  { %9166 = vmatmul.mubr.msk.f32.gmra.mxu0 %vm317_vm4, %v11258_v51 }
 0xaea   :  { %9168 = vmatprep.mubr.msk.f32.mxu0 %vm9847_vm0, %v13083_v63 }
 0xaed   :  { %9169 = vmatmul.mubr.msk.f32.gmra.mxu0 %vm317_vm4, %v11260_v54 }
 0xaee   :  { %9171 = vmatprep.mubr.msk.f32.mxu0 %vm9847_vm0, %v13083_v63 }
 0xaf1   :  { %9172 = vmatmul.mubr.msk.f32.gmra.mxu0 %vm317_vm4, %v11262_v57 }
 0xaf2   :  { %9201 = vmatprep.mubr.msk.f32.mxu0 %vm9847_vm0, %v13083_v63 }
 0xaf5   :  { %9202 = vmatmul.mubr.msk.f32.vlgmr.msra.gmra.mxu0 %vm317_vm4, %v11254_v10 }
 0xaf6   :  { %9204 = vmatprep.mubr.msk.f32.mxu0 %vm9847_vm0, %v13083_v63  ;;  %9234 = vmatpush3.xpose.msk.msra.mxu0 %vm317_vm4, %v3939_v52 }
 0xaf7   :  { %9275 = vmatprep.subr.mxu0 %v13083_v63 }
 0xaf9   :  { %9205 = vmatmul.mubr.msk.f32.gmra.mxu0 %vm317_vm4, %v11256_v31 }
 0xafa   :  { %9207 = vmatprep.mubr.msk.f32.mxu0 %vm9847_vm0, %v13083_v63 }
 0xafd   :  { %9208 = vmatmul.mubr.msk.f32.gmra.mxu0 %vm317_vm4, %v11258_v51 }
 0xafe   :  { %9210 = vmatprep.mubr.msk.f32.mxu0 %vm9847_vm0, %v13083_v63 }
 0xb01   :  { %9211 = vmatmul.mubr.msk.f32.gmra.mxu0 %vm317_vm4, %v11260_v54 }
 0xb02   :  { %9213 = vmatprep.mubr.msk.f32.mxu0 %vm9847_vm0, %v13083_v63 }
 0xb05   :  { %9214 = vmatmul.mubr.msk.f32.gmra.mxu0 %vm317_vm4, %v11262_v57 }
 0xb06   :  { %9235 = vmatprep.mubr.msk.f32.mxu0 %vm9847_vm0, %v13083_v63 }
 0xb09   :  { %9236 = vmatmul.mubr.msk.f32.vlgmr.msra.gmra.mxu0 %vm317_vm4, %v11254_v10 }
 0xb0a   :  { %9238 = vmatprep.mubr.msk.f32.mxu0 %vm9847_vm0, %v13083_v63  ;;  %9276 = vmatpush3.xpose.msk.msra.mxu0 %vm317_vm4, %v3930_v62 }
 0xb0b   :  { %9309 = vmatprep.subr.mxu0 %v13083_v63 }
 0xb0d   :  { %9239 = vmatmul.mubr.msk.f32.gmra.mxu0 %vm317_vm4, %v11256_v31 }
 0xb0e   :  { %9241 = vmatprep.mubr.msk.f32.mxu0 %vm9847_vm0, %v13083_v63 }
 0xb11   :  { %9242 = vmatmul.mubr.msk.f32.gmra.mxu0 %vm317_vm4, %v11258_v51 }
 0xb12   :  { %9244 = vmatprep.mubr.msk.f32.mxu0 %vm9847_vm0, %v13083_v63 }
 0xb15   :  { %9245 = vmatmul.mubr.msk.f32.gmra.mxu0 %vm317_vm4, %v11260_v54 }
 0xb16   :  { %9247 = vmatprep.mubr.msk.f32.mxu0 %vm9847_vm0, %v13083_v63 }
 0xb19   :  { %9248 = vmatmul.mubr.msk.f32.gmra.mxu0 %vm317_vm4, %v11262_v57 }
 0xb1a   :  { %9277 = vmatprep.mubr.msk.f32.mxu0 %vm9847_vm0, %v13083_v63 }
 0xb1d   :  { %9278 = vmatmul.mubr.msk.f32.vlgmr.msra.gmra.mxu0 %vm317_vm4, %v11254_v10 }
 0xb1e   :  { %9280 = vmatprep.mubr.msk.f32.mxu0 %vm9847_vm0, %v13083_v63  ;;  %9310 = vmatpush3.xpose.msk.msra.mxu0 %vm317_vm4, %v3940_v28  ;;  %v7850_v28 = vld [vmem:[%s13013_s3 + $0x14] ss:$0 sm:$0xff] }
 0xb1f   :  { %9351 = vmatprep.subr.mxu0 %v13083_v63 }
 0xb21   :  { %9281 = vmatmul.mubr.msk.f32.gmra.mxu0 %vm317_vm4, %v11256_v31 }
 0xb22   :  { %9283 = vmatprep.mubr.msk.f32.mxu0 %vm9847_vm0, %v13083_v63 }
 0xb25   :  { %9284 = vmatmul.mubr.msk.f32.gmra.mxu0 %vm317_vm4, %v11258_v51 }
 0xb26   :  { %9286 = vmatprep.mubr.msk.f32.mxu0 %vm9847_vm0, %v13083_v63 }
 0xb29   :  { %9287 = vmatmul.mubr.msk.f32.gmra.mxu0 %vm317_vm4, %v11260_v54 }
 0xb2a   :  { %9289 = vmatprep.mubr.msk.f32.mxu0 %vm9847_vm0, %v13083_v63 }
 0xb2d   :  { %9290 = vmatmul.mubr.msk.f32.gmra.mxu0 %vm317_vm4, %v11262_v57 }
 0xb2e   :  { %9311 = vmatprep.mubr.msk.f32.mxu0 %vm9847_vm0, %v13083_v63 }
 0xb31   :  { %9312 = vmatmul.mubr.msk.f32.vlgmr.msra.gmra.mxu0 %vm317_vm4, %v11254_v10 }
 0xb32   :  { %9314 = vmatprep.mubr.msk.f32.mxu0 %vm9847_vm0, %v13083_v63 }
 0xb35   :  { %9315 = vmatmul.mubr.msk.f32.gmra.mxu0 %vm317_vm4, %v11256_v31 }
 0xb36   :  { %9317 = vmatprep.mubr.msk.f32.mxu0 %vm9847_vm0, %v13083_v63 }
 0xb39   :  { %9318 = vmatmul.mubr.msk.f32.gmra.mxu0 %vm317_vm4, %v11258_v51 }
 0xb3a   :  { %9320 = vmatprep.mubr.msk.f32.mxu0 %vm9847_vm0, %v13083_v63 }
 0xb3d   :  { %9321 = vmatmul.mubr.msk.f32.gmra.mxu0 %vm317_vm4, %v11260_v54 }
 0xb3e   :  { %9323 = vmatprep.mubr.msk.f32.mxu0 %vm9847_vm0, %v13083_v63 }
 0xb41   :  { %9324 = vmatmul.mubr.msk.f32.gmra.mxu0 %vm317_vm4, %v11262_v57 }
 0xb42   :  { %9361 = vmatprep.mubr.msk.f32.mxu0 %vm9847_vm0, %v13083_v63 }
 0xb65   :  { %v4038_v21 = vpop.f32.mrf.mxu0  ;;  %v4139_v40 = vpop.f32.mrf.mxu1 }
 0xb66   :  { %v4140_v12 = vadd.f32 %v7842_v6, %v4139_v40  ;;  %v4039_v62 = vadd.f32 %v7834_v26, %v4038_v21 }
 0xb67   :  { %v9051_v22 = vpop.f32.mrf.mxu0  ;;  %v9068_v15 = vpop.f32.mrf.mxu1 }
 0xb68   :  { %v3933_v15 = vld [vmem:[#allocation3 + $0xa8] sm:$0xff] }
 0xb69   :  { %v4043_v36 = vpop.f32.mrf.mxu0  ;;  %v4144_v5 = vpop.f32.mrf.mxu1 }
 0xb6a   :  { %v4145_v45 = vadd.f32 %v7842_v6, %v4144_v5  ;;  %v4044_v40 = vadd.f32 %v7834_v26, %v4043_v36 }
 0xb6b   :  { %v9054_v32 = vpop.f32.mrf.mxu0  ;;  %v9071_v34 = vpop.f32.mrf.mxu1 }
 0xb6d   :  { %v4048_v7 = vpop.f32.mrf.mxu0  ;;  %v4149_v0 = vpop.f32.mrf.mxu1 }
 0xb6e   :  { %v4150_v44 = vadd.f32 %v7842_v6, %v4149_v0  ;;  %v4049_v36 = vadd.f32 %v7834_v26, %v4048_v7 }
 0xb6f   :  { %v9057_v1 = vpop.f32.mrf.mxu0  ;;  %v9074_v35 = vpop.f32.mrf.mxu1 }
 0xb71   :  { %v11483_v33 = vpop.f32.mrf.mxu0  ;;  %v4154_v53 = vpop.f32.mrf.mxu1 }
 0xb72   :  { %v4155_v38 = vadd.f32 %v7842_v6, %v4154_v53 }
 0xb73   :  { %v9060_v23 = vpop.f32.mrf.mxu0  ;;  %v9077_v19 = vpop.f32.mrf.mxu1 }
 0xb75   :  { %v11488_v2 = vpop.f32.mrf.mxu0  ;;  %v4159_v56 = vpop.f32.mrf.mxu1 }
 0xb76   :  { %v4160_v25 = vadd.f32 %v7842_v6, %v4159_v56  ;;  %v4054_v6 = vadd.f32 %v7834_v26, %v11483_v33 }
 0xb77   :  { %v9063_v30 = vpop.f32.mrf.mxu0  ;;  %v9080_v27 = vpop.f32.mrf.mxu1 }
 0xb78   :  { %9099 = vmatpush3.xpose.msk.msra.mxu1 %vm185_vm3, %v4160_v25  ;;  %v4059_v25 = vadd.f32 %v7834_v26, %v11488_v2 }
 0xb79   :  { %v4240_v11 = vpop.f32.mrf.mxu0  ;;  %9100 = vmatprep.subr.mxu1 %v13083_v63 }
 0xb7a   :  { %v4241_v23 = vadd.f32 %v7850_v28, %v4240_v11 }
 0xb7b   :  { %v9085_v41 = vpop.f32.mrf.mxu0 }
 0xb7c   :  { %9101 = vmatpush3.xpose.msk.msra.mxu1 %vm185_vm3, %v4155_v38 }
 0xb7d   :  { %v4245_v13 = vpop.f32.mrf.mxu0  ;;  %9102 = vmatprep.subr.mxu1 %v13083_v63 }
 0xb7e   :  { %v4246_v35 = vadd.f32 %v7850_v28, %v4245_v13 }
 0xb7f   :  { %v9088_v61 = vpop.f32.mrf.mxu0 }
 0xb80   :  { %9103 = vmatpush3.xpose.msk.msra.mxu1 %vm185_vm3, %v4150_v44 }
 0xb81   :  { %v4250_v55 = vpop.f32.mrf.mxu0  ;;  %9104 = vmatprep.subr.mxu1 %v13083_v63 }
 0xb82   :  { %v4251_v21 = vadd.f32 %v7850_v28, %v4250_v55 }
 0xb83   :  { %v9091_v4 = vpop.f32.mrf.mxu0 }
 0xb84   :  { %9105 = vmatpush3.xpose.msk.msra.mxu1 %vm185_vm3, %v4145_v45 }
 0xb85   :  { %v4255_v47 = vpop.f32.mrf.mxu0  ;;  %9106 = vmatprep.subr.mxu1 %v13083_v63 }
 0xb86   :  { %v4256_v34 = vadd.f32 %v7850_v28, %v4255_v47 }
 0xb87   :  { %v9094_v52 = vpop.f32.mrf.mxu0 }
 0xb88   :  { %9107 = vmatpush3.xpose.msk.msra.mxu1 %vm185_vm3, %v4140_v12 }
 0xb89   :  { %v4260_v22 = vpop.f32.mrf.mxu0  ;;  %9140 = vmatprep.subr.mxu1 %v13083_v63 }
 0xb8a   :  { %v4261_v5 = vadd.f32 %v7850_v28, %v4260_v22 }
 0xb8b   :  { %v9097_v32 = vpop.f32.mrf.mxu0  ;;  %9109 = vmatmul.mubr.msk.f32.vlgmr.msra.gmra.mxu1 %vm185_vm3, %v4039_v62 }
 0xb8c   :  { %9141 = vmatpush3.xpose.msk.msra.mxu1 %vm317_vm4, %v3933_v15  ;;  %9352 = vmatpush3.msra.mxu0 %v4261_v5 }
 0xb8d   :  { %v11508_v0 = vpop.f32.mrf.mxu0  ;;  %9353 = vmatprep.subr.mxu0 %v13083_v63  ;;  %9111 = vmatprep.mubr.msk.f32.mxu1 %vm9847_vm0, %v13083_v63 }
 0xb8e   :  { %9354 = vmatpush3.msra.mxu0 %v4256_v34  ;;  %9174 = vmatprep.subr.mxu1 %v13083_v63 }
 0xb8f   :  { %9112 = vmatmul.mubr.msk.f32.gmra.mxu1 %vm185_vm3, %v4044_v40  ;;  %v9127_v1 = vpop.f32.mrf.mxu0  ;;  %9355 = vmatprep.subr.mxu0 %v13083_v63 }
 0xb90   :  { %9356 = vmatpush3.msra.mxu0 %v4251_v21  ;;  %9114 = vmatprep.mubr.msk.f32.mxu1 %vm9847_vm0, %v13083_v63 }
 0xb91   :  { %v11518_v53 = vpop.f32.mrf.mxu0  ;;  %9357 = vmatprep.subr.mxu0 %v13083_v63 }
 0xb92   :  { %9358 = vmatpush3.msra.mxu0 %v4246_v35 }
 0xb93   :  { %9115 = vmatmul.mubr.msk.f32.gmra.mxu1 %vm185_vm3, %v4049_v36  ;;  %v9130_v19 = vpop.f32.mrf.mxu0  ;;  %9359 = vmatprep.subr.mxu0 %v13083_v63 }
 0xb94   :  { %9360 = vmatpush3.msra.mxu0 %v4241_v23  ;;  %9117 = vmatprep.mubr.msk.f32.mxu1 %vm9847_vm0, %v13083_v63 }
 0xb95   :  { %v11526_v56 = vpop.f32.mrf.mxu0  ;;  %9401 = vmatprep.subr.mxu0 %v13083_v63 }
 0xb97   :  { %9118 = vmatmul.mubr.msk.f32.gmra.mxu1 %vm185_vm3, %v4054_v6  ;;  %v9133_v7 = vpop.f32.mrf.mxu0 }
 0xb98   :  { %9120 = vmatprep.mubr.msk.f32.mxu1 %vm9847_vm0, %v13083_v63 }
 0xb99   :  { %v11533_v30 = vpop.f32.mrf.mxu0 }
 0xb9b   :  { %9121 = vmatmul.mubr.msk.f32.gmra.mxu1 %vm185_vm3, %v4059_v25  ;;  %v9136_v27 = vpop.f32.mrf.mxu0 }
 0xb9c   :  { %9142 = vmatprep.mubr.msk.f32.mxu1 %vm9847_vm0, %v13083_v63 }
 0xb9d   :  { %v11538_v33 = vpop.f32.mrf.mxu0 }
 0xb9f   :  { %v9139_v11 = vpop.f32.mrf.mxu0  ;;  %9143 = vmatmul.mubr.msk.f32.vlgmr.msra.gmra.mxu1 %vm317_vm4, %v11254_v10 }
 0xba0   :  { %9145 = vmatprep.mubr.msk.f32.mxu1 %vm9847_vm0, %v13083_v63 }
 0xba1   :  { %v11544_v38 = vpop.f32.mrf.mxu0 }
 0xba3   :  { %9146 = vmatmul.mubr.msk.f32.gmra.mxu1 %vm317_vm4, %v11256_v31  ;;  %v9161_v2 = vpop.f32.mrf.mxu0 }
 0xba4   :  { %9148 = vmatprep.mubr.msk.f32.mxu1 %vm9847_vm0, %v13083_v63 }
 0xba5   :  { %v11550_v41 = vpop.f32.mrf.mxu0 }
 0xba7   :  { %9149 = vmatmul.mubr.msk.f32.gmra.mxu1 %vm317_vm4, %v11258_v51  ;;  %v9164_v13 = vpop.f32.mrf.mxu0 }
 0xba8   :  { %9151 = vmatprep.mubr.msk.f32.mxu1 %vm9847_vm0, %v13083_v63 }
 0xba9   :  { %v11556_v44 = vpop.f32.mrf.mxu0 }
 0xbab   :  { %9152 = vmatmul.mubr.msk.f32.gmra.mxu1 %vm317_vm4, %v11260_v54  ;;  %v9167_v61 = vpop.f32.mrf.mxu0 }
 0xbac   :  { %9154 = vmatprep.mubr.msk.f32.mxu1 %vm9847_vm0, %v13083_v63 }
 0xbad   :  { %v11562_v55 = vpop.f32.mrf.mxu0 }
 0xbaf   :  { %9155 = vmatmul.mubr.msk.f32.gmra.mxu1 %vm317_vm4, %v11262_v57  ;;  %v9170_v45 = vpop.f32.mrf.mxu0 }
 0xbb0   :  { %9184 = vmatprep.mubr.msk.f32.mxu1 %vm9847_vm0, %v13083_v63 }
 0xbb1   :  { %v11568_v4 = vpop.f32.mrf.mxu0 }
 0xbb3   :  { %v9173_v47 = vpop.f32.mrf.mxu0 }
 0xbb5   :  { %v11570_v26 = vpop.f32.mrf.mxu0 }
 0xbb7   :  { %v9203_v12 = vpop.f32.mrf.mxu0 }
 0xbb9   :  { %v11572_v52 = vpop.f32.mrf.mxu0 }
 0xbbb   :  { %v9206_v62 = vpop.f32.mrf.mxu0 }
 0xbbd   :  { %v11574_v28 = vpop.f32.mrf.mxu0 }
 0xbbf   :  { %v9209_v22 = vpop.f32.mrf.mxu0 }
 0xbc1   :  { %v11576_v15 = vpop.f32.mrf.mxu0 }
 0xbc3   :  { %v9212_v5 = vpop.f32.mrf.mxu0 }
 0xbc5   :  { %v11578_v32 = vpop.f32.mrf.mxu0 }
 0xbc7   :  { %v9215_v34 = vpop.f32.mrf.mxu0 }
 0xbc9   :  { %v11580_v40 = vpop.f32.mrf.mxu0 }
 0xbcb   :  { %v9237_v21 = vpop.f32.mrf.mxu0 }
 0xbcd   :  { %v11582_v1 = vpop.f32.mrf.mxu0 }
 0xbcf   :  { %v9240_v35 = vpop.f32.mrf.mxu0 }
 0xbd1   :  { %v11584_v36 = vpop.f32.mrf.mxu0 }
 0xbd3   :  { %v9243_v23 = vpop.f32.mrf.mxu0 }
 0xbd5   :  { %v11586_v19 = vpop.f32.mrf.mxu0 }
 0xbd7   :  { %v9246_v6 = vpop.f32.mrf.mxu0 }
 0xbd9   :  { %v11588_v7 = vpop.f32.mrf.mxu0 }
 0xbdb   :  { %v9249_v25 = vpop.f32.mrf.mxu0 }
 0xbdd   :  { %v11590_v27 = vpop.f32.mrf.mxu0 }
 0xbdf   :  { %v9279_v11 = vpop.f32.mrf.mxu0 }
 0xbe1   :  { %v11592_v2 = vpop.f32.mrf.mxu0 }
 0xbe3   :  { %v9282_v13 = vpop.f32.mrf.mxu0 }
 0xbe5   :  { %v11594_v61 = vpop.f32.mrf.mxu0 }
 0xbe7   :  { %v9285_v45 = vpop.f32.mrf.mxu0 }
 0xbe9   :  { %v11596_v47 = vpop.f32.mrf.mxu0 }
 0xbeb   :  { %v9288_v12 = vpop.f32.mrf.mxu0 }
 0xbed   :  { %v11598_v62 = vpop.f32.mrf.mxu0 }
 0xbef   :  { %v9291_v22 = vpop.f32.mrf.mxu0 }
 0xbf1   :  { %v11600_v5 = vpop.f32.mrf.mxu0 }
 0xbf2   :  { %13107 = vst [vmem:[#allocation41_spill] sm:$0xff] %v11600_v5 }
 0xbf3   :  { %v9313_v34 = vpop.f32.mrf.mxu0 }
 0xbf5   :  { %v11602_v21 = vpop.f32.mrf.mxu0 }
 0xbf7   :  { %v9316_v35 = vpop.f32.mrf.mxu0 }
 0xbf9   :  { %v11604_v23 = vpop.f32.mrf.mxu0 }
 0xbfb   :  { %v9319_v6 = vpop.f32.mrf.mxu0 }
 0xbfd   :  { %v11606_v25 = vpop.f32.mrf.mxu0 }
 0xbff   :  { %v9322_v11 = vpop.f32.mrf.mxu0 }
 0xc01   :  { %v11608_v13 = vpop.f32.mrf.mxu0 }
 0xc03   :  { %v9325_v45 = vpop.f32.mrf.mxu0 }
 0xc4b   :  { %v4360_v20 = vpop.f32.mrf.mxu1 }
 0xc4c   :  { %v4384_v12 = vmul.f32 0.35355338, %v4360_v20 }
 0xc4d   :  { %v9110_v18 = vpop.f32.mrf.mxu1 }
 0xc4e   :  { %v4389_v22 = vadd.f32 %v4384_v12, %v10341_v8 }
 0xc4f   :  { %v4365_v37 = vpop.f32.mrf.mxu1 }
 0xc50   :  { %v4394_v34 = vsel %vm286_vm6, %v4389_v22, -1e+30  ;;  %v4385_v24 = vmul.f32 0.35355338, %v4365_v37 }
 0xc51   :  { %4399 = vst.msk [vmem:[#allocation2] sm:$0xff] %vm758_vm5, %v4394_v34  ;;  %v9113_v35 = vpop.f32.mrf.mxu1  ;;  %v13108_v34 = vld [vmem:[#allocation11_spill] sm:$0xff] }
 0xc52   :  { %v4390_v6 = vadd.f32 %v4385_v24, %v10348_v16 }
 0xc53   :  { %v4370_v17 = vpop.f32.mrf.mxu1 }
 0xc54   :  { %v4395_v11 = vsel %vm287_vm7, %v4390_v6, -1e+30  ;;  %v4386_v45 = vmul.f32 0.35355338, %v4370_v17 }
 0xc55   :  { %4400 = vst.msk [vmem:[#allocation2 + $0x8] sm:$0xff] %vm758_vm5, %v4395_v11  ;;  %v9116_v18 = vpop.f32.mrf.mxu1  ;;  %v13109_v11 = vld [vmem:[#allocation12_spill] sm:$0xff] }
 0xc56   :  { %v4391_v8 = vadd.f32 %v4386_v45, %v10355_v29 }
 0xc57   :  { %v4375_v20 = vpop.f32.mrf.mxu1 }
 0xc58   :  { %v4396_v12 = vsel %vm288_vm8, %v4391_v8, -1e+30  ;;  %v4387_v37 = vmul.f32 0.35355338, %v4375_v20 }
 0xc59   :  { %4401 = vst.msk [vmem:[#allocation2 + $0x10] sm:$0xff] %vm758_vm5, %v4396_v12  ;;  %v9119_v22 = vpop.f32.mrf.mxu1 }
 0xc5a   :  { %v4392_v16 = vadd.f32 %v4387_v37, %v13108_v34 }
 0xc5b   :  { %v4380_v24 = vpop.f32.mrf.mxu1 }
 0xc5c   :  { %v4397_v35 = vsel %vm289_vm9, %v4392_v16, -1e+30  ;;  %v4388_v17 = vmul.f32 0.35355338, %v4380_v24  ;;  %v7876_v16 = vld [vmem:[%s13013_s3 + $0x11] ss:$0 sm:$0xff] }
 0xc5d   :  { %4402 = vst.msk [vmem:[#allocation2 + $0x18] sm:$0xff] %vm758_vm5, %v4397_v35  ;;  %v9122_v6 = vpop.f32.mrf.mxu1 }
 0xc5e   :  { %v4393_v29 = vadd.f32 %v4388_v17, %v13109_v11 }
 0xc5f   :  { %v4582_v45 = vpop.f32.mrf.mxu1 }
 0xc60   :  { %v4398_v18 = vsel %vm290_vm10, %v4393_v29, -1e+30  ;;  %v7868_v29 = vld [vmem:[%s13013_s3 + $0xd] ss:$0 sm:$0xff] }
 0xc61   :  { %4403 = vst.msk [vmem:[#allocation2 + $0x20] sm:$0xff] %vm758_vm5, %v4398_v18  ;;  %v9144_v8 = vpop.f32.mrf.mxu1  ;;  %v4583_v18 = vadd.f32 %v7876_v16, %v4582_v45  ;;  %v4497_v45 = vadd.f32 %v7868_v29, %v11533_v30 }
 0xc62   :  { %v4482_v8 = vadd.f32 %v7868_v29, %v11508_v0  ;;  %v4492_v0 = vadd.f32 %v7868_v29, %v11526_v56 }
 0xc63   :  { %v4587_v20 = vpop.f32.mrf.mxu1 }
 0xc65   :  { %v9147_v12 = vpop.f32.mrf.mxu1 }
 0xc66   :  { %v3934_v12 = vld [vmem:[#allocation3 + $0xb0] sm:$0xff] }
 0xc67   :  { %v4592_v37 = vpop.f32.mrf.mxu1 }
 0xc68   :  { %v4593_v11 = vadd.f32 %v7876_v16, %v4592_v37  ;;  %v13110_v37 = vld [vmem:[#allocation13_spill] sm:$0xff] }
 0xc69   :  { %v9150_v22 = vpop.f32.mrf.mxu1 }
 0xc6b   :  { %v4597_v34 = vpop.f32.mrf.mxu1 }
 0xc6c   :  { %v4598_v6 = vadd.f32 %v7876_v16, %v4597_v34 }
 0xc6d   :  { %v9153_v5 = vpop.f32.mrf.mxu1 }
 0xc6e   :  { %v4588_v5 = vadd.f32 %v7876_v16, %v4587_v20  ;;  %v4487_v20 = vadd.f32 %v7868_v29, %v11518_v53  ;;  %v4502_v53 = vadd.f32 %v7868_v29, %v11538_v33 }
 0xc6f   :  { %v4602_v24 = vpop.f32.mrf.mxu1 }
 0xc70   :  { %v4603_v35 = vadd.f32 %v7876_v16, %v4602_v24 }
 0xc71   :  { %v9156_v17 = vpop.f32.mrf.mxu1 }
 0xc72   :  { %9175 = vmatpush3.xpose.msk.msra.mxu1 %vm185_vm3, %v4603_v35  ;;  %v13111_v17 = vld [vmem:[#allocation14_spill] sm:$0xff] }
 0xc73   :  { %9176 = vmatprep.subr.mxu1 %v13083_v63 }
 0xc76   :  { %9177 = vmatpush3.xpose.msk.msra.mxu1 %vm185_vm3, %v4598_v6 }
 0xc77   :  { %9178 = vmatprep.subr.mxu1 %v13083_v63 }
 0xc7a   :  { %9179 = vmatpush3.xpose.msk.msra.mxu1 %vm185_vm3, %v4593_v11 }
 0xc7b   :  { %9180 = vmatprep.subr.mxu1 %v13083_v63 }
 0xc7e   :  { %9181 = vmatpush3.xpose.msk.msra.mxu1 %vm185_vm3, %v4588_v5 }
 0xc7f   :  { %9182 = vmatprep.subr.mxu1 %v13083_v63 }
 0xc82   :  { %9183 = vmatpush3.xpose.msk.msra.mxu1 %vm185_vm3, %v4583_v18 }
 0xc83   :  { %9216 = vmatprep.subr.mxu1 %v13083_v63 }
 0xc85   :  { %9185 = vmatmul.mubr.msk.f32.vlgmr.msra.gmra.mxu1 %vm185_vm3, %v4482_v8  ;;  %v13112_v8 = vld [vmem:[#allocation15_spill] sm:$0xff] }
 0xc86   :  { %9217 = vmatpush3.xpose.msk.msra.mxu1 %vm317_vm4, %v3934_v12  ;;  %9187 = vmatprep.mubr.msk.f32.mxu1 %vm9847_vm0, %v13083_v63 }
 0xc87   :  { %9250 = vmatprep.subr.mxu1 %v13083_v63 }
 0xc89   :  { %9188 = vmatmul.mubr.msk.f32.gmra.mxu1 %vm185_vm3, %v4487_v20 }
 0xc8a   :  { %9190 = vmatprep.mubr.msk.f32.mxu1 %vm9847_vm0, %v13083_v63 }
 0xc8d   :  { %9191 = vmatmul.mubr.msk.f32.gmra.mxu1 %vm185_vm3, %v4492_v0 }
 0xc8e   :  { %9193 = vmatprep.mubr.msk.f32.mxu1 %vm9847_vm0, %v13083_v63 }
 0xc91   :  { %9194 = vmatmul.mubr.msk.f32.gmra.mxu1 %vm185_vm3, %v4497_v45 }
 0xc92   :  { %9196 = vmatprep.mubr.msk.f32.mxu1 %vm9847_vm0, %v13083_v63 }
 0xc95   :  { %9197 = vmatmul.mubr.msk.f32.gmra.mxu1 %vm185_vm3, %v4502_v53 }
 0xc96   :  { %9218 = vmatprep.mubr.msk.f32.mxu1 %vm9847_vm0, %v13083_v63 }
 0xc99   :  { %9219 = vmatmul.mubr.msk.f32.vlgmr.msra.gmra.mxu1 %vm317_vm4, %v11254_v10 }
 0xc9a   :  { %9221 = vmatprep.mubr.msk.f32.mxu1 %vm9847_vm0, %v13083_v63 }
 0xc9d   :  { %9222 = vmatmul.mubr.msk.f32.gmra.mxu1 %vm317_vm4, %v11256_v31 }
 0xc9e   :  { %9224 = vmatprep.mubr.msk.f32.mxu1 %vm9847_vm0, %v13083_v63 }
 0xca1   :  { %9225 = vmatmul.mubr.msk.f32.gmra.mxu1 %vm317_vm4, %v11258_v51 }
 0xca2   :  { %9227 = vmatprep.mubr.msk.f32.mxu1 %vm9847_vm0, %v13083_v63 }
 0xca5   :  { %9228 = vmatmul.mubr.msk.f32.gmra.mxu1 %vm317_vm4, %v11260_v54 }
 0xca6   :  { %9230 = vmatprep.mubr.msk.f32.mxu1 %vm9847_vm0, %v13083_v63 }
 0xca9   :  { %9231 = vmatmul.mubr.msk.f32.gmra.mxu1 %vm317_vm4, %v11262_v57 }
 0xcaa   :  { %9260 = vmatprep.mubr.msk.f32.mxu1 %vm9847_vm0, %v13083_v63 }
 0xd45   :  { %v4803_v56 = vpop.f32.mrf.mxu1 }
 0xd46   :  { %v4827_v30 = vmul.f32 0.35355338, %v4803_v56 }
 0xd47   :  { %v9186_v33 = vpop.f32.mrf.mxu1 }
 0xd48   :  { %v4832_v22 = vadd.f32 %v4827_v30, %v13110_v37  ;;  %v13113_v33 = vld [vmem:[#allocation16_spill] sm:$0xff] }
 0xd49   :  { %v4808_v34 = vpop.f32.mrf.mxu1 }
 0xd4a   :  { %v4837_v16 = vsel %vm286_vm6, %v4832_v22, -1e+30  ;;  %v4828_v24 = vmul.f32 0.35355338, %v4808_v34 }
 0xd4b   :  { %4842 = vst.msk [vmem:[#allocation2 + $0x28] sm:$0xff] %vm758_vm5, %v4837_v16  ;;  %v9189_v35 = vpop.f32.mrf.mxu1 }
 0xd4c   :  { %v4833_v6 = vadd.f32 %v4828_v24, %v13111_v17 }
 0xd4d   :  { %v4813_v11 = vpop.f32.mrf.mxu1 }
 0xd4e   :  { %v4838_v5 = vsel %vm287_vm7, %v4833_v6, -1e+30  ;;  %v4829_v29 = vmul.f32 0.35355338, %v4813_v11  ;;  %v13114_v6 = vld [vmem:[#allocation17_spill] sm:$0xff] }
 0xd4f   :  { %4843 = vst.msk [vmem:[#allocation2 + $0x30] sm:$0xff] %vm758_vm5, %v4838_v5  ;;  %v9192_v18 = vpop.f32.mrf.mxu1 }
 0xd50   :  { %v4834_v12 = vadd.f32 %v4829_v29, %v13112_v8 }
 0xd51   :  { %v4818_v20 = vpop.f32.mrf.mxu1 }
 0xd52   :  { %v4839_v0 = vsel %vm288_vm8, %v4834_v12, -1e+30  ;;  %v4830_v45 = vmul.f32 0.35355338, %v4818_v20  ;;  %v11699_v53 = vld [vmem:[#allocation2 + $0x28] sm:$0xff] }
 0xd53   :  { %4844 = vst.msk [vmem:[#allocation2 + $0x38] sm:$0xff] %vm758_vm5, %v4839_v0  ;;  %v9195_v56 = vpop.f32.mrf.mxu1  ;;  %v5768_v30 = vsel %vm758_vm5, %v11699_v53, -inf }
 0xd54   :  { %v4835_v37 = vadd.f32 %v4830_v45, %v13113_v33  ;;  %5769 = vmax.xlane.f32.xlu0 %v5768_v30 }
 0xd55   :  { %v4823_v22 = vpop.f32.mrf.mxu1 }
 0xd56   :  { %v4840_v34 = vsel %vm289_vm9, %v4835_v37, -1e+30  ;;  %v4831_v16 = vmul.f32 0.35355338, %v4823_v22  ;;  %v11707_v24 = vld [vmem:[#allocation2 + $0x30] sm:$0xff] }
 0xd57   :  { %4845 = vst.msk [vmem:[#allocation2 + $0x40] sm:$0xff] %vm758_vm5, %v4840_v34  ;;  %v9198_v35 = vpop.f32.mrf.mxu1  ;;  %v5771_v17 = vsel %vm758_vm5, %v11707_v24, -inf }
 0xd58   :  { %v4836_v11 = vadd.f32 %v4831_v16, %v13114_v6  ;;  %5772 = vmax.xlane.f32.xlu1 %v5771_v17  ;;  %v7910_v35 = vld [vmem:[%s13013_s3 + $0x12] ss:$0 sm:$0xff] }
 0xd59   :  { %v5025_v5 = vpop.f32.mrf.mxu1 }
 0xd5a   :  { %v4841_v29 = vsel %vm290_vm10, %v4836_v11, -1e+30  ;;  %v11715_v18 = vld [vmem:[#allocation2 + $0x38] sm:$0xff] }
 0xd5b   :  { %4846 = vst.msk [vmem:[#allocation2 + $0x48] sm:$0xff] %vm758_vm5, %v4841_v29  ;;  %v9220_v8 = vpop.f32.mrf.mxu1  ;;  %v5774_v12 = vsel %vm758_vm5, %v11715_v18, -inf }
 0xd5c   :  { %5775 = vmax.xlane.f32.xlu0 %v5774_v12 }
 0xd5d   :  { %v5030_v20 = vpop.f32.mrf.mxu1 }
 0xd5e   :  { %v11720_v0 = vld [vmem:[#allocation2 + $0x40] sm:$0xff]  ;;  %v5031_v12 = vadd.f32 %v7910_v35, %v5030_v20 }
 0xd5f   :  { %v9223_v45 = vpop.f32.mrf.mxu1  ;;  %v5777_v56 = vsel %vm758_vm5, %v11720_v0, -inf }
 0xd60   :  { %5778 = vmax.xlane.f32.xlu1 %v5777_v56  ;;  %v7902_v45 = vld [vmem:[%s13013_s3 + $0xe] ss:$0 sm:$0xff]  ;;  %v5026_v56 = vadd.f32 %v7910_v35, %v5025_v5 }
 0xd61   :  { %v5035_v30 = vpop.f32.mrf.mxu1  ;;  %v4930_v20 = vadd.f32 %v7902_v45, %v11572_v52  ;;  %v4940_v5 = vadd.f32 %v7902_v45, %v11576_v15  ;;  %v4945_v52 = vadd.f32 %v7902_v45, %v11578_v32 }
 0xd62   :  { %v11724_v33 = vld [vmem:[#allocation2 + $0x48] sm:$0xff]  ;;  %v5036_v8 = vadd.f32 %v7910_v35, %v5035_v30  ;;  %v3935_v30 = vld [vmem:[#allocation3 + $0xb8] sm:$0xff] }
 0xd63   :  { %v9226_v37 = vpop.f32.mrf.mxu1  ;;  %v5780_v22 = vsel %vm758_vm5, %v11724_v33, -inf }
 0xd64   :  { %5781 = vmax.xlane.f32.xlu0 %v5780_v22  ;;  %v4925_v37 = vadd.f32 %v7902_v45, %v11570_v26  ;;  %v4935_v26 = vadd.f32 %v7902_v45, %v11574_v28 }
 0xd65   :  { %v5040_v34 = vpop.f32.mrf.mxu1 }
 0xd66   :  { %v5041_v29 = vadd.f32 %v7910_v35, %v5040_v34 }
 0xd67   :  { %v9229_v16 = vpop.f32.mrf.mxu1 }
 0xd69   :  { %v5045_v17 = vpop.f32.mrf.mxu1 }
 0xd6a   :  { %v5046_v6 = vadd.f32 %v7910_v35, %v5045_v17 }
 0xd6b   :  { %v9232_v11 = vpop.f32.mrf.mxu1 }
 0xd6c   :  { %9251 = vmatpush3.xpose.msk.msra.mxu1 %vm185_vm3, %v5046_v6 }
 0xd6d   :  { %9252 = vmatprep.subr.mxu1 %v13083_v63 }
 0xd70   :  { %9253 = vmatpush3.xpose.msk.msra.mxu1 %vm185_vm3, %v5041_v29 }
 0xd71   :  { %9254 = vmatprep.subr.mxu1 %v13083_v63 }
 0xd74   :  { %9255 = vmatpush3.xpose.msk.msra.mxu1 %vm185_vm3, %v5036_v8 }
 0xd75   :  { %9256 = vmatprep.subr.mxu1 %v13083_v63 }
 0xd78   :  { %9257 = vmatpush3.xpose.msk.msra.mxu1 %vm185_vm3, %v5031_v12 }
 0xd79   :  { %9258 = vmatprep.subr.mxu1 %v13083_v63 }
 0xd7c   :  { %9259 = vmatpush3.xpose.msk.msra.mxu1 %vm185_vm3, %v5026_v56 }
 0xd7d   :  { %9292 = vmatprep.subr.mxu1 %v13083_v63 }
 0xd7f   :  { %9261 = vmatmul.mubr.msk.f32.vlgmr.msra.gmra.mxu1 %vm185_vm3, %v4925_v37 }
 0xd80   :  { %9293 = vmatpush3.xpose.msk.msra.mxu1 %vm317_vm4, %v3935_v30  ;;  %9263 = vmatprep.mubr.msk.f32.mxu1 %vm9847_vm0, %v13083_v63 }
 0xd81   :  { %9326 = vmatprep.subr.mxu1 %v13083_v63 }
 0xd83   :  { %9264 = vmatmul.mubr.msk.f32.gmra.mxu1 %vm185_vm3, %v4930_v20 }
 0xd84   :  { %9266 = vmatprep.mubr.msk.f32.mxu1 %vm9847_vm0, %v13083_v63 }
 0xd87   :  { %9267 = vmatmul.mubr.msk.f32.gmra.mxu1 %vm185_vm3, %v4935_v26  ;;  %v11807_v26 = vld [vmem:[#allocation2] sm:$0xff] }
 0xd88   :  { %9269 = vmatprep.mubr.msk.f32.mxu1 %vm9847_vm0, %v13083_v63 }
 0xd8b   :  { %9270 = vmatmul.mubr.msk.f32.gmra.mxu1 %vm185_vm3, %v4940_v5 }
 0xd8c   :  { %9272 = vmatprep.mubr.msk.f32.mxu1 %vm9847_vm0, %v13083_v63 }
 0xd8f   :  { %9273 = vmatmul.mubr.msk.f32.gmra.mxu1 %vm185_vm3, %v4945_v52  ;;  %v5753_v52 = vsel %vm758_vm5, %v11807_v26, -inf }
 0xd90   :  { %9294 = vmatprep.mubr.msk.f32.mxu1 %vm9847_vm0, %v13083_v63 }
 0xd93   :  { %9295 = vmatmul.mubr.msk.f32.vlgmr.msra.gmra.mxu1 %vm317_vm4, %v11254_v10 }
 0xd94   :  { %9297 = vmatprep.mubr.msk.f32.mxu1 %vm9847_vm0, %v13083_v63 }
 0xd97   :  { %9298 = vmatmul.mubr.msk.f32.gmra.mxu1 %vm317_vm4, %v11256_v31 }
 0xd98   :  { %9300 = vmatprep.mubr.msk.f32.mxu1 %vm9847_vm0, %v13083_v63 }
 0xd9b   :  { %9301 = vmatmul.mubr.msk.f32.gmra.mxu1 %vm317_vm4, %v11258_v51 }
 0xd9c   :  { %9303 = vmatprep.mubr.msk.f32.mxu1 %vm9847_vm0, %v13083_v63 }
 0xd9f   :  { %9304 = vmatmul.mubr.msk.f32.gmra.mxu1 %vm317_vm4, %v11260_v54 }
 0xda0   :  { %9306 = vmatprep.mubr.msk.f32.mxu1 %vm9847_vm0, %v13083_v63 }
 0xda3   :  { %9307 = vmatmul.mubr.msk.f32.gmra.mxu1 %vm317_vm4, %v11262_v57 }
 0xda4   :  { %9336 = vmatprep.mubr.msk.f32.mxu1 %vm9847_vm0, %v13083_v63 }
 0xddd   :  { %v5770_v28 = vpop.xlane.xlu0 %5769 }
 0xdde   :  { %v5818_v15 = vsub.f32 %v11699_v53, %v5770_v28 }
 0xde0   :  { %v5843_v32 = vmul.f32 1.442695, %v5818_v15  ;;  %v11815_v15 = vld [vmem:[#allocation2 + $0x10] sm:$0xff] }
 0xde1   :  { %v5773_v22 = vpop.xlane.xlu1 %5772 }
 0xde2   :  { %9694 = vpow2.f32 %v5843_v32  ;;  %v5819_v34 = vsub.f32 %v11707_v24, %v5773_v22  ;;  %v11817_v32 = vld [vmem:[#allocation2 + $0x8] sm:$0xff]  ;;  %v5759_v22 = vsel %vm758_vm5, %v11815_v15, -inf }
 0xde4   :  { %v5845_v16 = vmul.f32 1.442695, %v5819_v34  ;;  %v5756_v34 = vsel %vm758_vm5, %v11817_v32, -inf }
 0xde5   :  { %v5776_v35 = vpop.xlane.xlu0 %5775 }
 0xde6   :  { %9696 = vpow2.f32 %v5845_v16  ;;  %v5820_v17 = vsub.f32 %v11715_v18, %v5776_v35  ;;  %v11823_v16 = vld [vmem:[#allocation2 + $0x20] sm:$0xff]  ;;  %v11825_v35 = vld [vmem:[#allocation2 + $0x18] sm:$0xff] }
 0xde8   :  { %v5847_v6 = vmul.f32 1.442695, %v5820_v17  ;;  %v5765_v17 = vsel %vm758_vm5, %v11823_v16, -inf }
 0xde9   :  { %v5779_v11 = vpop.xlane.xlu1 %5778 }
 0xdea   :  { %9698 = vpow2.f32 %v5847_v6  ;;  %v5821_v29 = vsub.f32 %v11720_v0, %v5779_v11  ;;  %v5762_v6 = vsel %vm758_vm5, %v11825_v35, -inf }
 0xdec   :  { %v5849_v8 = vmul.f32 1.442695, %v5821_v29 }
 0xded   :  { %v5782_v12 = vpop.xlane.xlu0 %5781 }
 0xdee   :  { %9700 = vpow2.f32 %v5849_v8  ;;  %v5822_v53 = vsub.f32 %v11724_v33, %v5782_v12  ;;  %v13115_v12 = vld [vmem:[#allocation18_spill] sm:$0xff] }
 0xdef   :  { %v11791_v45 = vpop.eup %9694 }
 0xdf0   :  { %v5851_v56 = vmul.f32 1.442695, %v5822_v53  ;;  %v5888_v24 = vsel %vm758_vm5, %v11791_v45, 0.0 }
 0xdf1   :  { %5889 = vadd.xlane.f32.xlu1 %v5888_v24 }
 0xdf2   :  { %9702 = vpow2.f32 %v5851_v56 }
 0xdf3   :  { %v11795_v37 = vpop.eup %9696 }
 0xdf4   :  { %v5891_v18 = vsel %vm758_vm5, %v11795_v37, 0.0 }
 0xdf5   :  { %5892 = vadd.xlane.f32.xlu0 %v5891_v18 }
 0xdf7   :  { %v11799_v0 = vpop.eup %9698 }
 0xdf8   :  { %v5894_v30 = vsel %vm758_vm5, %v11799_v0, 0.0 }
 0xdf9   :  { %5895 = vadd.xlane.f32.xlu1 %v5894_v30 }
 0xdfb   :  { %v11803_v33 = vpop.eup %9700 }
 0xdfc   :  { %v5897_v20 = vsel %vm758_vm5, %v11803_v33, 0.0 }
 0xdfd   :  { %5898 = vadd.xlane.f32.xlu0 %v5897_v20  ;;  %v13116_v20 = vld [vmem:[#allocation19_spill] sm:$0xff] }
 0xdff   :  { %v11809_v5 = vpop.eup %9702 }
 0xe00   :  { %v5900_v28 = vsel %vm758_vm5, %v11809_v5, 0.0 }
 0xe01   :  { %5754 = vmax.xlane.f32.xlu0 %v5753_v52  ;;  %5901 = vadd.xlane.f32.xlu1 %v5900_v28 }
 0xe05   :  { %5760 = vmax.xlane.f32.xlu0 %v5759_v22  ;;  %5757 = vmax.xlane.f32.xlu1 %v5756_v34 }
 0xe09   :  { %5766 = vmax.xlane.f32.xlu0 %v5765_v17  ;;  %5763 = vmax.xlane.f32.xlu1 %v5762_v6  ;;  %v13117_v6 = vld [vmem:[#allocation20_spill] sm:$0xff] }
 0xe3f   :  { %v5246_v11 = vpop.f32.mrf.mxu1 }
 0xe40   :  { %v5270_v29 = vmul.f32 0.35355338, %v5246_v11 }
 0xe41   :  { %v9262_v8 = vpop.f32.mrf.mxu1 }
 0xe42   :  { %v5275_v53 = vadd.f32 %v5270_v29, %v13115_v12 }
 0xe43   :  { %v5251_v56 = vpop.f32.mrf.mxu1 }
 0xe44   :  { %v5280_v24 = vsel %vm286_vm6, %v5275_v53, -1e+30  ;;  %v5271_v18 = vmul.f32 0.35355338, %v5251_v56 }
 0xe45   :  { %5285 = vst.msk [vmem:[#allocation2 + $0x50] sm:$0xff] %vm758_vm5, %v5280_v24  ;;  %v9265_v30 = vpop.f32.mrf.mxu1 }
 0xe46   :  { %v5276_v52 = vadd.f32 %v5271_v18, %v13116_v20  ;;  %v13118_v18 = vld [vmem:[#allocation21_spill] sm:$0xff] }
 0xe47   :  { %v5256_v28 = vpop.f32.mrf.mxu1 }
 0xe48   :  { %v5281_v22 = vsel %vm287_vm7, %v5276_v52, -1e+30  ;;  %v5272_v34 = vmul.f32 0.35355338, %v5256_v28 }
 0xe49   :  { %5286 = vst.msk [vmem:[#allocation2 + $0x58] sm:$0xff] %vm758_vm5, %v5281_v22  ;;  %v9268_v17 = vpop.f32.mrf.mxu1 }
 0xe4a   :  { %v5277_v11 = vadd.f32 %v5272_v34, %v13117_v6  ;;  %v13119_v6 = vld [vmem:[#allocation22_spill] sm:$0xff] }
 0xe4b   :  { %v5261_v29 = vpop.f32.mrf.mxu1 }
 0xe4c   :  { %v5282_v8 = vsel %vm288_vm8, %v5277_v11, -1e+30  ;;  %v5273_v12 = vmul.f32 0.35355338, %v5261_v29  ;;  %v11842_v53 = vld [vmem:[#allocation2 + $0x50] sm:$0xff] }
 0xe4d   :  { %5287 = vst.msk [vmem:[#allocation2 + $0x60] sm:$0xff] %vm758_vm5, %v5282_v8  ;;  %v9271_v56 = vpop.f32.mrf.mxu1  ;;  %v5783_v24 = vsel %vm758_vm5, %v11842_v53, -inf }
 0xe4e   :  { %v5278_v30 = vadd.f32 %v5273_v12, %v13118_v18  ;;  %5784 = vmax.xlane.f32.xlu1 %v5783_v24 }
 0xe4f   :  { %v5266_v20 = vpop.f32.mrf.mxu1 }
 0xe50   :  { %v5283_v52 = vsel %vm289_vm9, %v5278_v30, -1e+30  ;;  %v5274_v28 = vmul.f32 0.35355338, %v5266_v20  ;;  %v11850_v22 = vld [vmem:[#allocation2 + $0x58] sm:$0xff] }
 0xe51   :  { %5288 = vst.msk [vmem:[#allocation2 + $0x68] sm:$0xff] %vm758_vm5, %v5283_v52  ;;  %v9274_v34 = vpop.f32.mrf.mxu1  ;;  %v5786_v17 = vsel %vm758_vm5, %v11850_v22, -inf }
 0xe52   :  { %v5279_v11 = vadd.f32 %v5274_v28, %v13119_v6  ;;  %5787 = vmax.xlane.f32.xlu0 %v5786_v17 }
 0xe53   :  { %v5468_v29 = vpop.f32.mrf.mxu1 }
 0xe54   :  { %v5284_v8 = vsel %vm290_vm10, %v5279_v11, -1e+30  ;;  %v11858_v12 = vld [vmem:[#allocation2 + $0x60] sm:$0xff] }
 0xe55   :  { %5289 = vst.msk [vmem:[#allocation2 + $0x70] sm:$0xff] %vm758_vm5, %v5284_v8  ;;  %v9296_v56 = vpop.f32.mrf.mxu1  ;;  %v5789_v24 = vsel %vm758_vm5, %v11858_v12, -inf }
 0xe56   :  { %5790 = vmax.xlane.f32.xlu1 %v5789_v24  ;;  %v7944_v56 = vld [vmem:[%s13013_s3 + $0x13] ss:$0 sm:$0xff] }
 0xe57   :  { %v5473_v18 = vpop.f32.mrf.mxu1 }
 0xe58   :  { %v11863_v30 = vld [vmem:[#allocation2 + $0x68] sm:$0xff] }
 0xe59   :  { %v9299_v20 = vpop.f32.mrf.mxu1  ;;  %v5792_v52 = vsel %vm758_vm5, %v11863_v30, -inf }
 0xe5a   :  { %5793 = vmax.xlane.f32.xlu0 %v5792_v52 }
 0xe5b   :  { %v5478_v28 = vpop.f32.mrf.mxu1 }
 0xe5c   :  { %v11867_v34 = vld [vmem:[#allocation2 + $0x70] sm:$0xff] }
 0xe5d   :  { %v9302_v17 = vpop.f32.mrf.mxu1  ;;  %v5795_v6 = vsel %vm758_vm5, %v11867_v34, -inf }
 0xe5e   :  { %5796 = vmax.xlane.f32.xlu1 %v5795_v6  ;;  %v5479_v17 = vadd.f32 %v7944_v56, %v5478_v28  ;;  %v5474_v6 = vadd.f32 %v7944_v56, %v5473_v18  ;;  %v7884_v28 = vld [vmem:[%s13013_s3 + $0x15] ss:$0 sm:$0xff] }
 0xe5f   :  { %v5483_v11 = vpop.f32.mrf.mxu1  ;;  %v4704_v18 = vadd.f32 %v7884_v28, %v11568_v4  ;;  %v4689_v4 = vadd.f32 %v7884_v28, %v11550_v41 }
 0xe60   :  { %v5484_v52 = vadd.f32 %v7944_v56, %v5483_v11 }
 0xe61   :  { %v9305_v8 = vpop.f32.mrf.mxu1 }
 0xe62   :  { %v5469_v8 = vadd.f32 %v7944_v56, %v5468_v29 }
 0xe63   :  { %v5488_v24 = vpop.f32.mrf.mxu1 }
 0xe64   :  { %v5489_v20 = vadd.f32 %v7944_v56, %v5488_v24  ;;  %v4699_v24 = vadd.f32 %v7884_v28, %v11562_v55 }
 0xe65   :  { %v9308_v57 = vpop.f32.mrf.mxu1 }
 0xe66   :  { %9327 = vmatpush3.xpose.msk.msra.mxu1 %vm185_vm3, %v5489_v20  ;;  %v7936_v57 = vld [vmem:[%s13013_s3 + $0xf] ss:$0 sm:$0xff] }
 0xe67   :  { %9328 = vmatprep.subr.mxu1 %v13083_v63  ;;  %v5368_v11 = vadd.f32 %v7936_v57, %v11590_v27  ;;  %v5373_v29 = vadd.f32 %v7936_v57, %v11592_v2  ;;  %v4694_v27 = vadd.f32 %v7884_v28, %v11556_v44  ;;  %v5378_v56 = vadd.f32 %v7936_v57, %v11594_v61 }
 0xe68   :  { %v4684_v2 = vadd.f32 %v7884_v28, %v11544_v38  ;;  %v5383_v41 = vadd.f32 %v7936_v57, %v11596_v47  ;;  %v5388_v38 = vadd.f32 %v7936_v57, %v11598_v62 }
 0xe6a   :  { %9329 = vmatpush3.xpose.msk.msra.mxu1 %vm185_vm3, %v5484_v52 }
 0xe6b   :  { %9330 = vmatprep.subr.mxu1 %v13083_v63 }
 0xe6e   :  { %9331 = vmatpush3.xpose.msk.msra.mxu1 %vm185_vm3, %v5479_v17 }
 0xe6f   :  { %9332 = vmatprep.subr.mxu1 %v13083_v63 }
 0xe72   :  { %9333 = vmatpush3.xpose.msk.msra.mxu1 %vm185_vm3, %v5474_v6 }
 0xe73   :  { %9334 = vmatprep.subr.mxu1 %v13083_v63 }
 0xe76   :  { %9335 = vmatpush3.xpose.msk.msra.mxu1 %vm185_vm3, %v5469_v8 }
 0xe77   :  { %9376 = vmatprep.subr.mxu1 %v13083_v63 }
 0xe79   :  { %9337 = vmatmul.mubr.msk.f32.vlgmr.msra.gmra.mxu1 %vm185_vm3, %v5368_v11 }
 0xe7a   :  { %v5890_v20 = vpop.xlane.xlu1 %5889  ;;  %9377 = vmatpush3.msra.mxu1 %v4704_v18  ;;  %9339 = vmatprep.mubr.msk.f32.mxu1 %vm9847_vm0, %v13083_v63 }
 0xe7b   :  { %9704 = vrcp.f32 %v5890_v20  ;;  %9378 = vmatprep.subr.mxu1 %v13083_v63 }
 0xe7c   :  { %9379 = vmatpush3.msra.mxu1 %v4699_v24 }
 0xe7d   :  { %9340 = vmatmul.mubr.msk.f32.gmra.mxu1 %vm185_vm3, %v5373_v29  ;;  %9380 = vmatprep.subr.mxu1 %v13083_v63 }
 0xe7e   :  { %v5893_v55 = vpop.xlane.xlu0 %5892  ;;  %9381 = vmatpush3.msra.mxu1 %v4694_v27  ;;  %9342 = vmatprep.mubr.msk.f32.mxu1 %vm9847_vm0, %v13083_v63 }
 0xe7f   :  { %9706 = vrcp.f32 %v5893_v55  ;;  %9382 = vmatprep.subr.mxu1 %v13083_v63 }
 0xe80   :  { %9383 = vmatpush3.msra.mxu1 %v4689_v4 }
 0xe81   :  { %9343 = vmatmul.mubr.msk.f32.gmra.mxu1 %vm185_vm3, %v5378_v56  ;;  %9384 = vmatprep.subr.mxu1 %v13083_v63 }
 0xe82   :  { %v5896_v44 = vpop.xlane.xlu1 %5895  ;;  %9385 = vmatpush3.msra.mxu1 %v4684_v2  ;;  %9345 = vmatprep.mubr.msk.f32.mxu1 %vm9847_vm0, %v13083_v63 }
 0xe83   :  { %9708 = vrcp.f32 %v5896_v44  ;;  %9418 = vmatprep.subr.mxu1 %v13083_v63 }
 0xe85   :  { %9346 = vmatmul.mubr.msk.f32.gmra.mxu1 %vm185_vm3, %v5383_v41 }
 0xe86   :  { %v5899_v61 = vpop.xlane.xlu0 %5898  ;;  %9348 = vmatprep.mubr.msk.f32.mxu1 %vm9847_vm0, %v13083_v63 }
 0xe87   :  { %9710 = vrcp.f32 %v5899_v61 }
 0xe88   :  { %v9705_v52 = vpop.eup %9704 }
 0xe89   :  { %v11918_v17 = vmul.f32 %v9705_v52, %v11791_v45  ;;  %9349 = vmatmul.mubr.msk.f32.gmra.mxu1 %vm185_vm3, %v5388_v38 }
 0xe8a   :  { %v5902_v6 = vpop.xlane.xlu1 %5901  ;;  %9386 = vmatprep.mubr.msk.f32.mxu1 %vm9847_vm0, %v13083_v63  ;;  %v5755_v11 = vpop.xlane.xlu0 %5754 }
 0xe8b   :  { %8001 = vst.msk [vmem:[%s13017_s7 + $0x108] sm:$0x1f] %vm2423_vm11, %v11918_v17  ;;  %9712 = vrcp.f32 %v5902_v6  ;;  %v5813_v56 = vsub.f32 %v11807_v26, %v5755_v11 }
 0xe8c   :  { %v9707_v47 = vpop.eup %9706 }
 0xe8d   :  { %9387 = vmatmul.mubr.msk.f32.vlgmr.msra.gmra.mxu1 %vm758_vm5, %v11918_v17  ;;  %v11933_v62 = vmul.f32 %v9707_v47, %v11795_v37  ;;  %v5833_v6 = vmul.f32 1.442695, %v5813_v56 }
 0xe8e   :  { %9389 = vmatprep.mubr.msk.f32.mxu1 %vm9847_vm0, %v13083_v63  ;;  %v5758_v20 = vpop.xlane.xlu1 %5757  ;;  %v5761_v4 = vpop.xlane.xlu0 %5760 }
 0xe8f   :  { %v5814_v41 = vsub.f32 %v11817_v32, %v5758_v20  ;;  %v5815_v43 = vsub.f32 %v11815_v15, %v5761_v4  ;;  %9714 = vpow2.f32 %v5833_v6 }
 0xe90   :  { %v9709_v45 = vpop.eup %9708 }
 0xe91   :  { %9390 = vmatmul.mubr.msk.f32.gmra.mxu1 %vm758_vm5, %v11933_v62  ;;  %v11940_v57 = vmul.f32 %v9709_v45, %v11799_v0 }
 0xe92   :  { %9392 = vmatprep.mubr.msk.f32.mxu1 %vm9847_vm0, %v13083_v63  ;;  %v5764_v38 = vpop.xlane.xlu1 %5763  ;;  %v5767_v26 = vpop.xlane.xlu0 %5766 }
 0xe93   :  { %v5817_v15 = vsub.f32 %v11823_v16, %v5767_v26 }
 0xe94   :  { %v9711_v8 = vpop.eup %9710 }
 0xe95   :  { %9393 = vmatmul.mubr.msk.f32.gmra.mxu1 %vm758_vm5, %v11940_v57  ;;  %v11947_v37 = vmul.f32 %v9711_v8, %v11803_v33  ;;  %v5835_v8 = vmul.f32 1.442695, %v5814_v41 }
 0xe96   :  { %9395 = vmatprep.mubr.msk.f32.mxu1 %vm9847_vm0, %v13083_v63 }
 0xe97   :  { %9716 = vpow2.f32 %v5835_v8 }
 0xe98   :  { %v9713_v28 = vpop.eup %9712 }
 0xe99   :  { %9396 = vmatmul.mubr.msk.f32.gmra.mxu1 %vm758_vm5, %v11947_v37  ;;  %v11954_v0 = vmul.f32 %v9713_v28, %v11809_v5 }
 0xe9a   :  { %9398 = vmatprep.mubr.msk.f32.mxu1 %vm9847_vm0, %v13083_v63 }
 0xe9d   :  { %9399 = vmatmul.mubr.msk.f32.gmra.mxu1 %vm758_vm5, %v11954_v0 }
 0xe9e   :  { %9420 = vmatprep.mubr.msk.f32.mxu1 %vm9847_vm0, %v13083_v63 }
 0xedb   :  { %v5788_v20 = vpop.xlane.xlu0 %5787 }
 0xedc   :  { %v5824_v56 = vsub.f32 %v11850_v22, %v5788_v20 }
 0xede   :  { %v5855_v6 = vmul.f32 1.442695, %v5824_v56 }
 0xee3   :  { %v5794_v41 = vpop.xlane.xlu0 %5793 }
 0xf39   :  { %v5689_v18 = vpop.f32.mrf.mxu1 }
 0xf3a   :  { %v5713_v33 = vmul.f32 0.35355338, %v5689_v18  ;;  %v5837_v18 = vmul.f32 1.442695, %v5815_v43  ;;  %v5826_v43 = vsub.f32 %v11863_v30, %v5794_v41 }
 0xf3b   :  { %v9338_v24 = vpop.f32.mrf.mxu1 }
 0xf3c   :  { %v5718_v29 = vadd.f32 %v5713_v33, %v10726_v14  ;;  %v5785_v33 = vpop.xlane.xlu1 %5784  ;;  %9718 = vpow2.f32 %v5837_v18 }
 0xf3d   :  { %v5694_v27 = vpop.f32.mrf.mxu1 }
 0xf3e   :  { %v5723_v55 = vsel %vm286_vm6, %v5718_v29, -1e+30  ;;  %v5714_v5 = vmul.f32 0.35355338, %v5694_v27  ;;  %v5823_v27 = vsub.f32 %v11842_v53, %v5785_v33  ;;  %vm2432_vm6 = vcmask 39941  }
 0xf3f   :  { %5728 = vst.msk [vmem:[#allocation2 + $0x78] sm:$0xff] %vm758_vm5, %v5723_v55  ;;  %v9341_v2 = vpop.f32.mrf.mxu1 }
 0xf40   :  { %v5719_v44 = vadd.f32 %v5714_v5, %v10733_v9  ;;  %v5816_v9 = vsub.f32 %v11825_v35, %v5764_v38  ;;  %v5841_v5 = vmul.f32 1.442695, %v5817_v15  ;;  %v5791_v2 = vpop.xlane.xlu1 %5790  ;;  %v5853_v38 = vmul.f32 1.442695, %v5823_v27 }
 0xf41   :  { %v5699_v61 = vpop.f32.mrf.mxu1 }
 0xf42   :  { %v5724_v14 = vsel %vm287_vm7, %v5719_v44, -1e+30  ;;  %v5715_v52 = vmul.f32 0.35355338, %v5699_v61  ;;  %v5839_v46 = vmul.f32 1.442695, %v5816_v9 }
 0xf43   :  { %5729 = vst.msk [vmem:[#allocation2 + $0x80] sm:$0xff] %vm758_vm5, %v5724_v14  ;;  %v9344_v47 = vpop.f32.mrf.mxu1  ;;  %v13120_v61 = vld [vmem:[#allocation28_spill] sm:$0xff]  ;;  %v5825_v14 = vsub.f32 %v11858_v12, %v5791_v2  ;;  %v5859_v9 = vmul.f32 1.442695, %v5826_v43  ;;  %vm2434_vm7 = vcmask 33792  }
 0xf44   :  { %v5720_v45 = vadd.f32 %v5715_v52, %v10741_v60  ;;  %9720 = vpow2.f32 %v5839_v46 }
 0xf45   :  { %v5704_v28 = vpop.f32.mrf.mxu1  ;;  %9722 = vpow2.f32 %v5841_v5  ;;  %v5857_v12 = vmul.f32 1.442695, %v5825_v14 }
 0xf46   :  { %v5725_v32 = vsel %vm288_vm8, %v5720_v45, -1e+30  ;;  %v5716_v11 = vmul.f32 0.35355338, %v5704_v28  ;;  %v11975_v42 = vld [vmem:[#allocation2 + $0x78] sm:$0xff]  ;;  %v5797_v45 = vpop.xlane.xlu1 %5796  ;;  %9724 = vpow2.f32 %v5853_v38  ;;  %vm2449_vm8 = vcmask 39943  }
 0xf47   :  { %5730 = vst.msk [vmem:[#allocation2 + $0x88] sm:$0xff] %vm758_vm5, %v5725_v32  ;;  %v9347_v24 = vpop.f32.mrf.mxu1  ;;  %v5798_v60 = vsel %vm758_vm5, %v11975_v42, -inf  ;;  %9726 = vpow2.f32 %v5855_v6  ;;  %v5827_v28 = vsub.f32 %v11867_v34, %v5797_v45 }
 0xf48   :  { %v5721_v35 = vadd.f32 %v5716_v11, %v10753_v39  ;;  %5799 = vmax.xlane.f32.xlu0 %v5798_v60  ;;  %v12010_v11 = vpop.eup %9714  ;;  %9728 = vpow2.f32 %v5857_v12 }
 0xf49   :  { %v5709_v29 = vpop.f32.mrf.mxu1  ;;  %v12014_v33 = vpop.eup %9716  ;;  %9730 = vpow2.f32 %v5859_v9  ;;  %v5861_v24 = vmul.f32 1.442695, %v5827_v28  ;;  %v5873_v20 = vsel %vm758_vm5, %v12010_v11, 0.0 }
 0xf4a   :  { %v5726_v4 = vsel %vm289_vm9, %v5721_v35, -1e+30  ;;  %v5717_v16 = vmul.f32 0.35355338, %v5709_v29  ;;  %v11985_v55 = vld [vmem:[#allocation2 + $0x80] sm:$0xff]  ;;  %v12019_v35 = vpop.eup %9718  ;;  %vm2440_vm9 = vcmask 38914  }
 0xf4b   :  { %5731 = vst.msk [vmem:[#allocation2 + $0x90] sm:$0xff] %vm758_vm5, %v5726_v4  ;;  %v9350_v39 = vpop.f32.mrf.mxu1  ;;  %v5801_v44 = vsel %vm758_vm5, %v11985_v55, -inf  ;;  %9732 = vpow2.f32 %v5861_v24  ;;  %v5879_v4 = vsel %vm758_vm5, %v12019_v35, 0.0 }
 0xf4c   :  { %v5722_v53 = vadd.f32 %v5717_v16, %v13120_v61  ;;  %5802 = vmax.xlane.f32.xlu1 %v5801_v44  ;;  %v5876_v16 = vsel %vm758_vm5, %v12014_v33, 0.0 }
 0xf4d   :  { %v11992_v48 = vpop.f32.mrf.mxu1 }
 0xf4e   :  { %v5727_v22 = vsel %vm290_vm10, %v5722_v53, -1e+30  ;;  %v11997_v52 = vld [vmem:[#allocation2 + $0x88] sm:$0xff]  ;;  %vm2460_vm10 = vcmask 39940  }
 0xf4f   :  { %5732 = vst.msk [vmem:[#allocation2 + $0x98] sm:$0xff] %vm758_vm5, %v5727_v22  ;;  %v9388_v47 = vpop.f32.mrf.mxu1  ;;  %v5804_v26 = vsel %vm758_vm5, %v11997_v52, -inf }
 0xf50   :  { %5805 = vmax.xlane.f32.xlu0 %v5804_v26 }
 0xf51   :  { %v12003_v8 = vpop.f32.mrf.mxu1  ;;  %v12023_v29 = vpop.eup %9720 }
 0xf52   :  { %v12005_v50 = vld [vmem:[#allocation2 + $0x90] sm:$0xff]  ;;  %v12029_v5 = vpop.eup %9722  ;;  %v5882_v41 = vsel %vm758_vm5, %v12023_v29, 0.0 }
 0xf53   :  { %v9391_v32 = vpop.f32.mrf.mxu1  ;;  %v5807_v30 = vsel %vm758_vm5, %v12005_v50, -inf  ;;  %v12033_v2 = vpop.eup %9724  ;;  %v5885_v44 = vsel %vm758_vm5, %v12029_v5, 0.0 }
 0xf54   :  { %5808 = vmax.xlane.f32.xlu1 %v5807_v30  ;;  %v12039_v61 = vpop.eup %9726  ;;  %v5903_v14 = vsel %vm758_vm5, %v12033_v2, 0.0 }
 0xf55   :  { %v12012_v18 = vpop.f32.mrf.mxu1  ;;  %v12041_v53 = vpop.eup %9728  ;;  %v5906_v38 = vsel %vm758_vm5, %v12039_v61, 0.0 }
 0xf56   :  { %v5752_v15 = vld [vmem:[#allocation2 + $0x98] sm:$0xff]  ;;  %v12047_v22 = vpop.eup %9730  ;;  %v5909_v43 = vsel %vm758_vm5, %v12041_v53, 0.0 }
 0xf57   :  { %v9394_v60 = vpop.f32.mrf.mxu1  ;;  %v5810_v34 = vsel %vm758_vm5, %v5752_v15, -inf  ;;  %v5912_v6 = vsel %vm758_vm5, %v12047_v22, 0.0 }
 0xf58   :  { %5874 = vadd.xlane.f32.xlu1 %v5873_v20  ;;  %5811 = vmax.xlane.f32.xlu0 %v5810_v34  ;;  %v12053_v47 = vpop.eup %9732 }
 0xf59   :  { %v12021_v46 = vpop.f32.mrf.mxu1  ;;  %v5915_v26 = vsel %vm758_vm5, %v12053_v47, 0.0 }
 0xf5b   :  { %v9397_v27 = vpop.f32.mrf.mxu1 }
 0xf5c   :  { %5880 = vadd.xlane.f32.xlu1 %v5879_v4  ;;  %5877 = vadd.xlane.f32.xlu0 %v5876_v16 }
 0xf5d   :  { %v12031_v56 = vpop.f32.mrf.mxu1 }
 0xf5f   :  { %v9400_v39 = vpop.f32.mrf.mxu1 }
 0xf60   :  { %5886 = vadd.xlane.f32.xlu1 %v5885_v44  ;;  %5883 = vadd.xlane.f32.xlu0 %v5882_v41 }
 0xf64   :  { %5907 = vadd.xlane.f32.xlu1 %v5906_v38  ;;  %5904 = vadd.xlane.f32.xlu0 %v5903_v14 }
 0xf68   :  { %5913 = vadd.xlane.f32.xlu1 %v5912_v6  ;;  %5910 = vadd.xlane.f32.xlu0 %v5909_v43 }
 0xf6c   :  { %5916 = vadd.xlane.f32.xlu0 %v5915_v26 }
 0xfd1   :  { %v5800_v45 = vpop.xlane.xlu0 %5799 }
 0xfd2   :  { %v5828_v12 = vsub.f32 %v11975_v42, %v5800_v45 }
 0xfd4   :  { %v5863_v9 = vmul.f32 1.442695, %v5828_v12 }
 0xfd5   :  { %v5803_v28 = vpop.xlane.xlu1 %5802 }
 0xfd6   :  { %9734 = vpow2.f32 %v5863_v9  ;;  %v5829_v32 = vsub.f32 %v11985_v55, %v5803_v28 }
 0xfd8   :  { %v5865_v30 = vmul.f32 1.442695, %v5829_v32 }
 0xfd9   :  { %v5806_v24 = vpop.xlane.xlu0 %5805 }
 0xfda   :  { %9736 = vpow2.f32 %v5865_v30  ;;  %v5830_v60 = vsub.f32 %v11997_v52, %v5806_v24  ;;  %v3943_v30 = vld [vmem:[#allocation3 + $0xe8] sm:$0xff] }
 0xfdc   :  { %v5867_v20 = vmul.f32 1.442695, %v5830_v60 }
 0xfdd   :  { %v5809_v34 = vpop.xlane.xlu1 %5808 }
 0xfde   :  { %9738 = vpow2.f32 %v5867_v20  ;;  %v5831_v27 = vsub.f32 %v12005_v50, %v5809_v34 }
 0xfe0   :  { %v5869_v4 = vmul.f32 1.442695, %v5831_v27 }
 0xfe1   :  { %v5875_v16 = vpop.xlane.xlu1 %5874  ;;  %v5812_v39 = vpop.xlane.xlu0 %5811 }
 0xfe2   :  { %9740 = vpow2.f32 %v5869_v4  ;;  %v5832_v42 = vsub.f32 %v5752_v15, %v5812_v39 }
 0xfe3   :  { %v12061_v44 = vpop.eup %9734  ;;  %9742 = vrcp.f32 %v5875_v16 }
 0xfe4   :  { %v5871_v41 = vmul.f32 1.442695, %v5832_v42  ;;  %v5918_v55 = vsel %vm758_vm5, %v12061_v44, 0.0 }
 0xfe5   :  { %5919 = vadd.xlane.f32.xlu1 %v5918_v55  ;;  %v5878_v38 = vpop.xlane.xlu0 %5877  ;;  %v5881_v14 = vpop.xlane.xlu1 %5880 }
 0xfe6   :  { %9744 = vpow2.f32 %v5871_v41 }
 0xfe7   :  { %v12065_v52 = vpop.eup %9736  ;;  %9746 = vrcp.f32 %v5878_v38  ;;  %v13124_v38 = vld [vmem:[#allocation41_spill] sm:$0xff] }
 0xfe8   :  { %v5921_v50 = vsel %vm758_vm5, %v12065_v52, 0.0  ;;  %9748 = vrcp.f32 %v5881_v14 }
 0xfe9   :  { %5922 = vadd.xlane.f32.xlu0 %v5921_v50  ;;  %v5884_v6 = vpop.xlane.xlu0 %5883  ;;  %v5887_v12 = vpop.xlane.xlu1 %5886  ;;  %v13125_v50 = vld [vmem:[#allocation25_spill] sm:$0xff] }
 0xfea   :  { %9750 = vrcp.f32 %v5884_v6  ;;  %v13126_v6 = vld [vmem:[#allocation26_spill] sm:$0xff] }
 0xfeb   :  { %v12069_v15 = vpop.eup %9738 }
 0xfec   :  { %v5924_v43 = vsel %vm758_vm5, %v12069_v15, 0.0 }
 0xfed   :  { %5925 = vadd.xlane.f32.xlu1 %v5924_v43  ;;  %v5905_v26 = vpop.xlane.xlu0 %5904  ;;  %v5908_v41 = vpop.xlane.xlu1 %5907 }
 0xfee   :  { %9752 = vrcp.f32 %v5905_v26  ;;  %v3942_v26 = vld [vmem:[#allocation3 + $0xe0] sm:$0xff] }
 0xfef   :  { %v12073_v45 = vpop.eup %9740  ;;  %9754 = vrcp.f32 %v5887_v12  ;;  %9419 = vmatpush3.msra.mxu1 %v3942_v26  ;;  %v13129_v12 = vld [vmem:[#allocation31_spill] sm:$0xff] }
 0xff0   :  { %v9743_v9 = vpop.eup %9742  ;;  %v5927_v28 = vsel %vm758_vm5, %v12073_v45, 0.0  ;;  %9756 = vrcp.f32 %v5908_v41  ;;  %9460 = vmatprep.subr.mxu1 %v13083_v63 }
 0xff1   :  { %v12078_v32 = vmul.f32 %v9743_v9, %v12010_v11  ;;  %5928 = vadd.xlane.f32.xlu0 %v5927_v28  ;;  %v13130_v9 = vld [vmem:[#allocation32_spill] sm:$0xff]  ;;  %v13131_v28 = vld [vmem:[#allocation33_spill] sm:$0xff] }
 0xff3   :  { %v12080_v24 = vpop.eup %9744  ;;  %7974 = vst.msk [vmem:[%s13017_s7 + $0x100] sm:$0x1f] %vm2423_vm11, %v12078_v32  ;;  %9362 = vmatmul.mubr.msk.f32.vlgmr.msra.gmra.mxu0 %vm758_vm5, %v12078_v32 }
 0xff4   :  { %9364 = vmatprep.mubr.msk.f32.mxu0 %vm9847_vm0, %v13083_v63  ;;  %v5930_v11 = vsel %vm758_vm5, %v12080_v24, 0.0  ;;  %9402 = vmatpush3.msra.mxu0 %v3943_v30  ;;  %v9747_v60 = vpop.eup %9746  ;;  %v13132_v30 = vld [vmem:[#allocation34_spill] sm:$0xff] }
 0xff5   :  { %5931 = vadd.xlane.f32.xlu1 %v5930_v11  ;;  %9435 = vmatprep.subr.mxu0 %v13083_v63  ;;  %v12095_v20 = vmul.f32 %v9747_v60, %v12014_v33  ;;  %v9749_v34 = vpop.eup %9748  ;;  %v13133_v11 = vld [vmem:[#allocation35_spill] sm:$0xff]  ;;  %v13134_v60 = vld [vmem:[#allocation36_spill] sm:$0xff] }
 0xff6   :  { %v12102_v27 = vmul.f32 %v9749_v34, %v12019_v35  ;;  %v13135_v34 = vld [vmem:[#allocation37_spill] sm:$0xff] }
 0xff7   :  { %9365 = vmatmul.mubr.msk.f32.gmra.mxu0 %vm758_vm5, %v12095_v20  ;;  %v9751_v4 = vpop.eup %9750 }
 0xff8   :  { %9367 = vmatprep.mubr.msk.f32.mxu0 %vm9847_vm0, %v13083_v63  ;;  %v12112_v33 = vmul.f32 %v9751_v4, %v12023_v29  ;;  %v7918_v29 = vld [vmem:[%s13013_s3 + $0x16] ss:$0 sm:$0xff]  ;;  %v13136_v4 = vld [vmem:[#allocation38_spill] sm:$0xff] }
 0xffb   :  { %v9753_v16 = vpop.eup %9752  ;;  %9368 = vmatmul.mubr.msk.f32.gmra.mxu0 %vm758_vm5, %v12102_v27 }
 0xffc   :  { %v12107_v39 = vmul.f32 %v9753_v16, %v12033_v2  ;;  %9370 = vmatprep.mubr.msk.f32.mxu0 %vm9847_vm0, %v13083_v63  ;;  %v9755_v42 = vpop.eup %9754  ;;  %v5147_v2 = vadd.f32 %v7918_v29, %v11588_v7  ;;  %v5137_v7 = vadd.f32 %v7918_v29, %v11584_v36  ;;  %v5127_v36 = vadd.f32 %v7918_v29, %v11580_v40  ;;  %v5914_v40 = vpop.xlane.xlu1 %5913  ;;  %v13137_v16 = vld [vmem:[#allocation39_spill] sm:$0xff] }
 0xffd   :  { %v12124_v35 = vmul.f32 %v9755_v42, %v12029_v5  ;;  %v5142_v5 = vadd.f32 %v7918_v29, %v11586_v19  ;;  %v7952_v19 = vld [vmem:[%s13013_s3 + $0x17] ss:$0 sm:$0xff] }
 0xffe   :  { %8023 = vst.msk [vmem:[%s13017_s7 + $0x110] sm:$0x1f] %vm2423_vm11, %v12107_v39  ;;  %v5580_v55 = vadd.f32 %v7952_v19, %v11604_v23  ;;  %v5570_v14 = vadd.f32 %v7952_v19, %v13124_v38 }
 0xfff   :  { %9371 = vmatmul.mubr.msk.f32.gmra.mxu0 %vm758_vm5, %v12112_v33 }
0x1000   :  { %9373 = vmatprep.mubr.msk.f32.mxu0 %vm9847_vm0, %v13083_v63 }
0x1003   :  { %9374 = vmatmul.mubr.msk.f32.gmra.mxu0 %vm758_vm5, %v12124_v35 }
0x1004   :  { %9403 = vmatprep.mubr.msk.f32.mxu0 %vm9847_vm0, %v13083_v63 }
0x1006   :  { %2427 = vrot.lane.b32.xlu1 %v10871_v58, %s9850_s19 }
0x1007   :  { %2425 = vrot.lane.b32.xlu0 %v10854_v59, %s9850_s19  ;;  %9404 = vmatmul.mubr.msk.f32.vlgmr.msra.gmra.mxu0 %vm185_vm3, %v11992_v48  ;;  %v5132_v59 = vadd.f32 %v7918_v29, %v11582_v1  ;;  %v13121_v1 = vld [vmem:[#allocation30_spill] sm:$0xff]  ;;  %v5590_v48 = vadd.f32 %v7952_v19, %v11608_v13 }
0x1008   :  { %9436 = vmatpush3.msra.mxu0 %v5147_v2  ;;  %9406 = vmatprep.mubr.msk.f32.mxu0 %vm9847_vm0, %v13083_v63 }
0x1009   :  { %9437 = vmatprep.subr.mxu0 %v13083_v63 }
0x100a   :  { %2436 = vrot.lane.b32.xlu1 %v10871_v58, %s9851_s20  ;;  %9438 = vmatpush3.msra.mxu0 %v5142_v5 }
0x100b   :  { %2442 = vrot.lane.b32.xlu0 %v10871_v58, %s9852_s21  ;;  %9439 = vmatprep.subr.mxu0 %v13083_v63  ;;  %v5911_v58 = vpop.xlane.xlu0 %5910 }
0x100c   :  { %9407 = vmatmul.mubr.msk.f32.gmra.mxu0 %vm185_vm3, %v12003_v8  ;;  %9758 = vrcp.f32 %v5911_v58  ;;  %v13122_v8 = vld [vmem:[#allocation23_spill] sm:$0xff] }
0x100d   :  { %9440 = vmatpush3.msra.mxu0 %v5137_v7  ;;  %9409 = vmatprep.mubr.msk.f32.mxu0 %vm9847_vm0, %v13083_v63  ;;  %9760 = vrcp.f32 %v5914_v40 }
0x100e   :  { %9441 = vmatprep.subr.mxu0 %v13083_v63  ;;  %2444 = vrot.lane.b32.xlu1 %v10878_v49, %s9852_s21 }
0x100f   :  { %9442 = vmatpush3.msra.mxu0 %v5132_v59  ;;  %2453 = vrot.lane.b32.xlu0 %v10878_v49, %s9853_s22  ;;  %v5917_v49 = vpop.xlane.xlu0 %5916 }
0x1010   :  { %9443 = vmatprep.subr.mxu0 %v13083_v63  ;;  %9410 = vmatmul.mubr.msk.f32.gmra.mxu0 %vm185_vm3, %v12012_v18  ;;  %9762 = vrcp.f32 %v5917_v49  ;;  %v5585_v18 = vadd.f32 %v7952_v19, %v11606_v25  ;;  %v5575_v25 = vadd.f32 %v7952_v19, %v11602_v21 }
0x1011   :  { %9444 = vmatpush3.msra.mxu0 %v5127_v36  ;;  %9412 = vmatprep.mubr.msk.f32.mxu0 %vm9847_vm0, %v13083_v63 }
0x1012   :  { %2455 = vrot.lane.b32.xlu1 %v10888_v3, %s9853_s22  ;;  %9477 = vmatprep.subr.mxu0 %v13083_v63 }
0x1013   :  { %2464 = vrot.lane.b32.xlu0 %v10888_v3, %s9854_s23 }
0x1014   :  { %9413 = vmatmul.mubr.msk.f32.gmra.mxu0 %vm185_vm3, %v12021_v46  ;;  %v13123_v46 = vld [vmem:[#allocation24_spill] sm:$0xff] }
0x1015   :  { %9415 = vmatprep.mubr.msk.f32.mxu0 %vm9847_vm0, %v13083_v63 }
0x1016   :  { %2470 = vrot.lane.b32.xlu1 %v10888_v3, %s9855_s1  ;;  %v9757_v3 = vpop.eup %9756 }
0x1017   :  { %2472 = vrot.lane.b32.xlu0 %v13121_v1, %s9855_s1 }
0x1018   :  { %9416 = vmatmul.mubr.msk.f32.gmra.mxu0 %vm185_vm3, %v12031_v56  ;;  %v12200_v56 = vmul.f32 %v9757_v3, %v12039_v61 }
0x1019   :  { %9445 = vmatprep.mubr.msk.f32.mxu0 %vm9847_vm0, %v13083_v63  ;;  %v9759_v13 = vpop.eup %9758 }
0x101a   :  { %2481 = vrot.lane.b32.xlu1 %v13121_v1, %s9856_s26  ;;  %v12215_v23 = vmul.f32 %v9759_v13, %v12041_v53  ;;  %v9761_v61 = vpop.eup %9760 }
0x101b   :  { %2804 = vrot.lane.b32.xlu0 %v13122_v8, %s9850_s19  ;;  %v12228_v21 = vmul.f32 %v9761_v61, %v12047_v22  ;;  %v13127_v22 = vld [vmem:[#allocation27_spill] sm:$0xff] }
0x101c   :  { %9446 = vmatmul.mubr.msk.f32.vlgmr.msra.gmra.mxu0 %vm758_vm5, %v12107_v39 }
0x101d   :  { %9478 = vmatpush3.msra.mxu0 %v5590_v48  ;;  %9448 = vmatprep.mubr.msk.f32.mxu0 %vm9847_vm0, %v13083_v63  ;;  %v9763_v53 = vpop.eup %9762 }
0x101e   :  { %9479 = vmatprep.subr.mxu0 %v13083_v63  ;;  %2806 = vrot.lane.b32.xlu1 %v13123_v46, %s9850_s19  ;;  %v12240_v43 = vmul.f32 %v9763_v53, %v12053_v47  ;;  %v13128_v47 = vld [vmem:[#allocation29_spill] sm:$0xff] }
0x101f   :  { %9480 = vmatpush3.msra.mxu0 %v5585_v18  ;;  %2813 = vrot.lane.b32.xlu0 %v13123_v46, %s9851_s20 }
0x1020   :  { %9481 = vmatprep.subr.mxu0 %v13083_v63  ;;  %9449 = vmatmul.mubr.msk.f32.gmra.mxu0 %vm758_vm5, %v12200_v56 }
0x1021   :  { %9482 = vmatpush3.msra.mxu0 %v5580_v55  ;;  %9451 = vmatprep.mubr.msk.f32.mxu0 %vm9847_vm0, %v13083_v63 }
0x1022   :  { %9483 = vmatprep.subr.mxu0 %v13083_v63  ;;  %2818 = vrot.lane.b32.xlu1 %v13123_v46, %s9852_s21 }
0x1023   :  { %9484 = vmatpush3.msra.mxu0 %v5575_v25  ;;  %2820 = vrot.lane.b32.xlu0 %v13125_v50, %s9852_s21 }
0x1024   :  { %9485 = vmatprep.subr.mxu0 %v13083_v63  ;;  %9452 = vmatmul.mubr.msk.f32.gmra.mxu0 %vm758_vm5, %v12215_v23 }
0x1025   :  { %9486 = vmatpush3.msra.mxu0 %v5570_v14  ;;  %9454 = vmatprep.mubr.msk.f32.mxu0 %vm9847_vm0, %v13083_v63 }
0x1026   :  { %2827 = vrot.lane.b32.xlu1 %v13125_v50, %s9853_s22  ;;  %9519 = vmatprep.subr.mxu0 %v13083_v63  ;;  %v3944_v50 = vld [vmem:[#allocation3 + $0xf0] sm:$0xff] }
0x1027   :  { %2829 = vrot.lane.b32.xlu0 %v13126_v6, %s9853_s22 }
0x1028   :  { %9455 = vmatmul.mubr.msk.f32.gmra.mxu0 %vm758_vm5, %v12228_v21 }
0x1029   :  { %9457 = vmatprep.mubr.msk.f32.mxu0 %vm9847_vm0, %v13083_v63 }
0x102a   :  { %2836 = vrot.lane.b32.xlu1 %v13126_v6, %s9854_s23 }
0x102b   :  { %2841 = vrot.lane.b32.xlu0 %v13126_v6, %s9855_s1 }
0x102c   :  { %9458 = vmatmul.mubr.msk.f32.gmra.mxu0 %vm758_vm5, %v12240_v43 }
0x102d   :  { %9487 = vmatprep.mubr.msk.f32.mxu0 %vm9847_vm0, %v13083_v63 }
0x102e   :  { %2843 = vrot.lane.b32.xlu1 %v13127_v22, %s9855_s1 }
0x102f   :  { %2850 = vrot.lane.b32.xlu0 %v13127_v22, %s9856_s26 }
0x1032   :  { %3072 = vrot.lane.b32.xlu1 %v13128_v47, %s9850_s19 }
0x1033   :  { %3074 = vrot.lane.b32.xlu0 %v13129_v12, %s9850_s19 }
0x1036   :  { %3081 = vrot.lane.b32.xlu1 %v13129_v12, %s9851_s20 }
0x1037   :  { %3086 = vrot.lane.b32.xlu0 %v13129_v12, %s9852_s21 }
0x103a   :  { %3088 = vrot.lane.b32.xlu1 %v13130_v9, %s9852_s21 }
0x103b   :  { %3095 = vrot.lane.b32.xlu0 %v13130_v9, %s9853_s22 }
0x103e   :  { %3097 = vrot.lane.b32.xlu1 %v13131_v28, %s9853_s22 }
0x103f   :  { %3104 = vrot.lane.b32.xlu0 %v13131_v28, %s9854_s23 }
0x1042   :  { %3109 = vrot.lane.b32.xlu1 %v13131_v28, %s9855_s1 }
0x1043   :  { %3111 = vrot.lane.b32.xlu0 %v13132_v30, %s9855_s1 }
0x1046   :  { %3118 = vrot.lane.b32.xlu1 %v13132_v30, %s9856_s26 }
0x1047   :  { %3340 = vrot.lane.b32.xlu0 %v13133_v11, %s9850_s19 }
0x104a   :  { %3342 = vrot.lane.b32.xlu1 %v13134_v60, %s9850_s19 }
0x104b   :  { %3349 = vrot.lane.b32.xlu0 %v13134_v60, %s9851_s20 }
0x104e   :  { %3354 = vrot.lane.b32.xlu1 %v13134_v60, %s9852_s21 }
0x104f   :  { %3356 = vrot.lane.b32.xlu0 %v13135_v34, %s9852_s21 }
0x1052   :  { %3363 = vrot.lane.b32.xlu1 %v13135_v34, %s9853_s22 }
0x1053   :  { %3365 = vrot.lane.b32.xlu0 %v13136_v4, %s9853_s22 }
0x1056   :  { %3372 = vrot.lane.b32.xlu1 %v13136_v4, %s9854_s23 }
0x1057   :  { %3377 = vrot.lane.b32.xlu0 %v13136_v4, %s9855_s1 }
0x105a   :  { %3379 = vrot.lane.b32.xlu1 %v13137_v16, %s9855_s1 }
0x105b   :  { %3386 = vrot.lane.b32.xlu0 %v13137_v16, %s9856_s26 }
0x105e   :  { %6080 = vrot.lane.b32.xlu1 %v12078_v32, %s9850_s19 }
0x105f   :  { %6082 = vrot.lane.b32.xlu0 %v12095_v20, %s9850_s19 }
0x1062   :  { %6089 = vrot.lane.b32.xlu1 %v12095_v20, %s9851_s20 }
0x1063   :  { %6094 = vrot.lane.b32.xlu0 %v12095_v20, %s9852_s21 }
0x1066   :  { %6096 = vrot.lane.b32.xlu1 %v12102_v27, %s9852_s21 }
0x1067   :  { %6103 = vrot.lane.b32.xlu0 %v12102_v27, %s9853_s22 }
0x106a   :  { %6105 = vrot.lane.b32.xlu1 %v12112_v33, %s9853_s22 }
0x106b   :  { %6112 = vrot.lane.b32.xlu0 %v12112_v33, %s9854_s23 }
0x106e   :  { %v5920_v32 = vpop.xlane.xlu1 %5919  ;;  %6117 = vrot.lane.b32.xlu1 %v12112_v33, %s9855_s1 }
0x106f   :  { %9764 = vrcp.f32 %v5920_v32  ;;  %6119 = vrot.lane.b32.xlu0 %v12124_v35, %s9855_s1 }
0x1072   :  { %6126 = vrot.lane.b32.xlu1 %v12124_v35, %s9856_s26  ;;  %v5923_v20 = vpop.xlane.xlu0 %5922 }
0x1073   :  { %9766 = vrcp.f32 %v5923_v20  ;;  %6448 = vrot.lane.b32.xlu0 %v11918_v17, %s9850_s19 }
0x1076   :  { %v5926_v27 = vpop.xlane.xlu1 %5925  ;;  %6450 = vrot.lane.b32.xlu1 %v11933_v62, %s9850_s19 }
0x1077   :  { %9768 = vrcp.f32 %v5926_v27  ;;  %6457 = vrot.lane.b32.xlu0 %v11933_v62, %s9851_s20 }
0x107a   :  { %6462 = vrot.lane.b32.xlu1 %v11933_v62, %s9852_s21  ;;  %v5929_v33 = vpop.xlane.xlu0 %5928 }
0x107b   :  { %9770 = vrcp.f32 %v5929_v33  ;;  %6464 = vrot.lane.b32.xlu0 %v11940_v57, %s9852_s21 }
0x107c   :  { %v9765_v42 = vpop.eup %9764 }
0x107d   :  { %v12330_v17 = vmul.f32 %v9765_v42, %v12061_v44 }
0x107e   :  { %v5932_v35 = vpop.xlane.xlu1 %5931  ;;  %6471 = vrot.lane.b32.xlu1 %v11940_v57, %s9853_s22  ;;  %v2426_v29 = vpop.permute.xlu0 %2425 }
0x107f   :  { %8045 = vst.msk [vmem:[%s13017_s7 + $0x118] sm:$0x1f] %vm2423_vm11, %v12330_v17  ;;  %9772 = vrcp.f32 %v5932_v35  ;;  %6473 = vrot.lane.b32.xlu0 %v11947_v37, %s9853_s22  ;;  %9488 = vmatmul.mubr.msk.f32.vlgmr.msra.gmra.mxu0 %vm758_vm5, %v12330_v17  ;;  %vm2451_vm11 = vcmask 35840  }
0x1080   :  { %7737 = vst.msk [vmem:[%s13017_s7 + $0x1b] sm:$0xe0] %vm2432_vm6, %v2426_v29  ;;  %v9767_v62 = vpop.eup %9766  ;;  %9490 = vmatprep.mubr.msk.f32.mxu0 %vm9847_vm0, %v13083_v63 }
0x1081   :  { %v12350_v57 = vmul.f32 %v9767_v62, %v12065_v52 }
0x1082   :  { %v2428_v44 = vpop.permute.xlu1 %2427  ;;  %6480 = vrot.lane.b32.xlu1 %v11947_v37, %s9854_s23  ;;  %v2443_v2 = vpop.permute.xlu0 %2442 }
0x1083   :  { %7738 = vst.msk [vmem:[%s13017_s7 + $0x23] sm:$0x3] %vm2434_vm7, %v2428_v44  ;;  %6485 = vrot.lane.b32.xlu0 %v11947_v37, %s9855_s1  ;;  %9491 = vmatmul.mubr.msk.f32.gmra.mxu0 %vm758_vm5, %v12350_v57 }
0x1084   :  { %7740 = vst.msk [vmem:[%s13017_s7 + $0x59] sm:$0x80] %vm2449_vm8, %v2443_v2  ;;  %v9769_v52 = vpop.eup %9768  ;;  %9493 = vmatprep.mubr.msk.f32.mxu0 %vm9847_vm0, %v13083_v63 }
0x1085   :  { %v12369_v5 = vmul.f32 %v9769_v52, %v12069_v15 }
0x1086   :  { %v2437_v7 = vpop.permute.xlu1 %2436  ;;  %6487 = vrot.lane.b32.xlu1 %v11954_v0, %s9855_s1  ;;  %v2454_v41 = vpop.permute.xlu0 %2453 }
0x1087   :  { %7739 = vst.msk [vmem:[%s13017_s7 + $0x3e] sm:$0x7c] %vm2440_vm9, %v2437_v7  ;;  %6494 = vrot.lane.b32.xlu0 %v11954_v0, %s9856_s26  ;;  %9494 = vmatmul.mubr.msk.f32.gmra.mxu0 %vm758_vm5, %v12369_v5 }
0x1088   :  { %7742 = vst.msk [vmem:[%s13017_s7 + $0x7c] sm:$0xf0] %vm2460_vm10, %v2454_v41  ;;  %v9771_v37 = vpop.eup %9770  ;;  %9496 = vmatprep.mubr.msk.f32.mxu0 %vm9847_vm0, %v13083_v63 }
0x1089   :  { %v12388_v15 = vmul.f32 %v9771_v37, %v12073_v45 }
0x108a   :  { %v2445_v59 = vpop.permute.xlu1 %2444  ;;  %6716 = vrot.lane.b32.xlu1 %v12107_v39, %s9850_s19  ;;  %v2465_v36 = vpop.permute.xlu0 %2464 }
0x108b   :  { %7741 = vst.msk [vmem:[%s13017_s7 + $0x61] sm:$0xf] %vm2451_vm11, %v2445_v59  ;;  %6718 = vrot.lane.b32.xlu0 %v12200_v56, %s9850_s19  ;;  %9497 = vmatmul.mubr.msk.f32.gmra.mxu0 %vm758_vm5, %v12388_v15 }
0x108c   :  { %7744 = vst.msk [vmem:[%s13017_s7 + $0x9f] sm:$0x3e] %vm2468_vm13, %v2465_v36  ;;  %v9773_v0 = vpop.eup %9772  ;;  %9499 = vmatprep.mubr.msk.f32.mxu0 %vm9847_vm0, %v13083_v63 }
0x108d   :  { %v12407_v45 = vmul.f32 %v9773_v0, %v12080_v24 }
0x108e   :  { %v2456_v39 = vpop.permute.xlu1 %2455  ;;  %6725 = vrot.lane.b32.xlu1 %v12200_v56, %s9851_s20  ;;  %v2473_v58 = vpop.permute.xlu0 %2472 }
0x108f   :  { %7743 = vst.msk [vmem:[%s13017_s7 + $0x84] sm:$0x1] %vm2462_vm14, %v2456_v39  ;;  %6730 = vrot.lane.b32.xlu0 %v12200_v56, %s9852_s21  ;;  %9500 = vmatmul.mubr.msk.f32.gmra.mxu0 %vm758_vm5, %v12407_v45  ;;  %vm2485_vm5 = vcmask 39939  }
0x1090   :  { %7746 = vst.msk [vmem:[%s13017_s7 + $0xc2] sm:$0x7] %vm2479_vm15, %v2473_v58  ;;  %9527 = vmatprep.mubr.msk.f32.mxu0 %vm9847_vm0, %v13083_v63 }
0x1092   :  { %v2471_v24 = vpop.permute.xlu1 %2470  ;;  %6732 = vrot.lane.b32.xlu1 %v12215_v23, %s9852_s21  ;;  %v2805_v40 = vpop.permute.xlu0 %2804 }
0x1093   :  { %7745 = vst.msk [vmem:[%s13017_s7 + $0xba] sm:$0xc0] %vm2477_vm1, %v2471_v24  ;;  %6739 = vrot.lane.b32.xlu0 %v12215_v23, %s9853_s22  ;;  %v3945_v24 = vld [vmem:[#allocation3 + $0xf8] sm:$0xff] }
0x1094   :  { %7764 = vst.msk [vmem:[%s13017_s7 + $0x23] sm:$0xe0] %vm2432_vm6, %v2805_v40 }
0x1096   :  { %v2482_v49 = vpop.permute.xlu1 %2481  ;;  %6741 = vrot.lane.b32.xlu1 %v12228_v21, %s9853_s22  ;;  %v2814_v1 = vpop.permute.xlu0 %2813 }
0x1097   :  { %7747 = vst.msk [vmem:[%s13017_s7 + $0xdd] sm:$0xf8] %vm2485_vm5, %v2482_v49  ;;  %6748 = vrot.lane.b32.xlu0 %v12228_v21, %s9854_s23 }
0x1098   :  { %7766 = vst.msk [vmem:[%s13017_s7 + $0x46] sm:$0x7c] %vm2440_vm9, %v2814_v1 }
0x109a   :  { %v2807_v19 = vpop.permute.xlu1 %2806  ;;  %6753 = vrot.lane.b32.xlu1 %v12228_v21, %s9855_s1  ;;  %v2821_v3 = vpop.permute.xlu0 %2820 }
0x109b   :  { %7765 = vst.msk [vmem:[%s13017_s7 + $0x2b] sm:$0x3] %vm2434_vm7, %v2807_v19  ;;  %6755 = vrot.lane.b32.xlu0 %v12240_v43, %s9855_s1 }
0x109c   :  { %7768 = vst.msk [vmem:[%s13017_s7 + $0x69] sm:$0xf] %vm2451_vm11, %v2821_v3 }
0x109e   :  { %v2819_v48 = vpop.permute.xlu1 %2818  ;;  %6762 = vrot.lane.b32.xlu1 %v12240_v43, %s9856_s26  ;;  %v2830_v8 = vpop.permute.xlu0 %2829 }
0x109f   :  { %7767 = vst.msk [vmem:[%s13017_s7 + $0x61] sm:$0x80] %vm2449_vm8, %v2819_v48  ;;  %6984 = vrot.lane.b32.xlu0 %v12330_v17, %s9850_s19 }
0x10a0   :  { %7770 = vst.msk [vmem:[%s13017_s7 + $0x8c] sm:$0x1] %vm2462_vm14, %v2830_v8 }
0x10a2   :  { %v2828_v18 = vpop.permute.xlu1 %2827  ;;  %6986 = vrot.lane.b32.xlu1 %v12350_v57, %s9850_s19  ;;  %v2842_v46 = vpop.permute.xlu0 %2841 }
0x10a3   :  { %7769 = vst.msk [vmem:[%s13017_s7 + $0x84] sm:$0xf0] %vm2460_vm10, %v2828_v18  ;;  %6993 = vrot.lane.b32.xlu0 %v12350_v57, %s9851_s20 }
0x10a4   :  { %7772 = vst.msk [vmem:[%s13017_s7 + $0xc2] sm:$0xc0] %vm2477_vm1, %v2842_v46 }
0x10a6   :  { %v2837_v56 = vpop.permute.xlu1 %2836  ;;  %6998 = vrot.lane.b32.xlu1 %v12350_v57, %s9852_s21  ;;  %v2851_v13 = vpop.permute.xlu0 %2850 }
0x10a7   :  { %7771 = vst.msk [vmem:[%s13017_s7 + $0xa7] sm:$0x3e] %vm2468_vm13, %v2837_v56  ;;  %7000 = vrot.lane.b32.xlu0 %v12369_v5, %s9852_s21 }
0x10a8   :  { %7774 = vst.msk [vmem:[%s13017_s7 + $0xe5] sm:$0xf8] %vm2485_vm5, %v2851_v13 }
0x10aa   :  { %v2844_v55 = vpop.permute.xlu1 %2843  ;;  %7007 = vrot.lane.b32.xlu1 %v12369_v5, %s9853_s22  ;;  %v3075_v25 = vpop.permute.xlu0 %3074 }
0x10ab   :  { %7773 = vst.msk [vmem:[%s13017_s7 + $0xca] sm:$0x7] %vm2479_vm15, %v2844_v55  ;;  %7009 = vrot.lane.b32.xlu0 %v12388_v15, %s9853_s22 }
0x10ac   :  { %7787 = vst.msk [vmem:[%s13017_s7 + $0x33] sm:$0x3] %vm2434_vm7, %v3075_v25 }
0x10ae   :  { %v3073_v23 = vpop.permute.xlu1 %3072  ;;  %7016 = vrot.lane.b32.xlu1 %v12388_v15, %s9854_s23  ;;  %v3087_v61 = vpop.permute.xlu0 %3086 }
0x10af   :  { %7786 = vst.msk [vmem:[%s13017_s7 + $0x2b] sm:$0xe0] %vm2432_vm6, %v3073_v23  ;;  %7021 = vrot.lane.b32.xlu0 %v12388_v15, %s9855_s1 }
0x10b0   :  { %7789 = vst.msk [vmem:[%s13017_s7 + $0x69] sm:$0x80] %vm2449_vm8, %v3087_v61 }
0x10b2   :  { %v3082_v38 = vpop.permute.xlu1 %3081  ;;  %7023 = vrot.lane.b32.xlu1 %v12407_v45, %s9855_s1  ;;  %v3096_v14 = vpop.permute.xlu0 %3095 }
0x10b3   :  { %7788 = vst.msk [vmem:[%s13017_s7 + $0x4e] sm:$0x7c] %vm2440_vm9, %v3082_v38  ;;  %v6054_v21 = vpop.f32.mrf.mxu0  ;;  %7030 = vrot.lane.b32.xlu0 %v12407_v45, %s9856_s26 }
0x10b4   :  { %7791 = vst.msk [vmem:[%s13017_s7 + $0x8c] sm:$0xf0] %vm2460_vm10, %v3096_v14  ;;  %9421 = vmatmul.mubr.msk.f32.vlgmr.msra.gmra.mxu1 %vm185_vm3, %v6054_v21 }
0x10b5   :  { %v9363_v53 = vpop.f32.mrf.mxu0  ;;  %9423 = vmatprep.mubr.msk.f32.mxu1 %vm9847_vm0, %v13083_v63  ;;  %9461 = vmatpush3.msra.mxu1 %v3944_v50 }
0x10b6   :  { %v3089_v6 = vpop.permute.xlu1 %3088  ;;  %v3105_v43 = vpop.permute.xlu0 %3104  ;;  %9502 = vmatprep.subr.mxu1 %v13083_v63 }
0x10b7   :  { %7790 = vst.msk [vmem:[%s13017_s7 + $0x71] sm:$0xf] %vm2451_vm11, %v3089_v6  ;;  %v6059_v22 = vpop.f32.mrf.mxu0 }
0x10b8   :  { %7793 = vst.msk [vmem:[%s13017_s7 + $0xaf] sm:$0x3e] %vm2468_vm13, %v3105_v43  ;;  %9424 = vmatmul.mubr.msk.f32.gmra.mxu1 %vm185_vm3, %v6059_v22 }
0x10b9   :  { %v9366_v26 = vpop.f32.mrf.mxu0  ;;  %9426 = vmatprep.mubr.msk.f32.mxu1 %vm9847_vm0, %v13083_v63 }
0x10ba   :  { %v3098_v47 = vpop.permute.xlu1 %3097  ;;  %v3112_v12 = vpop.permute.xlu0 %3111 }
0x10bb   :  { %7792 = vst.msk [vmem:[%s13017_s7 + $0x94] sm:$0x1] %vm2462_vm14, %v3098_v47  ;;  %v6064_v9 = vpop.f32.mrf.mxu0 }
0x10bc   :  { %7795 = vst.msk [vmem:[%s13017_s7 + $0xd2] sm:$0x7] %vm2479_vm15, %v3112_v12  ;;  %9427 = vmatmul.mubr.msk.f32.gmra.mxu1 %vm185_vm3, %v6064_v9 }
0x10bd   :  { %v9369_v28 = vpop.f32.mrf.mxu0  ;;  %9429 = vmatprep.mubr.msk.f32.mxu1 %vm9847_vm0, %v13083_v63 }
0x10be   :  { %v3110_v30 = vpop.permute.xlu1 %3109  ;;  %v3341_v11 = vpop.permute.xlu0 %3340 }
0x10bf   :  { %7794 = vst.msk [vmem:[%s13017_s7 + $0xca] sm:$0xc0] %vm2477_vm1, %v3110_v30  ;;  %v6069_v60 = vpop.f32.mrf.mxu0 }
0x10c0   :  { %7808 = vst.msk [vmem:[%s13017_s7 + $0x33] sm:$0xe0] %vm2432_vm6, %v3341_v11  ;;  %9430 = vmatmul.mubr.msk.f32.gmra.mxu1 %vm185_vm3, %v6069_v60 }
0x10c1   :  { %v9372_v34 = vpop.f32.mrf.mxu0  ;;  %9432 = vmatprep.mubr.msk.f32.mxu1 %vm9847_vm0, %v13083_v63 }
0x10c2   :  { %v3119_v4 = vpop.permute.xlu1 %3118  ;;  %v3350_v16 = vpop.permute.xlu0 %3349 }
0x10c3   :  { %7796 = vst.msk [vmem:[%s13017_s7 + $0xed] sm:$0xf8] %vm2485_vm5, %v3119_v4  ;;  %v6074_v32 = vpop.f32.mrf.mxu0 }
0x10c4   :  { %7810 = vst.msk [vmem:[%s13017_s7 + $0x56] sm:$0x7c] %vm2440_vm9, %v3350_v16  ;;  %9433 = vmatmul.mubr.msk.f32.gmra.mxu1 %vm185_vm3, %v6074_v32 }
0x10c5   :  { %v9375_v20 = vpop.f32.mrf.mxu0  ;;  %9462 = vmatprep.mubr.msk.f32.mxu1 %vm9847_vm0, %v13083_v63 }
0x10c6   :  { %v3343_v27 = vpop.permute.xlu1 %3342  ;;  %v3357_v33 = vpop.permute.xlu0 %3356 }
0x10c7   :  { %7809 = vst.msk [vmem:[%s13017_s7 + $0x3b] sm:$0x3] %vm2434_vm7, %v3343_v27  ;;  %v12589_v42 = vpop.f32.mrf.mxu0 }
0x10c8   :  { %7812 = vst.msk [vmem:[%s13017_s7 + $0x79] sm:$0xf] %vm2451_vm11, %v3357_v33 }
0x10c9   :  { %v9405_v17 = vpop.f32.mrf.mxu0 }
0x10ca   :  { %v3355_v35 = vpop.permute.xlu1 %3354  ;;  %v3366_v29 = vpop.permute.xlu0 %3365 }
0x10cb   :  { %7811 = vst.msk [vmem:[%s13017_s7 + $0x71] sm:$0x80] %vm2449_vm8, %v3355_v35 }
0x10cc   :  { %7814 = vst.msk [vmem:[%s13017_s7 + $0x9c] sm:$0x1] %vm2462_vm14, %v3366_v29  ;;  %v12599_v62 = vpop.f32.mrf.mxu0 }
0x10ce   :  { %v9408_v57 = vpop.f32.mrf.mxu0  ;;  %v3364_v44 = vpop.permute.xlu1 %3363 }
0x10cf   :  { %7813 = vst.msk [vmem:[%s13017_s7 + $0x94] sm:$0xf0] %vm2460_vm10, %v3364_v44  ;;  %v3378_v2 = vpop.permute.xlu0 %3377 }
0x10d0   :  { %7816 = vst.msk [vmem:[%s13017_s7 + $0xd2] sm:$0xc0] %vm2477_vm1, %v3378_v2  ;;  %v12609_v52 = vpop.f32.mrf.mxu0 }
0x10d2   :  { %v9411_v5 = vpop.f32.mrf.mxu0  ;;  %v3373_v7 = vpop.permute.xlu1 %3372 }
0x10d3   :  { %7815 = vst.msk [vmem:[%s13017_s7 + $0xb7] sm:$0x3e] %vm2468_vm13, %v3373_v7  ;;  %v3387_v41 = vpop.permute.xlu0 %3386 }
0x10d4   :  { %7818 = vst.msk [vmem:[%s13017_s7 + $0xf5] sm:$0xf8] %vm2485_vm5, %v3387_v41  ;;  %v12619_v37 = vpop.f32.mrf.mxu0 }
0x10d6   :  { %v9414_v15 = vpop.f32.mrf.mxu0  ;;  %v3380_v59 = vpop.permute.xlu1 %3379 }
0x10d7   :  { %7817 = vst.msk [vmem:[%s13017_s7 + $0xda] sm:$0x7] %vm2479_vm15, %v3380_v59  ;;  %v6083_v36 = vpop.permute.xlu0 %6082 }
0x10d8   :  { %7976 = vst.msk [vmem:[%s13017_s7 + $0x123] sm:$0x3] %vm2434_vm7, %v6083_v36  ;;  %v12629_v0 = vpop.f32.mrf.mxu0 }
0x10da   :  { %v9417_v45 = vpop.f32.mrf.mxu0  ;;  %v6081_v39 = vpop.permute.xlu1 %6080 }
0x10db   :  { %7975 = vst.msk [vmem:[%s13017_s7 + $0x11b] sm:$0xe0] %vm2432_vm6, %v6081_v39  ;;  %v6095_v58 = vpop.permute.xlu0 %6094 }
0x10dc   :  { %7978 = vst.msk [vmem:[%s13017_s7 + $0x159] sm:$0x80] %vm2449_vm8, %v6095_v58  ;;  %v6580_v40 = vpop.f32.mrf.mxu0 }
0x10dd   :  { %9463 = vmatmul.mubr.msk.f32.vlgmr.msra.gmra.mxu1 %vm185_vm3, %v6580_v40 }
0x10de   :  { %v9447_v49 = vpop.f32.mrf.mxu0  ;;  %v6090_v1 = vpop.permute.xlu1 %6089  ;;  %9465 = vmatprep.mubr.msk.f32.mxu1 %vm9847_vm0, %v13083_v63  ;;  %9503 = vmatpush3.msra.mxu1 %v3945_v24 }
0x10df   :  { %7977 = vst.msk [vmem:[%s13017_s7 + $0x13e] sm:$0x7c] %vm2440_vm9, %v6090_v1  ;;  %v6104_v19 = vpop.permute.xlu0 %6103  ;;  %9542 = vmatprep.subr.mxu1 %v13083_v63 }
0x10e0   :  { %7980 = vst.msk [vmem:[%s13017_s7 + $0x17c] sm:$0xf0] %vm2460_vm10, %v6104_v19  ;;  %v6585_v3 = vpop.f32.mrf.mxu0 }
0x10e1   :  { %9466 = vmatmul.mubr.msk.f32.gmra.mxu1 %vm185_vm3, %v6585_v3 }
0x10e2   :  { %v9450_v48 = vpop.f32.mrf.mxu0  ;;  %v6097_v8 = vpop.permute.xlu1 %6096  ;;  %9468 = vmatprep.mubr.msk.f32.mxu1 %vm9847_vm0, %v13083_v63 }
0x10e3   :  { %7979 = vst.msk [vmem:[%s13017_s7 + $0x161] sm:$0xf] %vm2451_vm11, %v6097_v8  ;;  %v6113_v18 = vpop.permute.xlu0 %6112 }
0x10e4   :  { %7982 = vst.msk [vmem:[%s13017_s7 + $0x19f] sm:$0x3e] %vm2468_vm13, %v6113_v18  ;;  %v6590_v46 = vpop.f32.mrf.mxu0 }
0x10e5   :  { %9469 = vmatmul.mubr.msk.f32.gmra.mxu1 %vm185_vm3, %v6590_v46 }
0x10e6   :  { %v9453_v56 = vpop.f32.mrf.mxu0  ;;  %v6106_v13 = vpop.permute.xlu1 %6105  ;;  %9471 = vmatprep.mubr.msk.f32.mxu1 %vm9847_vm0, %v13083_v63 }
0x10e7   :  { %7981 = vst.msk [vmem:[%s13017_s7 + $0x184] sm:$0x1] %vm2462_vm14, %v6106_v13  ;;  %v6120_v55 = vpop.permute.xlu0 %6119 }
0x10e8   :  { %7984 = vst.msk [vmem:[%s13017_s7 + $0x1c2] sm:$0x7] %vm2479_vm15, %v6120_v55  ;;  %v6595_v25 = vpop.f32.mrf.mxu0 }
0x10e9   :  { %9472 = vmatmul.mubr.msk.f32.gmra.mxu1 %vm185_vm3, %v6595_v25 }
0x10ea   :  { %v9456_v23 = vpop.f32.mrf.mxu0  ;;  %v6118_v61 = vpop.permute.xlu1 %6117  ;;  %9474 = vmatprep.mubr.msk.f32.mxu1 %vm9847_vm0, %v13083_v63 }
0x10eb   :  { %7983 = vst.msk [vmem:[%s13017_s7 + $0x1ba] sm:$0xc0] %vm2477_vm1, %v6118_v61  ;;  %v6449_v38 = vpop.permute.xlu0 %6448 }
0x10ec   :  { %8002 = vst.msk [vmem:[%s13017_s7 + $0x123] sm:$0xe0] %vm2432_vm6, %v6449_v38  ;;  %v6600_v14 = vpop.f32.mrf.mxu0 }
0x10ed   :  { %9475 = vmatmul.mubr.msk.f32.gmra.mxu1 %vm185_vm3, %v6600_v14 }
0x10ee   :  { %v9459_v50 = vpop.f32.mrf.mxu0  ;;  %v6127_v21 = vpop.permute.xlu1 %6126  ;;  %9504 = vmatprep.mubr.msk.f32.mxu1 %vm9847_vm0, %v13083_v63 }
0x10ef   :  { %7985 = vst.msk [vmem:[%s13017_s7 + $0x1dd] sm:$0xf8] %vm2485_vm5, %v6127_v21  ;;  %v6458_v53 = vpop.permute.xlu0 %6457 }
0x10f0   :  { %8004 = vst.msk [vmem:[%s13017_s7 + $0x146] sm:$0x7c] %vm2440_vm9, %v6458_v53 }
0x10f2   :  { %v6451_v6 = vpop.permute.xlu1 %6450 }
0x10f3   :  { %8003 = vst.msk [vmem:[%s13017_s7 + $0x12b] sm:$0x3] %vm2434_vm7, %v6451_v6  ;;  %v6465_v43 = vpop.permute.xlu0 %6464 }
0x10f4   :  { %8006 = vst.msk [vmem:[%s13017_s7 + $0x169] sm:$0xf] %vm2451_vm11, %v6465_v43 }
0x10f6   :  { %v6463_v22 = vpop.permute.xlu1 %6462 }
0x10f7   :  { %8005 = vst.msk [vmem:[%s13017_s7 + $0x161] sm:$0x80] %vm2449_vm8, %v6463_v22  ;;  %v6474_v26 = vpop.permute.xlu0 %6473 }
0x10f8   :  { %8008 = vst.msk [vmem:[%s13017_s7 + $0x18c] sm:$0x1] %vm2462_vm14, %v6474_v26 }
0x10fa   :  { %v6472_v47 = vpop.permute.xlu1 %6471 }
0x10fb   :  { %8007 = vst.msk [vmem:[%s13017_s7 + $0x184] sm:$0xf0] %vm2460_vm10, %v6472_v47  ;;  %v6486_v12 = vpop.permute.xlu0 %6485 }
0x10fc   :  { %8010 = vst.msk [vmem:[%s13017_s7 + $0x1c2] sm:$0xc0] %vm2477_vm1, %v6486_v12 }
0x10fe   :  { %v6481_v9 = vpop.permute.xlu1 %6480 }
0x10ff   :  { %8009 = vst.msk [vmem:[%s13017_s7 + $0x1a7] sm:$0x3e] %vm2468_vm13, %v6481_v9  ;;  %v6495_v28 = vpop.permute.xlu0 %6494 }
0x1100   :  { %8012 = vst.msk [vmem:[%s13017_s7 + $0x1e5] sm:$0xf8] %vm2485_vm5, %v6495_v28 }
0x1102   :  { %v6488_v30 = vpop.permute.xlu1 %6487 }
0x1103   :  { %8011 = vst.msk [vmem:[%s13017_s7 + $0x1ca] sm:$0x7] %vm2479_vm15, %v6488_v30  ;;  %v6719_v11 = vpop.permute.xlu0 %6718 }
0x1104   :  { %8025 = vst.msk [vmem:[%s13017_s7 + $0x133] sm:$0x3] %vm2434_vm7, %v6719_v11 }
0x1106   :  { %v6717_v60 = vpop.permute.xlu1 %6716 }
0x1107   :  { %8024 = vst.msk [vmem:[%s13017_s7 + $0x12b] sm:$0xe0] %vm2432_vm6, %v6717_v60  ;;  %v6731_v34 = vpop.permute.xlu0 %6730 }
0x1108   :  { %8027 = vst.msk [vmem:[%s13017_s7 + $0x169] sm:$0x80] %vm2449_vm8, %v6731_v34 }
0x110a   :  { %v6726_v4 = vpop.permute.xlu1 %6725 }
0x110b   :  { %8026 = vst.msk [vmem:[%s13017_s7 + $0x14e] sm:$0x7c] %vm2440_vm9, %v6726_v4  ;;  %v6740_v16 = vpop.permute.xlu0 %6739 }
0x110c   :  { %8029 = vst.msk [vmem:[%s13017_s7 + $0x18c] sm:$0xf0] %vm2460_vm10, %v6740_v16 }
0x110e   :  { %v6733_v32 = vpop.permute.xlu1 %6732 }
0x110f   :  { %8028 = vst.msk [vmem:[%s13017_s7 + $0x171] sm:$0xf] %vm2451_vm11, %v6733_v32  ;;  %v6749_v20 = vpop.permute.xlu0 %6748 }
0x1110   :  { %8031 = vst.msk [vmem:[%s13017_s7 + $0x1af] sm:$0x3e] %vm2468_vm13, %v6749_v20 }
0x1112   :  { %v6742_v27 = vpop.permute.xlu1 %6741 }
0x1113   :  { %8030 = vst.msk [vmem:[%s13017_s7 + $0x194] sm:$0x1] %vm2462_vm14, %v6742_v27  ;;  %v6756_v33 = vpop.permute.xlu0 %6755  ;;  %v7122_v27 = vld [vmem:[#allocation5 + $0x58] sm:$0xff] }
0x1114   :  { %8033 = vst.msk [vmem:[%s13017_s7 + $0x1d2] sm:$0x7] %vm2479_vm15, %v6756_v33  ;;  %9520 = vmatpush3.msra.mxu0 %v7122_v27  ;;  %v7120_v33 = vld [vmem:[#allocation5 + $0x48] sm:$0xff] }
0x1115   :  { %9521 = vmatprep.subr.mxu0 %v13083_v63 }
0x1116   :  { %v6754_v17 = vpop.permute.xlu1 %6753 }
0x1117   :  { %8032 = vst.msk [vmem:[%s13017_s7 + $0x1ca] sm:$0xc0] %vm2477_vm1, %v6754_v17  ;;  %v6985_v35 = vpop.permute.xlu0 %6984 }
0x1118   :  { %8046 = vst.msk [vmem:[%s13017_s7 + $0x133] sm:$0xe0] %vm2432_vm6, %v6985_v35 }
0x111a   :  { %v6763_v29 = vpop.permute.xlu1 %6762 }
0x111b   :  { %8034 = vst.msk [vmem:[%s13017_s7 + $0x1ed] sm:$0xf8] %vm2485_vm5, %v6763_v29  ;;  %v6994_v57 = vpop.permute.xlu0 %6993 }
0x111c   :  { %8048 = vst.msk [vmem:[%s13017_s7 + $0x156] sm:$0x7c] %vm2440_vm9, %v6994_v57  ;;  %v13138_v57 = vld [vmem:[#allocation9_spill] sm:$0xff] }
0x111e   :  { %v6987_v44 = vpop.permute.xlu1 %6986 }
0x111f   :  { %8047 = vst.msk [vmem:[%s13017_s7 + $0x13b] sm:$0x3] %vm2434_vm7, %v6987_v44  ;;  %v7001_v2 = vpop.permute.xlu0 %7000  ;;  %v13139_v44 = vsub.s32 0, %v13138_v57 }
0x1120   :  { %8050 = vst.msk [vmem:[%s13017_s7 + $0x179] sm:$0xf] %vm2451_vm11, %v7001_v2 }
0x1122   :  { %v6999_v5 = vpop.permute.xlu1 %6998 }
0x1123   :  { %8049 = vst.msk [vmem:[%s13017_s7 + $0x171] sm:$0x80] %vm2449_vm8, %v6999_v5  ;;  %v7010_v7 = vpop.permute.xlu0 %7009 }
0x1124   :  { %8052 = vst.msk [vmem:[%s13017_s7 + $0x19c] sm:$0x1] %vm2462_vm14, %v7010_v7 }
0x1126   :  { %v7008_v41 = vpop.permute.xlu1 %7007 }
0x1127   :  { %8051 = vst.msk [vmem:[%s13017_s7 + $0x194] sm:$0xf0] %vm2460_vm10, %v7008_v41  ;;  %v7022_v15 = vpop.permute.xlu0 %7021 }
0x1128   :  { %8054 = vst.msk [vmem:[%s13017_s7 + $0x1d2] sm:$0xc0] %vm2477_vm1, %v7022_v15 }
0x112a   :  { %v7017_v59 = vpop.permute.xlu1 %7016 }
0x112b   :  { %8053 = vst.msk [vmem:[%s13017_s7 + $0x1b7] sm:$0x3e] %vm2468_vm13, %v7017_v59  ;;  %v7031_v36 = vpop.permute.xlu0 %7030 }
0x112c   :  { %8056 = vst.msk [vmem:[%s13017_s7 + $0x1f5] sm:$0xf8] %vm2485_vm5, %v7031_v36 }
0x112e   :  { %v7024_v45 = vpop.permute.xlu1 %7023 }
0x112f   :  { %8055 = vst.msk [vmem:[%s13017_s7 + $0x1da] sm:$0x7] %vm2479_vm15, %v7024_v45 }
0x113f   :  { %v6848_v39 = vpop.f32.mrf.mxu0 }
0x1140   :  { %9505 = vmatmul.mubr.msk.f32.vlgmr.msra.gmra.mxu1 %vm185_vm3, %v6848_v39 }
0x1141   :  { %v9489_v58 = vpop.f32.mrf.mxu0  ;;  %9507 = vmatprep.mubr.msk.f32.mxu1 %vm9847_vm0, %v13083_v63 }
0x1143   :  { %v6853_v24 = vpop.f32.mrf.mxu0 }
0x1144   :  { %9508 = vmatmul.mubr.msk.f32.gmra.mxu1 %vm185_vm3, %v6853_v24 }
0x1145   :  { %v9492_v40 = vpop.f32.mrf.mxu0  ;;  %9510 = vmatprep.mubr.msk.f32.mxu1 %vm9847_vm0, %v13083_v63 }
0x1147   :  { %v6858_v49 = vpop.f32.mrf.mxu0 }
0x1148   :  { %9511 = vmatmul.mubr.msk.f32.gmra.mxu1 %vm185_vm3, %v6858_v49 }
0x1149   :  { %v9495_v1 = vpop.f32.mrf.mxu0  ;;  %9513 = vmatprep.mubr.msk.f32.mxu1 %vm9847_vm0, %v13083_v63 }
0x114b   :  { %v6863_v19 = vpop.f32.mrf.mxu0 }
0x114c   :  { %9514 = vmatmul.mubr.msk.f32.gmra.mxu1 %vm185_vm3, %v6863_v19 }
0x114d   :  { %v9498_v3 = vpop.f32.mrf.mxu0  ;;  %9516 = vmatprep.mubr.msk.f32.mxu1 %vm9847_vm0, %v13083_v63 }
0x114f   :  { %v6868_v48 = vpop.f32.mrf.mxu0 }
0x1150   :  { %9517 = vmatmul.mubr.msk.f32.gmra.mxu1 %vm185_vm3, %v6868_v48 }
0x1151   :  { %v9501_v8 = vpop.f32.mrf.mxu0  ;;  %9550 = vmatprep.mubr.msk.f32.mxu1 %vm9847_vm0, %v13083_v63 }
0x1174   :  { %v6422_v18 = vpop.f32.mrf.mxu1 }
0x1175   :  { %v6423_v50 = vadd.f32 %v6422_v18, %v12589_v42 }
0x1176   :  { %v9422_v46 = vpop.f32.mrf.mxu1 }
0x1178   :  { %v6427_v56 = vpop.f32.mrf.mxu1 }
0x1179   :  { %v6428_v43 = vadd.f32 %v6427_v56, %v12599_v62  ;;  %v7121_v62 = vld [vmem:[#allocation5 + $0x50] sm:$0xff] }
0x117a   :  { %v9425_v13 = vpop.f32.mrf.mxu1  ;;  %9522 = vmatpush3.msra.mxu0 %v7121_v62 }
0x117b   :  { %9523 = vmatprep.subr.mxu0 %v13083_v63 }
0x117c   :  { %v6432_v55 = vpop.f32.mrf.mxu1  ;;  %9524 = vmatpush3.msra.mxu0 %v7120_v33 }
0x117d   :  { %v6433_v12 = vadd.f32 %v6432_v55, %v12609_v52  ;;  %v7119_v52 = vld [vmem:[#allocation5 + $0x40] sm:$0xff]  ;;  %9525 = vmatprep.subr.mxu0 %v13083_v63 }
0x117e   :  { %v9428_v25 = vpop.f32.mrf.mxu1  ;;  %9526 = vmatpush3.msra.mxu0 %v7119_v52 }
0x1180   :  { %v6437_v23 = vpop.f32.mrf.mxu1 }
0x1181   :  { %v6438_v11 = vadd.f32 %v6437_v23, %v12619_v37  ;;  %v12845_v37 = vld [vmem:[%s13015_s5 + $0x8] sm:$0xff]  ;;  %v13140_v23 = vld [vmem:[#allocation40_spill] sm:$0xff] }
0x1182   :  { %v9431_v61 = vpop.f32.mrf.mxu1  ;;  %v7045_v2 = vrot.slane %v12845_v37, %v13139_v44 }
0x1184   :  { %v6442_v38 = vpop.f32.mrf.mxu1 }
0x1185   :  { %v6443_v42 = vadd.f32 %v6442_v38, %v12629_v0 }
0x1186   :  { %v9434_v14 = vpop.f32.mrf.mxu1 }
0x119d   :  { %v6685_v21 = vpop.f32.mrf.mxu1 }
0x119e   :  { %v6709_v53 = vadd.f32 %v6685_v21, %v6423_v50 }
0x119f   :  { %v9464_v6 = vpop.f32.mrf.mxu1 }
0x11a1   :  { %v6690_v22 = vpop.f32.mrf.mxu1 }
0x11a2   :  { %v6710_v26 = vadd.f32 %v6690_v22, %v6428_v43 }
0x11a3   :  { %v9467_v47 = vpop.f32.mrf.mxu1 }
0x11a5   :  { %v6695_v9 = vpop.f32.mrf.mxu1 }
0x11a6   :  { %v6711_v28 = vadd.f32 %v6695_v9, %v6433_v12 }
0x11a7   :  { %v9470_v30 = vpop.f32.mrf.mxu1 }
0x11a9   :  { %v6700_v60 = vpop.f32.mrf.mxu1 }
0x11aa   :  { %v6712_v34 = vadd.f32 %v6700_v60, %v6438_v11 }
0x11ab   :  { %v9473_v4 = vpop.f32.mrf.mxu1 }
0x11ad   :  { %v6705_v16 = vpop.f32.mrf.mxu1 }
0x11ae   :  { %v6713_v32 = vadd.f32 %v6705_v16, %v6443_v42 }
0x11af   :  { %v9476_v20 = vpop.f32.mrf.mxu1 }
0x1200   :  { %v6953_v0 = vpop.f32.mrf.mxu1 }
0x1201   :  { %v6977_v17 = vadd.f32 %v6953_v0, %v6709_v53 }
0x1202   :  { %v9506_v35 = vpop.f32.mrf.mxu1 }
0x1203   :  { %v7037_v29 = vadd.f32 %v6977_v17, %v11254_v10 }
0x1204   :  { %v6958_v5 = vpop.f32.mrf.mxu1 }
0x1205   :  { %v6978_v7 = vadd.f32 %v6958_v5, %v6710_v26  ;;  %v7046_v15 = vadd.f32 %v7045_v2, %v7037_v29 }
0x1206   :  { %v9509_v41 = vpop.f32.mrf.mxu1 }
0x1207   :  { %v7038_v59 = vadd.f32 %v6978_v7, %v11256_v31  ;;  %v7051_v24 = vsel %vm317_vm4, %v7046_v15, 0.0 }
0x1208   :  { %v6963_v36 = vpop.f32.mrf.mxu1 }
0x1209   :  { %v7047_v45 = vadd.f32 %v7045_v2, %v7038_v59  ;;  %v6979_v39 = vadd.f32 %v6963_v36, %v6711_v28  ;;  %v13141_v59 = vsub.s32 3, %v13138_v57 }
0x120a   :  { %v9512_v58 = vpop.f32.mrf.mxu1 }
0x120b   :  { %v7052_v40 = vsel %vm317_vm4, %v7047_v45, 0.0  ;;  %v7039_v10 = vadd.f32 %v6979_v39, %v11258_v51  ;;  %v7103_v36 = vrot.slane %v12845_v37, %v13141_v59  ;;  %v13142_v39 = vsub.s32 4, %v13138_v57 }
0x120c   :  { %v7053_v49 = vadd.f32 %v7052_v40, %v7051_v24  ;;  %v6968_v1 = vpop.f32.mrf.mxu1 }
0x120d   :  { %v7048_v19 = vadd.f32 %v7045_v2, %v7039_v10  ;;  %v6980_v3 = vadd.f32 %v6968_v1, %v6712_v34  ;;  %v7112_v58 = vrot.slane %v12845_v37, %v13142_v39 }
0x120e   :  { %v9515_v48 = vpop.f32.mrf.mxu1 }
0x120f   :  { %v7054_v8 = vsel %vm317_vm4, %v7048_v19, 0.0  ;;  %v7040_v18 = vadd.f32 %v6980_v3, %v11260_v54 }
0x1210   :  { %v7055_v31 = vadd.f32 %v7054_v8, %v7053_v49  ;;  %v6973_v46 = vpop.f32.mrf.mxu1 }
0x1211   :  { %v7049_v56 = vadd.f32 %v7045_v2, %v7040_v18  ;;  %v6981_v13 = vadd.f32 %v6973_v46, %v6713_v32 }
0x1212   :  { %v9518_v55 = vpop.f32.mrf.mxu1 }
0x1213   :  { %v7056_v25 = vsel %vm317_vm4, %v7049_v56, 0.0  ;;  %v7041_v61 = vadd.f32 %v6981_v13, %v13140_v23  ;;  %v7370_v23 = vld [vmem:[#allocation5 + $0x70] sm:$0xff] }
0x1214   :  { %v7057_v38 = vadd.f32 %v7056_v25, %v7055_v31  ;;  %v7371_v25 = vld [vmem:[#allocation5 + $0x78] sm:$0xff] }
0x1215   :  { %v7050_v51 = vadd.f32 %v7045_v2, %v7041_v61  ;;  %9543 = vmatpush3.xpose.msk.msra.mxu1 %vm3731_vm12, %v7371_v25  ;;  %v7369_v61 = vld [vmem:[#allocation5 + $0x68] sm:$0xff] }
0x1216   :  { %9544 = vmatprep.subr.mxu1 %v13083_v63 }
0x1217   :  { %v7058_v14 = vsel %vm317_vm4, %v7050_v51, 0.0 }
0x1218   :  { %v7059_v50 = vadd.f32 %v7058_v14, %v7057_v38  ;;  %v7368_v38 = vld [vmem:[#allocation5 + $0x60] sm:$0xff] }
0x1219   :  { %9545 = vmatpush3.xpose.msk.msra.mxu1 %vm3731_vm12, %v7370_v23 }
0x121a   :  { %v7060_v21 = vrot.slane %v7059_v50, 4  ;;  %9546 = vmatprep.subr.mxu1 %v13083_v63 }
0x121c   :  { %v7061_v53 = vadd.f32 %v7060_v21, %v7059_v50 }
0x121d   :  { %9547 = vmatpush3.xpose.msk.msra.mxu1 %vm3731_vm12, %v7369_v61 }
0x121e   :  { %v7062_v6 = vrot.slane %v7061_v53, 2  ;;  %9548 = vmatprep.subr.mxu1 %v13083_v63 }
0x1220   :  { %v7063_v43 = vadd.f32 %v7062_v6, %v7061_v53 }
0x1221   :  { %9549 = vmatpush3.xpose.msk.msra.mxu1 %vm3731_vm12, %v7368_v38 }
0x1222   :  { %v7064_v22 = vrot.slane %v7063_v43, 1 }
0x1224   :  { %v7065_v54 = vadd.f32 %v7064_v22, %v7063_v43 }
0x1226   :  { %v7066_v26 = vmul.f32 0.025, %v7065_v54 }
0x1228   :  { %v7067_v47 = vsub.f32 %v7046_v15, %v7066_v26  ;;  %v7068_v12 = vsub.f32 %v7047_v45, %v7066_v26  ;;  %v7069_v9 = vsub.f32 %v7048_v19, %v7066_v26  ;;  %v7070_v28 = vsub.f32 %v7049_v56, %v7066_v26 }
0x1229   :  { %v7071_v30 = vsub.f32 %v7050_v51, %v7066_v26  ;;  %v13143_v51 = vld [vmem:[#allocation10_spill] sm:$0xff] }
0x122a   :  { %v7072_v11 = vmul.f32 %v7067_v47, %v7067_v47  ;;  %v7073_v60 = vmul.f32 %v7068_v12, %v7068_v12  ;;  %v7074_v34 = vmul.f32 %v7069_v9, %v7069_v9  ;;  %v7075_v4 = vmul.f32 %v7070_v28, %v7070_v28 }
0x122b   :  { %v7076_v20 = vmul.f32 %v7071_v30, %v7071_v30  ;;  %v7126_v14 = vrot.slane %v12845_v37, %v13143_v51 }
0x122c   :  { %v7077_v42 = vsel %vm317_vm4, %v7072_v11, 0.0  ;;  %v7078_v16 = vsel %vm317_vm4, %v7073_v60, 0.0  ;;  %v7080_v27 = vsel %vm317_vm4, %v7074_v34, 0.0  ;;  %v7082_v33 = vsel %vm317_vm4, %v7075_v4, 0.0 }
0x122d   :  { %v7079_v32 = vadd.f32 %v7078_v16, %v7077_v42  ;;  %v7084_v0 = vsel %vm317_vm4, %v7076_v20, 0.0 }
0x122f   :  { %v7081_v62 = vadd.f32 %v7080_v27, %v7079_v32 }
0x1231   :  { %v7083_v52 = vadd.f32 %v7082_v33, %v7081_v62 }
0x1233   :  { %v7085_v17 = vadd.f32 %v7084_v0, %v7083_v52 }
0x1235   :  { %v7086_v35 = vrot.slane %v7085_v17, 4 }
0x1237   :  { %v7087_v29 = vadd.f32 %v7086_v35, %v7085_v17 }
0x1239   :  { %v7088_v44 = vrot.slane %v7087_v29, 2 }
0x123b   :  { %v7089_v2 = vadd.f32 %v7088_v44, %v7087_v29 }
0x123d   :  { %v7090_v5 = vrot.slane %v7089_v2, 1 }
0x123f   :  { %v7091_v7 = vadd.f32 %v7090_v5, %v7089_v2 }
0x1241   :  { %v7092_v41 = vmul.f32 0.025, %v7091_v7 }
0x1243   :  { %v7093_v15 = vadd.f32 1e-05, %v7092_v41 }
0x1245   :  { %9774 = vrsqrt.f32 %v7093_v15 }
0x1252   :  { %v9775_v45 = vpop.eup %9774 }
0x1253   :  { %v7095_v24 = vmul.f32 %v9775_v45, %v7067_v47  ;;  %v7099_v40 = vmul.f32 %v9775_v45, %v7071_v30  ;;  %v7096_v10 = vmul.f32 %v9775_v45, %v7068_v12  ;;  %v7097_v49 = vmul.f32 %v9775_v45, %v7069_v9 }
0x1254   :  { %v7098_v1 = vmul.f32 %v9775_v45, %v7070_v28 }
0x1255   :  { %v7108_v19 = vmul.f32 %v7103_v36, %v7099_v40  ;;  %v7104_v3 = vmul.f32 %v7103_v36, %v7095_v24  ;;  %v7105_v48 = vmul.f32 %v7103_v36, %v7096_v10  ;;  %v7106_v8 = vmul.f32 %v7103_v36, %v7097_v49 }
0x1256   :  { %v7107_v18 = vmul.f32 %v7103_v36, %v7098_v1 }
0x1257   :  { %v12871_v31 = vadd.f32 %v7112_v58, %v7104_v3  ;;  %v12873_v46 = vadd.f32 %v7112_v58, %v7105_v48  ;;  %v12875_v56 = vadd.f32 %v7112_v58, %v7106_v8  ;;  %v12877_v13 = vadd.f32 %v7112_v58, %v7108_v19 }
0x1258   :  { %v12879_v55 = vadd.f32 %v7112_v58, %v7107_v18 }
0x1259   :  { %9528 = vmatmul.mubr.msk.f32.vlgmr.msra.gmra.mxu0 %vm317_vm4, %v12871_v31 }
0x125a   :  { %9530 = vmatprep.mubr.msk.f32.mxu0 %vm9847_vm0, %v13083_v63 }
0x125d   :  { %9531 = vmatmul.mubr.msk.f32.gmra.mxu0 %vm317_vm4, %v12873_v46 }
0x125e   :  { %9533 = vmatprep.mubr.msk.f32.mxu0 %vm9847_vm0, %v13083_v63 }
0x1261   :  { %9534 = vmatmul.mubr.msk.f32.gmra.mxu0 %vm317_vm4, %v12875_v56 }
0x1262   :  { %9536 = vmatprep.mubr.msk.f32.mxu0 %vm9847_vm0, %v13083_v63 }
0x1265   :  { %9537 = vmatmul.mubr.msk.f32.gmra.mxu0 %vm317_vm4, %v12879_v55 }
0x1266   :  { %9539 = vmatprep.mubr.msk.f32.mxu0 %vm9847_vm0, %v13083_v63 }
0x1269   :  { %9540 = vmatmul.mubr.msk.f32.gmra.mxu0 %vm317_vm4, %v12877_v13 }
0x1319   :  { %v7208_v50 = vpop.f32.mrf.mxu0 }
0x131a   :  { %v12908_v21 = vadd.f32 %v7208_v50, %v7126_v14 }
0x131b   :  { %v9529_v53 = vpop.f32.mrf.mxu0 }
0x131c   :  { %v12911_v6 = vmul.f32 0.70710677, %v12908_v21 }
0x131d   :  { %v7213_v43 = vpop.f32.mrf.mxu0 }
0x131e   :  { %v7252_v22 = vand.u32 2147483647, %v12911_v6  ;;  %v12914_v54 = vadd.f32 %v7213_v43, %v7126_v14  ;;  %vm7242_vm3 = vcmp.ge.f32.partialorder %v12911_v6, 0.0 }
0x131f   :  { %v9532_v26 = vpop.f32.mrf.mxu0 }
0x1320   :  { %v7257_v47 = vmul.f32 0.3275911, %v7252_v22  ;;  %v12917_v12 = vmul.f32 0.70710677, %v12914_v54  ;;  %v7322_v0 = vsub.f32 0.0, %v7252_v22 }
0x1321   :  { %v7218_v9 = vpop.f32.mrf.mxu0 }
0x1322   :  { %v7262_v28 = vadd.f32 1.0, %v7257_v47  ;;  %v7253_v30 = vand.u32 2147483647, %v12917_v12  ;;  %v12920_v11 = vadd.f32 %v7218_v9, %v7126_v14  ;;  %v7327_v7 = vmul.f32 %v7322_v0, %v7252_v22 }
0x1323   :  { %v9535_v60 = vpop.f32.mrf.mxu0  ;;  %vm7243_vm2 = vcmp.ge.f32.partialorder %v12917_v12, 0.0 }
0x1324   :  { %9776 = vrcp.f32 %v7262_v28  ;;  %v7258_v34 = vmul.f32 0.3275911, %v7253_v30  ;;  %v12923_v4 = vmul.f32 0.70710677, %v12920_v11  ;;  %v7323_v41 = vsub.f32 0.0, %v7253_v30 }
0x1325   :  { %v7223_v42 = vpop.f32.mrf.mxu0  ;;  %v7332_v58 = vmul.f32 1.442695, %v7327_v7 }
0x1326   :  { %v7263_v16 = vadd.f32 1.0, %v7258_v34  ;;  %v12925_v32 = vadd.f32 %v7223_v42, %v7126_v14  ;;  %v7254_v20 = vand.u32 2147483647, %v12923_v4  ;;  %v7328_v24 = vmul.f32 %v7323_v41, %v7253_v30 }
0x1327   :  { %v9538_v27 = vpop.f32.mrf.mxu0  ;;  %vm7244_vm6 = vcmp.ge.f32.partialorder %v12923_v4, 0.0 }
0x1328   :  { %9778 = vrcp.f32 %v7263_v16  ;;  %v7259_v62 = vmul.f32 0.3275911, %v7254_v20  ;;  %v12929_v33 = vmul.f32 0.70710677, %v12925_v32  ;;  %v7324_v10 = vsub.f32 0.0, %v7254_v20 }
0x1329   :  { %v7228_v52 = vpop.f32.mrf.mxu0  ;;  %v7334_v48 = vmul.f32 1.442695, %v7328_v24 }
0x132a   :  { %v12931_v17 = vadd.f32 %v7228_v52, %v7126_v14  ;;  %v7264_v35 = vadd.f32 1.0, %v7259_v62  ;;  %v7255_v29 = vand.u32 2147483647, %v12929_v33  ;;  %v7329_v8 = vmul.f32 %v7324_v10, %v7254_v20 }
0x132b   :  { %v9541_v44 = vpop.f32.mrf.mxu0  ;;  %vm7245_vm7 = vcmp.ge.f32.partialorder %v12929_v33, 0.0 }
0x132c   :  { %v12935_v2 = vmul.f32 0.70710677, %v12931_v17  ;;  %9780 = vrcp.f32 %v7264_v35  ;;  %v7260_v5 = vmul.f32 0.3275911, %v7255_v29  ;;  %v7325_v18 = vsub.f32 0.0, %v7255_v29 }
0x132d   :  { %v7336_v53 = vmul.f32 1.442695, %v7329_v8 }
0x132e   :  { %v7256_v15 = vand.u32 2147483647, %v12935_v2  ;;  %v7265_v59 = vadd.f32 1.0, %v7260_v5  ;;  %v7330_v43 = vmul.f32 %v7325_v18, %v7255_v29  ;;  %vm7246_vm8 = vcmp.ge.f32.partialorder %v12935_v2, 0.0 }
0x1330   :  { %v7261_v36 = vmul.f32 0.3275911, %v7256_v15  ;;  %9782 = vrcp.f32 %v7265_v59  ;;  %v7326_v14 = vsub.f32 0.0, %v7256_v15  ;;  %v7338_v16 = vmul.f32 1.442695, %v7330_v43 }
0x1331   :  { %v9777_v45 = vpop.eup %9776 }
0x1332   :  { %v7277_v39 = vmul.f32 1.0614054, %v9777_v45  ;;  %v7266_v40 = vadd.f32 1.0, %v7261_v36  ;;  %v7331_v60 = vmul.f32 %v7326_v14, %v7256_v15 }
0x1334   :  { %v7282_v49 = vadd.f32 -1.4531521, %v7277_v39  ;;  %9784 = vrcp.f32 %v7266_v40  ;;  %v7340_v29 = vmul.f32 1.442695, %v7331_v60 }
0x1335   :  { %v9779_v1 = vpop.eup %9778  ;;  %9786 = vpow2.f32 %v7332_v58 }
0x1336   :  { %v7287_v19 = vmul.f32 %v9777_v45, %v7282_v49  ;;  %v7278_v3 = vmul.f32 1.0614054, %v9779_v1  ;;  %9788 = vpow2.f32 %v7334_v48 }
0x1337   :  { %9790 = vpow2.f32 %v7336_v53 }
0x1338   :  { %v7292_v25 = vadd.f32 1.4214138, %v7287_v19  ;;  %v7283_v23 = vadd.f32 -1.4531521, %v7278_v3  ;;  %9792 = vpow2.f32 %v7338_v16 }
0x1339   :  { %v9781_v61 = vpop.eup %9780  ;;  %9794 = vpow2.f32 %v7340_v29 }
0x133a   :  { %v7297_v38 = vmul.f32 %v9777_v45, %v7292_v25  ;;  %v7288_v51 = vmul.f32 %v9779_v1, %v7283_v23  ;;  %v7279_v50 = vmul.f32 1.0614054, %v9781_v61 }
0x133c   :  { %v7302_v22 = vadd.f32 -0.28449672, %v7297_v38  ;;  %v7293_v26 = vadd.f32 1.4214138, %v7288_v51  ;;  %v7284_v47 = vadd.f32 -1.4531521, %v7279_v50 }
0x133d   :  { %v9783_v9 = vpop.eup %9782  ;;  %v7232_v51 = vmul.f32 0.5, %v12908_v21 }
0x133e   :  { %v7307_v28 = vmul.f32 %v9777_v45, %v7302_v22  ;;  %v7298_v30 = vmul.f32 %v9779_v1, %v7293_v26  ;;  %v7289_v34 = vmul.f32 %v9781_v61, %v7284_v47  ;;  %v7280_v42 = vmul.f32 1.0614054, %v9783_v9 }
0x1340   :  { %v7312_v20 = vadd.f32 0.2548296, %v7307_v28  ;;  %v7303_v27 = vadd.f32 -0.28449672, %v7298_v30  ;;  %v7294_v52 = vadd.f32 1.4214138, %v7289_v34 }
0x1341   :  { %v9785_v62 = vpop.eup %9784  ;;  %v7285_v0 = vadd.f32 -1.4531521, %v7280_v42  ;;  %v7233_v34 = vmul.f32 0.5, %v12914_v54 }
0x1342   :  { %v7317_v35 = vmul.f32 %v9777_v45, %v7312_v20  ;;  %v7308_v44 = vmul.f32 %v9779_v1, %v7303_v27  ;;  %v7281_v5 = vmul.f32 1.0614054, %v9785_v62  ;;  %v9787_v7 = vpop.eup %9786  ;;  %v7299_v41 = vmul.f32 %v9781_v61, %v7294_v52 }
0x1343   :  { %v7290_v59 = vmul.f32 %v9783_v9, %v7285_v0  ;;  %v9789_v19 = vpop.eup %9788  ;;  %v13144_v45 = vmov -1.0  }
0x1344   :  { %v7342_v15 = vmul.f32 %v9787_v7, %v7317_v35  ;;  %v7313_v36 = vadd.f32 0.2548296, %v7308_v44  ;;  %v7286_v39 = vadd.f32 -1.4531521, %v7281_v5  ;;  %v7304_v58 = vadd.f32 -0.28449672, %v7299_v41  ;;  %v9791_v26 = vpop.eup %9790 }
0x1345   :  { %v7295_v24 = vadd.f32 1.4214138, %v7290_v59  ;;  %v7247_v3 = vsel %vm7242_vm3, 1.0, %v13144_v45  ;;  %v7249_v52 = vsel %vm7244_vm6, 1.0, %v13144_v45  ;;  %v7234_v5 = vmul.f32 0.5, %v12920_v11 }
0x1346   :  { %v7347_v40 = vsub.f32 1.0, %v7342_v15  ;;  %v7318_v10 = vmul.f32 %v9779_v1, %v7313_v36  ;;  %v7291_v49 = vmul.f32 %v9785_v62, %v7286_v39  ;;  %v7309_v48 = vmul.f32 %v9781_v61, %v7304_v58 }
0x1347   :  { %v7300_v8 = vmul.f32 %v9783_v9, %v7295_v24  ;;  %v7248_v1 = vsel %vm7243_vm2, 1.0, %v13144_v45  ;;  %v7250_v7 = vsel %vm7245_vm7, 1.0, %v13144_v45  ;;  %v7251_v39 = vsel %vm7246_vm8, 1.0, %v13144_v45 }
0x1348   :  { %v7352_v18 = vmul.f32 %v7347_v40, %v7247_v3  ;;  %v7343_v25 = vmul.f32 %v9789_v19, %v7318_v10  ;;  %v7296_v23 = vadd.f32 1.4214138, %v7291_v49  ;;  %v7314_v6 = vadd.f32 0.2548296, %v7309_v48 }
0x1349   :  { %v7305_v38 = vadd.f32 -0.28449672, %v7300_v8  ;;  %v7236_v24 = vmul.f32 0.5, %v12931_v17  ;;  %v13145_v49 = vsub.s32 2, %v13138_v57 }
0x134a   :  { %v7357_v14 = vadd.f32 1.0, %v7352_v18  ;;  %v7348_v50 = vsub.f32 1.0, %v7343_v25  ;;  %v7301_v53 = vmul.f32 %v9785_v62, %v7296_v23  ;;  %v7319_v43 = vmul.f32 %v9781_v61, %v7314_v6  ;;  %v9793_v61 = vpop.eup %9792 }
0x134b   :  { %v7310_v22 = vmul.f32 %v9783_v9, %v7305_v38  ;;  %v9795_v54 = vpop.eup %9794  ;;  %v7375_v19 = vrot.slane %v12845_v37, %v13145_v49 }
0x134c   :  { %v7362_v47 = vmul.f32 %v7357_v14, %v7232_v51  ;;  %v7353_v28 = vmul.f32 %v7348_v50, %v7248_v1  ;;  %v7306_v30 = vadd.f32 -0.28449672, %v7301_v53  ;;  %v7344_v12 = vmul.f32 %v9791_v26, %v7319_v43 }
0x134d   :  { %v7315_v60 = vadd.f32 0.2548296, %v7310_v22 }
0x134e   :  { %v7358_v42 = vadd.f32 1.0, %v7353_v28  ;;  %v7311_v16 = vmul.f32 %v9785_v62, %v7306_v30  ;;  %9551 = vmatmul.mubr.msk.f32.vlgmr.msra.gmra.mxu1 %vm3731_vm12, %v7362_v47  ;;  %v7349_v21 = vsub.f32 1.0, %v7344_v12 }
0x134f   :  { %v7320_v20 = vmul.f32 %v9783_v9, %v7315_v60  ;;  %9553 = vmatprep.mubr.msk.f32.mxu1 %vm9847_vm0, %v13083_v63 }
0x1350   :  { %v7363_v27 = vmul.f32 %v7358_v42, %v7233_v34  ;;  %v7316_v0 = vadd.f32 0.2548296, %v7311_v16  ;;  %v7354_v35 = vmul.f32 %v7349_v21, %v7249_v52 }
0x1351   :  { %v7345_v4 = vmul.f32 %v9793_v61, %v7320_v20 }
0x1352   :  { %v7321_v44 = vmul.f32 %v9785_v62, %v7316_v0  ;;  %9554 = vmatmul.mubr.msk.f32.gmra.mxu1 %vm3731_vm12, %v7363_v27  ;;  %v7359_v29 = vadd.f32 1.0, %v7354_v35  ;;  %v7235_v62 = vmul.f32 0.5, %v12925_v32 }
0x1353   :  { %v7350_v9 = vsub.f32 1.0, %v7345_v4  ;;  %9556 = vmatprep.mubr.msk.f32.mxu1 %vm9847_vm0, %v13083_v63 }
0x1354   :  { %v7346_v41 = vmul.f32 %v9795_v54, %v7321_v44  ;;  %v7364_v59 = vmul.f32 %v7359_v29, %v7234_v5 }
0x1355   :  { %v7355_v15 = vmul.f32 %v7350_v9, %v7250_v7 }
0x1356   :  { %v7351_v33 = vsub.f32 1.0, %v7346_v41  ;;  %9557 = vmatmul.mubr.msk.f32.gmra.mxu1 %vm3731_vm12, %v7364_v59 }
0x1357   :  { %v7360_v36 = vadd.f32 1.0, %v7355_v15  ;;  %9559 = vmatprep.mubr.msk.f32.mxu1 %vm9847_vm0, %v13083_v63 }
0x1358   :  { %v7356_v11 = vmul.f32 %v7351_v33, %v7251_v39 }
0x1359   :  { %v7365_v58 = vmul.f32 %v7360_v36, %v7235_v62 }
0x135a   :  { %v7361_v40 = vadd.f32 1.0, %v7356_v11 }
0x135b   :  { %9560 = vmatmul.mubr.msk.f32.gmra.mxu1 %vm3731_vm12, %v7365_v58 }
0x135c   :  { %v7366_v2 = vmul.f32 %v7361_v40, %v7236_v24  ;;  %9562 = vmatprep.mubr.msk.f32.mxu1 %vm9847_vm0, %v13083_v63 }
0x135f   :  { %9563 = vmatmul.mubr.msk.f32.gmra.mxu1 %vm3731_vm12, %v7366_v2 }
0x140e   :  { %v7469_v32 = vpop.f32.mrf.mxu1 }
0x140f   :  { %v7470_v8 = vadd.f32 %v7469_v32, %v7375_v19 }
0x1410   :  { %v9552_v10 = vpop.f32.mrf.mxu1 }
0x1411   :  { %v7493_v6 = vadd.f32 %v7470_v8, %v12871_v31 }
0x1412   :  { %v7474_v45 = vpop.f32.mrf.mxu1 }
0x1413   :  { %v7475_v3 = vadd.f32 %v7474_v45, %v7375_v19  ;;  %v7498_v53 = vsel %vm317_vm4, %v7493_v6, 0.0 }
0x1414   :  { %v9555_v48 = vpop.f32.mrf.mxu1 }
0x1415   :  { %v7494_v18 = vadd.f32 %v7475_v3, %v12873_v46  ;;  %v13147_v48 = vsub.s32 6, %v13138_v57 }
0x1416   :  { %v7479_v17 = vpop.f32.mrf.mxu1 }
0x1417   :  { %v7480_v25 = vadd.f32 %v7479_v17, %v7375_v19  ;;  %v7499_v51 = vsel %vm317_vm4, %v7494_v18, 0.0  ;;  %v7559_v8 = vrot.slane %v12845_v37, %v13147_v48 }
0x1418   :  { %v9558_v23 = vpop.f32.mrf.mxu1  ;;  %v7500_v22 = vadd.f32 %v7499_v51, %v7498_v53 }
0x1419   :  { %v7495_v63 = vadd.f32 %v7480_v25, %v12875_v56 }
0x141b   :  { %v7484_v38 = vpop.f32.mrf.mxu1  ;;  %v7501_v1 = vsel %vm317_vm4, %v7495_v63, 0.0 }
0x141c   :  { %v7485_v14 = vadd.f32 %v7484_v38, %v7375_v19  ;;  %v7502_v28 = vadd.f32 %v7501_v1, %v7500_v22 }
0x141d   :  { %v9561_v50 = vpop.f32.mrf.mxu1 }
0x141e   :  { %v7496_v43 = vadd.f32 %v7485_v14, %v12879_v55 }
0x141f   :  { %v7489_v26 = vpop.f32.mrf.mxu1 }
0x1420   :  { %v7503_v46 = vsel %vm317_vm4, %v7496_v43, 0.0  ;;  %v7490_v47 = vadd.f32 %v7489_v26, %v7375_v19  ;;  %v13146_v19 = vsub.s32 5, %v13138_v57 }
0x1421   :  { %v9564_v31 = vpop.f32.mrf.mxu1  ;;  %v7504_v30 = vadd.f32 %v7503_v46, %v7502_v28 }
0x1422   :  { %v7497_v56 = vadd.f32 %v7490_v47, %v12877_v13  ;;  %v7550_v45 = vrot.slane %v12845_v37, %v13146_v19 }
0x1424   :  { %v7505_v12 = vsel %vm317_vm4, %v7497_v56, 0.0 }
0x1425   :  { %v7506_v60 = vadd.f32 %v7505_v12, %v7504_v30 }
0x1427   :  { %v7507_v34 = vrot.slane %v7506_v60, 4 }
0x1429   :  { %v7508_v42 = vadd.f32 %v7507_v34, %v7506_v60 }
0x142b   :  { %v7509_v16 = vrot.slane %v7508_v42, 2 }
0x142d   :  { %v7510_v21 = vadd.f32 %v7509_v16, %v7508_v42 }
0x142f   :  { %v7511_v20 = vrot.slane %v7510_v21, 1 }
0x1431   :  { %v7512_v61 = vadd.f32 %v7511_v20, %v7510_v21 }
0x1433   :  { %v7513_v55 = vmul.f32 0.025, %v7512_v61 }
0x1435   :  { %v7514_v27 = vsub.f32 %v7493_v6, %v7513_v55  ;;  %v7515_v52 = vsub.f32 %v7494_v18, %v7513_v55  ;;  %v7516_v0 = vsub.f32 %v7495_v63, %v7513_v55  ;;  %v7517_v35 = vsub.f32 %v7496_v43, %v7513_v55 }
0x1436   :  { %v7518_v4 = vsub.f32 %v7497_v56, %v7513_v55 }
0x1437   :  { %v7519_v44 = vmul.f32 %v7514_v27, %v7514_v27  ;;  %v7520_v54 = vmul.f32 %v7515_v52, %v7515_v52  ;;  %v7521_v5 = vmul.f32 %v7516_v0, %v7516_v0  ;;  %v7522_v13 = vmul.f32 %v7517_v35, %v7517_v35 }
0x1438   :  { %v7523_v41 = vmul.f32 %v7518_v4, %v7518_v4 }
0x1439   :  { %v7524_v29 = vsel %vm317_vm4, %v7519_v44, 0.0  ;;  %v7525_v9 = vsel %vm317_vm4, %v7520_v54, 0.0  ;;  %v7527_v59 = vsel %vm317_vm4, %v7521_v5, 0.0  ;;  %v7529_v33 = vsel %vm317_vm4, %v7522_v13, 0.0 }
0x143a   :  { %v7526_v7 = vadd.f32 %v7525_v9, %v7524_v29  ;;  %v7531_v36 = vsel %vm317_vm4, %v7523_v41, 0.0 }
0x143c   :  { %v7528_v15 = vadd.f32 %v7527_v59, %v7526_v7 }
0x143e   :  { %v7530_v62 = vadd.f32 %v7529_v33, %v7528_v15 }
0x1440   :  { %v7532_v39 = vadd.f32 %v7531_v36, %v7530_v62 }
0x1442   :  { %v7533_v11 = vrot.slane %v7532_v39, 4 }
0x1444   :  { %v7534_v58 = vadd.f32 %v7533_v11, %v7532_v39 }
0x1446   :  { %v7535_v24 = vrot.slane %v7534_v58, 2 }
0x1448   :  { %v7536_v40 = vadd.f32 %v7535_v24, %v7534_v58 }
0x144a   :  { %v7537_v2 = vrot.slane %v7536_v40, 1 }
0x144c   :  { %v7538_v32 = vadd.f32 %v7537_v2, %v7536_v40 }
0x144e   :  { %v7539_v10 = vmul.f32 0.025, %v7538_v32 }
0x1450   :  { %v7540_v49 = vadd.f32 1e-05, %v7539_v10 }
0x1452   :  { %9796 = vrsqrt.f32 %v7540_v49 }
0x145f   :  { %v9797_v3 = vpop.eup %9796 }
0x1460   :  { %v7542_v17 = vmul.f32 %v9797_v3, %v7514_v27  ;;  %v7543_v18 = vmul.f32 %v9797_v3, %v7515_v52  ;;  %v7544_v25 = vmul.f32 %v9797_v3, %v7516_v0  ;;  %v7545_v23 = vmul.f32 %v9797_v3, %v7517_v35 }
0x1461   :  { %v7546_v6 = vmul.f32 %v9797_v3, %v7518_v4 }
0x1462   :  { %v7551_v63 = vmul.f32 %v7550_v45, %v7542_v17  ;;  %v7552_v38 = vmul.f32 %v7550_v45, %v7543_v18  ;;  %v7553_v51 = vmul.f32 %v7550_v45, %v7544_v25  ;;  %v7554_v14 = vmul.f32 %v7550_v45, %v7545_v23 }
0x1463   :  { %v7555_v50 = vmul.f32 %v7550_v45, %v7546_v6 }
0x1464   :  { %v7560_v53 = vadd.f32 %v7559_v8, %v7551_v63  ;;  %v7561_v1 = vadd.f32 %v7559_v8, %v7552_v38  ;;  %v7562_v43 = vadd.f32 %v7559_v8, %v7553_v51  ;;  %v7563_v22 = vadd.f32 %v7559_v8, %v7554_v14 }
0x1465   :  { %v7564_v26 = vadd.f32 %v7559_v8, %v7555_v50 }
0x1466   :  { %8072 = vst.msk [vmem:[%s13016_s6 + $0x28] sm:$0xff] %vm317_vm4, %v7560_v53  ;;  %8073 = vst.msk [vmem:[%s13016_s6 + $0x30] sm:$0xff] %vm317_vm4, %v7561_v1 }
0x1467   :  { %8074 = vst.msk [vmem:[%s13016_s6 + $0x38] sm:$0xff] %vm317_vm4, %v7562_v43  ;;  %8075 = vst.msk [vmem:[%s13016_s6 + $0x40] sm:$0xff] %vm317_vm4, %v7563_v22 }
0x1468   :  { %8076 = vst.msk [vmem:[%s13016_s6 + $0x48] sm:$0xff] %vm317_vm4, %v7564_v26 }
0x1469   :  { %7579 = vsyncpa [#allocation4], 1 }
0x146a   :  { %7580 = vsyncpa [#allocation6], 1 }

</bundles_post_ra>
